<compile_context>
chip_gen: v5e
topology: v5e:2x2
jax: 0.10.0
libtpu: 0.0.40
codegen_flags: <defaults>
</compile_context>

<pallas_src>
import functools

import jax
import jax.numpy as jnp
from jax.experimental import pallas as pl
from jax.experimental.pallas import tpu as pltpu

BN_EPS = 1e-5
ROW_TILE_CAP = 1024                    # max rows per grid step (memory-bound kernels)
VMEM_LIMIT = 32 * 1024 * 1024          # safe on v5e/v6e/v7x


def _cparams(*sem):
    return pltpu.CompilerParams(dimension_semantics=sem, vmem_limit_bytes=VMEM_LIMIT)


def _row_tile(m, cap=ROW_TILE_CAP):
    """Largest row tile <= cap dividing m (prefer multiples of 8); whole array if m <= cap."""
    if m <= cap:
        return m
    for t in range(cap, 7, -1):
        if m % t == 0 and t % 8 == 0:
            return t
    for t in range(cap, 0, -1):
        if m % t == 0:
            return t
    return m


# ----------------------------------------------------------------------------
# Pallas kernels
# ----------------------------------------------------------------------------
def _matmul_bias_act_kernel(a_ref, b_ref, bias_ref, o_ref, *, act):
    """o = act(a @ b + bias); bf16 MXU operands, f32 accumulation."""
    y = jnp.dot(a_ref[...].astype(jnp.bfloat16), b_ref[...],
                preferred_element_type=jnp.float32)
    y = y + bias_ref[...]
    if act == "relu":
        y = jnp.maximum(y, 0.0)
    elif act == "sigmoid":
        y = 1.0 / (1.0 + jnp.exp(-y))
    o_ref[...] = y.astype(o_ref.dtype)


def _conv3x3_stats_kernel(xp_ref, w_ref, y_ref, sum_ref, ssq_ref):
    """3x3 same conv of one padded image + fused BN sum / sum-of-squares.

    xp_ref: (1, H+2, W+2, Cin)   w_ref: (9, Cin, Cout) bf16
    y_ref:  (1, H, W, Cout)      sum_ref/ssq_ref: (1, 1, Cout) per-image partials
    """
    _, h, w, cout = y_ref.shape
    cin = xp_ref.shape[3]
    acc = jnp.zeros((h * w, cout), jnp.float32)
    for kh in range(3):
        for kw in range(3):
            tap = xp_ref[0, kh:kh + h, kw:kw + w, :]
            tap = tap.reshape(h * w, cin).astype(jnp.bfloat16)
            acc = acc + jnp.dot(tap, w_ref[kh * 3 + kw],
                                preferred_element_type=jnp.float32)
    y_ref[...] = acc.reshape(1, h, w, cout)
    sum_ref[...] = jnp.sum(acc, axis=0, keepdims=True).reshape(1, 1, cout)
    ssq_ref[...] = jnp.sum(acc * acc, axis=0, keepdims=True).reshape(1, 1, cout)


def _deconv4x4_s2_relu_kernel(xp_ref, w_ref, bias_ref, y_ref):
    """ConvTranspose2d(k=4, s=2, p=1) + bias + ReLU via sub-pixel phases.

    Output pixel (2h+dh, 2w+dw) only depends on a 2x3 patch of the 1-padded
    input (rows h+dh, h+dh+1; cols w..w+2) -> 12 small matmuls per image,
    zero multiplies against inserted zeros.

    xp_ref: (1, H+2, W+2, Cin)   w_ref: (2, 2, 3, Cin, 2*Cout) bf16
    bias_ref: (1, 2*Cout)        y_ref: (1, H, 2, W, 2*Cout)  [== (1,2H,2W,Cout)]
    """
    _, h, _, w, cout2 = y_ref.shape
    cin = xp_ref.shape[3]
    for dh in range(2):
        acc = jnp.zeros((h * w, cout2), jnp.float32)
        for r in range(2):
            row0 = dh + r
            for b in range(3):
                tap = xp_ref[0, row0:row0 + h, b:b + w, :]
                tap = tap.reshape(h * w, cin).astype(jnp.bfloat16)
                acc = acc + jnp.dot(tap, w_ref[dh, r, b],
                                    preferred_element_type=jnp.float32)
        acc = jnp.maximum(acc + bias_ref[...], 0.0)
        y_ref[0, :, pl.ds(dh, 1), :, :] = acc.reshape(h, 1, w, cout2)


def _scale_shift_relu_kernel(x_ref, scale_ref, shift_ref, o_ref):
    o_ref[...] = jnp.maximum(x_ref[...] * scale_ref[...] + shift_ref[...], 0.0)


def _scale_shift_add_relu_kernel(x_ref, scale_ref, shift_ref, r_ref, o_ref):
    y = x_ref[...] * scale_ref[...] + shift_ref[...] + r_ref[...]
    o_ref[...] = jnp.maximum(y, 0.0)


# ----------------------------------------------------------------------------
# Pallas wrappers (host-side glue is just reshapes / padding / tiny math)
# ----------------------------------------------------------------------------
def matmul_bias_act(a, b_bf16, bias, act="none"):
    """(Mr, K) @ (K, Nc) + bias, fused activation, tiled over rows."""
    mr, k = a.shape
    nc = b_bf16.shape[1]
    tr = _row_tile(mr)
    return pl.pallas_call(
        functools.partial(_matmul_bias_act_kernel, act=act),
        grid=(mr // tr,),
        in_specs=[
            pl.BlockSpec((tr, k), lambda i: (i, 0)),
            pl.BlockSpec((k, nc), lambda i: (0, 0)),
            pl.BlockSpec((1, nc), lambda i: (0, 0)),
        ],
        out_specs=pl.BlockSpec((tr, nc), lambda i: (i, 0)),
        out_shape=jax.ShapeDtypeStruct((mr, nc), jnp.float32),
        compiler_params=_cparams("parallel"),
    )(a, b_bf16, bias)


def conv1x1(x_nhwc, w, b, act="none"):
    """Pointwise conv; w: (Cout, Cin). Lane-dense via block-diagonal pixel packing."""
    n, h, wd, cin = x_nhwc.shape
    cout = w.shape[0]
    m = n * h * wd
    p = 128 // cin if (128 % cin == 0) else 1
    if p > 1 and m % p != 0:
        p = 1
    # Pack p pixels per matmul row (free row-major reshape); the weight becomes
    # block-diag(W^T, ..., W^T) so loads AND stores are >=128 lanes wide and the
    # MXU sees p x fewer row pushes.
    a = x_nhwc.reshape(m // p, p * cin)
    b_mat = jnp.kron(jnp.eye(p, dtype=jnp.float32), w.T.astype(jnp.float32))
    b_mat = b_mat.astype(jnp.bfloat16)                       # (p*cin, p*cout)
    bias = jnp.tile(b.astype(jnp.float32), p).reshape(1, p * cout)
    y = matmul_bias_act(a, b_mat, bias, act)                 # (m//p, p*cout)
    return y.reshape(n, h, wd, cout)


def _bn_affine(psum, pssq, count, gamma, beta):
    """Training-mode BatchNorm (batch stats, biased variance) -> scale/shift."""
    s = jnp.sum(psum, axis=(0, 1))
    ss = jnp.sum(pssq, axis=(0, 1))
    mean = s / count
    # guard tiny negative variance from E[x^2]-E[x]^2 cancellation in f32
    var = jnp.maximum(ss / count - mean * mean, 0.0)
    scale = gamma * jax.lax.rsqrt(var + BN_EPS)
    shift = beta - mean * scale
    return scale, shift


def bn_apply_relu(y_nhwc, scale, shift, res_nhwc=None):
    """relu(y * scale + shift [+ res]) elementwise, lane-dense (rows, 128) slabs."""
    n, h, w, c = y_nhwc.shape
    total = n * h * w * c
    if total % 128 == 0 and 128 % c == 0:
        lanes, rep = 128, 128 // c        # free row-major reshape -> unmasked stores
    else:
        lanes, rep = c, 1
    rows = total // lanes
    tr = _row_tile(rows)
    y2 = y_nhwc.reshape(rows, lanes)
    sc = jnp.tile(scale.astype(jnp.float32), rep).reshape(1, lanes)
    sh = jnp.tile(shift.astype(jnp.float32), rep).reshape(1, lanes)
    args = [y2, sc, sh]
    in_specs = [
        pl.BlockSpec((tr, lanes), lambda i: (i, 0)),
        pl.BlockSpec((1, lanes), lambda i: (0, 0)),
        pl.BlockSpec((1, lanes), lambda i: (0, 0)),
    ]
    if res_nhwc is None:
        kern = _scale_shift_relu_kernel
    else:
        args.append(res_nhwc.reshape(rows, lanes))
        in_specs.append(pl.BlockSpec((tr, lanes), lambda i: (i, 0)))
        kern = _scale_shift_add_relu_kernel
    out = pl.pallas_call(
        kern,
        grid=(rows // tr,),
        in_specs=in_specs,
        out_specs=pl.BlockSpec((tr, lanes), lambda i: (i, 0)),
        out_shape=jax.ShapeDtypeStruct((rows, lanes), jnp.float32),
        compiler_params=_cparams("parallel"),
    )(*args)
    return out.reshape(n, h, w, c)


def conv3x3_bn_relu(x_nhwc, w, gamma, beta, res_nhwc=None):
    """3x3 conv (pad 1; bias folded into BN) + BatchNorm(batch stats) + ReLU [+ residual]."""
    n, h, wd, cin = x_nhwc.shape
    cout = w.shape[0]
    xp = jnp.pad(x_nhwc, ((0, 0), (1, 1), (1, 1), (0, 0)))
    w_mat = jnp.transpose(w, (2, 3, 1, 0)).reshape(9, cin, cout).astype(jnp.bfloat16)
    y, psum, pssq = pl.pallas_call(
        _conv3x3_stats_kernel,
        grid=(n,),
        in_specs=[
            pl.BlockSpec((1, h + 2, wd + 2, cin), lambda i: (i, 0, 0, 0)),
            pl.BlockSpec((9, cin, cout), lambda i: (0, 0, 0)),
        ],
        out_specs=(
            pl.BlockSpec((1, h, wd, cout), lambda i: (i, 0, 0, 0)),
            pl.BlockSpec((1, 1, cout), lambda i: (i, 0, 0)),
            pl.BlockSpec((1, 1, cout), lambda i: (i, 0, 0)),
        ),
        out_shape=(
            jax.ShapeDtypeStruct((n, h, wd, cout), jnp.float32),
            jax.ShapeDtypeStruct((n, 1, cout), jnp.float32),
            jax.ShapeDtypeStruct((n, 1, cout), jnp.float32),
        ),
        compiler_params=_cparams("parallel"),
    )(xp, w_mat)
    scale, shift = _bn_affine(psum, pssq, n * h * wd, gamma, beta)
    return bn_apply_relu(y, scale, shift, res_nhwc)


def _build_deconv_weights(w_t):
    """Combine ConvTranspose2d(4,2,1) taps into (dh, input-row, input-col) matrices.

    w_t: (Cin, Cout, 4, 4) PyTorch ConvTranspose2d weight.
    Returns (2, 2, 3, Cin, 2*Cout) bf16; last-dim halves are the dw=0 / dw=1 phases.
    """
    cin, cout = w_t.shape[0], w_t.shape[1]
    zeros = jnp.zeros((cin, cout), w_t.dtype)
    ky_tab = ((3, 1), (2, 0))                  # [dh][r] -> kernel row
    kx_tab = ((3, None), (1, 2), (None, 0))    # [b]     -> (kx for dw=0, kx for dw=1)
    per_dh = []
    for dh in range(2):
        per_r = []
        for r in range(2):
            ky = ky_tab[dh][r]
            per_b = []
            for b in range(3):
                kx0, kx1 = kx_tab[b]
                left = w_t[:, :, ky, kx0] if kx0 is not None else zeros
                right = w_t[:, :, ky, kx1] if kx1 is not None else zeros
                per_b.append(jnp.concatenate([left, right], axis=1))
            per_r.append(jnp.stack(per_b))
        per_dh.append(jnp.stack(per_r))
    return jnp.stack(per_dh).astype(jnp.bfloat16)


def conv_transpose4x4_s2_relu(x_nhwc, w_t, bias):
    """PyTorch ConvTranspose2d(k=4, s=2, p=1) + ReLU (sub-pixel phase decomposition)."""
    n, h, wd, cin = x_nhwc.shape
    cout = w_t.shape[1]
    xp = jnp.pad(x_nhwc, ((0, 0), (1, 1), (1, 1), (0, 0)))
    w_comb = _build_deconv_weights(w_t)
    bias2 = jnp.tile(bias.astype(jnp.float32), 2).reshape(1, 2 * cout)
    y = pl.pallas_call(
        _deconv4x4_s2_relu_kernel,
        grid=(n,),
        in_specs=[
            pl.BlockSpec((1, h + 2, wd + 2, cin), lambda i: (i, 0, 0, 0)),
            pl.BlockSpec((2, 2, 3, cin, 2 * cout), lambda i: (0, 0, 0, 0, 0)),
            pl.BlockSpec((1, 2 * cout), lambda i: (0, 0)),
        ],
        out_specs=pl.BlockSpec((1, h, 2, wd, 2 * cout), lambda i: (i, 0, 0, 0, 0)),
        out_shape=jax.ShapeDtypeStruct((n, h, 2, wd, 2 * cout), jnp.float32),
        compiler_params=_cparams("parallel"),
    )(xp, w_comb, bias2)
    # (n, h, 2, w, 2, cout) row-major == (n, 2h, 2w, cout): free reshape, phases
    # were interleaved on write inside the kernel.
    return y.reshape(n, 2 * h, 2 * wd, cout)


# ----------------------------------------------------------------------------
# Model forward
# ----------------------------------------------------------------------------
def residual_block(x_nhwc, p):
    """relu(x + norm2(conv2(relu(norm1(conv1(x)))))); conv biases are dropped
    because they are exactly cancelled by the following BatchNorm."""
    y = conv3x3_bn_relu(x_nhwc, p["conv1_w"], p["g1"], p["b1"])
    return conv3x3_bn_relu(y, p["conv2_w"], p["g2"], p["b2"], res_nhwc=x_nhwc)


def conv2d_decoder_forward(params, z_nchw):
    """(N, Cin, H, W) -> (N, Cout, H*2^L, W*2^L), matching the PyTorch module."""
    x = jnp.transpose(z_nchw, (0, 2, 3, 1)).astype(jnp.float32)      # -> NHWC
    x = conv1x1(x, params["in_conv"]["w"], params["in_conv"]["b"], act="none")
    for layer in params["layers"]:
        for blk in layer["blocks"]:
            x = residual_block(x, blk)
        x = conv_transpose4x4_s2_relu(x, layer["up_w"], layer["up_b"])
    x = conv1x1(x, params["out_conv"]["w"], params["out_conv"]["b"], act="sigmoid")
    return jnp.transpose(x, (0, 3, 1, 2))                            # -> NCHW


# ----------------------------------------------------------------------------
# Deterministic parameter init (shapes follow the PyTorch module __init__)
# ----------------------------------------------------------------------------
def init_params(key, in_ch, hidden, out_ch, num_layers, num_resnet_blocks):
    keys = iter(jax.random.split(key, 128))

    def nrm(shape, s=0.1):
        return s * jax.random.normal(next(keys), shape, jnp.float32)

    params = {
        "in_conv": {"w": nrm((hidden, in_ch)), "b": nrm((hidden,))},
        "layers": [],
        "out_conv": {"w": nrm((out_ch, hidden)), "b": nrm((out_ch,))},
    }
    for _ in range(num_layers):
        blocks = []
        for _ in range(num_resnet_blocks):
            blocks.append({
                # conv biases omitted: cancelled exactly by the following BatchNorm
                "conv1_w": nrm((hidden, hidden, 3, 3)),
                "g1": 1.0 + nrm((hidden,)), "b1": nrm((hidden,)),
                "conv2_w": nrm((hidden, hidden, 3, 3)),
                "g2": 1.0 + nrm((hidden,)), "b2": nrm((hidden,)),
            })
        params["layers"].append({
            "blocks": blocks,
            "up_w": nrm((hidden, hidden, 4, 4)),   # ConvTranspose2d weight (Cin,Cout,4,4)
            "up_b": nrm((hidden,)),
        })
    return params


# ----------------------------------------------------------------------------
if __name__ == "__main__":
    # config: input_channels=8, hidden_size=16, num_layers=2,
    #         num_resnet_blocks=1, output_channels=3
    IN_CH, HIDDEN, OUT_CH, NUM_LAYERS, NUM_RES = 8, 16, 3, 2, 1
    BATCH, H, W = 2, 8, 8

    key = jax.random.PRNGKey(0)
    kp, kz = jax.random.split(key)
    params = init_params(kp, IN_CH, HIDDEN, OUT_CH, NUM_LAYERS, NUM_RES)
    z = jax.random.normal(kz, (BATCH, IN_CH, H, W), jnp.float32)

    # TODO(synk): BatchNorm uses training-mode batch statistics (the behaviour
    # of a freshly constructed PyTorch module); running statistics are not
    # tracked since they do not affect the forward output.

    fwd = jax.jit(conv2d_decoder_forward)
    out = jax.block_until_ready(fwd(params, z))

    expected = (BATCH, OUT_CH, H * (2 ** NUM_LAYERS), W * (2 ** NUM_LAYERS))
    assert out.shape == expected, (out.shape, expected)
    assert bool(jnp.all(jnp.isfinite(out)))
    assert bool(jnp.all((out >= 0.0) & (out <= 1.0)))   # sigmoid output range
    print("KERNEL_OK")
</pallas_src>

<mosaic_0001>
module attributes {stable_mosaic.version = 11 : i64} {
  func.func @_matmul_bias_act_kernel(%arg0: i32, %arg1: memref<8x128xf32, #tpu.memory_space<vmem>>, %arg2: memref<128x256xbf16, #tpu.memory_space<vmem>>, %arg3: memref<1x256xf32, #tpu.memory_space<vmem>>, %arg4: memref<8x256xf32, #tpu.memory_space<vmem>>) attributes {dimension_semantics = [#tpu.dimension_semantics<parallel>], iteration_bounds = array<i64: 1>, scalar_prefetch = 0 : i64, scratch_operands = 0 : i64, tpu.core_type = #tpu.core_type<tc>, window_params = [{transform_indices = @transform_0, window_bounds = array<i64: 8, 128>}, {pipeline_mode = #tpu.pipeline_mode<synchronous>, transform_indices = @transform_1, window_bounds = array<i64: 128, 256>}, {pipeline_mode = #tpu.pipeline_mode<synchronous>, transform_indices = @transform_2, window_bounds = array<i64: 1, 256>}, {transform_indices = @transform_3, window_bounds = array<i64: 8, 256>}]} {
    %c0 = arith.constant 0 : index
    %c0_0 = arith.constant 0 : index
    %0 = vector.load %arg1[%c0, %c0_0] : memref<8x128xf32, #tpu.memory_space<vmem>>, vector<8x128xf32>
    %1 = arith.truncf %0 : vector<8x128xf32> to vector<8x128xbf16>
    %c0_1 = arith.constant 0 : index
    %c0_2 = arith.constant 0 : index
    %2 = vector.load %arg2[%c0_1, %c0_2] : memref<128x256xbf16, #tpu.memory_space<vmem>>, vector<128x256xbf16>
    %cst = arith.constant dense<0.000000e+00> : vector<8x256xf32>
    %3 = tpu.matmul %1, %2, %cst {dimension_numbers = #tpu.dot_dimension_numbers<[1], [0], [0], [1], [0, 0, 1, 1], [], []>} : vector<8x128xbf16>, vector<128x256xbf16>, vector<8x256xf32> -> vector<8x256xf32>
    %c0_3 = arith.constant 0 : index
    %c0_4 = arith.constant 0 : index
    %4 = vector.load %arg3[%c0_3, %c0_4] : memref<1x256xf32, #tpu.memory_space<vmem>>, vector<1x256xf32>
    %5 = vector.broadcast %4 : vector<1x256xf32> to vector<8x256xf32>
    %6 = arith.addf %3, %5 : vector<8x256xf32>
    %c0_5 = arith.constant 0 : index
    %c0_6 = arith.constant 0 : index
    %7 = vector.load %arg4[%c0_5, %c0_6] : memref<8x256xf32, #tpu.memory_space<vmem>>, vector<8x256xf32>
    tpu.vector_store %arg4[%c0_5, %c0_6], %6 {strides = array<i32>} : memref<8x256xf32, #tpu.memory_space<vmem>>, vector<8x256xf32>,
    return
  }
  func.func @transform_0(%arg0: i32) -> (i32, i32) {
    %c0_i32 = arith.constant 0 : i32
    %c0_i32_0 = arith.constant 0 : i32
    return %arg0, %c0_i32 : i32, i32
  }
  func.func @transform_1(%arg0: i32) -> (i32, i32) {
    %c0_i32 = arith.constant 0 : i32
    %c0_i32_0 = arith.constant 0 : i32
    %c0_i32_1 = arith.constant 0 : i32
    return %c0_i32, %c0_i32_0 : i32, i32
  }
  func.func @transform_2(%arg0: i32) -> (i32, i32) {
    %c0_i32 = arith.constant 0 : i32
    %c0_i32_0 = arith.constant 0 : i32
    %c0_i32_1 = arith.constant 0 : i32
    return %c0_i32, %c0_i32_0 : i32, i32
  }
  func.func @transform_3(%arg0: i32) -> (i32, i32) {
    %c0_i32 = arith.constant 0 : i32
    %c0_i32_0 = arith.constant 0 : i32
    return %arg0, %c0_i32 : i32, i32
  }
}

module attributes {stable_mosaic.version = 11 : i64} {
  func.func @_conv3x3_stats_kernel(%arg0: i32, %arg1: memref<1x10x10x16xf32, #tpu.memory_space<vmem>>, %arg2: memref<9x16x16xbf16, #tpu.memory_space<vmem>>, %arg3: memref<1x8x8x16xf32, #tpu.memory_space<vmem>>, %arg4: memref<1x1x16xf32, #tpu.memory_space<vmem>>, %arg5: memref<1x1x16xf32, #tpu.memory_space<vmem>>) attributes {dimension_semantics = [#tpu.dimension_semantics<parallel>], iteration_bounds = array<i64: 2>, scalar_prefetch = 0 : i64, scratch_operands = 0 : i64, tpu.core_type = #tpu.core_type<tc>, window_params = [{transform_indices = @transform_0, window_bounds = array<i64: 1, 10, 10, 16>}, {pipeline_mode = #tpu.pipeline_mode<synchronous>, transform_indices = @transform_1, window_bounds = array<i64: 9, 16, 16>}, {transform_indices = @transform_2, window_bounds = array<i64: 1, 8, 8, 16>}, {transform_indices = @transform_3, window_bounds = array<i64: 1, 1, 16>}, {transform_indices = @transform_4, window_bounds = array<i64: 1, 1, 16>}]} {
    %cst = arith.constant 0.000000e+00 : f32
    %0 = vector.broadcast %cst : f32 to vector<64x16xf32>
    %c0 = arith.constant 0 : index
    %c0_0 = arith.constant 0 : index
    %c0_1 = arith.constant 0 : index
    %c0_2 = arith.constant 0 : index
    %1 = vector.load %arg1[%c0, %c0_0, %c0_1, %c0_2] : memref<1x10x10x16xf32, #tpu.memory_space<vmem>>, vector<1x8x8x16xf32>
    %2 = vector.shape_cast %1 : vector<1x8x8x16xf32> to vector<8x8x16xf32>
    %3 = vector.shape_cast %2 : vector<8x8x16xf32> to vector<64x16xf32>
    %4 = arith.truncf %3 : vector<64x16xf32> to vector<64x16xbf16>
    %c0_3 = arith.constant 0 : index
    %c0_4 = arith.constant 0 : index
    %c0_5 = arith.constant 0 : index
    %5 = vector.load %arg2[%c0_3, %c0_4, %c0_5] : memref<9x16x16xbf16, #tpu.memory_space<vmem>>, vector<1x16x16xbf16>
    %6 = vector.shape_cast %5 : vector<1x16x16xbf16> to vector<16x16xbf16>
    %cst_6 = arith.constant dense<0.000000e+00> : vector<64x16xf32>
    %7 = tpu.matmul %4, %6, %cst_6 {dimension_numbers = #tpu.dot_dimension_numbers<[1], [0], [0], [1], [0, 0, 1, 1], [], []>} : vector<64x16xbf16>, vector<16x16xbf16>, vector<64x16xf32> -> vector<64x16xf32>
    %8 = arith.addf %0, %7 : vector<64x16xf32>
    %c0_7 = arith.constant 0 : index
    %c0_8 = arith.constant 0 : index
    %c1 = arith.constant 1 : index
    %c0_9 = arith.constant 0 : index
    %9 = vector.load %arg1[%c0_7, %c0_8, %c1, %c0_9] : memref<1x10x10x16xf32, #tpu.memory_space<vmem>>, vector<1x8x8x16xf32>
    %10 = vector.shape_cast %9 : vector<1x8x8x16xf32> to vector<8x8x16xf32>
    %11 = vector.shape_cast %10 : vector<8x8x16xf32> to vector<64x16xf32>
    %12 = arith.truncf %11 : vector<64x16xf32> to vector<64x16xbf16>
    %c1_10 = arith.constant 1 : index
    %c0_11 = arith.constant 0 : index
    %c0_12 = arith.constant 0 : index
    %13 = vector.load %arg2[%c1_10, %c0_11, %c0_12] : memref<9x16x16xbf16, #tpu.memory_space<vmem>>, vector<1x16x16xbf16>
    %14 = vector.shape_cast %13 : vector<1x16x16xbf16> to vector<16x16xbf16>
    %cst_13 = arith.constant dense<0.000000e+00> : vector<64x16xf32>
    %15 = tpu.matmul %12, %14, %cst_13 {dimension_numbers = #tpu.dot_dimension_numbers<[1], [0], [0], [1], [0, 0, 1, 1], [], []>} : vector<64x16xbf16>, vector<16x16xbf16>, vector<64x16xf32> -> vector<64x16xf32>
    %16 = arith.addf %8, %15 : vector<64x16xf32>
    %c0_14 = arith.constant 0 : index
    %c0_15 = arith.constant 0 : index
    %c2 = arith.constant 2 : index
    %c0_16 = arith.constant 0 : index
    %17 = vector.load %arg1[%c0_14, %c0_15, %c2, %c0_16] : memref<1x10x10x16xf32, #tpu.memory_space<vmem>>, vector<1x8x8x16xf32>
    %18 = vector.shape_cast %17 : vector<1x8x8x16xf32> to vector<8x8x16xf32>
    %19 = vector.shape_cast %18 : vector<8x8x16xf32> to vector<64x16xf32>
    %20 = arith.truncf %19 : vector<64x16xf32> to vector<64x16xbf16>
    %c2_17 = arith.constant 2 : index
    %c0_18 = arith.constant 0 : index
    %c0_19 = arith.constant 0 : index
    %21 = vector.load %arg2[%c2_17, %c0_18, %c0_19] : memref<9x16x16xbf16, #tpu.memory_space<vmem>>, vector<1x16x16xbf16>
    %22 = vector.shape_cast %21 : vector<1x16x16xbf16> to vector<16x16xbf16>
    %cst_20 = arith.constant dense<0.000000e+00> : vector<64x16xf32>
    %23 = tpu.matmul %20, %22, %cst_20 {dimension_numbers = #tpu.dot_dimension_numbers<[1], [0], [0], [1], [0, 0, 1, 1], [], []>} : vector<64x16xbf16>, vector<16x16xbf16>, vector<64x16xf32> -> vector<64x16xf32>
    %24 = arith.addf %16, %23 : vector<64x16xf32>
    %c0_21 = arith.constant 0 : index
    %c1_22 = arith.constant 1 : index
    %c0_23 = arith.constant 0 : index
    %c0_24 = arith.constant 0 : index
    %25 = vector.load %arg1[%c0_21, %c1_22, %c0_23, %c0_24] : memref<1x10x10x16xf32, #tpu.memory_space<vmem>>, vector<1x8x8x16xf32>
    %26 = vector.shape_cast %25 : vector<1x8x8x16xf32> to vector<8x8x16xf32>
    %27 = vector.shape_cast %26 : vector<8x8x16xf32> to vector<64x16xf32>
    %28 = arith.truncf %27 : vector<64x16xf32> to vector<64x16xbf16>
    %c3 = arith.constant 3 : index
    %c0_25 = arith.constant 0 : index
    %c0_26 = arith.constant 0 : index
    %29 = vector.load %arg2[%c3, %c0_25, %c0_26] : memref<9x16x16xbf16, #tpu.memory_space<vmem>>, vector<1x16x16xbf16>
    %30 = vector.shape_cast %29 : vector<1x16x16xbf16> to vector<16x16xbf16>
    %cst_27 = arith.constant dense<0.000000e+00> : vector<64x16xf32>
    %31 = tpu.matmul %28, %30, %cst_27 {dimension_numbers = #tpu.dot_dimension_numbers<[1], [0], [0], [1], [0, 0, 1, 1], [], []>} : vector<64x16xbf16>, vector<16x16xbf16>, vector<64x16xf32> -> vector<64x16xf32>
    %32 = arith.addf %24, %31 : vector<64x16xf32>
    %c0_28 = arith.constant 0 : index
    %c1_29 = arith.constant 1 : index
    %c1_30 = arith.constant 1 : index
    %c0_31 = arith.constant 0 : index
    %33 = vector.load %arg1[%c0_28, %c1_29, %c1_30, %c0_31] : memref<1x10x10x16xf32, #tpu.memory_space<vmem>>, vector<1x8x8x16xf32>
    %34 = vector.shape_cast %33 : vector<1x8x8x16xf32> to vector<8x8x16xf32>
    %35 = vector.shape_cast %34 : vector<8x8x16xf32> to vector<64x16xf32>
    %36 = arith.truncf %35 : vector<64x16xf32> to vector<64x16xbf16>
    %c4 = arith.constant 4 : index
    %c0_32 = arith.constant 0 : index
    %c0_33 = arith.constant 0 : index
    %37 = vector.load %arg2[%c4, %c0_32, %c0_33] : memref<9x16x16xbf16, #tpu.memory_space<vmem>>, vector<1x16x16xbf16>
    %38 = vector.shape_cast %37 : vector<1x16x16xbf16> to vector<16x16xbf16>
    %cst_34 = arith.constant dense<0.000000e+00> : vector<64x16xf32>
    %39 = tpu.matmul %36, %38, %cst_34 {dimension_numbers = #tpu.dot_dimension_numbers<[1], [0], [0], [1], [0, 0, 1, 1], [], []>} : vector<64x16xbf16>, vector<16x16xbf16>, vector<64x16xf32> -> vector<64x16xf32>
    %40 = arith.addf %32, %39 : vector<64x16xf32>
    %c0_35 = arith.constant 0 : index
    %c1_36 = arith.constant 1 : index
    %c2_37 = arith.constant 2 : index
    %c0_38 = arith.constant 0 : index
    %41 = vector.load %arg1[%c0_35, %c1_36, %c2_37, %c0_38] : memref<1x10x10x16xf32, #tpu.memory_space<vmem>>, vector<1x8x8x16xf32>
    %42 = vector.shape_cast %41 : vector<1x8x8x16xf32> to vector<8x8x16xf32>
    %43 = vector.shape_cast %42 : vector<8x8x16xf32> to vector<64x16xf32>
    %44 = arith.truncf %43 : vector<64x16xf32> to vector<64x16xbf16>
    %c5 = arith.constant 5 : index
    %c0_39 = arith.constant 0 : index
    %c0_40 = arith.constant 0 : index
    %45 = vector.load %arg2[%c5, %c0_39, %c0_40] : memref<9x16x16xbf16, #tpu.memory_space<vmem>>, vector<1x16x16xbf16>
    %46 = vector.shape_cast %45 : vector<1x16x16xbf16> to vector<16x16xbf16>
    %cst_41 = arith.constant dense<0.000000e+00> : vector<64x16xf32>
    %47 = tpu.matmul %44, %46, %cst_41 {dimension_numbers = #tpu.dot_dimension_numbers<[1], [0], [0], [1], [0, 0, 1, 1], [], []>} : vector<64x16xbf16>, vector<16x16xbf16>, vector<64x16xf32> -> vector<64x16xf32>
    %48 = arith.addf %40, %47 : vector<64x16xf32>
    %c0_42 = arith.constant 0 : index
    %c2_43 = arith.constant 2 : index
    %c0_44 = arith.constant 0 : index
    %c0_45 = arith.constant 0 : index
    %49 = vector.load %arg1[%c0_42, %c2_43, %c0_44, %c0_45] : memref<1x10x10x16xf32, #tpu.memory_space<vmem>>, vector<1x8x8x16xf32>
    %50 = vector.shape_cast %49 : vector<1x8x8x16xf32> to vector<8x8x16xf32>
    %51 = vector.shape_cast %50 : vector<8x8x16xf32> to vector<64x16xf32>
    %52 = arith.truncf %51 : vector<64x16xf32> to vector<64x16xbf16>
    %c6 = arith.constant 6 : index
    %c0_46 = arith.constant 0 : index
    %c0_47 = arith.constant 0 : index
    %53 = vector.load %arg2[%c6, %c0_46, %c0_47] : memref<9x16x16xbf16, #tpu.memory_space<vmem>>, vector<1x16x16xbf16>
    %54 = vector.shape_cast %53 : vector<1x16x16xbf16> to vector<16x16xbf16>
    %cst_48 = arith.constant dense<0.000000e+00> : vector<64x16xf32>
    %55 = tpu.matmul %52, %54, %cst_48 {dimension_numbers = #tpu.dot_dimension_numbers<[1], [0], [0], [1], [0, 0, 1, 1], [], []>} : vector<64x16xbf16>, vector<16x16xbf16>, vector<64x16xf32> -> vector<64x16xf32>
    %56 = arith.addf %48, %55 : vector<64x16xf32>
    %c0_49 = arith.constant 0 : index
    %c2_50 = arith.constant 2 : index
    %c1_51 = arith.constant 1 : index
    %c0_52 = arith.constant 0 : index
    %57 = vector.load %arg1[%c0_49, %c2_50, %c1_51, %c0_52] : memref<1x10x10x16xf32, #tpu.memory_space<vmem>>, vector<1x8x8x16xf32>
    %58 = vector.shape_cast %57 : vector<1x8x8x16xf32> to vector<8x8x16xf32>
    %59 = vector.shape_cast %58 : vector<8x8x16xf32> to vector<64x16xf32>
    %60 = arith.truncf %59 : vector<64x16xf32> to vector<64x16xbf16>
    %c7 = arith.constant 7 : index
    %c0_53 = arith.constant 0 : index
    %c0_54 = arith.constant 0 : index
    %61 = vector.load %arg2[%c7, %c0_53, %c0_54] : memref<9x16x16xbf16, #tpu.memory_space<vmem>>, vector<1x16x16xbf16>
    %62 = vector.shape_cast %61 : vector<1x16x16xbf16> to vector<16x16xbf16>
    %cst_55 = arith.constant dense<0.000000e+00> : vector<64x16xf32>
    %63 = tpu.matmul %60, %62, %cst_55 {dimension_numbers = #tpu.dot_dimension_numbers<[1], [0], [0], [1], [0, 0, 1, 1], [], []>} : vector<64x16xbf16>, vector<16x16xbf16>, vector<64x16xf32> -> vector<64x16xf32>
    %64 = arith.addf %56, %63 : vector<64x16xf32>
    %c0_56 = arith.constant 0 : index
    %c2_57 = arith.constant 2 : index
    %c2_58 = arith.constant 2 : index
    %c0_59 = arith.constant 0 : index
    %65 = vector.load %arg1[%c0_56, %c2_57, %c2_58, %c0_59] : memref<1x10x10x16xf32, #tpu.memory_space<vmem>>, vector<1x8x8x16xf32>
    %66 = vector.shape_cast %65 : vector<1x8x8x16xf32> to vector<8x8x16xf32>
    %67 = vector.shape_cast %66 : vector<8x8x16xf32> to vector<64x16xf32>
    %68 = arith.truncf %67 : vector<64x16xf32> to vector<64x16xbf16>
    %c8 = arith.constant 8 : index
    %c0_60 = arith.constant 0 : index
    %c0_61 = arith.constant 0 : index
    %69 = vector.load %arg2[%c8, %c0_60, %c0_61] : memref<9x16x16xbf16, #tpu.memory_space<vmem>>, vector<1x16x16xbf16>
    %70 = vector.shape_cast %69 : vector<1x16x16xbf16> to vector<16x16xbf16>
    %cst_62 = arith.constant dense<0.000000e+00> : vector<64x16xf32>
    %71 = tpu.matmul %68, %70, %cst_62 {dimension_numbers = #tpu.dot_dimension_numbers<[1], [0], [0], [1], [0, 0, 1, 1], [], []>} : vector<64x16xbf16>, vector<16x16xbf16>, vector<64x16xf32> -> vector<64x16xf32>
    %72 = arith.addf %64, %71 : vector<64x16xf32>
    %73 = vector.shape_cast %72 : vector<64x16xf32> to vector<1x8x8x16xf32>
    %c0_63 = arith.constant 0 : index
    %c0_64 = arith.constant 0 : index
    %c0_65 = arith.constant 0 : index
    %c0_66 = arith.constant 0 : index
    %74 = vector.load %arg3[%c0_63, %c0_64, %c0_65, %c0_66] : memref<1x8x8x16xf32, #tpu.memory_space<vmem>>, vector<1x8x8x16xf32>
    tpu.vector_store %arg3[%c0_63, %c0_64, %c0_65, %c0_66], %73 {strides = array<i32>} : memref<1x8x8x16xf32, #tpu.memory_space<vmem>>, vector<1x8x8x16xf32>,
    %cst_67 = arith.constant dense<0.000000e+00> : vector<16xf32>
    %75 = vector.multi_reduction <add>, %72, %cst_67 [0] : vector<64x16xf32> to vector<16xf32>
    %76 = vector.shape_cast %75 : vector<16xf32> to vector<1x16xf32>
    %77 = vector.shape_cast %76 : vector<1x16xf32> to vector<1x1x16xf32>
    %c0_68 = arith.constant 0 : index
    %c0_69 = arith.constant 0 : index
    %c0_70 = arith.constant 0 : index
    %78 = vector.load %arg4[%c0_68, %c0_69, %c0_70] : memref<1x1x16xf32, #tpu.memory_space<vmem>>, vector<1x1x16xf32>
    tpu.vector_store %arg4[%c0_68, %c0_69, %c0_70], %77 {strides = array<i32>} : memref<1x1x16xf32, #tpu.memory_space<vmem>>, vector<1x1x16xf32>,
    %79 = arith.mulf %72, %72 : vector<64x16xf32>
    %cst_71 = arith.constant dense<0.000000e+00> : vector<16xf32>
    %80 = vector.multi_reduction <add>, %79, %cst_71 [0] : vector<64x16xf32> to vector<16xf32>
    %81 = vector.shape_cast %80 : vector<16xf32> to vector<1x16xf32>
    %82 = vector.shape_cast %81 : vector<1x16xf32> to vector<1x1x16xf32>
    %c0_72 = arith.constant 0 : index
    %c0_73 = arith.constant 0 : index
    %c0_74 = arith.constant 0 : index
    %83 = vector.load %arg5[%c0_72, %c0_73, %c0_74] : memref<1x1x16xf32, #tpu.memory_space<vmem>>, vector<1x1x16xf32>
    tpu.vector_store %arg5[%c0_72, %c0_73, %c0_74], %82 {strides = array<i32>} : memref<1x1x16xf32, #tpu.memory_space<vmem>>, vector<1x1x16xf32>,
    return
  }
  func.func @transform_0(%arg0: i32) -> (i32, i32, i32, i32) {
    %c0_i32 = arith.constant 0 : i32
    %c0_i32_0 = arith.constant 0 : i32
    %c0_i32_1 = arith.constant 0 : i32
    %c0_i32_2 = arith.constant 0 : i32
    return %arg0, %c0_i32, %c0_i32_0, %c0_i32_1 : i32, i32, i32, i32
  }
  func.func @transform_1(%arg0: i32) -> (i32, i32, i32) {
    %c0_i32 = arith.constant 0 : i32
    %c0_i32_0 = arith.constant 0 : i32
    %c0_i32_1 = arith.constant 0 : i32
    %c0_i32_2 = arith.constant 0 : i32
    return %c0_i32, %c0_i32_0, %c0_i32_1 : i32, i32, i32
  }
  func.func @transform_2(%arg0: i32) -> (i32, i32, i32, i32) {
    %c0_i32 = arith.constant 0 : i32
    %c0_i32_0 = arith.constant 0 : i32
    %c0_i32_1 = arith.constant 0 : i32
    %c0_i32_2 = arith.constant 0 : i32
    return %arg0, %c0_i32, %c0_i32_0, %c0_i32_1 : i32, i32, i32, i32
  }
  func.func @transform_3(%arg0: i32) -> (i32, i32, i32) {
    %c0_i32 = arith.constant 0 : i32
    %c0_i32_0 = arith.constant 0 : i32
    %c0_i32_1 = arith.constant 0 : i32
    return %arg0, %c0_i32, %c0_i32_0 : i32, i32, i32
  }
  func.func @transform_4(%arg0: i32) -> (i32, i32, i32) {
    %c0_i32 = arith.constant 0 : i32
    %c0_i32_0 = arith.constant 0 : i32
    %c0_i32_1 = arith.constant 0 : i32
    return %arg0, %c0_i32, %c0_i32_0 : i32, i32, i32
  }
}

module attributes {stable_mosaic.version = 11 : i64} {
  func.func @_scale_shift_relu_kernel(%arg0: i32, %arg1: memref<16x128xf32, #tpu.memory_space<vmem>>, %arg2: memref<1x128xf32, #tpu.memory_space<vmem>>, %arg3: memref<1x128xf32, #tpu.memory_space<vmem>>, %arg4: memref<16x128xf32, #tpu.memory_space<vmem>>) attributes {dimension_semantics = [#tpu.dimension_semantics<parallel>], iteration_bounds = array<i64: 1>, scalar_prefetch = 0 : i64, scratch_operands = 0 : i64, tpu.core_type = #tpu.core_type<tc>, window_params = [{transform_indices = @transform_0, window_bounds = array<i64: 16, 128>}, {pipeline_mode = #tpu.pipeline_mode<synchronous>, transform_indices = @transform_1, window_bounds = array<i64: 1, 128>}, {pipeline_mode = #tpu.pipeline_mode<synchronous>, transform_indices = @transform_2, window_bounds = array<i64: 1, 128>}, {transform_indices = @transform_3, window_bounds = array<i64: 16, 128>}]} {
    %c0 = arith.constant 0 : index
    %c0_0 = arith.constant 0 : index
    %0 = vector.load %arg1[%c0, %c0_0] : memref<16x128xf32, #tpu.memory_space<vmem>>, vector<16x128xf32>
    %c0_1 = arith.constant 0 : index
    %c0_2 = arith.constant 0 : index
    %1 = vector.load %arg2[%c0_1, %c0_2] : memref<1x128xf32, #tpu.memory_space<vmem>>, vector<1x128xf32>
    %2 = vector.broadcast %1 : vector<1x128xf32> to vector<16x128xf32>
    %3 = arith.mulf %0, %2 : vector<16x128xf32>
    %c0_3 = arith.constant 0 : index
    %c0_4 = arith.constant 0 : index
    %4 = vector.load %arg3[%c0_3, %c0_4] : memref<1x128xf32, #tpu.memory_space<vmem>>, vector<1x128xf32>
    %5 = vector.broadcast %4 : vector<1x128xf32> to vector<16x128xf32>
    %6 = arith.addf %3, %5 : vector<16x128xf32>
    %cst = arith.constant 0.000000e+00 : f32
    %7 = vector.broadcast %cst : f32 to vector<16x128xf32>
    %8 = arith.maximumf %6, %7 : vector<16x128xf32>
    %c0_5 = arith.constant 0 : index
    %c0_6 = arith.constant 0 : index
    %9 = vector.load %arg4[%c0_5, %c0_6] : memref<16x128xf32, #tpu.memory_space<vmem>>, vector<16x128xf32>
    tpu.vector_store %arg4[%c0_5, %c0_6], %8 {strides = array<i32>} : memref<16x128xf32, #tpu.memory_space<vmem>>, vector<16x128xf32>,
    return
  }
  func.func @transform_0(%arg0: i32) -> (i32, i32) {
    %c0_i32 = arith.constant 0 : i32
    %c0_i32_0 = arith.constant 0 : i32
    return %arg0, %c0_i32 : i32, i32
  }
  func.func @transform_1(%arg0: i32) -> (i32, i32) {
    %c0_i32 = arith.constant 0 : i32
    %c0_i32_0 = arith.constant 0 : i32
    %c0_i32_1 = arith.constant 0 : i32
    return %c0_i32, %c0_i32_0 : i32, i32
  }
  func.func @transform_2(%arg0: i32) -> (i32, i32) {
    %c0_i32 = arith.constant 0 : i32
    %c0_i32_0 = arith.constant 0 : i32
    %c0_i32_1 = arith.constant 0 : i32
    return %c0_i32, %c0_i32_0 : i32, i32
  }
  func.func @transform_3(%arg0: i32) -> (i32, i32) {
    %c0_i32 = arith.constant 0 : i32
    %c0_i32_0 = arith.constant 0 : i32
    return %arg0, %c0_i32 : i32, i32
  }
}

module attributes {stable_mosaic.version = 11 : i64} {
  func.func @_scale_shift_add_relu_kernel(%arg0: i32, %arg1: memref<16x128xf32, #tpu.memory_space<vmem>>, %arg2: memref<1x128xf32, #tpu.memory_space<vmem>>, %arg3: memref<1x128xf32, #tpu.memory_space<vmem>>, %arg4: memref<16x128xf32, #tpu.memory_space<vmem>>, %arg5: memref<16x128xf32, #tpu.memory_space<vmem>>) attributes {dimension_semantics = [#tpu.dimension_semantics<parallel>], iteration_bounds = array<i64: 1>, scalar_prefetch = 0 : i64, scratch_operands = 0 : i64, tpu.core_type = #tpu.core_type<tc>, window_params = [{transform_indices = @transform_0, window_bounds = array<i64: 16, 128>}, {pipeline_mode = #tpu.pipeline_mode<synchronous>, transform_indices = @transform_1, window_bounds = array<i64: 1, 128>}, {pipeline_mode = #tpu.pipeline_mode<synchronous>, transform_indices = @transform_2, window_bounds = array<i64: 1, 128>}, {transform_indices = @transform_3, window_bounds = array<i64: 16, 128>}, {transform_indices = @transform_4, window_bounds = array<i64: 16, 128>}]} {
    %c0 = arith.constant 0 : index
    %c0_0 = arith.constant 0 : index
    %0 = vector.load %arg1[%c0, %c0_0] : memref<16x128xf32, #tpu.memory_space<vmem>>, vector<16x128xf32>
    %c0_1 = arith.constant 0 : index
    %c0_2 = arith.constant 0 : index
    %1 = vector.load %arg2[%c0_1, %c0_2] : memref<1x128xf32, #tpu.memory_space<vmem>>, vector<1x128xf32>
    %2 = vector.broadcast %1 : vector<1x128xf32> to vector<16x128xf32>
    %3 = arith.mulf %0, %2 : vector<16x128xf32>
    %c0_3 = arith.constant 0 : index
    %c0_4 = arith.constant 0 : index
    %4 = vector.load %arg3[%c0_3, %c0_4] : memref<1x128xf32, #tpu.memory_space<vmem>>, vector<1x128xf32>
    %5 = vector.broadcast %4 : vector<1x128xf32> to vector<16x128xf32>
    %6 = arith.addf %3, %5 : vector<16x128xf32>
    %c0_5 = arith.constant 0 : index
    %c0_6 = arith.constant 0 : index
    %7 = vector.load %arg4[%c0_5, %c0_6] : memref<16x128xf32, #tpu.memory_space<vmem>>, vector<16x128xf32>
    %8 = arith.addf %6, %7 : vector<16x128xf32>
    %cst = arith.constant 0.000000e+00 : f32
    %9 = vector.broadcast %cst : f32 to vector<16x128xf32>
    %10 = arith.maximumf %8, %9 : vector<16x128xf32>
    %c0_7 = arith.constant 0 : index
    %c0_8 = arith.constant 0 : index
    %11 = vector.load %arg5[%c0_7, %c0_8] : memref<16x128xf32, #tpu.memory_space<vmem>>, vector<16x128xf32>
    tpu.vector_store %arg5[%c0_7, %c0_8], %10 {strides = array<i32>} : memref<16x128xf32, #tpu.memory_space<vmem>>, vector<16x128xf32>,
    return
  }
  func.func @transform_0(%arg0: i32) -> (i32, i32) {
    %c0_i32 = arith.constant 0 : i32
    %c0_i32_0 = arith.constant 0 : i32
    return %arg0, %c0_i32 : i32, i32
  }
  func.func @transform_1(%arg0: i32) -> (i32, i32) {
    %c0_i32 = arith.constant 0 : i32
    %c0_i32_0 = arith.constant 0 : i32
    %c0_i32_1 = arith.constant 0 : i32
    return %c0_i32, %c0_i32_0 : i32, i32
  }
  func.func @transform_2(%arg0: i32) -> (i32, i32) {
    %c0_i32 = arith.constant 0 : i32
    %c0_i32_0 = arith.constant 0 : i32
    %c0_i32_1 = arith.constant 0 : i32
    return %c0_i32, %c0_i32_0 : i32, i32
  }
  func.func @transform_3(%arg0: i32) -> (i32, i32) {
    %c0_i32 = arith.constant 0 : i32
    %c0_i32_0 = arith.constant 0 : i32
    return %arg0, %c0_i32 : i32, i32
  }
  func.func @transform_4(%arg0: i32) -> (i32, i32) {
    %c0_i32 = arith.constant 0 : i32
    %c0_i32_0 = arith.constant 0 : i32
    return %arg0, %c0_i32 : i32, i32
  }
}

module attributes {stable_mosaic.version = 11 : i64} {
  func.func @_deconv4x4_s2_relu_kernel(%arg0: i32, %arg1: memref<1x10x10x16xf32, #tpu.memory_space<vmem>>, %arg2: memref<2x2x3x16x32xbf16, #tpu.memory_space<vmem>>, %arg3: memref<1x32xf32, #tpu.memory_space<vmem>>, %arg4: memref<1x8x2x8x32xf32, #tpu.memory_space<vmem>>) attributes {dimension_semantics = [#tpu.dimension_semantics<parallel>], iteration_bounds = array<i64: 2>, scalar_prefetch = 0 : i64, scratch_operands = 0 : i64, tpu.core_type = #tpu.core_type<tc>, window_params = [{transform_indices = @transform_0, window_bounds = array<i64: 1, 10, 10, 16>}, {pipeline_mode = #tpu.pipeline_mode<synchronous>, transform_indices = @transform_1, window_bounds = array<i64: 2, 2, 3, 16, 32>}, {pipeline_mode = #tpu.pipeline_mode<synchronous>, transform_indices = @transform_2, window_bounds = array<i64: 1, 32>}, {transform_indices = @transform_3, window_bounds = array<i64: 1, 8, 2, 8, 32>}]} {
    %cst = arith.constant 0.000000e+00 : f32
    %0 = vector.broadcast %cst : f32 to vector<64x32xf32>
    %c0 = arith.constant 0 : index
    %c0_0 = arith.constant 0 : index
    %c0_1 = arith.constant 0 : index
    %c0_2 = arith.constant 0 : index
    %1 = vector.load %arg1[%c0, %c0_0, %c0_1, %c0_2] : memref<1x10x10x16xf32, #tpu.memory_space<vmem>>, vector<1x8x8x16xf32>
    %2 = vector.shape_cast %1 : vector<1x8x8x16xf32> to vector<8x8x16xf32>
    %3 = vector.shape_cast %2 : vector<8x8x16xf32> to vector<64x16xf32>
    %4 = arith.truncf %3 : vector<64x16xf32> to vector<64x16xbf16>
    %c0_3 = arith.constant 0 : index
    %c0_4 = arith.constant 0 : index
    %c0_5 = arith.constant 0 : index
    %c0_6 = arith.constant 0 : index
    %c0_7 = arith.constant 0 : index
    %5 = vector.load %arg2[%c0_3, %c0_4, %c0_5, %c0_6, %c0_7] : memref<2x2x3x16x32xbf16, #tpu.memory_space<vmem>>, vector<1x1x1x16x32xbf16>
    %6 = vector.shape_cast %5 : vector<1x1x1x16x32xbf16> to vector<16x32xbf16>
    %cst_8 = arith.constant dense<0.000000e+00> : vector<64x32xf32>
    %7 = tpu.matmul %4, %6, %cst_8 {dimension_numbers = #tpu.dot_dimension_numbers<[1], [0], [0], [1], [0, 0, 1, 1], [], []>} : vector<64x16xbf16>, vector<16x32xbf16>, vector<64x32xf32> -> vector<64x32xf32>
    %8 = arith.addf %0, %7 : vector<64x32xf32>
    %c0_9 = arith.constant 0 : index
    %c0_10 = arith.constant 0 : index
    %c1 = arith.constant 1 : index
    %c0_11 = arith.constant 0 : index
    %9 = vector.load %arg1[%c0_9, %c0_10, %c1, %c0_11] : memref<1x10x10x16xf32, #tpu.memory_space<vmem>>, vector<1x8x8x16xf32>
    %10 = vector.shape_cast %9 : vector<1x8x8x16xf32> to vector<8x8x16xf32>
    %11 = vector.shape_cast %10 : vector<8x8x16xf32> to vector<64x16xf32>
    %12 = arith.truncf %11 : vector<64x16xf32> to vector<64x16xbf16>
    %c0_12 = arith.constant 0 : index
    %c0_13 = arith.constant 0 : index
    %c1_14 = arith.constant 1 : index
    %c0_15 = arith.constant 0 : index
    %c0_16 = arith.constant 0 : index
    %13 = vector.load %arg2[%c0_12, %c0_13, %c1_14, %c0_15, %c0_16] : memref<2x2x3x16x32xbf16, #tpu.memory_space<vmem>>, vector<1x1x1x16x32xbf16>
    %14 = vector.shape_cast %13 : vector<1x1x1x16x32xbf16> to vector<16x32xbf16>
    %cst_17 = arith.constant dense<0.000000e+00> : vector<64x32xf32>
    %15 = tpu.matmul %12, %14, %cst_17 {dimension_numbers = #tpu.dot_dimension_numbers<[1], [0], [0], [1], [0, 0, 1, 1], [], []>} : vector<64x16xbf16>, vector<16x32xbf16>, vector<64x32xf32> -> vector<64x32xf32>
    %16 = arith.addf %8, %15 : vector<64x32xf32>
    %c0_18 = arith.constant 0 : index
    %c0_19 = arith.constant 0 : index
    %c2 = arith.constant 2 : index
    %c0_20 = arith.constant 0 : index
    %17 = vector.load %arg1[%c0_18, %c0_19, %c2, %c0_20] : memref<1x10x10x16xf32, #tpu.memory_space<vmem>>, vector<1x8x8x16xf32>
    %18 = vector.shape_cast %17 : vector<1x8x8x16xf32> to vector<8x8x16xf32>
    %19 = vector.shape_cast %18 : vector<8x8x16xf32> to vector<64x16xf32>
    %20 = arith.truncf %19 : vector<64x16xf32> to vector<64x16xbf16>
    %c0_21 = arith.constant 0 : index
    %c0_22 = arith.constant 0 : index
    %c2_23 = arith.constant 2 : index
    %c0_24 = arith.constant 0 : index
    %c0_25 = arith.constant 0 : index
    %21 = vector.load %arg2[%c0_21, %c0_22, %c2_23, %c0_24, %c0_25] : memref<2x2x3x16x32xbf16, #tpu.memory_space<vmem>>, vector<1x1x1x16x32xbf16>
    %22 = vector.shape_cast %21 : vector<1x1x1x16x32xbf16> to vector<16x32xbf16>
    %cst_26 = arith.constant dense<0.000000e+00> : vector<64x32xf32>
    %23 = tpu.matmul %20, %22, %cst_26 {dimension_numbers = #tpu.dot_dimension_numbers<[1], [0], [0], [1], [0, 0, 1, 1], [], []>} : vector<64x16xbf16>, vector<16x32xbf16>, vector<64x32xf32> -> vector<64x32xf32>
    %24 = arith.addf %16, %23 : vector<64x32xf32>
    %c0_27 = arith.constant 0 : index
    %c1_28 = arith.constant 1 : index
    %c0_29 = arith.constant 0 : index
    %c0_30 = arith.constant 0 : index
    %25 = vector.load %arg1[%c0_27, %c1_28, %c0_29, %c0_30] : memref<1x10x10x16xf32, #tpu.memory_space<vmem>>, vector<1x8x8x16xf32>
    %26 = vector.shape_cast %25 : vector<1x8x8x16xf32> to vector<8x8x16xf32>
    %27 = vector.shape_cast %26 : vector<8x8x16xf32> to vector<64x16xf32>
    %28 = arith.truncf %27 : vector<64x16xf32> to vector<64x16xbf16>
    %c0_31 = arith.constant 0 : index
    %c1_32 = arith.constant 1 : index
    %c0_33 = arith.constant 0 : index
    %c0_34 = arith.constant 0 : index
    %c0_35 = arith.constant 0 : index
    %29 = vector.load %arg2[%c0_31, %c1_32, %c0_33, %c0_34, %c0_35] : memref<2x2x3x16x32xbf16, #tpu.memory_space<vmem>>, vector<1x1x1x16x32xbf16>
    %30 = vector.shape_cast %29 : vector<1x1x1x16x32xbf16> to vector<16x32xbf16>
    %cst_36 = arith.constant dense<0.000000e+00> : vector<64x32xf32>
    %31 = tpu.matmul %28, %30, %cst_36 {dimension_numbers = #tpu.dot_dimension_numbers<[1], [0], [0], [1], [0, 0, 1, 1], [], []>} : vector<64x16xbf16>, vector<16x32xbf16>, vector<64x32xf32> -> vector<64x32xf32>
    %32 = arith.addf %24, %31 : vector<64x32xf32>
    %c0_37 = arith.constant 0 : index
    %c1_38 = arith.constant 1 : index
    %c1_39 = arith.constant 1 : index
    %c0_40 = arith.constant 0 : index
    %33 = vector.load %arg1[%c0_37, %c1_38, %c1_39, %c0_40] : memref<1x10x10x16xf32, #tpu.memory_space<vmem>>, vector<1x8x8x16xf32>
    %34 = vector.shape_cast %33 : vector<1x8x8x16xf32> to vector<8x8x16xf32>
    %35 = vector.shape_cast %34 : vector<8x8x16xf32> to vector<64x16xf32>
    %36 = arith.truncf %35 : vector<64x16xf32> to vector<64x16xbf16>
    %c0_41 = arith.constant 0 : index
    %c1_42 = arith.constant 1 : index
    %c1_43 = arith.constant 1 : index
    %c0_44 = arith.constant 0 : index
    %c0_45 = arith.constant 0 : index
    %37 = vector.load %arg2[%c0_41, %c1_42, %c1_43, %c0_44, %c0_45] : memref<2x2x3x16x32xbf16, #tpu.memory_space<vmem>>, vector<1x1x1x16x32xbf16>
    %38 = vector.shape_cast %37 : vector<1x1x1x16x32xbf16> to vector<16x32xbf16>
    %cst_46 = arith.constant dense<0.000000e+00> : vector<64x32xf32>
    %39 = tpu.matmul %36, %38, %cst_46 {dimension_numbers = #tpu.dot_dimension_numbers<[1], [0], [0], [1], [0, 0, 1, 1], [], []>} : vector<64x16xbf16>, vector<16x32xbf16>, vector<64x32xf32> -> vector<64x32xf32>
    %40 = arith.addf %32, %39 : vector<64x32xf32>
    %c0_47 = arith.constant 0 : index
    %c1_48 = arith.constant 1 : index
    %c2_49 = arith.constant 2 : index
    %c0_50 = arith.constant 0 : index
    %41 = vector.load %arg1[%c0_47, %c1_48, %c2_49, %c0_50] : memref<1x10x10x16xf32, #tpu.memory_space<vmem>>, vector<1x8x8x16xf32>
    %42 = vector.shape_cast %41 : vector<1x8x8x16xf32> to vector<8x8x16xf32>
    %43 = vector.shape_cast %42 : vector<8x8x16xf32> to vector<64x16xf32>
    %44 = arith.truncf %43 : vector<64x16xf32> to vector<64x16xbf16>
    %c0_51 = arith.constant 0 : index
    %c1_52 = arith.constant 1 : index
    %c2_53 = arith.constant 2 : index
    %c0_54 = arith.constant 0 : index
    %c0_55 = arith.constant 0 : index
    %45 = vector.load %arg2[%c0_51, %c1_52, %c2_53, %c0_54, %c0_55] : memref<2x2x3x16x32xbf16, #tpu.memory_space<vmem>>, vector<1x1x1x16x32xbf16>
    %46 = vector.shape_cast %45 : vector<1x1x1x16x32xbf16> to vector<16x32xbf16>
    %cst_56 = arith.constant dense<0.000000e+00> : vector<64x32xf32>
    %47 = tpu.matmul %44, %46, %cst_56 {dimension_numbers = #tpu.dot_dimension_numbers<[1], [0], [0], [1], [0, 0, 1, 1], [], []>} : vector<64x16xbf16>, vector<16x32xbf16>, vector<64x32xf32> -> vector<64x32xf32>
    %48 = arith.addf %40, %47 : vector<64x32xf32>
    %c0_57 = arith.constant 0 : index
    %c0_58 = arith.constant 0 : index
    %49 = vector.load %arg3[%c0_57, %c0_58] : memref<1x32xf32, #tpu.memory_space<vmem>>, vector<1x32xf32>
    %50 = vector.broadcast %49 : vector<1x32xf32> to vector<64x32xf32>
    %51 = arith.addf %48, %50 : vector<64x32xf32>
    %cst_59 = arith.constant 0.000000e+00 : f32
    %52 = vector.broadcast %cst_59 : f32 to vector<64x32xf32>
    %53 = arith.maximumf %51, %52 : vector<64x32xf32>
    %54 = vector.shape_cast %53 : vector<64x32xf32> to vector<8x1x8x32xf32>
    %c0_60 = arith.constant 0 : index
    %c0_61 = arith.constant 0 : index
    %c0_62 = arith.constant 0 : index
    %c0_63 = arith.constant 0 : index
    %c0_64 = arith.constant 0 : index
    %55 = vector.load %arg4[%c0_60, %c0_61, %c0_62, %c0_63, %c0_64] : memref<1x8x2x8x32xf32, #tpu.memory_space<vmem>>, vector<1x8x1x8x32xf32>
    %56 = vector.shape_cast %55 : vector<1x8x1x8x32xf32> to vector<8x1x8x32xf32>
    %57 = vector.shape_cast %54 : vector<8x1x8x32xf32> to vector<1x8x1x8x32xf32>
    tpu.vector_store %arg4[%c0_60, %c0_61, %c0_62, %c0_63, %c0_64], %57 {strides = array<i32>} : memref<1x8x2x8x32xf32, #tpu.memory_space<vmem>>, vector<1x8x1x8x32xf32>,
    %cst_65 = arith.constant 0.000000e+00 : f32
    %58 = vector.broadcast %cst_65 : f32 to vector<64x32xf32>
    %c0_66 = arith.constant 0 : index
    %c1_67 = arith.constant 1 : index
    %c0_68 = arith.constant 0 : index
    %c0_69 = arith.constant 0 : index
    %59 = vector.load %arg1[%c0_66, %c1_67, %c0_68, %c0_69] : memref<1x10x10x16xf32, #tpu.memory_space<vmem>>, vector<1x8x8x16xf32>
    %60 = vector.shape_cast %59 : vector<1x8x8x16xf32> to vector<8x8x16xf32>
    %61 = vector.shape_cast %60 : vector<8x8x16xf32> to vector<64x16xf32>
    %62 = arith.truncf %61 : vector<64x16xf32> to vector<64x16xbf16>
    %c1_70 = arith.constant 1 : index
    %c0_71 = arith.constant 0 : index
    %c0_72 = arith.constant 0 : index
    %c0_73 = arith.constant 0 : index
    %c0_74 = arith.constant 0 : index
    %63 = vector.load %arg2[%c1_70, %c0_71, %c0_72, %c0_73, %c0_74] : memref<2x2x3x16x32xbf16, #tpu.memory_space<vmem>>, vector<1x1x1x16x32xbf16>
    %64 = vector.shape_cast %63 : vector<1x1x1x16x32xbf16> to vector<16x32xbf16>
    %cst_75 = arith.constant dense<0.000000e+00> : vector<64x32xf32>
    %65 = tpu.matmul %62, %64, %cst_75 {dimension_numbers = #tpu.dot_dimension_numbers<[1], [0], [0], [1], [0, 0, 1, 1], [], []>} : vector<64x16xbf16>, vector<16x32xbf16>, vector<64x32xf32> -> vector<64x32xf32>
    %66 = arith.addf %58, %65 : vector<64x32xf32>
    %c0_76 = arith.constant 0 : index
    %c1_77 = arith.constant 1 : index
    %c1_78 = arith.constant 1 : index
    %c0_79 = arith.constant 0 : index
    %67 = vector.load %arg1[%c0_76, %c1_77, %c1_78, %c0_79] : memref<1x10x10x16xf32, #tpu.memory_space<vmem>>, vector<1x8x8x16xf32>
    %68 = vector.shape_cast %67 : vector<1x8x8x16xf32> to vector<8x8x16xf32>
    %69 = vector.shape_cast %68 : vector<8x8x16xf32> to vector<64x16xf32>
    %70 = arith.truncf %69 : vector<64x16xf32> to vector<64x16xbf16>
    %c1_80 = arith.constant 1 : index
    %c0_81 = arith.constant 0 : index
    %c1_82 = arith.constant 1 : index
    %c0_83 = arith.constant 0 : index
    %c0_84 = arith.constant 0 : index
    %71 = vector.load %arg2[%c1_80, %c0_81, %c1_82, %c0_83, %c0_84] : memref<2x2x3x16x32xbf16, #tpu.memory_space<vmem>>, vector<1x1x1x16x32xbf16>
    %72 = vector.shape_cast %71 : vector<1x1x1x16x32xbf16> to vector<16x32xbf16>
    %cst_85 = arith.constant dense<0.000000e+00> : vector<64x32xf32>
    %73 = tpu.matmul %70, %72, %cst_85 {dimension_numbers = #tpu.dot_dimension_numbers<[1], [0], [0], [1], [0, 0, 1, 1], [], []>} : vector<64x16xbf16>, vector<16x32xbf16>, vector<64x32xf32> -> vector<64x32xf32>
    %74 = arith.addf %66, %73 : vector<64x32xf32>
    %c0_86 = arith.constant 0 : index
    %c1_87 = arith.constant 1 : index
    %c2_88 = arith.constant 2 : index
    %c0_89 = arith.constant 0 : index
    %75 = vector.load %arg1[%c0_86, %c1_87, %c2_88, %c0_89] : memref<1x10x10x16xf32, #tpu.memory_space<vmem>>, vector<1x8x8x16xf32>
    %76 = vector.shape_cast %75 : vector<1x8x8x16xf32> to vector<8x8x16xf32>
    %77 = vector.shape_cast %76 : vector<8x8x16xf32> to vector<64x16xf32>
    %78 = arith.truncf %77 : vector<64x16xf32> to vector<64x16xbf16>
    %c1_90 = arith.constant 1 : index
    %c0_91 = arith.constant 0 : index
    %c2_92 = arith.constant 2 : index
    %c0_93 = arith.constant 0 : index
    %c0_94 = arith.constant 0 : index
    %79 = vector.load %arg2[%c1_90, %c0_91, %c2_92, %c0_93, %c0_94] : memref<2x2x3x16x32xbf16, #tpu.memory_space<vmem>>, vector<1x1x1x16x32xbf16>
    %80 = vector.shape_cast %79 : vector<1x1x1x16x32xbf16> to vector<16x32xbf16>
    %cst_95 = arith.constant dense<0.000000e+00> : vector<64x32xf32>
    %81 = tpu.matmul %78, %80, %cst_95 {dimension_numbers = #tpu.dot_dimension_numbers<[1], [0], [0], [1], [0, 0, 1, 1], [], []>} : vector<64x16xbf16>, vector<16x32xbf16>, vector<64x32xf32> -> vector<64x32xf32>
    %82 = arith.addf %74, %81 : vector<64x32xf32>
    %c0_96 = arith.constant 0 : index
    %c2_97 = arith.constant 2 : index
    %c0_98 = arith.constant 0 : index
    %c0_99 = arith.constant 0 : index
    %83 = vector.load %arg1[%c0_96, %c2_97, %c0_98, %c0_99] : memref<1x10x10x16xf32, #tpu.memory_space<vmem>>, vector<1x8x8x16xf32>
    %84 = vector.shape_cast %83 : vector<1x8x8x16xf32> to vector<8x8x16xf32>
    %85 = vector.shape_cast %84 : vector<8x8x16xf32> to vector<64x16xf32>
    %86 = arith.truncf %85 : vector<64x16xf32> to vector<64x16xbf16>
    %c1_100 = arith.constant 1 : index
    %c1_101 = arith.constant 1 : index
    %c0_102 = arith.constant 0 : index
    %c0_103 = arith.constant 0 : index
    %c0_104 = arith.constant 0 : index
    %87 = vector.load %arg2[%c1_100, %c1_101, %c0_102, %c0_103, %c0_104] : memref<2x2x3x16x32xbf16, #tpu.memory_space<vmem>>, vector<1x1x1x16x32xbf16>
    %88 = vector.shape_cast %87 : vector<1x1x1x16x32xbf16> to vector<16x32xbf16>
    %cst_105 = arith.constant dense<0.000000e+00> : vector<64x32xf32>
    %89 = tpu.matmul %86, %88, %cst_105 {dimension_numbers = #tpu.dot_dimension_numbers<[1], [0], [0], [1], [0, 0, 1, 1], [], []>} : vector<64x16xbf16>, vector<16x32xbf16>, vector<64x32xf32> -> vector<64x32xf32>
    %90 = arith.addf %82, %89 : vector<64x32xf32>
    %c0_106 = arith.constant 0 : index
    %c2_107 = arith.constant 2 : index
    %c1_108 = arith.constant 1 : index
    %c0_109 = arith.constant 0 : index
    %91 = vector.load %arg1[%c0_106, %c2_107, %c1_108, %c0_109] : memref<1x10x10x16xf32, #tpu.memory_space<vmem>>, vector<1x8x8x16xf32>
    %92 = vector.shape_cast %91 : vector<1x8x8x16xf32> to vector<8x8x16xf32>
    %93 = vector.shape_cast %92 : vector<8x8x16xf32> to vector<64x16xf32>
    %94 = arith.truncf %93 : vector<64x16xf32> to vector<64x16xbf16>
    %c1_110 = arith.constant 1 : index
    %c1_111 = arith.constant 1 : index
    %c1_112 = arith.constant 1 : index
    %c0_113 = arith.constant 0 : index
    %c0_114 = arith.constant 0 : index
    %95 = vector.load %arg2[%c1_110, %c1_111, %c1_112, %c0_113, %c0_114] : memref<2x2x3x16x32xbf16, #tpu.memory_space<vmem>>, vector<1x1x1x16x32xbf16>
    %96 = vector.shape_cast %95 : vector<1x1x1x16x32xbf16> to vector<16x32xbf16>
    %cst_115 = arith.constant dense<0.000000e+00> : vector<64x32xf32>
    %97 = tpu.matmul %94, %96, %cst_115 {dimension_numbers = #tpu.dot_dimension_numbers<[1], [0], [0], [1], [0, 0, 1, 1], [], []>} : vector<64x16xbf16>, vector<16x32xbf16>, vector<64x32xf32> -> vector<64x32xf32>
    %98 = arith.addf %90, %97 : vector<64x32xf32>
    %c0_116 = arith.constant 0 : index
    %c2_117 = arith.constant 2 : index
    %c2_118 = arith.constant 2 : index
    %c0_119 = arith.constant 0 : index
    %99 = vector.load %arg1[%c0_116, %c2_117, %c2_118, %c0_119] : memref<1x10x10x16xf32, #tpu.memory_space<vmem>>, vector<1x8x8x16xf32>
    %100 = vector.shape_cast %99 : vector<1x8x8x16xf32> to vector<8x8x16xf32>
    %101 = vector.shape_cast %100 : vector<8x8x16xf32> to vector<64x16xf32>
    %102 = arith.truncf %101 : vector<64x16xf32> to vector<64x16xbf16>
    %c1_120 = arith.constant 1 : index
    %c1_121 = arith.constant 1 : index
    %c2_122 = arith.constant 2 : index
    %c0_123 = arith.constant 0 : index
    %c0_124 = arith.constant 0 : index
    %103 = vector.load %arg2[%c1_120, %c1_121, %c2_122, %c0_123, %c0_124] : memref<2x2x3x16x32xbf16, #tpu.memory_space<vmem>>, vector<1x1x1x16x32xbf16>
    %104 = vector.shape_cast %103 : vector<1x1x1x16x32xbf16> to vector<16x32xbf16>
    %cst_125 = arith.constant dense<0.000000e+00> : vector<64x32xf32>
    %105 = tpu.matmul %102, %104, %cst_125 {dimension_numbers = #tpu.dot_dimension_numbers<[1], [0], [0], [1], [0, 0, 1, 1], [], []>} : vector<64x16xbf16>, vector<16x32xbf16>, vector<64x32xf32> -> vector<64x32xf32>
    %106 = arith.addf %98, %105 : vector<64x32xf32>
    %c0_126 = arith.constant 0 : index
    %c0_127 = arith.constant 0 : index
    %107 = vector.load %arg3[%c0_126, %c0_127] : memref<1x32xf32, #tpu.memory_space<vmem>>, vector<1x32xf32>
    %108 = vector.broadcast %107 : vector<1x32xf32> to vector<64x32xf32>
    %109 = arith.addf %106, %108 : vector<64x32xf32>
    %cst_128 = arith.constant 0.000000e+00 : f32
    %110 = vector.broadcast %cst_128 : f32 to vector<64x32xf32>
    %111 = arith.maximumf %109, %110 : vector<64x32xf32>
    %112 = vector.shape_cast %111 : vector<64x32xf32> to vector<8x1x8x32xf32>
    %c0_129 = arith.constant 0 : index
    %c0_130 = arith.constant 0 : index
    %c1_131 = arith.constant 1 : index
    %c0_132 = arith.constant 0 : index
    %c0_133 = arith.constant 0 : index
    %113 = vector.load %arg4[%c0_129, %c0_130, %c1_131, %c0_132, %c0_133] : memref<1x8x2x8x32xf32, #tpu.memory_space<vmem>>, vector<1x8x1x8x32xf32>
    %114 = vector.shape_cast %113 : vector<1x8x1x8x32xf32> to vector<8x1x8x32xf32>
    %115 = vector.shape_cast %112 : vector<8x1x8x32xf32> to vector<1x8x1x8x32xf32>
    tpu.vector_store %arg4[%c0_129, %c0_130, %c1_131, %c0_132, %c0_133], %115 {strides = array<i32>} : memref<1x8x2x8x32xf32, #tpu.memory_space<vmem>>, vector<1x8x1x8x32xf32>,
    return
  }
  func.func @transform_0(%arg0: i32) -> (i32, i32, i32, i32) {
    %c0_i32 = arith.constant 0 : i32
    %c0_i32_0 = arith.constant 0 : i32
    %c0_i32_1 = arith.constant 0 : i32
    %c0_i32_2 = arith.constant 0 : i32
    return %arg0, %c0_i32, %c0_i32_0, %c0_i32_1 : i32, i32, i32, i32
  }
  func.func @transform_1(%arg0: i32) -> (i32, i32, i32, i32, i32) {
    %c0_i32 = arith.constant 0 : i32
    %c0_i32_0 = arith.constant 0 : i32
    %c0_i32_1 = arith.constant 0 : i32
    %c0_i32_2 = arith.constant 0 : i32
    %c0_i32_3 = arith.constant 0 : i32
    %c0_i32_4 = arith.constant 0 : i32
    return %c0_i32, %c0_i32_0, %c0_i32_1, %c0_i32_2, %c0_i32_3 : i32, i32, i32, i32, i32
  }
  func.func @transform_2(%arg0: i32) -> (i32, i32) {
    %c0_i32 = arith.constant 0 : i32
    %c0_i32_0 = arith.constant 0 : i32
    %c0_i32_1 = arith.constant 0 : i32
    return %c0_i32, %c0_i32_0 : i32, i32
  }
  func.func @transform_3(%arg0: i32) -> (i32, i32, i32, i32, i32) {
    %c0_i32 = arith.constant 0 : i32
    %c0_i32_0 = arith.constant 0 : i32
    %c0_i32_1 = arith.constant 0 : i32
    %c0_i32_2 = arith.constant 0 : i32
    %c0_i32_3 = arith.constant 0 : i32
    return %arg0, %c0_i32, %c0_i32_0, %c0_i32_1, %c0_i32_2 : i32, i32, i32, i32, i32
  }
}

module attributes {stable_mosaic.version = 11 : i64} {
  func.func @_conv3x3_stats_kernel(%arg0: i32, %arg1: memref<1x18x18x16xf32, #tpu.memory_space<vmem>>, %arg2: memref<9x16x16xbf16, #tpu.memory_space<vmem>>, %arg3: memref<1x16x16x16xf32, #tpu.memory_space<vmem>>, %arg4: memref<1x1x16xf32, #tpu.memory_space<vmem>>, %arg5: memref<1x1x16xf32, #tpu.memory_space<vmem>>) attributes {dimension_semantics = [#tpu.dimension_semantics<parallel>], iteration_bounds = array<i64: 2>, scalar_prefetch = 0 : i64, scratch_operands = 0 : i64, tpu.core_type = #tpu.core_type<tc>, window_params = [{transform_indices = @transform_0, window_bounds = array<i64: 1, 18, 18, 16>}, {pipeline_mode = #tpu.pipeline_mode<synchronous>, transform_indices = @transform_1, window_bounds = array<i64: 9, 16, 16>}, {transform_indices = @transform_2, window_bounds = array<i64: 1, 16, 16, 16>}, {transform_indices = @transform_3, window_bounds = array<i64: 1, 1, 16>}, {transform_indices = @transform_4, window_bounds = array<i64: 1, 1, 16>}]} {
    %cst = arith.constant 0.000000e+00 : f32
    %0 = vector.broadcast %cst : f32 to vector<256x16xf32>
    %c0 = arith.constant 0 : index
    %c0_0 = arith.constant 0 : index
    %c0_1 = arith.constant 0 : index
    %c0_2 = arith.constant 0 : index
    %1 = vector.load %arg1[%c0, %c0_0, %c0_1, %c0_2] : memref<1x18x18x16xf32, #tpu.memory_space<vmem>>, vector<1x16x16x16xf32>
    %2 = vector.shape_cast %1 : vector<1x16x16x16xf32> to vector<16x16x16xf32>
    %3 = vector.shape_cast %2 : vector<16x16x16xf32> to vector<256x16xf32>
    %4 = arith.truncf %3 : vector<256x16xf32> to vector<256x16xbf16>
    %c0_3 = arith.constant 0 : index
    %c0_4 = arith.constant 0 : index
    %c0_5 = arith.constant 0 : index
    %5 = vector.load %arg2[%c0_3, %c0_4, %c0_5] : memref<9x16x16xbf16, #tpu.memory_space<vmem>>, vector<1x16x16xbf16>
    %6 = vector.shape_cast %5 : vector<1x16x16xbf16> to vector<16x16xbf16>
    %cst_6 = arith.constant dense<0.000000e+00> : vector<256x16xf32>
    %7 = tpu.matmul %4, %6, %cst_6 {dimension_numbers = #tpu.dot_dimension_numbers<[1], [0], [0], [1], [0, 0, 1, 1], [], []>} : vector<256x16xbf16>, vector<16x16xbf16>, vector<256x16xf32> -> vector<256x16xf32>
    %8 = arith.addf %0, %7 : vector<256x16xf32>
    %c0_7 = arith.constant 0 : index
    %c0_8 = arith.constant 0 : index
    %c1 = arith.constant 1 : index
    %c0_9 = arith.constant 0 : index
    %9 = vector.load %arg1[%c0_7, %c0_8, %c1, %c0_9] : memref<1x18x18x16xf32, #tpu.memory_space<vmem>>, vector<1x16x16x16xf32>
    %10 = vector.shape_cast %9 : vector<1x16x16x16xf32> to vector<16x16x16xf32>
    %11 = vector.shape_cast %10 : vector<16x16x16xf32> to vector<256x16xf32>
    %12 = arith.truncf %11 : vector<256x16xf32> to vector<256x16xbf16>
    %c1_10 = arith.constant 1 : index
    %c0_11 = arith.constant 0 : index
    %c0_12 = arith.constant 0 : index
    %13 = vector.load %arg2[%c1_10, %c0_11, %c0_12] : memref<9x16x16xbf16, #tpu.memory_space<vmem>>, vector<1x16x16xbf16>
    %14 = vector.shape_cast %13 : vector<1x16x16xbf16> to vector<16x16xbf16>
    %cst_13 = arith.constant dense<0.000000e+00> : vector<256x16xf32>
    %15 = tpu.matmul %12, %14, %cst_13 {dimension_numbers = #tpu.dot_dimension_numbers<[1], [0], [0], [1], [0, 0, 1, 1], [], []>} : vector<256x16xbf16>, vector<16x16xbf16>, vector<256x16xf32> -> vector<256x16xf32>
    %16 = arith.addf %8, %15 : vector<256x16xf32>
    %c0_14 = arith.constant 0 : index
    %c0_15 = arith.constant 0 : index
    %c2 = arith.constant 2 : index
    %c0_16 = arith.constant 0 : index
    %17 = vector.load %arg1[%c0_14, %c0_15, %c2, %c0_16] : memref<1x18x18x16xf32, #tpu.memory_space<vmem>>, vector<1x16x16x16xf32>
    %18 = vector.shape_cast %17 : vector<1x16x16x16xf32> to vector<16x16x16xf32>
    %19 = vector.shape_cast %18 : vector<16x16x16xf32> to vector<256x16xf32>
    %20 = arith.truncf %19 : vector<256x16xf32> to vector<256x16xbf16>
    %c2_17 = arith.constant 2 : index
    %c0_18 = arith.constant 0 : index
    %c0_19 = arith.constant 0 : index
    %21 = vector.load %arg2[%c2_17, %c0_18, %c0_19] : memref<9x16x16xbf16, #tpu.memory_space<vmem>>, vector<1x16x16xbf16>
    %22 = vector.shape_cast %21 : vector<1x16x16xbf16> to vector<16x16xbf16>
    %cst_20 = arith.constant dense<0.000000e+00> : vector<256x16xf32>
    %23 = tpu.matmul %20, %22, %cst_20 {dimension_numbers = #tpu.dot_dimension_numbers<[1], [0], [0], [1], [0, 0, 1, 1], [], []>} : vector<256x16xbf16>, vector<16x16xbf16>, vector<256x16xf32> -> vector<256x16xf32>
    %24 = arith.addf %16, %23 : vector<256x16xf32>
    %c0_21 = arith.constant 0 : index
    %c1_22 = arith.constant 1 : index
    %c0_23 = arith.constant 0 : index
    %c0_24 = arith.constant 0 : index
    %25 = vector.load %arg1[%c0_21, %c1_22, %c0_23, %c0_24] : memref<1x18x18x16xf32, #tpu.memory_space<vmem>>, vector<1x16x16x16xf32>
    %26 = vector.shape_cast %25 : vector<1x16x16x16xf32> to vector<16x16x16xf32>
    %27 = vector.shape_cast %26 : vector<16x16x16xf32> to vector<256x16xf32>
    %28 = arith.truncf %27 : vector<256x16xf32> to vector<256x16xbf16>
    %c3 = arith.constant 3 : index
    %c0_25 = arith.constant 0 : index
    %c0_26 = arith.constant 0 : index
    %29 = vector.load %arg2[%c3, %c0_25, %c0_26] : memref<9x16x16xbf16, #tpu.memory_space<vmem>>, vector<1x16x16xbf16>
    %30 = vector.shape_cast %29 : vector<1x16x16xbf16> to vector<16x16xbf16>
    %cst_27 = arith.constant dense<0.000000e+00> : vector<256x16xf32>
    %31 = tpu.matmul %28, %30, %cst_27 {dimension_numbers = #tpu.dot_dimension_numbers<[1], [0], [0], [1], [0, 0, 1, 1], [], []>} : vector<256x16xbf16>, vector<16x16xbf16>, vector<256x16xf32> -> vector<256x16xf32>
    %32 = arith.addf %24, %31 : vector<256x16xf32>
    %c0_28 = arith.constant 0 : index
    %c1_29 = arith.constant 1 : index
    %c1_30 = arith.constant 1 : index
    %c0_31 = arith.constant 0 : index
    %33 = vector.load %arg1[%c0_28, %c1_29, %c1_30, %c0_31] : memref<1x18x18x16xf32, #tpu.memory_space<vmem>>, vector<1x16x16x16xf32>
    %34 = vector.shape_cast %33 : vector<1x16x16x16xf32> to vector<16x16x16xf32>
    %35 = vector.shape_cast %34 : vector<16x16x16xf32> to vector<256x16xf32>
    %36 = arith.truncf %35 : vector<256x16xf32> to vector<256x16xbf16>
    %c4 = arith.constant 4 : index
    %c0_32 = arith.constant 0 : index
    %c0_33 = arith.constant 0 : index
    %37 = vector.load %arg2[%c4, %c0_32, %c0_33] : memref<9x16x16xbf16, #tpu.memory_space<vmem>>, vector<1x16x16xbf16>
    %38 = vector.shape_cast %37 : vector<1x16x16xbf16> to vector<16x16xbf16>
    %cst_34 = arith.constant dense<0.000000e+00> : vector<256x16xf32>
    %39 = tpu.matmul %36, %38, %cst_34 {dimension_numbers = #tpu.dot_dimension_numbers<[1], [0], [0], [1], [0, 0, 1, 1], [], []>} : vector<256x16xbf16>, vector<16x16xbf16>, vector<256x16xf32> -> vector<256x16xf32>
    %40 = arith.addf %32, %39 : vector<256x16xf32>
    %c0_35 = arith.constant 0 : index
    %c1_36 = arith.constant 1 : index
    %c2_37 = arith.constant 2 : index
    %c0_38 = arith.constant 0 : index
    %41 = vector.load %arg1[%c0_35, %c1_36, %c2_37, %c0_38] : memref<1x18x18x16xf32, #tpu.memory_space<vmem>>, vector<1x16x16x16xf32>
    %42 = vector.shape_cast %41 : vector<1x16x16x16xf32> to vector<16x16x16xf32>
    %43 = vector.shape_cast %42 : vector<16x16x16xf32> to vector<256x16xf32>
    %44 = arith.truncf %43 : vector<256x16xf32> to vector<256x16xbf16>
    %c5 = arith.constant 5 : index
    %c0_39 = arith.constant 0 : index
    %c0_40 = arith.constant 0 : index
    %45 = vector.load %arg2[%c5, %c0_39, %c0_40] : memref<9x16x16xbf16, #tpu.memory_space<vmem>>, vector<1x16x16xbf16>
    %46 = vector.shape_cast %45 : vector<1x16x16xbf16> to vector<16x16xbf16>
    %cst_41 = arith.constant dense<0.000000e+00> : vector<256x16xf32>
    %47 = tpu.matmul %44, %46, %cst_41 {dimension_numbers = #tpu.dot_dimension_numbers<[1], [0], [0], [1], [0, 0, 1, 1], [], []>} : vector<256x16xbf16>, vector<16x16xbf16>, vector<256x16xf32> -> vector<256x16xf32>
    %48 = arith.addf %40, %47 : vector<256x16xf32>
    %c0_42 = arith.constant 0 : index
    %c2_43 = arith.constant 2 : index
    %c0_44 = arith.constant 0 : index
    %c0_45 = arith.constant 0 : index
    %49 = vector.load %arg1[%c0_42, %c2_43, %c0_44, %c0_45] : memref<1x18x18x16xf32, #tpu.memory_space<vmem>>, vector<1x16x16x16xf32>
    %50 = vector.shape_cast %49 : vector<1x16x16x16xf32> to vector<16x16x16xf32>
    %51 = vector.shape_cast %50 : vector<16x16x16xf32> to vector<256x16xf32>
    %52 = arith.truncf %51 : vector<256x16xf32> to vector<256x16xbf16>
    %c6 = arith.constant 6 : index
    %c0_46 = arith.constant 0 : index
    %c0_47 = arith.constant 0 : index
    %53 = vector.load %arg2[%c6, %c0_46, %c0_47] : memref<9x16x16xbf16, #tpu.memory_space<vmem>>, vector<1x16x16xbf16>
    %54 = vector.shape_cast %53 : vector<1x16x16xbf16> to vector<16x16xbf16>
    %cst_48 = arith.constant dense<0.000000e+00> : vector<256x16xf32>
    %55 = tpu.matmul %52, %54, %cst_48 {dimension_numbers = #tpu.dot_dimension_numbers<[1], [0], [0], [1], [0, 0, 1, 1], [], []>} : vector<256x16xbf16>, vector<16x16xbf16>, vector<256x16xf32> -> vector<256x16xf32>
    %56 = arith.addf %48, %55 : vector<256x16xf32>
    %c0_49 = arith.constant 0 : index
    %c2_50 = arith.constant 2 : index
    %c1_51 = arith.constant 1 : index
    %c0_52 = arith.constant 0 : index
    %57 = vector.load %arg1[%c0_49, %c2_50, %c1_51, %c0_52] : memref<1x18x18x16xf32, #tpu.memory_space<vmem>>, vector<1x16x16x16xf32>
    %58 = vector.shape_cast %57 : vector<1x16x16x16xf32> to vector<16x16x16xf32>
    %59 = vector.shape_cast %58 : vector<16x16x16xf32> to vector<256x16xf32>
    %60 = arith.truncf %59 : vector<256x16xf32> to vector<256x16xbf16>
    %c7 = arith.constant 7 : index
    %c0_53 = arith.constant 0 : index
    %c0_54 = arith.constant 0 : index
    %61 = vector.load %arg2[%c7, %c0_53, %c0_54] : memref<9x16x16xbf16, #tpu.memory_space<vmem>>, vector<1x16x16xbf16>
    %62 = vector.shape_cast %61 : vector<1x16x16xbf16> to vector<16x16xbf16>
    %cst_55 = arith.constant dense<0.000000e+00> : vector<256x16xf32>
    %63 = tpu.matmul %60, %62, %cst_55 {dimension_numbers = #tpu.dot_dimension_numbers<[1], [0], [0], [1], [0, 0, 1, 1], [], []>} : vector<256x16xbf16>, vector<16x16xbf16>, vector<256x16xf32> -> vector<256x16xf32>
    %64 = arith.addf %56, %63 : vector<256x16xf32>
    %c0_56 = arith.constant 0 : index
    %c2_57 = arith.constant 2 : index
    %c2_58 = arith.constant 2 : index
    %c0_59 = arith.constant 0 : index
    %65 = vector.load %arg1[%c0_56, %c2_57, %c2_58, %c0_59] : memref<1x18x18x16xf32, #tpu.memory_space<vmem>>, vector<1x16x16x16xf32>
    %66 = vector.shape_cast %65 : vector<1x16x16x16xf32> to vector<16x16x16xf32>
    %67 = vector.shape_cast %66 : vector<16x16x16xf32> to vector<256x16xf32>
    %68 = arith.truncf %67 : vector<256x16xf32> to vector<256x16xbf16>
    %c8 = arith.constant 8 : index
    %c0_60 = arith.constant 0 : index
    %c0_61 = arith.constant 0 : index
    %69 = vector.load %arg2[%c8, %c0_60, %c0_61] : memref<9x16x16xbf16, #tpu.memory_space<vmem>>, vector<1x16x16xbf16>
    %70 = vector.shape_cast %69 : vector<1x16x16xbf16> to vector<16x16xbf16>
    %cst_62 = arith.constant dense<0.000000e+00> : vector<256x16xf32>
    %71 = tpu.matmul %68, %70, %cst_62 {dimension_numbers = #tpu.dot_dimension_numbers<[1], [0], [0], [1], [0, 0, 1, 1], [], []>} : vector<256x16xbf16>, vector<16x16xbf16>, vector<256x16xf32> -> vector<256x16xf32>
    %72 = arith.addf %64, %71 : vector<256x16xf32>
    %73 = vector.shape_cast %72 : vector<256x16xf32> to vector<1x16x16x16xf32>
    %c0_63 = arith.constant 0 : index
    %c0_64 = arith.constant 0 : index
    %c0_65 = arith.constant 0 : index
    %c0_66 = arith.constant 0 : index
    %74 = vector.load %arg3[%c0_63, %c0_64, %c0_65, %c0_66] : memref<1x16x16x16xf32, #tpu.memory_space<vmem>>, vector<1x16x16x16xf32>
    tpu.vector_store %arg3[%c0_63, %c0_64, %c0_65, %c0_66], %73 {strides = array<i32>} : memref<1x16x16x16xf32, #tpu.memory_space<vmem>>, vector<1x16x16x16xf32>,
    %cst_67 = arith.constant dense<0.000000e+00> : vector<16xf32>
    %75 = vector.multi_reduction <add>, %72, %cst_67 [0] : vector<256x16xf32> to vector<16xf32>
    %76 = vector.shape_cast %75 : vector<16xf32> to vector<1x16xf32>
    %77 = vector.shape_cast %76 : vector<1x16xf32> to vector<1x1x16xf32>
    %c0_68 = arith.constant 0 : index
    %c0_69 = arith.constant 0 : index
    %c0_70 = arith.constant 0 : index
    %78 = vector.load %arg4[%c0_68, %c0_69, %c0_70] : memref<1x1x16xf32, #tpu.memory_space<vmem>>, vector<1x1x16xf32>
    tpu.vector_store %arg4[%c0_68, %c0_69, %c0_70], %77 {strides = array<i32>} : memref<1x1x16xf32, #tpu.memory_space<vmem>>, vector<1x1x16xf32>,
    %79 = arith.mulf %72, %72 : vector<256x16xf32>
    %cst_71 = arith.constant dense<0.000000e+00> : vector<16xf32>
    %80 = vector.multi_reduction <add>, %79, %cst_71 [0] : vector<256x16xf32> to vector<16xf32>
    %81 = vector.shape_cast %80 : vector<16xf32> to vector<1x16xf32>
    %82 = vector.shape_cast %81 : vector<1x16xf32> to vector<1x1x16xf32>
    %c0_72 = arith.constant 0 : index
    %c0_73 = arith.constant 0 : index
    %c0_74 = arith.constant 0 : index
    %83 = vector.load %arg5[%c0_72, %c0_73, %c0_74] : memref<1x1x16xf32, #tpu.memory_space<vmem>>, vector<1x1x16xf32>
    tpu.vector_store %arg5[%c0_72, %c0_73, %c0_74], %82 {strides = array<i32>} : memref<1x1x16xf32, #tpu.memory_space<vmem>>, vector<1x1x16xf32>,
    return
  }
  func.func @transform_0(%arg0: i32) -> (i32, i32, i32, i32) {
    %c0_i32 = arith.constant 0 : i32
    %c0_i32_0 = arith.constant 0 : i32
    %c0_i32_1 = arith.constant 0 : i32
    %c0_i32_2 = arith.constant 0 : i32
    return %arg0, %c0_i32, %c0_i32_0, %c0_i32_1 : i32, i32, i32, i32
  }
  func.func @transform_1(%arg0: i32) -> (i32, i32, i32) {
    %c0_i32 = arith.constant 0 : i32
    %c0_i32_0 = arith.constant 0 : i32
    %c0_i32_1 = arith.constant 0 : i32
    %c0_i32_2 = arith.constant 0 : i32
    return %c0_i32, %c0_i32_0, %c0_i32_1 : i32, i32, i32
  }
  func.func @transform_2(%arg0: i32) -> (i32, i32, i32, i32) {
    %c0_i32 = arith.constant 0 : i32
    %c0_i32_0 = arith.constant 0 : i32
    %c0_i32_1 = arith.constant 0 : i32
    %c0_i32_2 = arith.constant 0 : i32
    return %arg0, %c0_i32, %c0_i32_0, %c0_i32_1 : i32, i32, i32, i32
  }
  func.func @transform_3(%arg0: i32) -> (i32, i32, i32) {
    %c0_i32 = arith.constant 0 : i32
    %c0_i32_0 = arith.constant 0 : i32
    %c0_i32_1 = arith.constant 0 : i32
    return %arg0, %c0_i32, %c0_i32_0 : i32, i32, i32
  }
  func.func @transform_4(%arg0: i32) -> (i32, i32, i32) {
    %c0_i32 = arith.constant 0 : i32
    %c0_i32_0 = arith.constant 0 : i32
    %c0_i32_1 = arith.constant 0 : i32
    return %arg0, %c0_i32, %c0_i32_0 : i32, i32, i32
  }
}

module attributes {stable_mosaic.version = 11 : i64} {
  func.func @_scale_shift_relu_kernel(%arg0: i32, %arg1: memref<64x128xf32, #tpu.memory_space<vmem>>, %arg2: memref<1x128xf32, #tpu.memory_space<vmem>>, %arg3: memref<1x128xf32, #tpu.memory_space<vmem>>, %arg4: memref<64x128xf32, #tpu.memory_space<vmem>>) attributes {dimension_semantics = [#tpu.dimension_semantics<parallel>], iteration_bounds = array<i64: 1>, scalar_prefetch = 0 : i64, scratch_operands = 0 : i64, tpu.core_type = #tpu.core_type<tc>, window_params = [{transform_indices = @transform_0, window_bounds = array<i64: 64, 128>}, {pipeline_mode = #tpu.pipeline_mode<synchronous>, transform_indices = @transform_1, window_bounds = array<i64: 1, 128>}, {pipeline_mode = #tpu.pipeline_mode<synchronous>, transform_indices = @transform_2, window_bounds = array<i64: 1, 128>}, {transform_indices = @transform_3, window_bounds = array<i64: 64, 128>}]} {
    %c0 = arith.constant 0 : index
    %c0_0 = arith.constant 0 : index
    %0 = vector.load %arg1[%c0, %c0_0] : memref<64x128xf32, #tpu.memory_space<vmem>>, vector<64x128xf32>
    %c0_1 = arith.constant 0 : index
    %c0_2 = arith.constant 0 : index
    %1 = vector.load %arg2[%c0_1, %c0_2] : memref<1x128xf32, #tpu.memory_space<vmem>>, vector<1x128xf32>
    %2 = vector.broadcast %1 : vector<1x128xf32> to vector<64x128xf32>
    %3 = arith.mulf %0, %2 : vector<64x128xf32>
    %c0_3 = arith.constant 0 : index
    %c0_4 = arith.constant 0 : index
    %4 = vector.load %arg3[%c0_3, %c0_4] : memref<1x128xf32, #tpu.memory_space<vmem>>, vector<1x128xf32>
    %5 = vector.broadcast %4 : vector<1x128xf32> to vector<64x128xf32>
    %6 = arith.addf %3, %5 : vector<64x128xf32>
    %cst = arith.constant 0.000000e+00 : f32
    %7 = vector.broadcast %cst : f32 to vector<64x128xf32>
    %8 = arith.maximumf %6, %7 : vector<64x128xf32>
    %c0_5 = arith.constant 0 : index
    %c0_6 = arith.constant 0 : index
    %9 = vector.load %arg4[%c0_5, %c0_6] : memref<64x128xf32, #tpu.memory_space<vmem>>, vector<64x128xf32>
    tpu.vector_store %arg4[%c0_5, %c0_6], %8 {strides = array<i32>} : memref<64x128xf32, #tpu.memory_space<vmem>>, vector<64x128xf32>,
    return
  }
  func.func @transform_0(%arg0: i32) -> (i32, i32) {
    %c0_i32 = arith.constant 0 : i32
    %c0_i32_0 = arith.constant 0 : i32
    return %arg0, %c0_i32 : i32, i32
  }
  func.func @transform_1(%arg0: i32) -> (i32, i32) {
    %c0_i32 = arith.constant 0 : i32
    %c0_i32_0 = arith.constant 0 : i32
    %c0_i32_1 = arith.constant 0 : i32
    return %c0_i32, %c0_i32_0 : i32, i32
  }
  func.func @transform_2(%arg0: i32) -> (i32, i32) {
    %c0_i32 = arith.constant 0 : i32
    %c0_i32_0 = arith.constant 0 : i32
    %c0_i32_1 = arith.constant 0 : i32
    return %c0_i32, %c0_i32_0 : i32, i32
  }
  func.func @transform_3(%arg0: i32) -> (i32, i32) {
    %c0_i32 = arith.constant 0 : i32
    %c0_i32_0 = arith.constant 0 : i32
    return %arg0, %c0_i32 : i32, i32
  }
}

module attributes {stable_mosaic.version = 11 : i64} {
  func.func @_scale_shift_add_relu_kernel(%arg0: i32, %arg1: memref<64x128xf32, #tpu.memory_space<vmem>>, %arg2: memref<1x128xf32, #tpu.memory_space<vmem>>, %arg3: memref<1x128xf32, #tpu.memory_space<vmem>>, %arg4: memref<64x128xf32, #tpu.memory_space<vmem>>, %arg5: memref<64x128xf32, #tpu.memory_space<vmem>>) attributes {dimension_semantics = [#tpu.dimension_semantics<parallel>], iteration_bounds = array<i64: 1>, scalar_prefetch = 0 : i64, scratch_operands = 0 : i64, tpu.core_type = #tpu.core_type<tc>, window_params = [{transform_indices = @transform_0, window_bounds = array<i64: 64, 128>}, {pipeline_mode = #tpu.pipeline_mode<synchronous>, transform_indices = @transform_1, window_bounds = array<i64: 1, 128>}, {pipeline_mode = #tpu.pipeline_mode<synchronous>, transform_indices = @transform_2, window_bounds = array<i64: 1, 128>}, {transform_indices = @transform_3, window_bounds = array<i64: 64, 128>}, {transform_indices = @transform_4, window_bounds = array<i64: 64, 128>}]} {
    %c0 = arith.constant 0 : index
    %c0_0 = arith.constant 0 : index
    %0 = vector.load %arg1[%c0, %c0_0] : memref<64x128xf32, #tpu.memory_space<vmem>>, vector<64x128xf32>
    %c0_1 = arith.constant 0 : index
    %c0_2 = arith.constant 0 : index
    %1 = vector.load %arg2[%c0_1, %c0_2] : memref<1x128xf32, #tpu.memory_space<vmem>>, vector<1x128xf32>
    %2 = vector.broadcast %1 : vector<1x128xf32> to vector<64x128xf32>
    %3 = arith.mulf %0, %2 : vector<64x128xf32>
    %c0_3 = arith.constant 0 : index
    %c0_4 = arith.constant 0 : index
    %4 = vector.load %arg3[%c0_3, %c0_4] : memref<1x128xf32, #tpu.memory_space<vmem>>, vector<1x128xf32>
    %5 = vector.broadcast %4 : vector<1x128xf32> to vector<64x128xf32>
    %6 = arith.addf %3, %5 : vector<64x128xf32>
    %c0_5 = arith.constant 0 : index
    %c0_6 = arith.constant 0 : index
    %7 = vector.load %arg4[%c0_5, %c0_6] : memref<64x128xf32, #tpu.memory_space<vmem>>, vector<64x128xf32>
    %8 = arith.addf %6, %7 : vector<64x128xf32>
    %cst = arith.constant 0.000000e+00 : f32
    %9 = vector.broadcast %cst : f32 to vector<64x128xf32>
    %10 = arith.maximumf %8, %9 : vector<64x128xf32>
    %c0_7 = arith.constant 0 : index
    %c0_8 = arith.constant 0 : index
    %11 = vector.load %arg5[%c0_7, %c0_8] : memref<64x128xf32, #tpu.memory_space<vmem>>, vector<64x128xf32>
    tpu.vector_store %arg5[%c0_7, %c0_8], %10 {strides = array<i32>} : memref<64x128xf32, #tpu.memory_space<vmem>>, vector<64x128xf32>,
    return
  }
  func.func @transform_0(%arg0: i32) -> (i32, i32) {
    %c0_i32 = arith.constant 0 : i32
    %c0_i32_0 = arith.constant 0 : i32
    return %arg0, %c0_i32 : i32, i32
  }
  func.func @transform_1(%arg0: i32) -> (i32, i32) {
    %c0_i32 = arith.constant 0 : i32
    %c0_i32_0 = arith.constant 0 : i32
    %c0_i32_1 = arith.constant 0 : i32
    return %c0_i32, %c0_i32_0 : i32, i32
  }
  func.func @transform_2(%arg0: i32) -> (i32, i32) {
    %c0_i32 = arith.constant 0 : i32
    %c0_i32_0 = arith.constant 0 : i32
    %c0_i32_1 = arith.constant 0 : i32
    return %c0_i32, %c0_i32_0 : i32, i32
  }
  func.func @transform_3(%arg0: i32) -> (i32, i32) {
    %c0_i32 = arith.constant 0 : i32
    %c0_i32_0 = arith.constant 0 : i32
    return %arg0, %c0_i32 : i32, i32
  }
  func.func @transform_4(%arg0: i32) -> (i32, i32) {
    %c0_i32 = arith.constant 0 : i32
    %c0_i32_0 = arith.constant 0 : i32
    return %arg0, %c0_i32 : i32, i32
  }
}

module attributes {stable_mosaic.version = 11 : i64} {
  func.func @_deconv4x4_s2_relu_kernel(%arg0: i32, %arg1: memref<1x18x18x16xf32, #tpu.memory_space<vmem>>, %arg2: memref<2x2x3x16x32xbf16, #tpu.memory_space<vmem>>, %arg3: memref<1x32xf32, #tpu.memory_space<vmem>>, %arg4: memref<1x16x2x16x32xf32, #tpu.memory_space<vmem>>) attributes {dimension_semantics = [#tpu.dimension_semantics<parallel>], iteration_bounds = array<i64: 2>, scalar_prefetch = 0 : i64, scratch_operands = 0 : i64, tpu.core_type = #tpu.core_type<tc>, window_params = [{transform_indices = @transform_0, window_bounds = array<i64: 1, 18, 18, 16>}, {pipeline_mode = #tpu.pipeline_mode<synchronous>, transform_indices = @transform_1, window_bounds = array<i64: 2, 2, 3, 16, 32>}, {pipeline_mode = #tpu.pipeline_mode<synchronous>, transform_indices = @transform_2, window_bounds = array<i64: 1, 32>}, {transform_indices = @transform_3, window_bounds = array<i64: 1, 16, 2, 16, 32>}]} {
    %cst = arith.constant 0.000000e+00 : f32
    %0 = vector.broadcast %cst : f32 to vector<256x32xf32>
    %c0 = arith.constant 0 : index
    %c0_0 = arith.constant 0 : index
    %c0_1 = arith.constant 0 : index
    %c0_2 = arith.constant 0 : index
    %1 = vector.load %arg1[%c0, %c0_0, %c0_1, %c0_2] : memref<1x18x18x16xf32, #tpu.memory_space<vmem>>, vector<1x16x16x16xf32>
    %2 = vector.shape_cast %1 : vector<1x16x16x16xf32> to vector<16x16x16xf32>
    %3 = vector.shape_cast %2 : vector<16x16x16xf32> to vector<256x16xf32>
    %4 = arith.truncf %3 : vector<256x16xf32> to vector<256x16xbf16>
    %c0_3 = arith.constant 0 : index
    %c0_4 = arith.constant 0 : index
    %c0_5 = arith.constant 0 : index
    %c0_6 = arith.constant 0 : index
    %c0_7 = arith.constant 0 : index
    %5 = vector.load %arg2[%c0_3, %c0_4, %c0_5, %c0_6, %c0_7] : memref<2x2x3x16x32xbf16, #tpu.memory_space<vmem>>, vector<1x1x1x16x32xbf16>
    %6 = vector.shape_cast %5 : vector<1x1x1x16x32xbf16> to vector<16x32xbf16>
    %cst_8 = arith.constant dense<0.000000e+00> : vector<256x32xf32>
    %7 = tpu.matmul %4, %6, %cst_8 {dimension_numbers = #tpu.dot_dimension_numbers<[1], [0], [0], [1], [0, 0, 1, 1], [], []>} : vector<256x16xbf16>, vector<16x32xbf16>, vector<256x32xf32> -> vector<256x32xf32>
    %8 = arith.addf %0, %7 : vector<256x32xf32>
    %c0_9 = arith.constant 0 : index
    %c0_10 = arith.constant 0 : index
    %c1 = arith.constant 1 : index
    %c0_11 = arith.constant 0 : index
    %9 = vector.load %arg1[%c0_9, %c0_10, %c1, %c0_11] : memref<1x18x18x16xf32, #tpu.memory_space<vmem>>, vector<1x16x16x16xf32>
    %10 = vector.shape_cast %9 : vector<1x16x16x16xf32> to vector<16x16x16xf32>
    %11 = vector.shape_cast %10 : vector<16x16x16xf32> to vector<256x16xf32>
    %12 = arith.truncf %11 : vector<256x16xf32> to vector<256x16xbf16>
    %c0_12 = arith.constant 0 : index
    %c0_13 = arith.constant 0 : index
    %c1_14 = arith.constant 1 : index
    %c0_15 = arith.constant 0 : index
    %c0_16 = arith.constant 0 : index
    %13 = vector.load %arg2[%c0_12, %c0_13, %c1_14, %c0_15, %c0_16] : memref<2x2x3x16x32xbf16, #tpu.memory_space<vmem>>, vector<1x1x1x16x32xbf16>
    %14 = vector.shape_cast %13 : vector<1x1x1x16x32xbf16> to vector<16x32xbf16>
    %cst_17 = arith.constant dense<0.000000e+00> : vector<256x32xf32>
    %15 = tpu.matmul %12, %14, %cst_17 {dimension_numbers = #tpu.dot_dimension_numbers<[1], [0], [0], [1], [0, 0, 1, 1], [], []>} : vector<256x16xbf16>, vector<16x32xbf16>, vector<256x32xf32> -> vector<256x32xf32>
    %16 = arith.addf %8, %15 : vector<256x32xf32>
    %c0_18 = arith.constant 0 : index
    %c0_19 = arith.constant 0 : index
    %c2 = arith.constant 2 : index
    %c0_20 = arith.constant 0 : index
    %17 = vector.load %arg1[%c0_18, %c0_19, %c2, %c0_20] : memref<1x18x18x16xf32, #tpu.memory_space<vmem>>, vector<1x16x16x16xf32>
    %18 = vector.shape_cast %17 : vector<1x16x16x16xf32> to vector<16x16x16xf32>
    %19 = vector.shape_cast %18 : vector<16x16x16xf32> to vector<256x16xf32>
    %20 = arith.truncf %19 : vector<256x16xf32> to vector<256x16xbf16>
    %c0_21 = arith.constant 0 : index
    %c0_22 = arith.constant 0 : index
    %c2_23 = arith.constant 2 : index
    %c0_24 = arith.constant 0 : index
    %c0_25 = arith.constant 0 : index
    %21 = vector.load %arg2[%c0_21, %c0_22, %c2_23, %c0_24, %c0_25] : memref<2x2x3x16x32xbf16, #tpu.memory_space<vmem>>, vector<1x1x1x16x32xbf16>
    %22 = vector.shape_cast %21 : vector<1x1x1x16x32xbf16> to vector<16x32xbf16>
    %cst_26 = arith.constant dense<0.000000e+00> : vector<256x32xf32>
    %23 = tpu.matmul %20, %22, %cst_26 {dimension_numbers = #tpu.dot_dimension_numbers<[1], [0], [0], [1], [0, 0, 1, 1], [], []>} : vector<256x16xbf16>, vector<16x32xbf16>, vector<256x32xf32> -> vector<256x32xf32>
    %24 = arith.addf %16, %23 : vector<256x32xf32>
    %c0_27 = arith.constant 0 : index
    %c1_28 = arith.constant 1 : index
    %c0_29 = arith.constant 0 : index
    %c0_30 = arith.constant 0 : index
    %25 = vector.load %arg1[%c0_27, %c1_28, %c0_29, %c0_30] : memref<1x18x18x16xf32, #tpu.memory_space<vmem>>, vector<1x16x16x16xf32>
    %26 = vector.shape_cast %25 : vector<1x16x16x16xf32> to vector<16x16x16xf32>
    %27 = vector.shape_cast %26 : vector<16x16x16xf32> to vector<256x16xf32>
    %28 = arith.truncf %27 : vector<256x16xf32> to vector<256x16xbf16>
    %c0_31 = arith.constant 0 : index
    %c1_32 = arith.constant 1 : index
    %c0_33 = arith.constant 0 : index
    %c0_34 = arith.constant 0 : index
    %c0_35 = arith.constant 0 : index
    %29 = vector.load %arg2[%c0_31, %c1_32, %c0_33, %c0_34, %c0_35] : memref<2x2x3x16x32xbf16, #tpu.memory_space<vmem>>, vector<1x1x1x16x32xbf16>
    %30 = vector.shape_cast %29 : vector<1x1x1x16x32xbf16> to vector<16x32xbf16>
    %cst_36 = arith.constant dense<0.000000e+00> : vector<256x32xf32>
    %31 = tpu.matmul %28, %30, %cst_36 {dimension_numbers = #tpu.dot_dimension_numbers<[1], [0], [0], [1], [0, 0, 1, 1], [], []>} : vector<256x16xbf16>, vector<16x32xbf16>, vector<256x32xf32> -> vector<256x32xf32>
    %32 = arith.addf %24, %31 : vector<256x32xf32>
    %c0_37 = arith.constant 0 : index
    %c1_38 = arith.constant 1 : index
    %c1_39 = arith.constant 1 : index
    %c0_40 = arith.constant 0 : index
    %33 = vector.load %arg1[%c0_37, %c1_38, %c1_39, %c0_40] : memref<1x18x18x16xf32, #tpu.memory_space<vmem>>, vector<1x16x16x16xf32>
    %34 = vector.shape_cast %33 : vector<1x16x16x16xf32> to vector<16x16x16xf32>
    %35 = vector.shape_cast %34 : vector<16x16x16xf32> to vector<256x16xf32>
    %36 = arith.truncf %35 : vector<256x16xf32> to vector<256x16xbf16>
    %c0_41 = arith.constant 0 : index
    %c1_42 = arith.constant 1 : index
    %c1_43 = arith.constant 1 : index
    %c0_44 = arith.constant 0 : index
    %c0_45 = arith.constant 0 : index
    %37 = vector.load %arg2[%c0_41, %c1_42, %c1_43, %c0_44, %c0_45] : memref<2x2x3x16x32xbf16, #tpu.memory_space<vmem>>, vector<1x1x1x16x32xbf16>
    %38 = vector.shape_cast %37 : vector<1x1x1x16x32xbf16> to vector<16x32xbf16>
    %cst_46 = arith.constant dense<0.000000e+00> : vector<256x32xf32>
    %39 = tpu.matmul %36, %38, %cst_46 {dimension_numbers = #tpu.dot_dimension_numbers<[1], [0], [0], [1], [0, 0, 1, 1], [], []>} : vector<256x16xbf16>, vector<16x32xbf16>, vector<256x32xf32> -> vector<256x32xf32>
    %40 = arith.addf %32, %39 : vector<256x32xf32>
    %c0_47 = arith.constant 0 : index
    %c1_48 = arith.constant 1 : index
    %c2_49 = arith.constant 2 : index
    %c0_50 = arith.constant 0 : index
    %41 = vector.load %arg1[%c0_47, %c1_48, %c2_49, %c0_50] : memref<1x18x18x16xf32, #tpu.memory_space<vmem>>, vector<1x16x16x16xf32>
    %42 = vector.shape_cast %41 : vector<1x16x16x16xf32> to vector<16x16x16xf32>
    %43 = vector.shape_cast %42 : vector<16x16x16xf32> to vector<256x16xf32>
    %44 = arith.truncf %43 : vector<256x16xf32> to vector<256x16xbf16>
    %c0_51 = arith.constant 0 : index
    %c1_52 = arith.constant 1 : index
    %c2_53 = arith.constant 2 : index
    %c0_54 = arith.constant 0 : index
    %c0_55 = arith.constant 0 : index
    %45 = vector.load %arg2[%c0_51, %c1_52, %c2_53, %c0_54, %c0_55] : memref<2x2x3x16x32xbf16, #tpu.memory_space<vmem>>, vector<1x1x1x16x32xbf16>
    %46 = vector.shape_cast %45 : vector<1x1x1x16x32xbf16> to vector<16x32xbf16>
    %cst_56 = arith.constant dense<0.000000e+00> : vector<256x32xf32>
    %47 = tpu.matmul %44, %46, %cst_56 {dimension_numbers = #tpu.dot_dimension_numbers<[1], [0], [0], [1], [0, 0, 1, 1], [], []>} : vector<256x16xbf16>, vector<16x32xbf16>, vector<256x32xf32> -> vector<256x32xf32>
    %48 = arith.addf %40, %47 : vector<256x32xf32>
    %c0_57 = arith.constant 0 : index
    %c0_58 = arith.constant 0 : index
    %49 = vector.load %arg3[%c0_57, %c0_58] : memref<1x32xf32, #tpu.memory_space<vmem>>, vector<1x32xf32>
    %50 = vector.broadcast %49 : vector<1x32xf32> to vector<256x32xf32>
    %51 = arith.addf %48, %50 : vector<256x32xf32>
    %cst_59 = arith.constant 0.000000e+00 : f32
    %52 = vector.broadcast %cst_59 : f32 to vector<256x32xf32>
    %53 = arith.maximumf %51, %52 : vector<256x32xf32>
    %54 = vector.shape_cast %53 : vector<256x32xf32> to vector<16x1x16x32xf32>
    %c0_60 = arith.constant 0 : index
    %c0_61 = arith.constant 0 : index
    %c0_62 = arith.constant 0 : index
    %c0_63 = arith.constant 0 : index
    %c0_64 = arith.constant 0 : index
    %55 = vector.load %arg4[%c0_60, %c0_61, %c0_62, %c0_63, %c0_64] : memref<1x16x2x16x32xf32, #tpu.memory_space<vmem>>, vector<1x16x1x16x32xf32>
    %56 = vector.shape_cast %55 : vector<1x16x1x16x32xf32> to vector<16x1x16x32xf32>
    %57 = vector.shape_cast %54 : vector<16x1x16x32xf32> to vector<1x16x1x16x32xf32>
    tpu.vector_store %arg4[%c0_60, %c0_61, %c0_62, %c0_63, %c0_64], %57 {strides = array<i32>} : memref<1x16x2x16x32xf32, #tpu.memory_space<vmem>>, vector<1x16x1x16x32xf32>,
    %cst_65 = arith.constant 0.000000e+00 : f32
    %58 = vector.broadcast %cst_65 : f32 to vector<256x32xf32>
    %c0_66 = arith.constant 0 : index
    %c1_67 = arith.constant 1 : index
    %c0_68 = arith.constant 0 : index
    %c0_69 = arith.constant 0 : index
    %59 = vector.load %arg1[%c0_66, %c1_67, %c0_68, %c0_69] : memref<1x18x18x16xf32, #tpu.memory_space<vmem>>, vector<1x16x16x16xf32>
    %60 = vector.shape_cast %59 : vector<1x16x16x16xf32> to vector<16x16x16xf32>
    %61 = vector.shape_cast %60 : vector<16x16x16xf32> to vector<256x16xf32>
    %62 = arith.truncf %61 : vector<256x16xf32> to vector<256x16xbf16>
    %c1_70 = arith.constant 1 : index
    %c0_71 = arith.constant 0 : index
    %c0_72 = arith.constant 0 : index
    %c0_73 = arith.constant 0 : index
    %c0_74 = arith.constant 0 : index
    %63 = vector.load %arg2[%c1_70, %c0_71, %c0_72, %c0_73, %c0_74] : memref<2x2x3x16x32xbf16, #tpu.memory_space<vmem>>, vector<1x1x1x16x32xbf16>
    %64 = vector.shape_cast %63 : vector<1x1x1x16x32xbf16> to vector<16x32xbf16>
    %cst_75 = arith.constant dense<0.000000e+00> : vector<256x32xf32>
    %65 = tpu.matmul %62, %64, %cst_75 {dimension_numbers = #tpu.dot_dimension_numbers<[1], [0], [0], [1], [0, 0, 1, 1], [], []>} : vector<256x16xbf16>, vector<16x32xbf16>, vector<256x32xf32> -> vector<256x32xf32>
    %66 = arith.addf %58, %65 : vector<256x32xf32>
    %c0_76 = arith.constant 0 : index
    %c1_77 = arith.constant 1 : index
    %c1_78 = arith.constant 1 : index
    %c0_79 = arith.constant 0 : index
    %67 = vector.load %arg1[%c0_76, %c1_77, %c1_78, %c0_79] : memref<1x18x18x16xf32, #tpu.memory_space<vmem>>, vector<1x16x16x16xf32>
    %68 = vector.shape_cast %67 : vector<1x16x16x16xf32> to vector<16x16x16xf32>
    %69 = vector.shape_cast %68 : vector<16x16x16xf32> to vector<256x16xf32>
    %70 = arith.truncf %69 : vector<256x16xf32> to vector<256x16xbf16>
    %c1_80 = arith.constant 1 : index
    %c0_81 = arith.constant 0 : index
    %c1_82 = arith.constant 1 : index
    %c0_83 = arith.constant 0 : index
    %c0_84 = arith.constant 0 : index
    %71 = vector.load %arg2[%c1_80, %c0_81, %c1_82, %c0_83, %c0_84] : memref<2x2x3x16x32xbf16, #tpu.memory_space<vmem>>, vector<1x1x1x16x32xbf16>
    %72 = vector.shape_cast %71 : vector<1x1x1x16x32xbf16> to vector<16x32xbf16>
    %cst_85 = arith.constant dense<0.000000e+00> : vector<256x32xf32>
    %73 = tpu.matmul %70, %72, %cst_85 {dimension_numbers = #tpu.dot_dimension_numbers<[1], [0], [0], [1], [0, 0, 1, 1], [], []>} : vector<256x16xbf16>, vector<16x32xbf16>, vector<256x32xf32> -> vector<256x32xf32>
    %74 = arith.addf %66, %73 : vector<256x32xf32>
    %c0_86 = arith.constant 0 : index
    %c1_87 = arith.constant 1 : index
    %c2_88 = arith.constant 2 : index
    %c0_89 = arith.constant 0 : index
    %75 = vector.load %arg1[%c0_86, %c1_87, %c2_88, %c0_89] : memref<1x18x18x16xf32, #tpu.memory_space<vmem>>, vector<1x16x16x16xf32>
    %76 = vector.shape_cast %75 : vector<1x16x16x16xf32> to vector<16x16x16xf32>
    %77 = vector.shape_cast %76 : vector<16x16x16xf32> to vector<256x16xf32>
    %78 = arith.truncf %77 : vector<256x16xf32> to vector<256x16xbf16>
    %c1_90 = arith.constant 1 : index
    %c0_91 = arith.constant 0 : index
    %c2_92 = arith.constant 2 : index
    %c0_93 = arith.constant 0 : index
    %c0_94 = arith.constant 0 : index
    %79 = vector.load %arg2[%c1_90, %c0_91, %c2_92, %c0_93, %c0_94] : memref<2x2x3x16x32xbf16, #tpu.memory_space<vmem>>, vector<1x1x1x16x32xbf16>
    %80 = vector.shape_cast %79 : vector<1x1x1x16x32xbf16> to vector<16x32xbf16>
    %cst_95 = arith.constant dense<0.000000e+00> : vector<256x32xf32>
    %81 = tpu.matmul %78, %80, %cst_95 {dimension_numbers = #tpu.dot_dimension_numbers<[1], [0], [0], [1], [0, 0, 1, 1], [], []>} : vector<256x16xbf16>, vector<16x32xbf16>, vector<256x32xf32> -> vector<256x32xf32>
    %82 = arith.addf %74, %81 : vector<256x32xf32>
    %c0_96 = arith.constant 0 : index
    %c2_97 = arith.constant 2 : index
    %c0_98 = arith.constant 0 : index
    %c0_99 = arith.constant 0 : index
    %83 = vector.load %arg1[%c0_96, %c2_97, %c0_98, %c0_99] : memref<1x18x18x16xf32, #tpu.memory_space<vmem>>, vector<1x16x16x16xf32>
    %84 = vector.shape_cast %83 : vector<1x16x16x16xf32> to vector<16x16x16xf32>
    %85 = vector.shape_cast %84 : vector<16x16x16xf32> to vector<256x16xf32>
    %86 = arith.truncf %85 : vector<256x16xf32> to vector<256x16xbf16>
    %c1_100 = arith.constant 1 : index
    %c1_101 = arith.constant 1 : index
    %c0_102 = arith.constant 0 : index
    %c0_103 = arith.constant 0 : index
    %c0_104 = arith.constant 0 : index
    %87 = vector.load %arg2[%c1_100, %c1_101, %c0_102, %c0_103, %c0_104] : memref<2x2x3x16x32xbf16, #tpu.memory_space<vmem>>, vector<1x1x1x16x32xbf16>
    %88 = vector.shape_cast %87 : vector<1x1x1x16x32xbf16> to vector<16x32xbf16>
    %cst_105 = arith.constant dense<0.000000e+00> : vector<256x32xf32>
    %89 = tpu.matmul %86, %88, %cst_105 {dimension_numbers = #tpu.dot_dimension_numbers<[1], [0], [0], [1], [0, 0, 1, 1], [], []>} : vector<256x16xbf16>, vector<16x32xbf16>, vector<256x32xf32> -> vector<256x32xf32>
    %90 = arith.addf %82, %89 : vector<256x32xf32>
    %c0_106 = arith.constant 0 : index
    %c2_107 = arith.constant 2 : index
    %c1_108 = arith.constant 1 : index
    %c0_109 = arith.constant 0 : index
    %91 = vector.load %arg1[%c0_106, %c2_107, %c1_108, %c0_109] : memref<1x18x18x16xf32, #tpu.memory_space<vmem>>, vector<1x16x16x16xf32>
    %92 = vector.shape_cast %91 : vector<1x16x16x16xf32> to vector<16x16x16xf32>
    %93 = vector.shape_cast %92 : vector<16x16x16xf32> to vector<256x16xf32>
    %94 = arith.truncf %93 : vector<256x16xf32> to vector<256x16xbf16>
    %c1_110 = arith.constant 1 : index
    %c1_111 = arith.constant 1 : index
    %c1_112 = arith.constant 1 : index
    %c0_113 = arith.constant 0 : index
    %c0_114 = arith.constant 0 : index
    %95 = vector.load %arg2[%c1_110, %c1_111, %c1_112, %c0_113, %c0_114] : memref<2x2x3x16x32xbf16, #tpu.memory_space<vmem>>, vector<1x1x1x16x32xbf16>
    %96 = vector.shape_cast %95 : vector<1x1x1x16x32xbf16> to vector<16x32xbf16>
    %cst_115 = arith.constant dense<0.000000e+00> : vector<256x32xf32>
    %97 = tpu.matmul %94, %96, %cst_115 {dimension_numbers = #tpu.dot_dimension_numbers<[1], [0], [0], [1], [0, 0, 1, 1], [], []>} : vector<256x16xbf16>, vector<16x32xbf16>, vector<256x32xf32> -> vector<256x32xf32>
    %98 = arith.addf %90, %97 : vector<256x32xf32>
    %c0_116 = arith.constant 0 : index
    %c2_117 = arith.constant 2 : index
    %c2_118 = arith.constant 2 : index
    %c0_119 = arith.constant 0 : index
    %99 = vector.load %arg1[%c0_116, %c2_117, %c2_118, %c0_119] : memref<1x18x18x16xf32, #tpu.memory_space<vmem>>, vector<1x16x16x16xf32>
    %100 = vector.shape_cast %99 : vector<1x16x16x16xf32> to vector<16x16x16xf32>
    %101 = vector.shape_cast %100 : vector<16x16x16xf32> to vector<256x16xf32>
    %102 = arith.truncf %101 : vector<256x16xf32> to vector<256x16xbf16>
    %c1_120 = arith.constant 1 : index
    %c1_121 = arith.constant 1 : index
    %c2_122 = arith.constant 2 : index
    %c0_123 = arith.constant 0 : index
    %c0_124 = arith.constant 0 : index
    %103 = vector.load %arg2[%c1_120, %c1_121, %c2_122, %c0_123, %c0_124] : memref<2x2x3x16x32xbf16, #tpu.memory_space<vmem>>, vector<1x1x1x16x32xbf16>
    %104 = vector.shape_cast %103 : vector<1x1x1x16x32xbf16> to vector<16x32xbf16>
    %cst_125 = arith.constant dense<0.000000e+00> : vector<256x32xf32>
    %105 = tpu.matmul %102, %104, %cst_125 {dimension_numbers = #tpu.dot_dimension_numbers<[1], [0], [0], [1], [0, 0, 1, 1], [], []>} : vector<256x16xbf16>, vector<16x32xbf16>, vector<256x32xf32> -> vector<256x32xf32>
    %106 = arith.addf %98, %105 : vector<256x32xf32>
    %c0_126 = arith.constant 0 : index
    %c0_127 = arith.constant 0 : index
    %107 = vector.load %arg3[%c0_126, %c0_127] : memref<1x32xf32, #tpu.memory_space<vmem>>, vector<1x32xf32>
    %108 = vector.broadcast %107 : vector<1x32xf32> to vector<256x32xf32>
    %109 = arith.addf %106, %108 : vector<256x32xf32>
    %cst_128 = arith.constant 0.000000e+00 : f32
    %110 = vector.broadcast %cst_128 : f32 to vector<256x32xf32>
    %111 = arith.maximumf %109, %110 : vector<256x32xf32>
    %112 = vector.shape_cast %111 : vector<256x32xf32> to vector<16x1x16x32xf32>
    %c0_129 = arith.constant 0 : index
    %c0_130 = arith.constant 0 : index
    %c1_131 = arith.constant 1 : index
    %c0_132 = arith.constant 0 : index
    %c0_133 = arith.constant 0 : index
    %113 = vector.load %arg4[%c0_129, %c0_130, %c1_131, %c0_132, %c0_133] : memref<1x16x2x16x32xf32, #tpu.memory_space<vmem>>, vector<1x16x1x16x32xf32>
    %114 = vector.shape_cast %113 : vector<1x16x1x16x32xf32> to vector<16x1x16x32xf32>
    %115 = vector.shape_cast %112 : vector<16x1x16x32xf32> to vector<1x16x1x16x32xf32>
    tpu.vector_store %arg4[%c0_129, %c0_130, %c1_131, %c0_132, %c0_133], %115 {strides = array<i32>} : memref<1x16x2x16x32xf32, #tpu.memory_space<vmem>>, vector<1x16x1x16x32xf32>,
    return
  }
  func.func @transform_0(%arg0: i32) -> (i32, i32, i32, i32) {
    %c0_i32 = arith.constant 0 : i32
    %c0_i32_0 = arith.constant 0 : i32
    %c0_i32_1 = arith.constant 0 : i32
    %c0_i32_2 = arith.constant 0 : i32
    return %arg0, %c0_i32, %c0_i32_0, %c0_i32_1 : i32, i32, i32, i32
  }
  func.func @transform_1(%arg0: i32) -> (i32, i32, i32, i32, i32) {
    %c0_i32 = arith.constant 0 : i32
    %c0_i32_0 = arith.constant 0 : i32
    %c0_i32_1 = arith.constant 0 : i32
    %c0_i32_2 = arith.constant 0 : i32
    %c0_i32_3 = arith.constant 0 : i32
    %c0_i32_4 = arith.constant 0 : i32
    return %c0_i32, %c0_i32_0, %c0_i32_1, %c0_i32_2, %c0_i32_3 : i32, i32, i32, i32, i32
  }
  func.func @transform_2(%arg0: i32) -> (i32, i32) {
    %c0_i32 = arith.constant 0 : i32
    %c0_i32_0 = arith.constant 0 : i32
    %c0_i32_1 = arith.constant 0 : i32
    return %c0_i32, %c0_i32_0 : i32, i32
  }
  func.func @transform_3(%arg0: i32) -> (i32, i32, i32, i32, i32) {
    %c0_i32 = arith.constant 0 : i32
    %c0_i32_0 = arith.constant 0 : i32
    %c0_i32_1 = arith.constant 0 : i32
    %c0_i32_2 = arith.constant 0 : i32
    %c0_i32_3 = arith.constant 0 : i32
    return %arg0, %c0_i32, %c0_i32_0, %c0_i32_1, %c0_i32_2 : i32, i32, i32, i32, i32
  }
}

module attributes {stable_mosaic.version = 11 : i64} {
  func.func @_matmul_bias_act_kernel(%arg0: i32, %arg1: memref<256x128xf32, #tpu.memory_space<vmem>>, %arg2: memref<128x24xbf16, #tpu.memory_space<vmem>>, %arg3: memref<1x24xf32, #tpu.memory_space<vmem>>, %arg4: memref<256x24xf32, #tpu.memory_space<vmem>>) attributes {dimension_semantics = [#tpu.dimension_semantics<parallel>], iteration_bounds = array<i64: 1>, scalar_prefetch = 0 : i64, scratch_operands = 0 : i64, tpu.core_type = #tpu.core_type<tc>, window_params = [{transform_indices = @transform_0, window_bounds = array<i64: 256, 128>}, {pipeline_mode = #tpu.pipeline_mode<synchronous>, transform_indices = @transform_1, window_bounds = array<i64: 128, 24>}, {pipeline_mode = #tpu.pipeline_mode<synchronous>, transform_indices = @transform_2, window_bounds = array<i64: 1, 24>}, {transform_indices = @transform_3, window_bounds = array<i64: 256, 24>}]} {
    %c0 = arith.constant 0 : index
    %c0_0 = arith.constant 0 : index
    %0 = vector.load %arg1[%c0, %c0_0] : memref<256x128xf32, #tpu.memory_space<vmem>>, vector<256x128xf32>
    %1 = arith.truncf %0 : vector<256x128xf32> to vector<256x128xbf16>
    %c0_1 = arith.constant 0 : index
    %c0_2 = arith.constant 0 : index
    %2 = vector.load %arg2[%c0_1, %c0_2] : memref<128x24xbf16, #tpu.memory_space<vmem>>, vector<128x24xbf16>
    %cst = arith.constant dense<0.000000e+00> : vector<256x24xf32>
    %3 = tpu.matmul %1, %2, %cst {dimension_numbers = #tpu.dot_dimension_numbers<[1], [0], [0], [1], [0, 0, 1, 1], [], []>} : vector<256x128xbf16>, vector<128x24xbf16>, vector<256x24xf32> -> vector<256x24xf32>
    %c0_3 = arith.constant 0 : index
    %c0_4 = arith.constant 0 : index
    %4 = vector.load %arg3[%c0_3, %c0_4] : memref<1x24xf32, #tpu.memory_space<vmem>>, vector<1x24xf32>
    %5 = vector.broadcast %4 : vector<1x24xf32> to vector<256x24xf32>
    %6 = arith.addf %3, %5 : vector<256x24xf32>
    %cst_5 = arith.constant 0.000000e+00 : f32
    %7 = vector.broadcast %cst_5 : f32 to vector<256x24xf32>
    %8 = arith.subf %7, %6 : vector<256x24xf32>
    %9 = math.exp %8 : vector<256x24xf32>
    %cst_6 = arith.constant 1.000000e+00 : f32
    %10 = vector.broadcast %cst_6 : f32 to vector<256x24xf32>
    %11 = arith.addf %10, %9 : vector<256x24xf32>
    %cst_7 = arith.constant 1.000000e+00 : f32
    %12 = vector.broadcast %cst_7 : f32 to vector<256x24xf32>
    %13 = arith.divf %12, %11 : vector<256x24xf32>
    %c0_8 = arith.constant 0 : index
    %c0_9 = arith.constant 0 : index
    %14 = vector.load %arg4[%c0_8, %c0_9] : memref<256x24xf32, #tpu.memory_space<vmem>>, vector<256x24xf32>
    tpu.vector_store %arg4[%c0_8, %c0_9], %13 {strides = array<i32>} : memref<256x24xf32, #tpu.memory_space<vmem>>, vector<256x24xf32>,
    return
  }
  func.func @transform_0(%arg0: i32) -> (i32, i32) {
    %c0_i32 = arith.constant 0 : i32
    %c0_i32_0 = arith.constant 0 : i32
    return %arg0, %c0_i32 : i32, i32
  }
  func.func @transform_1(%arg0: i32) -> (i32, i32) {
    %c0_i32 = arith.constant 0 : i32
    %c0_i32_0 = arith.constant 0 : i32
    %c0_i32_1 = arith.constant 0 : i32
    return %c0_i32, %c0_i32_0 : i32, i32
  }
  func.func @transform_2(%arg0: i32) -> (i32, i32) {
    %c0_i32 = arith.constant 0 : i32
    %c0_i32_0 = arith.constant 0 : i32
    %c0_i32_1 = arith.constant 0 : i32
    return %c0_i32, %c0_i32_0 : i32, i32
  }
  func.func @transform_3(%arg0: i32) -> (i32, i32) {
    %c0_i32 = arith.constant 0 : i32
    %c0_i32_0 = arith.constant 0 : i32
    return %arg0, %c0_i32 : i32, i32
  }
}

</mosaic_0001>

<bundles_post_ra>
// kernel: tile.89
= control target key start
LH: loop header
LB: loop body
LE: loop exit
PB: predicated region body
PF: predicated region fallthrough
CT: control target
= control target key end

     0   :  { %vm7_vm0 = vcmask 130048   ;;  %vm13_vm1 = vcmask 261248   ;;  %s39_s0 = inlined_call_operand.vmem [shape: f32[2,16], index: 0, kind: input, shape index: {}]   ;;  %s40_s1 = inlined_call_operand.vmem [shape: f32[1,32], index: 1, kind: output, shape index: {}]  }
   0x1   :  { %v4_v0 = vld [vmem:[%s39_s0] sm:$0x3]  ;;  %s22_s0 = smov 16  }
   0x2   :  { %5 = vst [vmem:[#allocation1] sm:$0x3] %v4_v0 }
   0x9   :  { %v10_v1 = vld [vmem:[#allocation1 + $0x1] sm:$0x1]   ;;  %v6_v2 = vld [vmem:[#allocation1] sm:$0x1]  }
   0xa   :  { %11 = vrot.lane.b32.xlu0 %v10_v1, %s22_s0  ;;  %8 = vst.msk [vmem:[#allocation0] sm:$0x1] %vm7_vm0, %v6_v2  }
  0x7c   :  { %v12_v3 = vpop.permute.xlu0 %11  }
  0x7d   :  { %14 = vst.msk [vmem:[#allocation0] sm:$0x1] %vm13_vm1, %v12_v3  }
  0x84   :  { %v17_v4 = vld [vmem:[#allocation0] sm:$0x1] }
  0x85   :  { %20 = vst [vmem:[%s40_s1] sm:$0x1] %v17_v4 }

// kernel: tile.118
= control target key start
LH: loop header
LB: loop body
LE: loop exit
PB: predicated region body
PF: predicated region fallthrough
CT: control target
= control target key end

     0   :  { %s22_s0 = inlined_call_operand.vmem [shape: f32[3], index: 0, kind: input, shape index: {}]   ;;  %s23_s1 = inlined_call_operand.vmem [shape: f32[8,3], index: 1, kind: output, shape index: {}]  }
   0x1   :  { %v4_v0 = vld [vmem:[%s22_s0] ss:$0 sm:$0xff] }
   0x2   :  { %5 = vst [vmem:[%s23_s1] sm:$0xff] %v4_v0 }

// kernel: tile.88
= control target key start
LH: loop header
LB: loop body
LE: loop exit
PB: predicated region body
PF: predicated region fallthrough
CT: control target
= control target key end

     0   :  { %s22_s0 = inlined_call_operand.vmem [shape: f32[16], index: 0, kind: input, shape index: {}]   ;;  %s23_s1 = inlined_call_operand.vmem [shape: f32[2,16], index: 1, kind: output, shape index: {}]  }
   0x1   :  { %v4_v0 = vld [vmem:[%s22_s0] ss:$0 sm:$0xff] }
   0x2   :  { %5 = vst [vmem:[%s23_s1] sm:$0x3] %v4_v0 }

// kernel: tile.119
= control target key start
LH: loop header
LB: loop body
LE: loop exit
PB: predicated region body
PF: predicated region fallthrough
CT: control target
= control target key end

     0   :  { %s67_s10 = smov 21   ;;  %s68_s11 = smov 15   ;;  %vm3_vm0 = vcmask 23552   ;;  %vm9_vm1 = vcmask 195752   ;;  %vm15_vm2 = vcmask 171152   ;;  %vm21_vm3 = vcmask 146552   ;;  %s111_s0 = inlined_call_operand.vmem [shape: f32[8,3], index: 0, kind: input, shape index: {}]   ;;  %s112_s1 = inlined_call_operand.vmem [shape: f32[1,24], index: 1, kind: output, shape index: {}]  }
   0x1   :  { %v53_v0 = vld [vmem:[%s111_s0 + $0x7] sm:$0x1]   ;;  %v55_v1 = vld [vmem:[%s111_s0 + $0x5] sm:$0x1]   ;;  %v57_v2 = vld [vmem:[%s111_s0 + $0x3] sm:$0x1]  }
   0x2   :  { %7 = vrot.lane.b32.xlu0 %v53_v0, %s67_s10  ;;  %19 = vrot.lane.b32.xlu1 %v55_v1, %s68_s11  ;;  %s69_s14 = smov 9   ;;  %v54_v3 = vld [vmem:[%s111_s0 + $0x6] sm:$0x1]   ;;  %v56_v4 = vld [vmem:[%s111_s0 + $0x4] sm:$0x1]   ;;  %s70_s21 = smov 18  }
   0x3   :  { %31 = vrot.lane.b32.xlu2 %v57_v2, %s69_s14  ;;  %v58_v5 = vld [vmem:[%s111_s0 + $0x2] sm:$0x1]   ;;  %s71_s22 = smov 12   ;;  %s72_s23 = smov 6   ;;  %v59_v6 = vld [vmem:[%s111_s0 + $0x1] sm:$0x1]  }
   0x4   :  { %s73_s26 = smov 3   ;;  %v2_v7 = vld [vmem:[%s111_s0] sm:$0x1]   ;;  %vm27_vm4 = vcmask 121952   ;;  %vm33_vm5 = vcmask 97352   ;;  %vm39_vm6 = vcmask 72752  }
   0x5   :  { %4 = vst.msk [vmem:[#allocation0] sm:$0x1] %vm3_vm0, %v2_v7   ;;  %vm45_vm7 = vcmask 48152  }
   0xa   :  { %13 = vrot.lane.b32.xlu0 %v54_v3, %s70_s21  ;;  %25 = vrot.lane.b32.xlu1 %v56_v4, %s71_s22 }
   0xb   :  { %37 = vrot.lane.b32.xlu2 %v58_v5, %s72_s23 }
  0x12   :  { %43 = vrot.lane.b32.xlu0 %v59_v6, %s73_s26 }
  0x5d   :  { %v32_v8 = vpop.permute.xlu2 %31  }
  0x65   :  { %v38_v9 = vpop.permute.xlu2 %37  }
  0x74   :  { %v8_v10 = vpop.permute.xlu0 %7   ;;  %v20_v11 = vpop.permute.xlu1 %19  }
  0x75   :  { %10 = vst.msk [vmem:[#allocation0] sm:$0x1] %vm9_vm1, %v8_v10  }
  0x7c   :  { %v14_v12 = vpop.permute.xlu0 %13   ;;  %v26_v13 = vpop.permute.xlu1 %25  }
  0x7d   :  { %16 = vst.msk [vmem:[#allocation0] sm:$0x1] %vm15_vm2, %v14_v12  }
  0x7e   :  { %22 = vst.msk [vmem:[#allocation0] sm:$0x1] %vm21_vm3, %v20_v11  }
  0x7f   :  { %28 = vst.msk [vmem:[#allocation0] sm:$0x1] %vm27_vm4, %v26_v13  }
  0x80   :  { %34 = vst.msk [vmem:[#allocation0] sm:$0x1] %vm33_vm5, %v32_v8  }
  0x81   :  { %40 = vst.msk [vmem:[#allocation0] sm:$0x1] %vm39_vm6, %v38_v9  }
  0x84   :  { %v44_v14 = vpop.permute.xlu0 %43  }
  0x85   :  { %46 = vst.msk [vmem:[#allocation0] sm:$0x1] %vm45_vm7, %v44_v14  }
  0x8c   :  { %v49_v15 = vld [vmem:[#allocation0] sm:$0x1] }
  0x8d   :  { %52 = vst [vmem:[%s112_s1] sm:$0x1] %v49_v15 }

// kernel: tile.63
= control target key start
LH: loop header
LB: loop body
LE: loop exit
PB: predicated region body
PF: predicated region fallthrough
CT: control target
= control target key end

     0   :  { %s28_s0 = inlined_call_operand.vmem [shape: f32[16], index: 0, kind: input, shape index: {}]   ;;  %s29_s1 = inlined_call_operand.vmem [shape: f32[16,16], index: 1, kind: output, shape index: {}]  }
   0x1   :  { %v4_v0 = vld [vmem:[%s28_s0] ss:$0 sm:$0xff] }
   0x2   :  { %5 = vst [vmem:[%s29_s1] sm:$0xff] %v4_v0 }
   0x3   :  { %8 = vst [vmem:[%s29_s1 + $0x8] sm:$0xff] %v4_v0 }

// kernel: tile.64
= control target key start
LH: loop header
LB: loop body
LE: loop exit
PB: predicated region body
PF: predicated region fallthrough
CT: control target
= control target key end

     0   :  { %s7_s6 = smov 3  ;;  %s21_s9 = smov 3  ;;  %vm4_vm0 = vcmask 130048   ;;  %vm11_vm1 = vcmask 1048448   ;;  %vm18_vm2 = vcmask 917248   ;;  %vm25_vm3 = vcmask 786048   ;;  %s129_s0 = inlined_call_operand.vmem [shape: f32[16,16], index: 0, kind: input, shape index: {}]   ;;  %s130_s1 = inlined_call_operand.vmem [shape: f32[1,256], index: 1, kind: output, shape index: {}]  }
   0x1   :  { %v67_v0 = vld [vmem:[%s129_s0 + $0x7] ss:$8 sm:%s7_s6]   ;;  %s82_s10 = smov 112   ;;  %v69_v1 = vld [vmem:[%s129_s0 + $0x5] ss:$8 sm:%s21_s9]   ;;  %s83_s13 = smov 80  }
   0x2   :  { %9 = vrot.lane.b32.xlu0 %v67_v0, %s82_s10  ;;  %23 = vrot.lane.b32.xlu1 %v69_v1, %s83_s13  ;;  %s14_s14 = smov 3  ;;  %s28_s15 = smov 3  ;;  %vm32_vm4 = vcmask 654848   ;;  %vm39_vm5 = vcmask 523648   ;;  %vm46_vm6 = vcmask 392448   ;;  %vm53_vm7 = vcmask 261248  }
   0x3   :  { %s35_s16 = smov 3  ;;  %v68_v3 = vld [vmem:[%s129_s0 + $0x6] ss:$8 sm:%s14_s14]   ;;  %s84_s21 = smov 48   ;;  %v70_v4 = vld [vmem:[%s129_s0 + $0x4] ss:$8 sm:%s28_s15]  }
   0x4   :  { %v71_v2 = vld [vmem:[%s129_s0 + $0x3] ss:$8 sm:%s35_s16]   ;;  %s42_s24 = smov 3  ;;  %s85_s25 = smov 96  }
   0x5   :  { %37 = vrot.lane.b32.xlu2 %v71_v2, %s84_s21  ;;  %s86_s26 = smov 64   ;;  %s49_s27 = smov 3  ;;  %v72_v5 = vld [vmem:[%s129_s0 + $0x2] ss:$8 sm:%s42_s24]  }
   0x6   :  { %v73_v6 = vld [vmem:[%s129_s0 + $0x1] ss:$8 sm:%s49_s27]   ;;  %s87_s3 = smov 32   ;;  %s88_s4 = smov 16  }
   0x7   :  { %s2_s5 = smov 3 }
   0x8   :  { %v3_v7 = vld [vmem:[%s129_s0] ss:$8 sm:%s2_s5]  }
   0x9   :  { %5 = vst.msk [vmem:[#allocation0] ss:$8 sm:$0x3] %vm4_vm0, %v3_v7  }
   0xa   :  { %16 = vrot.lane.b32.xlu0 %v68_v3, %s85_s25  ;;  %30 = vrot.lane.b32.xlu1 %v70_v4, %s86_s26 }
   0xd   :  { %44 = vrot.lane.b32.xlu2 %v72_v5, %s87_s3 }
  0x12   :  { %51 = vrot.lane.b32.xlu0 %v73_v6, %s88_s4 }
  0x5f   :  { %v38_v8 = vpop.permute.xlu2 %37  }
  0x67   :  { %v45_v9 = vpop.permute.xlu2 %44  }
  0x74   :  { %v10_v10 = vpop.permute.xlu0 %9   ;;  %v24_v11 = vpop.permute.xlu1 %23  }
  0x75   :  { %12 = vst.msk [vmem:[#allocation0] ss:$8 sm:$0x3] %vm11_vm1, %v10_v10  }
  0x7c   :  { %v17_v12 = vpop.permute.xlu0 %16   ;;  %v31_v13 = vpop.permute.xlu1 %30  }
  0x7d   :  { %19 = vst.msk [vmem:[#allocation0] ss:$8 sm:$0x3] %vm18_vm2, %v17_v12  }
  0x7e   :  { %26 = vst.msk [vmem:[#allocation0] ss:$8 sm:$0x3] %vm25_vm3, %v24_v11  }
  0x7f   :  { %33 = vst.msk [vmem:[#allocation0] ss:$8 sm:$0x3] %vm32_vm4, %v31_v13  }
  0x80   :  { %40 = vst.msk [vmem:[#allocation0] ss:$8 sm:$0x3] %vm39_vm5, %v38_v8  }
  0x81   :  { %47 = vst.msk [vmem:[#allocation0] ss:$8 sm:$0x3] %vm46_vm6, %v45_v9  }
  0x84   :  { %v52_v14 = vpop.permute.xlu0 %51  }
  0x85   :  { %54 = vst.msk [vmem:[#allocation0] ss:$8 sm:$0x3] %vm53_vm7, %v52_v14  }
  0x8c   :  { %v57_v15 = vld [vmem:[#allocation0] sm:$0x1]  ;;  %v62_v16 = vld [vmem:[#allocation0 + $0x8] sm:$0x1] }
  0x8d   :  { %60 = vst [vmem:[%s130_s1] sm:$0x1] %v57_v15 }
  0x8e   :  { %74 = vst [vmem:[%s130_s1 + $0x1] sm:$0x1] %v62_v16 }

// kernel: tile.73
= control target key start
LH: loop header
LB: loop body
LE: loop exit
PB: predicated region body
PF: predicated region fallthrough
CT: control target
= control target key end

     0   :  { %s22_s0 = inlined_call_operand.vmem [shape: f32[16], index: 0, kind: input, shape index: {}]   ;;  %s23_s1 = inlined_call_operand.vmem [shape: f32[8,16], index: 1, kind: output, shape index: {}]  }
   0x1   :  { %v4_v0 = vld [vmem:[%s22_s0] ss:$0 sm:$0xff] }
   0x2   :  { %5 = vst [vmem:[%s23_s1] sm:$0xff] %v4_v0 }

// kernel: tile.74
= control target key start
LH: loop header
LB: loop body
LE: loop exit
PB: predicated region body
PF: predicated region fallthrough
CT: control target
= control target key end

     0   :  { %s67_s10 = smov 112   ;;  %s68_s11 = smov 80   ;;  %vm3_vm0 = vcmask 130048   ;;  %vm9_vm1 = vcmask 1048448   ;;  %vm15_vm2 = vcmask 917248   ;;  %vm21_vm3 = vcmask 786048   ;;  %s111_s0 = inlined_call_operand.vmem [shape: f32[8,16], index: 0, kind: input, shape index: {}]   ;;  %s112_s1 = inlined_call_operand.vmem [shape: f32[1,128], index: 1, kind: output, shape index: {}]  }
   0x1   :  { %v53_v0 = vld [vmem:[%s111_s0 + $0x7] sm:$0x1]   ;;  %v55_v1 = vld [vmem:[%s111_s0 + $0x5] sm:$0x1]   ;;  %v57_v2 = vld [vmem:[%s111_s0 + $0x3] sm:$0x1]  }
   0x2   :  { %7 = vrot.lane.b32.xlu0 %v53_v0, %s67_s10  ;;  %19 = vrot.lane.b32.xlu1 %v55_v1, %s68_s11  ;;  %s69_s14 = smov 48   ;;  %v54_v3 = vld [vmem:[%s111_s0 + $0x6] sm:$0x1]   ;;  %v56_v4 = vld [vmem:[%s111_s0 + $0x4] sm:$0x1]   ;;  %s70_s21 = smov 96  }
   0x3   :  { %31 = vrot.lane.b32.xlu2 %v57_v2, %s69_s14  ;;  %v58_v5 = vld [vmem:[%s111_s0 + $0x2] sm:$0x1]   ;;  %s71_s22 = smov 64   ;;  %s72_s23 = smov 32   ;;  %v59_v6 = vld [vmem:[%s111_s0 + $0x1] sm:$0x1]  }
   0x4   :  { %s73_s26 = smov 16   ;;  %v2_v7 = vld [vmem:[%s111_s0] sm:$0x1]   ;;  %vm27_vm4 = vcmask 654848   ;;  %vm33_vm5 = vcmask 523648   ;;  %vm39_vm6 = vcmask 392448  }
   0x5   :  { %4 = vst.msk [vmem:[#allocation0] sm:$0x1] %vm3_vm0, %v2_v7   ;;  %vm45_vm7 = vcmask 261248  }
   0xa   :  { %13 = vrot.lane.b32.xlu0 %v54_v3, %s70_s21  ;;  %25 = vrot.lane.b32.xlu1 %v56_v4, %s71_s22 }
   0xb   :  { %37 = vrot.lane.b32.xlu2 %v58_v5, %s72_s23 }
  0x12   :  { %43 = vrot.lane.b32.xlu0 %v59_v6, %s73_s26 }
  0x5d   :  { %v32_v8 = vpop.permute.xlu2 %31  }
  0x65   :  { %v38_v9 = vpop.permute.xlu2 %37  }
  0x74   :  { %v8_v10 = vpop.permute.xlu0 %7   ;;  %v20_v11 = vpop.permute.xlu1 %19  }
  0x75   :  { %10 = vst.msk [vmem:[#allocation0] sm:$0x1] %vm9_vm1, %v8_v10  }
  0x7c   :  { %v14_v12 = vpop.permute.xlu0 %13   ;;  %v26_v13 = vpop.permute.xlu1 %25  }
  0x7d   :  { %16 = vst.msk [vmem:[#allocation0] sm:$0x1] %vm15_vm2, %v14_v12  }
  0x7e   :  { %22 = vst.msk [vmem:[#allocation0] sm:$0x1] %vm21_vm3, %v20_v11  }
  0x7f   :  { %28 = vst.msk [vmem:[#allocation0] sm:$0x1] %vm27_vm4, %v26_v13  }
  0x80   :  { %34 = vst.msk [vmem:[#allocation0] sm:$0x1] %vm33_vm5, %v32_v8  }
  0x81   :  { %40 = vst.msk [vmem:[#allocation0] sm:$0x1] %vm39_vm6, %v38_v9  }
  0x84   :  { %v44_v14 = vpop.permute.xlu0 %43  }
  0x85   :  { %46 = vst.msk [vmem:[#allocation0] sm:$0x1] %vm45_vm7, %v44_v14  }
  0x8c   :  { %v49_v15 = vld [vmem:[#allocation0] sm:$0x1] }
  0x8d   :  { %52 = vst [vmem:[%s112_s1] sm:$0x1] %v49_v15 }

// kernel: conv2d_decoder_forward.12
= control target key start
LH: loop header
LB: loop body
LE: loop exit
PB: predicated region body
PF: predicated region fallthrough
CT: control target
= control target key end

     0   :  { %s358_s1 = inlined_call_operand.vmem [shape: bf16[128,256], index: 1, kind: input, shape index: {}]   ;;  %s359_s0 = inlined_call_operand.vmem [shape: f32[8,128], index: 0, kind: input, shape index: {}]   ;;  %s360_s2 = inlined_call_operand.vmem [shape: f32[1,256], index: 2, kind: input, shape index: {}]   ;;  %s361_s3 = inlined_call_operand.vmem [shape: f32[8,256], index: 3, kind: output, shape index: {}]  }
   0x1   :  { %v208_v0 = vld [vmem:[%s358_s1 + $0x70] sm:$0xf]  ;;  %v229_v1 = vld [vmem:[%s358_s1 + $0x74] sm:$0xf0]  ;;  %v228_v2 = vld [vmem:[%s358_s1 + $0x74] sm:$0xf] }
   0x2   :  { %v209_v3 = vor.u32 %v229_v1, %v208_v0  ;;  %v210_v4 = vld [vmem:[%s358_s1 + $0x78] sm:$0xf0]  ;;  %v200_v5 = vld [vmem:[%s358_s1 + $0x60] sm:$0xf]  ;;  %v227_v6 = vld [vmem:[%s358_s1 + $0x64] sm:$0xf0] }
   0x3   :  { %v213_v7 = vor.u32 %v228_v2, %v210_v4  ;;  %v226_v8 = vld [vmem:[%s358_s1 + $0x64] sm:$0xf]  ;;  %v202_v9 = vld [vmem:[%s358_s1 + $0x68] sm:$0xf0]  ;;  %v201_v10 = vor.u32 %v227_v6, %v200_v5  ;;  %v192_v12 = vld [vmem:[%s358_s1 + $0x50] sm:$0xf] }
   0x4   :  { %118 = vmatpush.bf16.msra.mxu0 %v209_v3  ;;  %v205_v11 = vor.u32 %v226_v8, %v202_v9  ;;  %v225_v13 = vld [vmem:[%s358_s1 + $0x54] sm:$0xf0]  ;;  %v224_v14 = vld [vmem:[%s358_s1 + $0x54] sm:$0xf]  ;;  %v194_v15 = vld [vmem:[%s358_s1 + $0x58] sm:$0xf0] }
   0x5   :  { %131 = vmatpush.bf16.msra.mxu1 %v213_v7  ;;  %v193_v16 = vor.u32 %v225_v13, %v192_v12  ;;  %v197_v17 = vor.u32 %v224_v14, %v194_v15  ;;  %v184_v18 = vld [vmem:[%s358_s1 + $0x40] sm:$0xf]  ;;  %v223_v19 = vld [vmem:[%s358_s1 + $0x44] sm:$0xf0]  ;;  %v222_v20 = vld [vmem:[%s358_s1 + $0x44] sm:$0xf] }
   0x6   :  { %v186_v21 = vld [vmem:[%s358_s1 + $0x48] sm:$0xf0]  ;;  %v185_v22 = vor.u32 %v223_v19, %v184_v18  ;;  %v176_v24 = vld [vmem:[%s358_s1 + $0x30] sm:$0xf]  ;;  %v221_v25 = vld [vmem:[%s358_s1 + $0x34] sm:$0xf0] }
   0x7   :  { %v189_v23 = vor.u32 %v222_v20, %v186_v21  ;;  %v220_v26 = vld [vmem:[%s358_s1 + $0x34] sm:$0xf]  ;;  %v178_v27 = vld [vmem:[%s358_s1 + $0x38] sm:$0xf0]  ;;  %v177_v28 = vor.u32 %v221_v25, %v176_v24  ;;  %v168_v30 = vld [vmem:[%s358_s1 + $0x20] sm:$0xf] }
   0x8   :  { %119 = vmatpush.bf16.msra.mxu0 %v201_v10  ;;  %v181_v29 = vor.u32 %v220_v26, %v178_v27  ;;  %v219_v31 = vld [vmem:[%s358_s1 + $0x24] sm:$0xf0]  ;;  %v218_v32 = vld [vmem:[%s358_s1 + $0x24] sm:$0xf]  ;;  %v170_v33 = vld [vmem:[%s358_s1 + $0x28] sm:$0xf0] }
   0x9   :  { %132 = vmatpush.bf16.msra.mxu1 %v205_v11  ;;  %v169_v34 = vor.u32 %v219_v31, %v168_v30  ;;  %v173_v35 = vor.u32 %v218_v32, %v170_v33  ;;  %v160_v36 = vld [vmem:[%s358_s1 + $0x10] sm:$0xf]  ;;  %v217_v37 = vld [vmem:[%s358_s1 + $0x14] sm:$0xf0]  ;;  %v216_v38 = vld [vmem:[%s358_s1 + $0x14] sm:$0xf] }
   0xa   :  { %v162_v39 = vld [vmem:[%s358_s1 + $0x18] sm:$0xf0]  ;;  %v161_v40 = vor.u32 %v217_v37, %v160_v36  ;;  %v152_v42 = vld [vmem:[%s358_s1] sm:$0xf]  ;;  %v215_v43 = vld [vmem:[%s358_s1 + $0x4] sm:$0xf0] }
   0xb   :  { %v165_v41 = vor.u32 %v216_v38, %v162_v39  ;;  %v214_v44 = vld [vmem:[%s358_s1 + $0x4] sm:$0xf]  ;;  %v154_v45 = vld [vmem:[%s358_s1 + $0x8] sm:$0xf0]  ;;  %v153_v46 = vor.u32 %v215_v43, %v152_v42  ;;  %v32_v50 = vld [vmem:[%s360_s2] sm:$0x3] }
   0xc   :  { %120 = vmatpush.bf16.msra.mxu0 %v193_v16  ;;  %v14_v47 = vld [vmem:[%s359_s0] sm:$0xff]  ;;  %v157_v48 = vor.u32 %v214_v44, %v154_v45  ;;  %v34_v51 = vperm.slane %v32_v50, 0  ;;  %v35_v52 = vperm.slane %v32_v50, 1 }
   0xd   :  { %133 = vmatpush.bf16.msra.mxu1 %v197_v17  ;;  %v15_v49 = vpack.c.bf16 %v14_v47, %v14_v47 }
  0x10   :  { %121 = vmatpush.bf16.msra.mxu0 %v185_v22 }
  0x11   :  { %134 = vmatpush.bf16.msra.mxu1 %v189_v23 }
  0x14   :  { %122 = vmatpush.bf16.msra.mxu0 %v177_v28 }
  0x15   :  { %135 = vmatpush.bf16.msra.mxu1 %v181_v29 }
  0x18   :  { %123 = vmatpush.bf16.msra.mxu0 %v169_v34 }
  0x19   :  { %136 = vmatpush.bf16.msra.mxu1 %v173_v35 }
  0x1c   :  { %124 = vmatpush.bf16.msra.mxu0 %v161_v40 }
  0x1d   :  { %137 = vmatpush.bf16.msra.mxu1 %v165_v41 }
  0x20   :  { %125 = vmatpush.bf16.msra.mxu0 %v153_v46 }
  0x21   :  { %138 = vmatpush.bf16.msra.mxu1 %v157_v48 }
  0x23   :  { %126 = vmatmul.bf16.vlgmr.msra.gmra.mxu0 %v15_v49 }
  0x24   :  { %139 = vmatmul.bf16.vlgmr.msra.gmra.mxu1 %v15_v49 }
  0xa0   :  { %v127_v53 = vpop.f32.mrf.mxu0 }
  0xa1   :  { %v128_v54 = vadd.f32 %v127_v53, %v34_v51  ;;  %v140_v55 = vpop.f32.mrf.mxu1 }
  0xa2   :  { %v141_v56 = vadd.f32 %v140_v55, %v35_v52 }
  0xa3   :  { %144 = vst [vmem:[%s361_s3] sm:$0xff] %v128_v54 }
  0xa4   :  { %145 = vst [vmem:[%s361_s3 + $0x8] sm:$0xff] %v141_v56 }
  0xa8   :  { %v129_v57 = vpop.f32.mrf.mxu0 }
  0xa9   :  { %v142_v58 = vpop.f32.mrf.mxu1 }

// kernel: conv2d_decoder_forward.14
= control target key start
LH: loop header
LB: loop body
LE: loop exit
PB: predicated region body
PF: predicated region fallthrough
CT: control target
= control target key end

     0   :  { %s76_s0 = inlined_call_operand.vmem [shape: f32[16,128], index: 0, kind: input, shape index: {}]   ;;  %s77_s1 = inlined_call_operand.vmem [shape: f32[1,128], index: 1, kind: input, shape index: {}]   ;;  %s78_s2 = inlined_call_operand.vmem [shape: f32[1,128], index: 2, kind: input, shape index: {}]   ;;  %s79_s3 = inlined_call_operand.vmem [shape: f32[16,128], index: 3, kind: output, shape index: {}]  }
   0x1   :  { %v14_v0 = vld [vmem:[%s76_s0] sm:$0xff]  ;;  %v15_v3 = vld [vmem:[%s76_s0 + $0x8] sm:$0xff] }
   0x2   :  { %v36_v1 = vld [vmem:[%s77_s1] ss:$0 sm:$0xff] }
   0x3   :  { %v37_v2 = vld [vmem:[%s78_s2] ss:$0 sm:$0xff]  ;;  %v20_v4 = vmul.f32 %v36_v1, %v14_v0  ;;  %v21_v5 = vmul.f32 %v36_v1, %v15_v3 }
   0x5   :  { %v26_v6 = vadd.f32 %v37_v2, %v20_v4  ;;  %v27_v7 = vadd.f32 %v37_v2, %v21_v5 }
   0x7   :  { %v28_v8 = vmax.f32 %v26_v6, 0.0  ;;  %v29_v9 = vmax.f32 %v27_v7, 0.0 }
   0x9   :  { %30 = vst [vmem:[%s79_s3] sm:$0xff] %v28_v8 }
   0xa   :  { %31 = vst [vmem:[%s79_s3 + $0x8] sm:$0xff] %v29_v9 }

// kernel: conv2d_decoder_forward.16
= control target key start
LH: loop header
LB: loop body
LE: loop exit
PB: predicated region body
PF: predicated region fallthrough
CT: control target
= control target key end

     0   :  { %s94_s0 = inlined_call_operand.vmem [shape: f32[16,128], index: 0, kind: input, shape index: {}]   ;;  %s95_s1 = inlined_call_operand.vmem [shape: f32[1,128], index: 1, kind: input, shape index: {}]   ;;  %s96_s2 = inlined_call_operand.vmem [shape: f32[1,128], index: 2, kind: input, shape index: {}]   ;;  %s97_s3 = inlined_call_operand.vmem [shape: f32[16,128], index: 3, kind: input, shape index: {}]   ;;  %s98_s4 = inlined_call_operand.vmem [shape: f32[16,128], index: 4, kind: output, shape index: {}]  }
   0x1   :  { %v17_v0 = vld [vmem:[%s94_s0] sm:$0xff]  ;;  %v18_v4 = vld [vmem:[%s94_s0 + $0x8] sm:$0xff] }
   0x2   :  { %v43_v1 = vld [vmem:[%s95_s1] ss:$0 sm:$0xff]  ;;  %v32_v8 = vld [vmem:[%s97_s3 + $0x8] sm:$0xff] }
   0x3   :  { %v44_v2 = vld [vmem:[%s96_s2] ss:$0 sm:$0xff]  ;;  %v23_v3 = vmul.f32 %v43_v1, %v17_v0  ;;  %v24_v6 = vmul.f32 %v43_v1, %v18_v4 }
   0x4   :  { %v31_v5 = vld [vmem:[%s97_s3] sm:$0xff] }
   0x5   :  { %v29_v7 = vadd.f32 %v44_v2, %v23_v3  ;;  %v30_v9 = vadd.f32 %v44_v2, %v24_v6 }
   0x7   :  { %v33_v10 = vadd.f32 %v31_v5, %v29_v7  ;;  %v34_v11 = vadd.f32 %v32_v8, %v30_v9 }
   0x9   :  { %v35_v12 = vmax.f32 %v33_v10, 0.0  ;;  %v36_v13 = vmax.f32 %v34_v11, 0.0 }
   0xb   :  { %37 = vst [vmem:[%s98_s4] sm:$0xff] %v35_v12 }
   0xc   :  { %38 = vst [vmem:[%s98_s4 + $0x8] sm:$0xff] %v36_v13 }

// kernel: conv2d_decoder_forward.13
= control target key start
LH: loop header
LB: loop body
LE: loop exit
PB: predicated region body
PF: predicated region fallthrough
CT: control target
= control target key end

     0   :  { %s1199_s15 = smov 0   ;;  %s1439_s0 = inlined_call_operand.vmem [shape: f32[2,10,10,16], index: 0, kind: input, shape index: {}]   ;;  %s1440_s1 = inlined_call_operand.vmem [shape: bf16[9,16,16], index: 1, kind: input, shape index: {}]   ;;  %s1441_s2 = inlined_call_operand.vmem [shape: f32[2,8,8,16], index: 2, kind: output, shape index: {0}]   ;;  %s1442_s3 = inlined_call_operand.vmem [shape: f32[2,1,16], index: 3, kind: output, shape index: {1}]   ;;  %s1443_s4 = inlined_call_operand.vmem [shape: f32[2,1,16], index: 4, kind: output, shape index: {2}]  }
   0x1 LB: > { %s998_s16 = sadd.s32 4294967295, %s1172_s15   ;;  %p1002_p0 = scmp.ge.s32.totalorder %s1172_s15, 1  ;;  %s1172_s15 = sphi %s1199_s15, %s15_s15  }
   0x2   : > { %p167_p1 = scmp.lt.s32.totalorder %s1172_s15, 3 }
   0x4   : > { %p168_p2 = pnand %p1002_p0, %p167_p1 }
   0x5   : > { %p199_p3 = scmp.lt.s32.totalorder (!%p168_p2), %s998_s16, 1 }
   0x6   : > { %171 = sbr.rel (%p168_p2) target bundleno = 311 (0x137), region = 28 }
   0xb   : > { %v1146_v0 = vld [vmem:[%s1440_s1 + $0x8] sm:$0xff]  ;;  %v1147_v1 = vld [vmem:[%s1440_s1 + $0x10] sm:$0xff]  ;;  %v1148_v2 = vld [vmem:[%s1440_s1 + $0x18] sm:$0xff]  ;;  %s1445_s16 = smov (!%p199_p3, %s998_s16), 1  ;;  %vm251_vm0 = vcmask 130048   ;;  %vm861_vm1 = vcmask 122880  }
   0xc   : > { %v1145_v3 = vld [vmem:[%s1440_s1] sm:$0xff]  ;;  %1154 = vmatpush.bf16.msra.mxu1 %v1146_v0  ;;  %1155 = vmatpush.bf16.msra.mxu2 %v1146_v0  ;;  %s1157_s27 = smul.u32 160, %s1445_s16  ;;  %v1151_v5 = vld [vmem:[%s1440_s1 + $0x30] sm:$0xff]  ;;  %v1152_v9 = vld [vmem:[%s1440_s1 + $0x38] sm:$0xff]  ;;  %s1144_s13 = sshll.u32 %s1445_s16, 6 }
   0xd   : > { %v1149_v4 = vld [vmem:[%s1440_s1 + $0x20] sm:$0xff]  ;;  %1156 = vmatpush.bf16.msra.mxu3 %v1146_v0  ;;  %271 = vmatpush.bf16.msra.mxu0 %v1146_v0  ;;  %v1150_v18 = vld [vmem:[%s1440_s1 + $0x28] sm:$0xff]  ;;  %s1372_s18 = scalar_lea.vmem %s1441_s2, %s1144_s13  ;;  %s211_s21 = scalar_lea.vmem %s1442_s3, %s1445_s16 }
   0xe   : > { %s1228_s30 = scalar_lea.vmem %s1439_s0, %s1157_s27  ;;  %v1153_v20 = vld [vmem:[%s1440_s1 + $0x40] sm:$0xff]  ;;  %s214_s24 = scalar_lea.vmem %s1443_s4, %s1445_s16 }
   0xf   : > { %v232_v6 = vld [vmem:[%s1228_s30 + $0x21] sm:$0xff]  ;;  %v233_v7 = vld [vmem:[%s1228_s30 + $0x31] sm:$0xff] }
  0x10   : > { %380 = vmatpush.bf16.msrb.mxu2 %v1147_v1  ;;  %318 = vmatpush.bf16.msrb.mxu1 %v1145_v3  ;;  %v234_v8 = vld [vmem:[%s1228_s30 + $0x41] sm:$0xff]  ;;  %v1239_v10 = vpack.c.bf16 %v233_v7, %v232_v6  ;;  %v235_v11 = vld [vmem:[%s1228_s30 + $0x51] sm:$0xff] }
  0x11   : > { %451 = vmatpush.bf16.msrb.mxu3 %v1148_v2  ;;  %521 = vmatpush.bf16.msrb.mxu0 %v1149_v4  ;;  %v236_v12 = vld [vmem:[%s1228_s30 + $0x61] sm:$0xff]  ;;  %v1244_v13 = vld [vmem:[%s1228_s30 + $0x71] sm:$0xff]  ;;  %v1246_v14 = vpack.c.bf16 %v235_v11, %v234_v8  ;;  %v490_v37 = vpack.c.bf16 %v234_v8, %v233_v7 }
  0x12   : > { %v1249_v15 = vpack.c.bf16 %v1244_v13, %v236_v12  ;;  %v230_v16 = vld [vmem:[%s1228_s30 + $0x1] sm:$0xff]  ;;  %v231_v17 = vld [vmem:[%s1228_s30 + $0x11] sm:$0xff]  ;;  %1013 = vmatmul.msk.bf16.vlgmr.msra.gmra.mxu1 %vm251_vm0, %v1239_v10  ;;  %v491_v45 = vpack.c.bf16 %v236_v12, %v235_v11 }
  0x13   : > { %v238_v19 = vpack.c.bf16 %v231_v17, %v230_v16  ;;  %1014 = vmatmul.msk.bf16.vlgmr.msra.gmra.mxu2 %vm251_vm0, %v1246_v14  ;;  %v216_v21 = vld [vmem:[%s1228_s30] sm:$0xff]  ;;  %v217_v22 = vld [vmem:[%s1228_s30 + $0x10] sm:$0xff]  ;;  %v489_v29 = vpack.c.bf16 %v232_v6, %v231_v17 }
  0x14   : > { %1015 = vmatmul.msk.bf16.vlgmr.msra.gmra.mxu3 %vm251_vm0, %v1249_v15  ;;  %662 = vmatpush.bf16.msra.mxu2 %v1151_v5  ;;  %v340_v23 = vld [vmem:[%s1228_s30 + $0x2] sm:$0xff]  ;;  %v341_v24 = vld [vmem:[%s1228_s30 + $0x12] sm:$0xff]  ;;  %v224_v26 = vpack.c.bf16 %v217_v22, %v216_v21 }
  0x15   : > { %1012 = vmatmul.msk.bf16.vlgmr.msra.gmra.mxu0 %vm251_vm0, %v238_v19  ;;  %732 = vmatpush.bf16.msra.mxu3 %v1152_v9  ;;  %v1035_v25 = vld [vmem:[%s1228_s30 + $0x20] sm:$0xff]  ;;  %v348_v27 = vpack.c.bf16 %v341_v24, %v340_v23  ;;  %v219_v30 = vld [vmem:[%s1228_s30 + $0x30] sm:$0xff] }
  0x16   : > { %591 = vmatpush.bf16.msra.mxu1 %v1150_v18  ;;  %802 = vmatpush.bf16.msra.mxu0 %v1153_v20  ;;  %v419_v28 = vpack.c.bf16 %v1035_v25, %v217_v22  ;;  %v342_v31 = vld [vmem:[%s1228_s30 + $0x22] sm:$0xff]  ;;  %v343_v32 = vld [vmem:[%s1228_s30 + $0x32] sm:$0xff]  ;;  %v225_v34 = vpack.c.bf16 %v219_v30, %v1035_v25 }
  0x17   : > { %v1037_v33 = vld [vmem:[%s1228_s30 + $0x40] sm:$0xff]  ;;  %v349_v35 = vpack.c.bf16 %v343_v32, %v342_v31  ;;  %v221_v38 = vld [vmem:[%s1228_s30 + $0x50] sm:$0xff]  ;;  %v559_v55 = vpack.c.bf16 %v342_v31, %v341_v24 }
  0x18   : > { %v420_v36 = vpack.c.bf16 %v1037_v33, %v219_v30  ;;  %v344_v39 = vld [vmem:[%s1228_s30 + $0x42] sm:$0xff]  ;;  %v345_v40 = vld [vmem:[%s1228_s30 + $0x52] sm:$0xff]  ;;  %v226_v42 = vpack.c.bf16 %v221_v38, %v1037_v33 }
  0x19   : > { %v1039_v41 = vld [vmem:[%s1228_s30 + $0x60] sm:$0xff]  ;;  %v350_v43 = vpack.c.bf16 %v345_v40, %v344_v39  ;;  %v223_v46 = vld [vmem:[%s1228_s30 + $0x70] sm:$0xff]  ;;  %v560_v56 = vpack.c.bf16 %v344_v39, %v343_v32 }
  0x1a   : > { %v421_v44 = vpack.c.bf16 %v1039_v41, %v221_v38  ;;  %v346_v47 = vld [vmem:[%s1228_s30 + $0x62] sm:$0xff]  ;;  %v347_v48 = vld [vmem:[%s1228_s30 + $0x72] sm:$0xff]  ;;  %v227_v51 = vpack.c.bf16 %v223_v46, %v1039_v41 }
  0x1b   : > { %v1041_v49 = vld [vmem:[%s1228_s30 + $0x80] sm:$0xff]  ;;  %v351_v52 = vpack.c.bf16 %v347_v48, %v346_v47  ;;  %v561_v57 = vpack.c.bf16 %v346_v47, %v345_v40  ;;  %v1095_v59 = vld [vmem:[%s1228_s30 + $0x90] sm:$0xff] }
  0x1c   : > { %v1059_v50 = vld [vmem:[%s1228_s30 + $0x81] sm:$0xff]  ;;  %v422_v53 = vpack.c.bf16 %v1041_v49, %v223_v46  ;;  %v1113_v60 = vld [vmem:[%s1228_s30 + $0x91] sm:$0xff]  ;;  %v633_v0 = vpack.c.bf16 %v1095_v59, %v1041_v49 }
  0x1d   : > { %v492_v54 = vpack.c.bf16 %v1059_v50, %v1244_v13  ;;  %v1077_v58 = vld [vmem:[%s1228_s30 + $0x82] sm:$0xff]  ;;  %v1131_v61 = vld [vmem:[%s1228_s30 + $0x92] sm:$0xff]  ;;  %v703_v1 = vpack.c.bf16 %v1113_v60, %v1059_v50 }
  0x1e   : > { %v562_v62 = vpack.c.bf16 %v1077_v58, %v347_v48  ;;  %v773_v2 = vpack.c.bf16 %v1131_v61, %v1077_v58 }
  0x22   : > { %1020 = vmatmul.msk.bf16.vlgmr.msrb.gmra.mxu1 %vm251_vm0, %v224_v26 }
  0x23   : > { %1030 = vmatmul.msk.bf16.vlgmr.msrb.gmra.mxu2 %vm251_vm0, %v348_v27 }
  0x24   : > { %1048 = vmatmul.msk.bf16.vlgmr.msrb.gmra.mxu3 %vm251_vm0, %v419_v28 }
  0x25   : > { %1066 = vmatmul.msk.bf16.vlgmr.msrb.gmra.mxu0 %vm251_vm0, %v489_v29 }
  0x32   : > { %1021 = vmatmul.msk.bf16.gmra.mxu1 %vm251_vm0, %v225_v34 }
  0x33   : > { %1031 = vmatmul.msk.bf16.gmra.mxu2 %vm251_vm0, %v349_v35 }
  0x34   : > { %1049 = vmatmul.msk.bf16.gmra.mxu3 %vm251_vm0, %v420_v36 }
  0x35   : > { %1067 = vmatmul.msk.bf16.gmra.mxu0 %vm251_vm0, %v490_v37 }
  0x42   : > { %1022 = vmatmul.msk.bf16.gmra.mxu1 %vm251_vm0, %v226_v42 }
  0x43   : > { %1032 = vmatmul.msk.bf16.gmra.mxu2 %vm251_vm0, %v350_v43 }
  0x44   : > { %1050 = vmatmul.msk.bf16.gmra.mxu3 %vm251_vm0, %v421_v44 }
  0x45   : > { %1068 = vmatmul.msk.bf16.gmra.mxu0 %vm251_vm0, %v491_v45 }
  0x52   : > { %1023 = vmatmul.msk.bf16.gmra.mxu1 %vm251_vm0, %v227_v51 }
  0x53   : > { %1033 = vmatmul.msk.bf16.gmra.mxu2 %vm251_vm0, %v351_v52 }
  0x54   : > { %1051 = vmatmul.msk.bf16.gmra.mxu3 %vm251_vm0, %v422_v53 }
  0x55   : > { %1069 = vmatmul.msk.bf16.gmra.mxu0 %vm251_vm0, %v492_v54 }
  0x62   : > { %1084 = vmatmul.msk.bf16.vlgmr.msra.gmra.mxu1 %vm251_vm0, %v559_v55 }
  0x63   : > { %1102 = vmatmul.msk.bf16.vlgmr.msra.gmra.mxu2 %vm251_vm0, %v225_v34 }
  0x64   : > { %1120 = vmatmul.msk.bf16.vlgmr.msra.gmra.mxu3 %vm251_vm0, %v1239_v10 }
  0x65   : > { %1138 = vmatmul.msk.bf16.vlgmr.msra.gmra.mxu0 %vm251_vm0, %v349_v35 }
  0x72   : > { %1085 = vmatmul.msk.bf16.gmra.mxu1 %vm251_vm0, %v560_v56 }
  0x73   : > { %1103 = vmatmul.msk.bf16.gmra.mxu2 %vm251_vm0, %v226_v42 }
  0x74   : > { %1121 = vmatmul.msk.bf16.gmra.mxu3 %vm251_vm0, %v1246_v14 }
  0x75   : > { %1139 = vmatmul.msk.bf16.gmra.mxu0 %vm251_vm0, %v350_v43 }
  0x82   : > { %1086 = vmatmul.msk.bf16.gmra.mxu1 %vm251_vm0, %v561_v57 }
  0x83   : > { %1104 = vmatmul.msk.bf16.gmra.mxu2 %vm251_vm0, %v227_v51 }
  0x84   : > { %1122 = vmatmul.msk.bf16.gmra.mxu3 %vm251_vm0, %v1249_v15 }
  0x85   : > { %1140 = vmatmul.msk.bf16.gmra.mxu0 %vm251_vm0, %v351_v52 }
  0x8f   : > { %v278_v63 = vpop.f32.mrf.mxu1 }
  0x92   : > { %v273_v3 = vpop.f32.mrf.mxu0  ;;  %1087 = vmatmul.msk.bf16.gmra.mxu1 %vm251_vm0, %v562_v62 }
  0x93   : > { %1105 = vmatmul.msk.bf16.gmra.mxu2 %vm251_vm0, %v633_v0 }
  0x94   : > { %1123 = vmatmul.msk.bf16.gmra.mxu3 %vm251_vm0, %v703_v1 }
  0x95   : > { %1141 = vmatmul.msk.bf16.gmra.mxu0 %vm251_vm0, %v773_v2 }
  0x96   : > { %v1324_v4 = vpop.f32.mrf.mxu2 }
  0x97   : > { %v1326_v5 = vpop.f32.mrf.mxu3  ;;  %v1328_v6 = vpop.f32.mrf.mxu1 }
  0x9a   : > { %v275_v7 = vpop.f32.mrf.mxu0 }
  0x9e   : > { %v1330_v8 = vpop.f32.mrf.mxu2 }
  0x9f   : > { %v1332_v9 = vpop.f32.mrf.mxu3  ;;  %v320_v10 = vpop.f32.mrf.mxu1 }
  0xa0   : > { %v321_v39 = vadd.f32 %v320_v10, %v273_v3 }
  0xa2   : > { %v523_v11 = vpop.f32.mrf.mxu0 }
  0xa6   : > { %v382_v12 = vpop.f32.mrf.mxu2 }
  0xa7   : > { %v453_v13 = vpop.f32.mrf.mxu3  ;;  %v322_v14 = vpop.f32.mrf.mxu1  ;;  %v402_v41 = vadd.f32 %v382_v12, %v321_v39 }
  0xa8   : > { %v323_v46 = vadd.f32 %v322_v14, %v275_v7 }
  0xa9   : > { %v473_v44 = vadd.f32 %v453_v13, %v402_v41 }
  0xaa   : > { %v525_v15 = vpop.f32.mrf.mxu0 }
  0xab   : > { %v543_v49 = vadd.f32 %v523_v11, %v473_v44 }
  0xae   : > { %v384_v16 = vpop.f32.mrf.mxu2 }
  0xaf   : > { %v455_v17 = vpop.f32.mrf.mxu3  ;;  %v325_v18 = vpop.f32.mrf.mxu1  ;;  %v403_v48 = vadd.f32 %v384_v16, %v323_v46 }
  0xb0   : > { %v326_v56 = vadd.f32 %v325_v18, %v278_v63 }
  0xb1   : > { %v474_v53 = vadd.f32 %v455_v17, %v403_v48 }
  0xb2   : > { %v528_v19 = vpop.f32.mrf.mxu0 }
  0xb3   : > { %v544_v61 = vadd.f32 %v525_v15, %v474_v53 }
  0xb6   : > { %v387_v20 = vpop.f32.mrf.mxu2 }
  0xb7   : > { %v458_v21 = vpop.f32.mrf.mxu3  ;;  %v327_v22 = vpop.f32.mrf.mxu1  ;;  %v404_v59 = vadd.f32 %v387_v20, %v326_v56 }
  0xb8   : > { %v328_v7 = vadd.f32 %v327_v22, %v1328_v6 }
  0xb9   : > { %v475_v2 = vadd.f32 %v458_v21, %v404_v59 }
  0xba   : > { %v1334_v23 = vpop.f32.mrf.mxu0 }
  0xbb   : > { %v545_v16 = vadd.f32 %v528_v19, %v475_v2 }
  0xbe   : > { %v389_v24 = vpop.f32.mrf.mxu2 }
  0xbf   : > { %v460_v25 = vpop.f32.mrf.mxu3  ;;  %v1336_v26 = vpop.f32.mrf.mxu1  ;;  %v405_v12 = vadd.f32 %v389_v24, %v328_v7 }
  0xc0   : > { %v331_v46 = vadd.f32 %v1336_v26, %v1324_v4 }
  0xc1   : > { %v476_v44 = vadd.f32 %v460_v25, %v405_v12 }
  0xc2   : > { %v1338_v27 = vpop.f32.mrf.mxu0 }
  0xc6   : > { %v1340_v28 = vpop.f32.mrf.mxu2 }
  0xc7   : > { %v1342_v29 = vpop.f32.mrf.mxu3  ;;  %v1344_v30 = vpop.f32.mrf.mxu1 }
  0xca   : > { %v1346_v31 = vpop.f32.mrf.mxu0 }
  0xce   : > { %v1348_v32 = vpop.f32.mrf.mxu2 }
  0xcf   : > { %v1350_v33 = vpop.f32.mrf.mxu3  ;;  %v1352_v34 = vpop.f32.mrf.mxu1 }
  0xd2   : > { %v1354_v35 = vpop.f32.mrf.mxu0 }
  0xd6   : > { %v1356_v36 = vpop.f32.mrf.mxu2 }
  0xd7   : > { %v1358_v37 = vpop.f32.mrf.mxu3  ;;  %v1360_v38 = vpop.f32.mrf.mxu1 }
  0xda   : > { %v1362_v40 = vpop.f32.mrf.mxu0 }
  0xde   : > { %v1364_v42 = vpop.f32.mrf.mxu2 }
  0xdf   : > { %v1366_v43 = vpop.f32.mrf.mxu3  ;;  %v593_v45 = vpop.f32.mrf.mxu1 }
  0xe0   : > { %v613_v50 = vadd.f32 %v593_v45, %v543_v49  ;;  %v406_v49 = vadd.f32 %v1340_v28, %v331_v46 }
  0xe2   : > { %v804_v47 = vpop.f32.mrf.mxu0 }
  0xe6   : > { %v664_v51 = vpop.f32.mrf.mxu2 }
  0xe7   : > { %v734_v52 = vpop.f32.mrf.mxu3  ;;  %v684_v54 = vadd.f32 %v664_v51, %v613_v50  ;;  %v595_v55 = vpop.f32.mrf.mxu1  ;;  %v546_v51 = vadd.f32 %v1334_v23, %v476_v44  ;;  %v333_v23 = vadd.f32 %v1344_v30, %v1330_v8 }
  0xe8   : > { %v614_v62 = vadd.f32 %v595_v55, %v544_v61 }
  0xe9   : > { %v754_v57 = vadd.f32 %v734_v52, %v684_v54 }
  0xea   : > { %v806_v58 = vpop.f32.mrf.mxu0 }
  0xeb   : > { %v824_v60 = vadd.f32 %v804_v47, %v754_v57  ;;  %v477_v57 = vadd.f32 %v1342_v29, %v406_v49 }
  0xed   : > { %832 = vst.msk [vmem:[%s1372_s18] sm:$0xff] %vm251_vm0, %v824_v60  ;;  %v863_v13 = vmul.f32 %v824_v60, %v824_v60  ;;  %v840_v17 = vsel %vm251_vm0, %v824_v60, 0.0  ;;  %v407_v60 = vadd.f32 %v1348_v32, %v333_v23 }
  0xee   : > { %v666_v0 = vpop.f32.mrf.mxu2 }
  0xef   : > { %v736_v1 = vpop.f32.mrf.mxu3  ;;  %v685_v3 = vadd.f32 %v666_v0, %v614_v62  ;;  %v598_v63 = vpop.f32.mrf.mxu1  ;;  %v871_v6 = vsel %vm251_vm0, %v863_v13, 0.0  ;;  %v547_v62 = vadd.f32 %v1338_v27, %v477_v57  ;;  %v336_v27 = vadd.f32 %v1352_v34, %v1326_v5 }
  0xf0   : > { %v615_v20 = vadd.f32 %v598_v63, %v545_v16 }
  0xf1   : > { %v755_v10 = vadd.f32 %v736_v1, %v685_v3  ;;  %v408_v13 = vadd.f32 %v1356_v36, %v336_v27 }
  0xf2   : > { %v809_v11 = vpop.f32.mrf.mxu0 }
  0xf3   : > { %v825_v14 = vadd.f32 %v806_v58, %v755_v10  ;;  %v478_v10 = vadd.f32 %v1350_v33, %v407_v60 }
  0xf5   : > { %833 = vst.msk [vmem:[%s1372_s18 + $0x8] sm:$0xff] %vm251_vm0, %v825_v14  ;;  %v841_v15 = vsel %vm251_vm0, %v825_v14, 0.0  ;;  %v864_v18 = vmul.f32 %v825_v14, %v825_v14  ;;  %v548_v16 = vadd.f32 %v1346_v31, %v478_v10  ;;  %v338_v31 = vadd.f32 %v1360_v38, %v1332_v9 }
  0xf6   : > { %v842_v21 = vadd.f32 %v841_v15, %v840_v17  ;;  %v669_v39 = vpop.f32.mrf.mxu2 }
  0xf7   : > { %v739_v41 = vpop.f32.mrf.mxu3  ;;  %v872_v22 = vsel %vm251_vm0, %v864_v18, 0.0  ;;  %v686_v24 = vadd.f32 %v669_v39, %v615_v20  ;;  %v600_v45 = vpop.f32.mrf.mxu1 }
  0xf8   : > { %v873_v19 = vadd.f32 %v872_v22, %v871_v6  ;;  %v616_v53 = vadd.f32 %v600_v45, %v546_v51  ;;  %v409_v22 = vadd.f32 %v1364_v42, %v338_v31 }
  0xf9   : > { %v756_v47 = vadd.f32 %v739_v41, %v686_v24  ;;  %v479_v41 = vadd.f32 %v1358_v37, %v408_v13 }
  0xfa   : > { %v811_v48 = vpop.f32.mrf.mxu0 }
  0xfb   : > { %v826_v50 = vadd.f32 %v809_v11, %v756_v47  ;;  %v549_v45 = vadd.f32 %v1354_v35, %v479_v41 }
  0xfd   : > { %834 = vst.msk [vmem:[%s1372_s18 + $0x10] sm:$0xff] %vm251_vm0, %v826_v50  ;;  %v843_v25 = vsel %vm251_vm0, %v826_v50, 0.0  ;;  %v865_v52 = vmul.f32 %v826_v50, %v826_v50  ;;  %v480_v50 = vadd.f32 %v1366_v43, %v409_v22 }
  0xfe   : > { %v844_v54 = vadd.f32 %v843_v25, %v842_v21  ;;  %v671_v55 = vpop.f32.mrf.mxu2 }
  0xff   : > { %v741_v56 = vpop.f32.mrf.mxu3  ;;  %v874_v4 = vsel %vm251_vm0, %v865_v52, 0.0  ;;  %v687_v26 = vadd.f32 %v671_v55, %v616_v53  ;;  %v603_v58 = vpop.f32.mrf.mxu1  ;;  %v550_v53 = vadd.f32 %v1362_v40, %v480_v50 }
 0x100   : > { %v875_v28 = vadd.f32 %v874_v4, %v873_v19  ;;  %v617_v2 = vadd.f32 %v603_v58, %v547_v62 }
 0x101   : > { %v757_v59 = vadd.f32 %v741_v56, %v687_v26 }
 0x102   : > { %v814_v0 = vpop.f32.mrf.mxu0 }
 0x103   : > { %v827_v61 = vadd.f32 %v811_v48, %v757_v59 }
 0x105   : > { %835 = vst.msk [vmem:[%s1372_s18 + $0x18] sm:$0xff] %vm251_vm0, %v827_v61  ;;  %v845_v1 = vsel %vm251_vm0, %v827_v61, 0.0  ;;  %v866_v29 = vmul.f32 %v827_v61, %v827_v61 }
 0x106   : > { %v846_v3 = vadd.f32 %v845_v1, %v844_v54  ;;  %v674_v63 = vpop.f32.mrf.mxu2 }
 0x107   : > { %v744_v7 = vpop.f32.mrf.mxu3  ;;  %v876_v8 = vsel %vm251_vm0, %v866_v29, 0.0  ;;  %v688_v30 = vadd.f32 %v674_v63, %v617_v2  ;;  %v605_v32 = vpop.f32.mrf.mxu1 }
 0x108   : > { %v877_v11 = vadd.f32 %v876_v8, %v875_v28  ;;  %v618_v33 = vadd.f32 %v605_v32, %v548_v16 }
 0x109   : > { %v758_v12 = vadd.f32 %v744_v7, %v688_v30 }
 0x10a   : > { %v816_v18 = vpop.f32.mrf.mxu0 }
 0x10b   : > { %v828_v14 = vadd.f32 %v814_v0, %v758_v12 }
 0x10d   : > { %836 = vst.msk [vmem:[%s1372_s18 + $0x20] sm:$0xff] %vm251_vm0, %v828_v14  ;;  %v847_v17 = vsel %vm251_vm0, %v828_v14, 0.0  ;;  %v867_v15 = vmul.f32 %v828_v14, %v828_v14 }
 0x10e   : > { %v848_v20 = vadd.f32 %v847_v17, %v846_v3  ;;  %v676_v21 = vpop.f32.mrf.mxu2 }
 0x10f   : > { %v746_v39 = vpop.f32.mrf.mxu3  ;;  %v878_v5 = vsel %vm251_vm0, %v867_v15, 0.0  ;;  %v689_v34 = vadd.f32 %v676_v21, %v618_v33  ;;  %v608_v44 = vpop.f32.mrf.mxu1 }
 0x110   : > { %v879_v36 = vadd.f32 %v878_v5, %v877_v11  ;;  %v619_v46 = vadd.f32 %v608_v44, %v549_v45 }
 0x111   : > { %v759_v6 = vadd.f32 %v746_v39, %v689_v34 }
 0x112   : > { %v819_v42 = vpop.f32.mrf.mxu0 }
 0x113   : > { %v829_v24 = vadd.f32 %v816_v18, %v759_v6 }
 0x115   : > { %837 = vst.msk [vmem:[%s1372_s18 + $0x28] sm:$0xff] %vm251_vm0, %v829_v24  ;;  %v849_v19 = vsel %vm251_vm0, %v829_v24, 0.0  ;;  %v868_v37 = vmul.f32 %v829_v24, %v829_v24 }
 0x116   : > { %v850_v47 = vadd.f32 %v849_v19, %v848_v20  ;;  %v679_v48 = vpop.f32.mrf.mxu2 }
 0x117   : > { %v749_v49 = vpop.f32.mrf.mxu3  ;;  %v880_v9 = vsel %vm251_vm0, %v868_v37, 0.0  ;;  %v690_v38 = vadd.f32 %v679_v48, %v619_v46  ;;  %v610_v52 = vpop.f32.mrf.mxu1 }
 0x118   : > { %v881_v51 = vadd.f32 %v880_v9, %v879_v36  ;;  %v620_v56 = vadd.f32 %v610_v52, %v550_v53 }
 0x119   : > { %v760_v25 = vadd.f32 %v749_v49, %v690_v38 }
 0x11a   : > { %v821_v59 = vpop.f32.mrf.mxu0 }
 0x11b   : > { %v830_v35 = vadd.f32 %v819_v42, %v760_v25 }
 0x11d   : > { %838 = vst.msk [vmem:[%s1372_s18 + $0x30] sm:$0xff] %vm251_vm0, %v830_v35  ;;  %v851_v54 = vsel %vm251_vm0, %v830_v35, 0.0  ;;  %v869_v55 = vmul.f32 %v830_v35, %v830_v35 }
 0x11e   : > { %v852_v57 = vadd.f32 %v851_v54, %v850_v47  ;;  %v681_v4 = vpop.f32.mrf.mxu2 }
 0x11f   : > { %v882_v43 = vsel %vm251_vm0, %v869_v55, 0.0  ;;  %v691_v26 = vadd.f32 %v681_v4, %v620_v56  ;;  %v751_v28 = vpop.f32.mrf.mxu3 }
 0x120   : > { %v883_v58 = vadd.f32 %v882_v43, %v881_v51 }
 0x121   : > { %v761_v23 = vadd.f32 %v751_v28, %v691_v26 }
 0x123   : > { %v831_v60 = vadd.f32 %v821_v59, %v761_v23 }
 0x125   : > { %839 = vst.msk [vmem:[%s1372_s18 + $0x38] sm:$0xff] %vm251_vm0, %v831_v60  ;;  %v853_v40 = vsel %vm251_vm0, %v831_v60, 0.0  ;;  %v870_v61 = vmul.f32 %v831_v60, %v831_v60 }
 0x126   : > { %v854_v62 = vadd.f32 %v853_v40, %v852_v57 }
 0x127   : > { %v884_v0 = vsel %vm251_vm0, %v870_v61, 0.0 }
 0x128   : > { %v855_v1 = vrot.slane %v854_v62, 4  ;;  %v885_v29 = vadd.f32 %v884_v0, %v883_v58 }
 0x12a   : > { %v856_v2 = vadd.f32 %v855_v1, %v854_v62  ;;  %v886_v3 = vrot.slane %v885_v29, 4 }
 0x12c   : > { %v857_v63 = vrot.slane %v856_v2, 2  ;;  %v887_v7 = vadd.f32 %v886_v3, %v885_v29 }
 0x12e   : > { %v858_v10 = vadd.f32 %v857_v63, %v856_v2  ;;  %v888_v8 = vrot.slane %v887_v7, 2 }
 0x130   : > { %v859_v30 = vrot.slane %v858_v10, 1  ;;  %v889_v32 = vadd.f32 %v888_v8, %v887_v7 }
 0x132   : > { %v860_v11 = vadd.f32 %v859_v30, %v858_v10  ;;  %v890_v27 = vrot.slane %v889_v32, 1 }
 0x134   : > { %862 = vst.msk [vmem:[%s211_s21] sm:$0x1] %vm861_vm1, %v860_v11  ;;  %v891_v12 = vadd.f32 %v890_v27, %v889_v32 }
 0x136   : > { %892 = vst.msk [vmem:[%s214_s24] sm:$0x1] %vm861_vm1, %v891_v12 }
 0x137 PF: > { %s15_s15 = sadd.s32 1, %s1172_s15  }
 0x138   : > { %p12_p4 = scmp.ge.s32.totalorder %s15_s15, 4  }
 0x13a   :  { %14 = sbr.rel (!%p12_p4) target bundleno = 1 (0x1), region = 92 }

// kernel: conv2d_decoder_forward.17
= control target key start
LH: loop header
LB: loop body
LE: loop exit
PB: predicated region body
PF: predicated region fallthrough
CT: control target
= control target key end

     0   :  { %s1355_s12 = smov 0   ;;  %s1692_s0 = inlined_call_operand.vmem [shape: f32[2,10,10,16], index: 0, kind: input, shape index: {}]   ;;  %s1693_s1 = inlined_call_operand.vmem [shape: bf16[2,2,3,16,32], index: 1, kind: input, shape index: {}]   ;;  %s1694_s2 = inlined_call_operand.vmem [shape: f32[1,32], index: 2, kind: input, shape index: {}]   ;;  %s1695_s3 = inlined_call_operand.vmem [shape: f32[2,8,2,8,32], index: 3, kind: output, shape index: {}]  }
   0x1 LB: > { %s1095_s13 = sadd.s32 4294967295, %s1333_s12   ;;  %p1099_p0 = scmp.ge.s32.totalorder %s1333_s12, 1  ;;  %s1333_s12 = sphi %s1355_s12, %s13_s12  }
   0x2   : > { %p137_p1 = scmp.lt.s32.totalorder %s1333_s12, 3 }
   0x4   : > { %p138_p2 = pnand %p1099_p0, %p137_p1 }
   0x5   : > { %p161_p3 = scmp.lt.s32.totalorder (!%p138_p2), %s1095_s13, 1 }
   0x6   : > { %141 = sbr.rel (%p138_p2) target bundleno = 345 (0x159), region = 32 }
   0xb   : > { %v1305_v0 = vld [vmem:[%s1693_s1 + $0x8] sm:$0xff]  ;;  %v1304_v1 = vld [vmem:[%s1693_s1] sm:$0xff]  ;;  %v1306_v2 = vld [vmem:[%s1693_s1 + $0x10] sm:$0xff]  ;;  %s1697_s13 = smov (!%p161_p3, %s1095_s13), 1  ;;  %vm207_vm0 = vcmask 130048   ;;  %vm597_vm1 = vcmask 261120  }
   0xc   : > { %v1307_v3 = vld [vmem:[%s1693_s1 + $0x18] sm:$0xff]  ;;  %v1308_v5 = vld [vmem:[%s1693_s1 + $0x20] sm:$0xff]  ;;  %227 = vmatpush.bf16.msra.mxu0 %v1305_v0  ;;  %274 = vmatpush.bf16.msra.mxu1 %v1304_v1  ;;  %v1310_v6 = vld [vmem:[%s1693_s1 + $0x30] sm:$0xff]  ;;  %s1316_s30 = smul.u32 160, %s1697_s13  ;;  %s1303_s19 = sshll.u32 %s1697_s13, 7 }
   0xd   : > { %v1311_v4 = vld [vmem:[%s1693_s1 + $0x38] sm:$0xff]  ;;  %v1309_v7 = vld [vmem:[%s1693_s1 + $0x28] sm:$0xff]  ;;  %336 = vmatpush.bf16.msra.mxu2 %v1306_v2  ;;  %407 = vmatpush.bf16.msra.mxu3 %v1307_v3  ;;  %v1314_v39 = vld [vmem:[%s1693_s1 + $0x50] sm:$0xff]  ;;  %s1567_s22 = scalar_lea.vmem %s1695_s3, %s1303_s19 }
   0xe   : > { %s1393_s6 = scalar_lea.vmem %s1692_s0, %s1316_s30  ;;  %v1312_v40 = vld [vmem:[%s1693_s1 + $0x40] sm:$0xff]  ;;  %v1315_v41 = vld [vmem:[%s1693_s1 + $0x58] sm:$0xff]  ;;  %v1313_v42 = vld [vmem:[%s1693_s1 + $0x48] sm:$0xff] }
   0xf   : > { %v186_v8 = vld [vmem:[%s1393_s6 + $0x1] sm:$0xff]  ;;  %v1397_v9 = vld [vmem:[%s1393_s6 + $0x11] sm:$0xff] }
  0x10   : > { %477 = vmatpush.bf16.msrb.mxu0 %v1308_v5  ;;  %547 = vmatpush.bf16.msrb.mxu1 %v1309_v7  ;;  %v172_v10 = vld [vmem:[%s1393_s6] sm:$0xff]  ;;  %v194_v11 = vpack.c.bf16 %v1397_v9, %v186_v8  ;;  %v173_v12 = vld [vmem:[%s1393_s6 + $0x10] sm:$0xff] }
  0x11   : > { %661 = vmatpush.bf16.msrb.mxu2 %v1311_v4  ;;  %708 = vmatpush.bf16.msrb.mxu3 %v1310_v6  ;;  %v296_v13 = vld [vmem:[%s1393_s6 + $0x2] sm:$0xff]  ;;  %v297_v14 = vld [vmem:[%s1393_s6 + $0x12] sm:$0xff]  ;;  %v180_v15 = vpack.c.bf16 %v173_v12, %v172_v10 }
  0x12   : > { %v304_v16 = vpack.c.bf16 %v297_v14, %v296_v13  ;;  %v1132_v17 = vld [vmem:[%s1393_s6 + $0x20] sm:$0xff]  ;;  %1109 = vmatmul.msk.bf16.vlgmr.msra.gmra.mxu0 %vm207_vm0, %v194_v11  ;;  %v189_v20 = vld [vmem:[%s1393_s6 + $0x31] sm:$0xff] }
  0x13   : > { %v375_v18 = vpack.c.bf16 %v1132_v17, %v173_v12  ;;  %1117 = vmatmul.msk.bf16.vlgmr.msra.gmra.mxu1 %vm207_vm0, %v180_v15  ;;  %v188_v19 = vld [vmem:[%s1393_s6 + $0x21] sm:$0xff]  ;;  %v175_v21 = vld [vmem:[%s1393_s6 + $0x30] sm:$0xff] }
  0x14   : > { %1127 = vmatmul.msk.bf16.vlgmr.msra.gmra.mxu2 %vm207_vm0, %v304_v16  ;;  %v298_v22 = vld [vmem:[%s1393_s6 + $0x22] sm:$0xff]  ;;  %v299_v23 = vld [vmem:[%s1393_s6 + $0x32] sm:$0xff]  ;;  %v1415_v25 = vpack.c.bf16 %v189_v20, %v188_v19  ;;  %v1417_v26 = vpack.c.bf16 %v175_v21, %v1132_v17  ;;  %770 = vmatpush.bf16.msra.mxu0 %v1312_v40  ;;  %v445_v53 = vpack.c.bf16 %v188_v19, %v1397_v9 }
  0x15   : > { %1145 = vmatmul.msk.bf16.vlgmr.msra.gmra.mxu3 %vm207_vm0, %v375_v18  ;;  %v1134_v24 = vld [vmem:[%s1393_s6 + $0x40] sm:$0xff]  ;;  %v1419_v27 = vpack.c.bf16 %v299_v23, %v298_v22  ;;  %v191_v30 = vld [vmem:[%s1393_s6 + $0x51] sm:$0xff]  ;;  %911 = vmatpush.bf16.msra.mxu2 %v1314_v39  ;;  %v515_v54 = vpack.c.bf16 %v298_v22, %v297_v14 }
  0x16   : > { %v376_v28 = vpack.c.bf16 %v1134_v24, %v175_v21  ;;  %v190_v29 = vld [vmem:[%s1393_s6 + $0x41] sm:$0xff]  ;;  %v177_v31 = vld [vmem:[%s1393_s6 + $0x50] sm:$0xff]  ;;  %981 = vmatpush.bf16.msra.mxu3 %v1315_v41  ;;  %841 = vmatpush.bf16.msra.mxu1 %v1313_v42 }
  0x17   : > { %v300_v32 = vld [vmem:[%s1393_s6 + $0x42] sm:$0xff]  ;;  %v301_v33 = vld [vmem:[%s1393_s6 + $0x52] sm:$0xff]  ;;  %v1434_v35 = vpack.c.bf16 %v191_v30, %v190_v29  ;;  %v1436_v36 = vpack.c.bf16 %v177_v31, %v1134_v24  ;;  %v446_v55 = vpack.c.bf16 %v190_v29, %v189_v20 }
  0x18   : > { %v1136_v34 = vld [vmem:[%s1393_s6 + $0x60] sm:$0xff]  ;;  %v1438_v37 = vpack.c.bf16 %v301_v33, %v300_v32  ;;  %v193_v44 = vld [vmem:[%s1393_s6 + $0x71] sm:$0xff]  ;;  %v516_v56 = vpack.c.bf16 %v300_v32, %v299_v23 }
  0x19   : > { %v377_v38 = vpack.c.bf16 %v1136_v34, %v177_v31  ;;  %v192_v43 = vld [vmem:[%s1393_s6 + $0x61] sm:$0xff]  ;;  %v179_v45 = vld [vmem:[%s1393_s6 + $0x70] sm:$0xff] }
  0x1a   : > { %v302_v46 = vld [vmem:[%s1393_s6 + $0x62] sm:$0xff]  ;;  %v303_v47 = vld [vmem:[%s1393_s6 + $0x72] sm:$0xff]  ;;  %v197_v49 = vpack.c.bf16 %v193_v44, %v192_v43  ;;  %v183_v50 = vpack.c.bf16 %v179_v45, %v1136_v34  ;;  %v447_v57 = vpack.c.bf16 %v192_v43, %v191_v30 }
  0x1b   : > { %v1465_v48 = vld [vmem:[%s1393_s6 + $0x80] sm:$0xff]  ;;  %v307_v51 = vpack.c.bf16 %v303_v47, %v302_v46  ;;  %v517_v58 = vpack.c.bf16 %v302_v46, %v301_v33  ;;  %v1246_v21 = vld [vmem:[%s1393_s6 + $0x90] sm:$0xff] }
  0x1c   : > { %v378_v52 = vpack.c.bf16 %v1465_v48, %v179_v45  ;;  %v1156_v59 = vld [vmem:[%s1393_s6 + $0x81] sm:$0xff]  ;;  %v1264_v22 = vld [vmem:[%s1393_s6 + $0x91] sm:$0xff] }
  0x1d   : > { %v1174_v60 = vld [vmem:[%s1393_s6 + $0x82] sm:$0xff]  ;;  %v448_v61 = vpack.c.bf16 %v1156_v59, %v193_v44  ;;  %v1282_v23 = vld [vmem:[%s1393_s6 + $0x92] sm:$0xff]  ;;  %v1560_v44 = vld [vmem:[%s1694_s2] ss:$0 sm:$0xff] }
  0x1e   : > { %v518_v62 = vpack.c.bf16 %v1174_v60, %v303_v47  ;;  %v952_v30 = vpack.c.bf16 %v1282_v23, %v1174_v60 }
  0x22   : > { %1110 = vmatmul.msk.bf16.gmra.mxu0 %vm207_vm0, %v1415_v25 }
  0x23   : > { %1118 = vmatmul.msk.bf16.gmra.mxu1 %vm207_vm0, %v1417_v26 }
  0x24   : > { %1128 = vmatmul.msk.bf16.gmra.mxu2 %vm207_vm0, %v1419_v27 }
  0x25   : > { %1146 = vmatmul.msk.bf16.gmra.mxu3 %vm207_vm0, %v376_v28 }
  0x32   : > { %1111 = vmatmul.msk.bf16.gmra.mxu0 %vm207_vm0, %v1434_v35 }
  0x33   : > { %1119 = vmatmul.msk.bf16.gmra.mxu1 %vm207_vm0, %v1436_v36 }
  0x34   : > { %1129 = vmatmul.msk.bf16.gmra.mxu2 %vm207_vm0, %v1438_v37 }
  0x35   : > { %1147 = vmatmul.msk.bf16.gmra.mxu3 %vm207_vm0, %v377_v38 }
  0x42   : > { %1112 = vmatmul.msk.bf16.gmra.mxu0 %vm207_vm0, %v197_v49 }
  0x43   : > { %1120 = vmatmul.msk.bf16.gmra.mxu1 %vm207_vm0, %v183_v50 }
  0x44   : > { %1130 = vmatmul.msk.bf16.gmra.mxu2 %vm207_vm0, %v307_v51 }
  0x45   : > { %1148 = vmatmul.msk.bf16.gmra.mxu3 %vm207_vm0, %v378_v52 }
  0x52   : > { %1163 = vmatmul.msk.bf16.vlgmr.msrb.gmra.mxu0 %vm207_vm0, %v445_v53 }
  0x53   : > { %1181 = vmatmul.msk.bf16.vlgmr.msrb.gmra.mxu1 %vm207_vm0, %v515_v54 }
  0x54   : > { %1209 = vmatmul.msk.bf16.vlgmr.msrb.gmra.mxu2 %vm207_vm0, %v445_v53 }
  0x55   : > { %1217 = vmatmul.msk.bf16.vlgmr.msrb.gmra.mxu3 %vm207_vm0, %v375_v18 }
  0x62   : > { %1164 = vmatmul.msk.bf16.gmra.mxu0 %vm207_vm0, %v446_v55 }
  0x63   : > { %1182 = vmatmul.msk.bf16.gmra.mxu1 %vm207_vm0, %v516_v56 }
  0x64   : > { %1210 = vmatmul.msk.bf16.gmra.mxu2 %vm207_vm0, %v446_v55 }
  0x65   : > { %1218 = vmatmul.msk.bf16.gmra.mxu3 %vm207_vm0, %v376_v28  ;;  %v882_v28 = vpack.c.bf16 %v1264_v22, %v1156_v59 }
  0x72   : > { %1165 = vmatmul.msk.bf16.gmra.mxu0 %vm207_vm0, %v447_v57 }
  0x73   : > { %1183 = vmatmul.msk.bf16.gmra.mxu1 %vm207_vm0, %v517_v58 }
  0x74   : > { %1211 = vmatmul.msk.bf16.gmra.mxu2 %vm207_vm0, %v447_v57 }
  0x75   : > { %1219 = vmatmul.msk.bf16.gmra.mxu3 %vm207_vm0, %v377_v38 }
  0x82   : > { %1166 = vmatmul.msk.bf16.gmra.mxu0 %vm207_vm0, %v448_v61 }
  0x83   : > { %1184 = vmatmul.msk.bf16.gmra.mxu1 %vm207_vm0, %v518_v62 }
  0x84   : > { %1212 = vmatmul.msk.bf16.gmra.mxu2 %vm207_vm0, %v448_v61 }
  0x85   : > { %1220 = vmatmul.msk.bf16.gmra.mxu3 %vm207_vm0, %v378_v52 }
  0x8f   : > { %v229_v63 = vpop.f32.mrf.mxu0 }
  0x90   : > { %v276_v0 = vpop.f32.mrf.mxu1 }
  0x91   : > { %v277_v34 = vadd.f32 %v276_v0, %v229_v63 }
  0x92   : > { %1235 = vmatmul.msk.bf16.vlgmr.msra.gmra.mxu0 %vm207_vm0, %v515_v54 }
  0x93   : > { %1253 = vmatmul.msk.bf16.vlgmr.msra.gmra.mxu1 %vm207_vm0, %v1417_v26 }
  0x94   : > { %1271 = vmatmul.msk.bf16.vlgmr.msra.gmra.mxu2 %vm207_vm0, %v1415_v25 }
  0x95   : > { %1289 = vmatmul.msk.bf16.vlgmr.msra.gmra.mxu3 %vm207_vm0, %v1419_v27  ;;  %v812_v27 = vpack.c.bf16 %v1246_v21, %v1465_v48 }
  0x97   : > { %v338_v1 = vpop.f32.mrf.mxu2  ;;  %v231_v3 = vpop.f32.mrf.mxu0 }
  0x98   : > { %v409_v2 = vpop.f32.mrf.mxu3  ;;  %v278_v4 = vpop.f32.mrf.mxu1 }
  0x99   : > { %v279_v41 = vadd.f32 %v278_v4, %v231_v3 }
  0x9f   : > { %v340_v5 = vpop.f32.mrf.mxu2  ;;  %v234_v7 = vpop.f32.mrf.mxu0 }
  0xa0   : > { %v411_v6 = vpop.f32.mrf.mxu3  ;;  %v281_v8 = vpop.f32.mrf.mxu1  ;;  %v359_v45 = vadd.f32 %v340_v5, %v279_v41 }
  0xa1   : > { %v282_v53 = vadd.f32 %v281_v8, %v234_v7 }
  0xa2   : > { %1236 = vmatmul.msk.bf16.gmra.mxu0 %vm207_vm0, %v516_v56  ;;  %v430_v48 = vadd.f32 %v411_v6, %v359_v45 }
  0xa3   : > { %1254 = vmatmul.msk.bf16.gmra.mxu1 %vm207_vm0, %v1436_v36  ;;  %v358_v36 = vadd.f32 %v338_v1, %v277_v34 }
  0xa4   : > { %1272 = vmatmul.msk.bf16.gmra.mxu2 %vm207_vm0, %v1434_v35 }
  0xa5   : > { %1290 = vmatmul.msk.bf16.gmra.mxu3 %vm207_vm0, %v1438_v37  ;;  %v429_v37 = vadd.f32 %v409_v2, %v358_v36 }
  0xa7   : > { %v343_v9 = vpop.f32.mrf.mxu2  ;;  %v1505_v11 = vpop.f32.mrf.mxu0 }
  0xa8   : > { %v414_v10 = vpop.f32.mrf.mxu3  ;;  %v1507_v12 = vpop.f32.mrf.mxu1  ;;  %v360_v56 = vadd.f32 %v343_v9, %v282_v53 }
  0xa9   : > { %v284_v0 = vadd.f32 %v1507_v12, %v1505_v11 }
  0xaa   : > { %v431_v59 = vadd.f32 %v414_v10, %v360_v56 }
  0xaf   : > { %v1509_v13 = vpop.f32.mrf.mxu2  ;;  %v1513_v15 = vpop.f32.mrf.mxu0 }
  0xb0   : > { %v1511_v14 = vpop.f32.mrf.mxu3  ;;  %v1515_v16 = vpop.f32.mrf.mxu1  ;;  %v361_v3 = vadd.f32 %v1509_v13, %v284_v0 }
  0xb1   : > { %v287_v11 = vadd.f32 %v1515_v16, %v1513_v15 }
  0xb2   : > { %1237 = vmatmul.msk.bf16.gmra.mxu0 %vm207_vm0, %v517_v58  ;;  %v432_v6 = vadd.f32 %v1511_v14, %v361_v3 }
  0xb3   : > { %1255 = vmatmul.msk.bf16.gmra.mxu1 %vm207_vm0, %v183_v50 }
  0xb4   : > { %1273 = vmatmul.msk.bf16.gmra.mxu2 %vm207_vm0, %v197_v49 }
  0xb5   : > { %1291 = vmatmul.msk.bf16.gmra.mxu3 %vm207_vm0, %v307_v51 }
  0xb7   : > { %v1521_v17 = vpop.f32.mrf.mxu2  ;;  %v1525_v19 = vpop.f32.mrf.mxu0 }
  0xb8   : > { %v1523_v18 = vpop.f32.mrf.mxu3  ;;  %v1527_v20 = vpop.f32.mrf.mxu1  ;;  %v362_v13 = vadd.f32 %v1521_v17, %v287_v11 }
  0xb9   : > { %v289_v15 = vadd.f32 %v1527_v20, %v1525_v19 }
  0xba   : > { %v433_v14 = vadd.f32 %v1523_v18, %v362_v13 }
  0xbf   : > { %v1532_v24 = vpop.f32.mrf.mxu2  ;;  %v1536_v26 = vpop.f32.mrf.mxu0 }
  0xc0   : > { %v1534_v25 = vpop.f32.mrf.mxu3  ;;  %v1539_v29 = vpop.f32.mrf.mxu1  ;;  %v363_v17 = vadd.f32 %v1532_v24, %v289_v15 }
  0xc1   : > { %v292_v19 = vadd.f32 %v1539_v29, %v1536_v26 }
  0xc2   : > { %1238 = vmatmul.msk.bf16.gmra.mxu0 %vm207_vm0, %v518_v62  ;;  %v434_v18 = vadd.f32 %v1534_v25, %v363_v17 }
  0xc3   : > { %1256 = vmatmul.msk.bf16.gmra.mxu1 %vm207_vm0, %v812_v27 }
  0xc4   : > { %1274 = vmatmul.msk.bf16.gmra.mxu2 %vm207_vm0, %v882_v28 }
  0xc5   : > { %1292 = vmatmul.msk.bf16.gmra.mxu3 %vm207_vm0, %v952_v30 }
  0xc7   : > { %v1545_v31 = vpop.f32.mrf.mxu2  ;;  %v1549_v33 = vpop.f32.mrf.mxu0 }
  0xc8   : > { %v1547_v32 = vpop.f32.mrf.mxu3  ;;  %v1551_v35 = vpop.f32.mrf.mxu1  ;;  %v364_v24 = vadd.f32 %v1545_v31, %v292_v19 }
  0xc9   : > { %v294_v26 = vadd.f32 %v1551_v35, %v1549_v33 }
  0xca   : > { %v435_v25 = vadd.f32 %v1547_v32, %v364_v24 }
  0xcf   : > { %v1553_v38 = vpop.f32.mrf.mxu2  ;;  %v479_v40 = vpop.f32.mrf.mxu0 }
  0xd0   : > { %v1555_v39 = vpop.f32.mrf.mxu3  ;;  %v499_v42 = vadd.f32 %v479_v40, %v429_v37  ;;  %v549_v43 = vpop.f32.mrf.mxu1  ;;  %v365_v31 = vadd.f32 %v1553_v38, %v294_v26 }
  0xd2   : > { %v569_v46 = vadd.f32 %v549_v43, %v499_v42  ;;  %v436_v32 = vadd.f32 %v1555_v39, %v365_v31 }
  0xd4   : > { %v581_v47 = vadd.f32 %v1560_v44, %v569_v46 }
  0xd6   : > { %v589_v49 = vmax.f32 %v581_v47, 0.0 }
  0xd7   : > { %v1569_v50 = vpop.f32.mrf.mxu2  ;;  %v481_v52 = vpop.f32.mrf.mxu0 }
  0xd8   : > { %v1571_v51 = vpop.f32.mrf.mxu3  ;;  %598 = vst.msk [vmem:[%s1567_s22] sm:$0xff] %vm597_vm1, %v589_v49  ;;  %v500_v54 = vadd.f32 %v481_v52, %v430_v48  ;;  %v551_v55 = vpop.f32.mrf.mxu1 }
  0xd9   : > { %v711_v3 = vadd.f32 %v1571_v51, %v1569_v50 }
  0xda   : > { %v570_v57 = vadd.f32 %v551_v55, %v500_v54 }
  0xdc   : > { %v582_v58 = vadd.f32 %v1560_v44, %v570_v57 }
  0xde   : > { %v590_v60 = vmax.f32 %v582_v58, 0.0 }
  0xdf   : > { %v1576_v61 = vpop.f32.mrf.mxu2  ;;  %v484_v63 = vpop.f32.mrf.mxu0 }
  0xe0   : > { %v1578_v62 = vpop.f32.mrf.mxu3  ;;  %599 = vst.msk [vmem:[%s1567_s22 + $0x10] sm:$0xff] %vm597_vm1, %v590_v60  ;;  %v501_v1 = vadd.f32 %v484_v63, %v431_v59  ;;  %v554_v2 = vpop.f32.mrf.mxu1 }
  0xe1   : > { %v713_v11 = vadd.f32 %v1578_v62, %v1576_v61 }
  0xe2   : > { %v571_v4 = vadd.f32 %v554_v2, %v501_v1 }
  0xe4   : > { %v583_v5 = vadd.f32 %v1560_v44, %v571_v4 }
  0xe6   : > { %v591_v7 = vmax.f32 %v583_v5, 0.0 }
  0xe7   : > { %v1587_v8 = vpop.f32.mrf.mxu2  ;;  %v486_v10 = vpop.f32.mrf.mxu0 }
  0xe8   : > { %v1589_v9 = vpop.f32.mrf.mxu3  ;;  %600 = vst.msk [vmem:[%s1567_s22 + $0x20] sm:$0xff] %vm597_vm1, %v591_v7  ;;  %v502_v12 = vadd.f32 %v486_v10, %v432_v6  ;;  %v556_v21 = vpop.f32.mrf.mxu1 }
  0xe9   : > { %v716_v61 = vadd.f32 %v1589_v9, %v1587_v8 }
  0xea   : > { %v572_v22 = vadd.f32 %v556_v21, %v502_v12  ;;  %v1651_v21 = vld [vmem:[%s1694_s2] ss:$0 sm:$0xff] }
  0xec   : > { %v584_v23 = vadd.f32 %v1560_v44, %v572_v22 }
  0xee   : > { %v592_v27 = vmax.f32 %v584_v23, 0.0 }
  0xef   : > { %v1598_v28 = vpop.f32.mrf.mxu2  ;;  %v489_v34 = vpop.f32.mrf.mxu0 }
  0xf0   : > { %v1600_v30 = vpop.f32.mrf.mxu3  ;;  %601 = vst.msk [vmem:[%s1567_s22 + $0x30] sm:$0xff] %vm597_vm1, %v592_v27  ;;  %v503_v16 = vadd.f32 %v489_v34, %v433_v14  ;;  %v559_v36 = vpop.f32.mrf.mxu1 }
  0xf1   : > { %v718_v19 = vadd.f32 %v1600_v30, %v1598_v28 }
  0xf2   : > { %v573_v37 = vadd.f32 %v559_v36, %v503_v16 }
  0xf4   : > { %v585_v40 = vadd.f32 %v1560_v44, %v573_v37 }
  0xf6   : > { %v593_v41 = vmax.f32 %v585_v40, 0.0 }
  0xf7   : > { %v1609_v42 = vpop.f32.mrf.mxu2  ;;  %v491_v45 = vpop.f32.mrf.mxu0 }
  0xf8   : > { %v1611_v43 = vpop.f32.mrf.mxu3  ;;  %602 = vst.msk [vmem:[%s1567_s22 + $0x40] sm:$0xff] %vm597_vm1, %v593_v41  ;;  %v504_v20 = vadd.f32 %v491_v45, %v434_v18  ;;  %v561_v46 = vpop.f32.mrf.mxu1 }
  0xf9   : > { %v721_v26 = vadd.f32 %v1611_v43, %v1609_v42 }
  0xfa   : > { %v574_v47 = vadd.f32 %v561_v46, %v504_v20 }
  0xfc   : > { %v586_v48 = vadd.f32 %v1560_v44, %v574_v47 }
  0xfe   : > { %v594_v49 = vmax.f32 %v586_v48, 0.0 }
  0xff   : > { %v1620_v52 = vpop.f32.mrf.mxu2  ;;  %v494_v54 = vpop.f32.mrf.mxu0 }
 0x100   : > { %v1622_v53 = vpop.f32.mrf.mxu3  ;;  %603 = vst.msk [vmem:[%s1567_s22 + $0x50] sm:$0xff] %vm597_vm1, %v594_v49  ;;  %v505_v29 = vadd.f32 %v494_v54, %v435_v25  ;;  %v564_v55 = vpop.f32.mrf.mxu1 }
 0x102   : > { %v575_v56 = vadd.f32 %v564_v55, %v505_v29 }
 0x104   : > { %v587_v57 = vadd.f32 %v1560_v44, %v575_v56 }
 0x106   : > { %v595_v58 = vmax.f32 %v587_v57, 0.0 }
 0x107   : > { %v1631_v59 = vpop.f32.mrf.mxu2  ;;  %v496_v63 = vpop.f32.mrf.mxu0 }
 0x108   : > { %v1633_v60 = vpop.f32.mrf.mxu3  ;;  %604 = vst.msk [vmem:[%s1567_s22 + $0x60] sm:$0xff] %vm597_vm1, %v595_v58  ;;  %v506_v33 = vadd.f32 %v496_v63, %v436_v32  ;;  %v566_v35 = vpop.f32.mrf.mxu1 }
 0x10a   : > { %v576_v0 = vadd.f32 %v566_v35, %v506_v33  ;;  %v723_v33 = vadd.f32 %v1622_v53, %v1620_v52 }
 0x10c   : > { %v588_v1 = vadd.f32 %v1560_v44, %v576_v0 }
 0x10e   : > { %v596_v38 = vmax.f32 %v588_v1, 0.0 }
 0x10f   : > { %v1638_v2 = vpop.f32.mrf.mxu2  ;;  %v772_v4 = vpop.f32.mrf.mxu0 }
 0x110   : > { %v1642_v39 = vpop.f32.mrf.mxu3  ;;  %605 = vst.msk [vmem:[%s1567_s22 + $0x70] sm:$0xff] %vm597_vm1, %v596_v38  ;;  %v843_v5 = vpop.f32.mrf.mxu1  ;;  %v792_v6 = vadd.f32 %v772_v4, %v711_v3 }
 0x112   : > { %v863_v7 = vadd.f32 %v843_v5, %v792_v6 }
 0x117   : > { %v913_v10 = vpop.f32.mrf.mxu2  ;;  %v774_v50 = vpop.f32.mrf.mxu0 }
 0x118   : > { %v933_v44 = vadd.f32 %v913_v10, %v863_v7  ;;  %v983_v12 = vpop.f32.mrf.mxu3  ;;  %v845_v51 = vpop.f32.mrf.mxu1  ;;  %v793_v22 = vadd.f32 %v774_v50, %v713_v11  ;;  %v726_v7 = vadd.f32 %v1633_v60, %v1631_v59 }
 0x11a   : > { %v1003_v13 = vadd.f32 %v983_v12, %v933_v44  ;;  %v864_v27 = vadd.f32 %v845_v51, %v793_v22 }
 0x11c   : > { %v1015_v23 = vadd.f32 %v1651_v21, %v1003_v13 }
 0x11e   : > { %v1023_v14 = vmax.f32 %v1015_v23, 0.0  ;;  %v728_v23 = vadd.f32 %v1642_v39, %v1638_v2 }
 0x11f   : > { %v915_v34 = vpop.f32.mrf.mxu2  ;;  %v777_v16 = vpop.f32.mrf.mxu0 }
 0x120   : > { %1293 = vst.msk [vmem:[%s1567_s22 + $0x8] sm:$0xff] %vm597_vm1, %v1023_v14  ;;  %v934_v62 = vadd.f32 %v915_v34, %v864_v27  ;;  %v985_v15 = vpop.f32.mrf.mxu3  ;;  %v848_v36 = vpop.f32.mrf.mxu1  ;;  %v794_v37 = vadd.f32 %v777_v16, %v716_v61 }
 0x122   : > { %v1004_v17 = vadd.f32 %v985_v15, %v934_v62  ;;  %v865_v41 = vadd.f32 %v848_v36, %v794_v37 }
 0x124   : > { %v1016_v40 = vadd.f32 %v1651_v21, %v1004_v17 }
 0x126   : > { %v1024_v18 = vmax.f32 %v1016_v40, 0.0 }
 0x127   : > { %v918_v45 = vpop.f32.mrf.mxu2  ;;  %v779_v20 = vpop.f32.mrf.mxu0 }
 0x128   : > { %1294 = vst.msk [vmem:[%s1567_s22 + $0x18] sm:$0xff] %vm597_vm1, %v1024_v18  ;;  %v935_v8 = vadd.f32 %v918_v45, %v865_v41  ;;  %v988_v9 = vpop.f32.mrf.mxu3  ;;  %v850_v46 = vpop.f32.mrf.mxu1  ;;  %v795_v47 = vadd.f32 %v779_v20, %v718_v19 }
 0x12a   : > { %v1005_v24 = vadd.f32 %v988_v9, %v935_v8  ;;  %v866_v49 = vadd.f32 %v850_v46, %v795_v47 }
 0x12c   : > { %v1017_v48 = vadd.f32 %v1651_v21, %v1005_v24 }
 0x12e   : > { %v1025_v25 = vmax.f32 %v1017_v48, 0.0 }
 0x12f   : > { %v920_v54 = vpop.f32.mrf.mxu2  ;;  %v782_v29 = vpop.f32.mrf.mxu0 }
 0x130   : > { %1295 = vst.msk [vmem:[%s1567_s22 + $0x28] sm:$0xff] %vm597_vm1, %v1025_v25  ;;  %v936_v28 = vadd.f32 %v920_v54, %v866_v49  ;;  %v990_v30 = vpop.f32.mrf.mxu3  ;;  %v853_v55 = vpop.f32.mrf.mxu1  ;;  %v796_v56 = vadd.f32 %v782_v29, %v721_v26 }
 0x132   : > { %v1006_v31 = vadd.f32 %v990_v30, %v936_v28  ;;  %v867_v58 = vadd.f32 %v853_v55, %v796_v56 }
 0x134   : > { %v1018_v57 = vadd.f32 %v1651_v21, %v1006_v31 }
 0x136   : > { %v1026_v32 = vmax.f32 %v1018_v57, 0.0 }
 0x137   : > { %v923_v63 = vpop.f32.mrf.mxu2  ;;  %v784_v35 = vpop.f32.mrf.mxu0 }
 0x138   : > { %1296 = vst.msk [vmem:[%s1567_s22 + $0x38] sm:$0xff] %vm597_vm1, %v1026_v32  ;;  %v937_v42 = vadd.f32 %v923_v63, %v867_v58  ;;  %v993_v43 = vpop.f32.mrf.mxu3  ;;  %v855_v0 = vpop.f32.mrf.mxu1  ;;  %v797_v38 = vadd.f32 %v784_v35, %v723_v33 }
 0x13a   : > { %v1007_v1 = vadd.f32 %v993_v43, %v937_v42  ;;  %v868_v5 = vadd.f32 %v855_v0, %v797_v38 }
 0x13c   : > { %v1019_v3 = vadd.f32 %v1651_v21, %v1007_v1 }
 0x13e   : > { %v1027_v4 = vmax.f32 %v1019_v3, 0.0 }
 0x13f   : > { %v925_v6 = vpop.f32.mrf.mxu2  ;;  %v787_v10 = vpop.f32.mrf.mxu0 }
 0x140   : > { %1297 = vst.msk [vmem:[%s1567_s22 + $0x48] sm:$0xff] %vm597_vm1, %v1027_v4  ;;  %v938_v52 = vadd.f32 %v925_v6, %v868_v5  ;;  %v995_v53 = vpop.f32.mrf.mxu3  ;;  %v798_v44 = vadd.f32 %v787_v10, %v726_v7  ;;  %v858_v12 = vpop.f32.mrf.mxu1 }
 0x142   : > { %v1008_v11 = vadd.f32 %v995_v53, %v938_v52  ;;  %v869_v13 = vadd.f32 %v858_v12, %v798_v44 }
 0x144   : > { %v1020_v50 = vadd.f32 %v1651_v21, %v1008_v11 }
 0x146   : > { %v1028_v51 = vmax.f32 %v1020_v50, 0.0 }
 0x147   : > { %v928_v22 = vpop.f32.mrf.mxu2  ;;  %v789_v14 = vpop.f32.mrf.mxu0 }
 0x148   : > { %1298 = vst.msk [vmem:[%s1567_s22 + $0x58] sm:$0xff] %vm597_vm1, %v1028_v51  ;;  %v939_v59 = vadd.f32 %v928_v22, %v869_v13  ;;  %v998_v60 = vpop.f32.mrf.mxu3  ;;  %v799_v34 = vadd.f32 %v789_v14, %v728_v23  ;;  %v860_v62 = vpop.f32.mrf.mxu1 }
 0x14a   : > { %v1009_v27 = vadd.f32 %v998_v60, %v939_v59  ;;  %v870_v16 = vadd.f32 %v860_v62, %v799_v34 }
 0x14c   : > { %v1021_v61 = vadd.f32 %v1651_v21, %v1009_v27 }
 0x14e   : > { %v1029_v15 = vmax.f32 %v1021_v61, 0.0 }
 0x14f   : > { %v930_v36 = vpop.f32.mrf.mxu2 }
 0x150   : > { %1299 = vst.msk [vmem:[%s1567_s22 + $0x68] sm:$0xff] %vm597_vm1, %v1029_v15  ;;  %v940_v17 = vadd.f32 %v930_v36, %v870_v16  ;;  %v1000_v37 = vpop.f32.mrf.mxu3 }
 0x152   : > { %v1010_v40 = vadd.f32 %v1000_v37, %v940_v17 }
 0x154   : > { %v1022_v2 = vadd.f32 %v1651_v21, %v1010_v40 }
 0x156   : > { %v1030_v39 = vmax.f32 %v1022_v2, 0.0 }
 0x158   : > { %1300 = vst.msk [vmem:[%s1567_s22 + $0x78] sm:$0xff] %vm597_vm1, %v1030_v39 }
 0x159 PF: > { %s13_s12 = sadd.s32 1, %s1333_s12  }
 0x15a   : > { %p10_p4 = scmp.ge.s32.totalorder %s13_s12, 4  }
 0x15c   :  { %12 = sbr.rel (!%p10_p4) target bundleno = 1 (0x1), region = 76 }

// kernel: conv2d_decoder_forward.19
= control target key start
LH: loop header
LB: loop body
LE: loop exit
PB: predicated region body
PF: predicated region fallthrough
CT: control target
= control target key end

     0   :  { %s142_s0 = inlined_call_operand.vmem [shape: f32[64,128], index: 0, kind: input, shape index: {}]   ;;  %s143_s1 = inlined_call_operand.vmem [shape: f32[1,128], index: 1, kind: input, shape index: {}]   ;;  %s144_s2 = inlined_call_operand.vmem [shape: f32[1,128], index: 2, kind: input, shape index: {}]   ;;  %s145_s3 = inlined_call_operand.vmem [shape: f32[64,128], index: 3, kind: output, shape index: {}]  }
   0x1   :  { %v14_v0 = vld [vmem:[%s142_s0] sm:$0xff]  ;;  %v15_v3 = vld [vmem:[%s142_s0 + $0x8] sm:$0xff]  ;;  %v16_v6 = vld [vmem:[%s142_s0 + $0x10] sm:$0xff] }
   0x2   :  { %v66_v1 = vld [vmem:[%s143_s1] ss:$0 sm:$0xff]  ;;  %v17_v7 = vld [vmem:[%s142_s0 + $0x18] sm:$0xff]  ;;  %v19_v12 = vld [vmem:[%s142_s0 + $0x28] sm:$0xff] }
   0x3   :  { %v67_v2 = vld [vmem:[%s144_s2] ss:$0 sm:$0xff]  ;;  %v26_v4 = vmul.f32 %v66_v1, %v14_v0  ;;  %v27_v5 = vmul.f32 %v66_v1, %v15_v3  ;;  %v28_v9 = vmul.f32 %v66_v1, %v16_v6  ;;  %v29_v10 = vmul.f32 %v66_v1, %v17_v7  ;;  %v20_v13 = vld [vmem:[%s142_s0 + $0x30] sm:$0xff]  ;;  %v21_v14 = vld [vmem:[%s142_s0 + $0x38] sm:$0xff] }
   0x4   :  { %v18_v8 = vld [vmem:[%s142_s0 + $0x20] sm:$0xff]  ;;  %v31_v17 = vmul.f32 %v66_v1, %v19_v12  ;;  %v32_v18 = vmul.f32 %v66_v1, %v20_v13  ;;  %v33_v22 = vmul.f32 %v66_v1, %v21_v14 }
   0x5   :  { %v30_v11 = vmul.f32 %v66_v1, %v18_v8  ;;  %v38_v15 = vadd.f32 %v67_v2, %v26_v4  ;;  %v39_v16 = vadd.f32 %v67_v2, %v27_v5  ;;  %v40_v19 = vadd.f32 %v67_v2, %v28_v9 }
   0x6   :  { %v41_v20 = vadd.f32 %v67_v2, %v29_v10  ;;  %v43_v25 = vadd.f32 %v67_v2, %v31_v17  ;;  %v44_v26 = vadd.f32 %v67_v2, %v32_v18  ;;  %v45_v29 = vadd.f32 %v67_v2, %v33_v22 }
   0x7   :  { %v42_v21 = vadd.f32 %v67_v2, %v30_v11  ;;  %v46_v23 = vmax.f32 %v38_v15, 0.0  ;;  %v47_v24 = vmax.f32 %v39_v16, 0.0  ;;  %v48_v27 = vmax.f32 %v40_v19, 0.0 }
   0x8   :  { %v49_v28 = vmax.f32 %v41_v20, 0.0  ;;  %v51_v31 = vmax.f32 %v43_v25, 0.0  ;;  %v52_v32 = vmax.f32 %v44_v26, 0.0  ;;  %v53_v33 = vmax.f32 %v45_v29, 0.0 }
   0x9   :  { %54 = vst [vmem:[%s145_s3] sm:$0xff] %v46_v23  ;;  %v50_v30 = vmax.f32 %v42_v21, 0.0 }
   0xa   :  { %55 = vst [vmem:[%s145_s3 + $0x8] sm:$0xff] %v47_v24 }
   0xb   :  { %56 = vst [vmem:[%s145_s3 + $0x10] sm:$0xff] %v48_v27 }
   0xc   :  { %57 = vst [vmem:[%s145_s3 + $0x18] sm:$0xff] %v49_v28 }
   0xd   :  { %58 = vst [vmem:[%s145_s3 + $0x20] sm:$0xff] %v50_v30 }
   0xe   :  { %59 = vst [vmem:[%s145_s3 + $0x28] sm:$0xff] %v51_v31 }
   0xf   :  { %60 = vst [vmem:[%s145_s3 + $0x30] sm:$0xff] %v52_v32 }
  0x10   :  { %61 = vst [vmem:[%s145_s3 + $0x38] sm:$0xff] %v53_v33 }

// kernel: conv2d_decoder_forward.21
= control target key start
LH: loop header
LB: loop body
LE: loop exit
PB: predicated region body
PF: predicated region fallthrough
CT: control target
= control target key end

     0   :  { %s190_s0 = inlined_call_operand.vmem [shape: f32[64,128], index: 0, kind: input, shape index: {}]   ;;  %s191_s1 = inlined_call_operand.vmem [shape: f32[1,128], index: 1, kind: input, shape index: {}]   ;;  %s192_s2 = inlined_call_operand.vmem [shape: f32[1,128], index: 2, kind: input, shape index: {}]   ;;  %s193_s3 = inlined_call_operand.vmem [shape: f32[64,128], index: 3, kind: input, shape index: {}]   ;;  %s194_s4 = inlined_call_operand.vmem [shape: f32[64,128], index: 4, kind: output, shape index: {}]  }
   0x1   :  { %v17_v0 = vld [vmem:[%s190_s0] sm:$0xff]  ;;  %v18_v4 = vld [vmem:[%s190_s0 + $0x8] sm:$0xff]  ;;  %v19_v5 = vld [vmem:[%s190_s0 + $0x10] sm:$0xff] }
   0x2   :  { %v85_v1 = vld [vmem:[%s191_s1] ss:$0 sm:$0xff]  ;;  %v50_v8 = vld [vmem:[%s193_s3 + $0x8] sm:$0xff]  ;;  %v20_v10 = vld [vmem:[%s190_s0 + $0x18] sm:$0xff] }
   0x3   :  { %v86_v2 = vld [vmem:[%s192_s2] ss:$0 sm:$0xff]  ;;  %v29_v3 = vmul.f32 %v85_v1, %v17_v0  ;;  %v30_v7 = vmul.f32 %v85_v1, %v18_v4  ;;  %v31_v9 = vmul.f32 %v85_v1, %v19_v5  ;;  %v51_v12 = vld [vmem:[%s193_s3 + $0x10] sm:$0xff]  ;;  %v32_v13 = vmul.f32 %v85_v1, %v20_v10  ;;  %v22_v15 = vld [vmem:[%s190_s0 + $0x28] sm:$0xff] }
   0x4   :  { %v49_v6 = vld [vmem:[%s193_s3] sm:$0xff]  ;;  %v52_v18 = vld [vmem:[%s193_s3 + $0x18] sm:$0xff]  ;;  %v34_v20 = vmul.f32 %v85_v1, %v22_v15  ;;  %v23_v21 = vld [vmem:[%s190_s0 + $0x30] sm:$0xff] }
   0x5   :  { %v41_v11 = vadd.f32 %v86_v2, %v29_v3  ;;  %v21_v14 = vld [vmem:[%s190_s0 + $0x20] sm:$0xff]  ;;  %v42_v16 = vadd.f32 %v86_v2, %v30_v7  ;;  %v43_v17 = vadd.f32 %v86_v2, %v31_v9  ;;  %v44_v23 = vadd.f32 %v86_v2, %v32_v13  ;;  %v54_v25 = vld [vmem:[%s193_s3 + $0x28] sm:$0xff]  ;;  %v24_v27 = vld [vmem:[%s190_s0 + $0x38] sm:$0xff] }
   0x6   :  { %v33_v19 = vmul.f32 %v85_v1, %v21_v14  ;;  %v53_v24 = vld [vmem:[%s193_s3 + $0x20] sm:$0xff]  ;;  %v35_v26 = vmul.f32 %v85_v1, %v23_v21  ;;  %v46_v31 = vadd.f32 %v86_v2, %v34_v20  ;;  %v55_v32 = vld [vmem:[%s193_s3 + $0x30] sm:$0xff]  ;;  %v36_v36 = vmul.f32 %v85_v1, %v24_v27  ;;  %v56_v41 = vld [vmem:[%s193_s3 + $0x38] sm:$0xff] }
   0x7   :  { %v57_v22 = vadd.f32 %v49_v6, %v41_v11  ;;  %v58_v28 = vadd.f32 %v50_v8, %v42_v16  ;;  %v59_v29 = vadd.f32 %v51_v12, %v43_v17  ;;  %v60_v34 = vadd.f32 %v52_v18, %v44_v23 }
   0x8   :  { %v45_v30 = vadd.f32 %v86_v2, %v33_v19  ;;  %v47_v35 = vadd.f32 %v86_v2, %v35_v26  ;;  %v62_v40 = vadd.f32 %v54_v25, %v46_v31  ;;  %v48_v44 = vadd.f32 %v86_v2, %v36_v36 }
   0x9   :  { %v65_v33 = vmax.f32 %v57_v22, 0.0  ;;  %v66_v37 = vmax.f32 %v58_v28, 0.0  ;;  %v67_v38 = vmax.f32 %v59_v29, 0.0  ;;  %v68_v42 = vmax.f32 %v60_v34, 0.0 }
   0xa   :  { %v61_v39 = vadd.f32 %v53_v24, %v45_v30  ;;  %v63_v43 = vadd.f32 %v55_v32, %v47_v35  ;;  %v70_v46 = vmax.f32 %v62_v40, 0.0  ;;  %v64_v48 = vadd.f32 %v56_v41, %v48_v44 }
   0xb   :  { %73 = vst [vmem:[%s194_s4] sm:$0xff] %v65_v33 }
   0xc   :  { %74 = vst [vmem:[%s194_s4 + $0x8] sm:$0xff] %v66_v37  ;;  %v69_v45 = vmax.f32 %v61_v39, 0.0  ;;  %v71_v47 = vmax.f32 %v63_v43, 0.0  ;;  %v72_v49 = vmax.f32 %v64_v48, 0.0 }
   0xd   :  { %75 = vst [vmem:[%s194_s4 + $0x10] sm:$0xff] %v67_v38 }
   0xe   :  { %76 = vst [vmem:[%s194_s4 + $0x18] sm:$0xff] %v68_v42 }
   0xf   :  { %77 = vst [vmem:[%s194_s4 + $0x20] sm:$0xff] %v69_v45 }
  0x10   :  { %78 = vst [vmem:[%s194_s4 + $0x28] sm:$0xff] %v70_v46 }
  0x11   :  { %79 = vst [vmem:[%s194_s4 + $0x30] sm:$0xff] %v71_v47 }
  0x12   :  { %80 = vst [vmem:[%s194_s4 + $0x38] sm:$0xff] %v72_v49 }

// kernel: conv2d_decoder_forward.18
= control target key start
LH: loop header
LB: loop body
LE: loop exit
PB: predicated region body
PF: predicated region fallthrough
CT: control target
= control target key end

     0   :  { %s2951_s15 = smov 0   ;;  %s3812_s0 = inlined_call_operand.vmem [shape: f32[2,18,18,16], index: 0, kind: input, shape index: {}]   ;;  %s3813_s1 = inlined_call_operand.vmem [shape: bf16[9,16,16], index: 1, kind: input, shape index: {}]   ;;  %s3814_s2 = inlined_call_operand.vmem [shape: f32[2,16,16,16], index: 2, kind: output, shape index: {0}]   ;;  %s3815_s3 = inlined_call_operand.vmem [shape: f32[2,1,16], index: 3, kind: output, shape index: {1}]   ;;  %s3816_s4 = inlined_call_operand.vmem [shape: f32[2,1,16], index: 4, kind: output, shape index: {2}]  }
   0x1 LB: > { %s2498_s16 = sadd.s32 4294967295, %s2924_s15   ;;  %p2502_p0 = scmp.ge.s32.totalorder %s2924_s15, 1  ;;  %s2924_s15 = sphi %s2951_s15, %s15_s15  }
   0x2   : > { %p167_p1 = scmp.lt.s32.totalorder %s2924_s15, 3 }
   0x4   : > { %p168_p2 = pnand %p2502_p0, %p167_p1 }
   0x6   : > { %171 = sbr.rel (%p168_p2) target bundleno = 745 (0x2e9), region = 28 }
   0xb   : > { %v2898_v0 = vld [vmem:[%s3813_s1 + $0x8] sm:$0xff]  ;;  %p199_p3 = scmp.lt.s32.totalorder %s2498_s16, 1  ;;  %v2899_v1 = vld [vmem:[%s3813_s1 + $0x10] sm:$0xff]  ;;  %v2900_v2 = vld [vmem:[%s3813_s1 + $0x18] sm:$0xff]  ;;  %vm323_vm0 = vcmask 130048   ;;  %vm2289_vm1 = vcmask 122880  }
   0xc   : > { %v2897_v3 = vld [vmem:[%s3813_s1] sm:$0xff]  ;;  %2906 = vmatpush.bf16.msra.mxu1 %v2898_v0  ;;  %2907 = vmatpush.bf16.msra.mxu2 %v2898_v0  ;;  %v2903_v41 = vld [vmem:[%s3813_s1 + $0x30] sm:$0xff]  ;;  %v2904_v42 = vld [vmem:[%s3813_s1 + $0x38] sm:$0xff] }
   0xd   : > { %v2901_v4 = vld [vmem:[%s3813_s1 + $0x20] sm:$0xff]  ;;  %s3860_s16 = smov (!%p199_p3, %s2498_s16), 1  ;;  %2908 = vmatpush.bf16.msra.mxu3 %v2898_v0  ;;  %379 = vmatpush.bf16.msra.mxu0 %v2898_v0  ;;  %v2902_v43 = vld [vmem:[%s3813_s1 + $0x28] sm:$0xff] }
   0xe   : > { %s2909_s27 = smul.u32 432, %s3860_s16  ;;  %v2905_v44 = vld [vmem:[%s3813_s1 + $0x40] sm:$0xff]  ;;  %s2896_s13 = sshll.u32 %s3860_s16, 8 }
   0xf   : > { %s3571_s18 = scalar_lea.vmem %s3814_s2, %s2896_s13  ;;  %s211_s21 = scalar_lea.vmem %s3815_s3, %s3860_s16 }
  0x10   : > { %716 = vmatpush.bf16.msrb.mxu2 %v2899_v1  ;;  %522 = vmatpush.bf16.msrb.mxu1 %v2897_v3  ;;  %s2980_s30 = scalar_lea.vmem %s3812_s0, %s2909_s27  ;;  %s214_s24 = scalar_lea.vmem %s3816_s4, %s3860_s16 }
  0x11   : > { %943 = vmatpush.bf16.msrb.mxu3 %v2900_v2  ;;  %1169 = vmatpush.bf16.msrb.mxu0 %v2901_v4  ;;  %v274_v5 = vld [vmem:[%s2980_s30 + $0x61] sm:$0xff]  ;;  %v275_v6 = vld [vmem:[%s2980_s30 + $0x69] sm:$0xff]  ;;  %v276_v17 = vld [vmem:[%s2980_s30 + $0x79] sm:$0xff] }
  0x12   : > { %v282_v7 = vld [vmem:[%s2980_s30 + $0xc1] sm:$0xff]  ;;  %v2985_v8 = vpack.c.bf16 %v275_v6, %v274_v5  ;;  %v283_v9 = vld [vmem:[%s2980_s30 + $0xc9] sm:$0xff]  ;;  %v284_v19 = vld [vmem:[%s2980_s30 + $0xd9] sm:$0xff] }
  0x13   : > { %v290_v10 = vld [vmem:[%s2980_s30 + $0x121] sm:$0xff]  ;;  %v291_v11 = vld [vmem:[%s2980_s30 + $0x129] sm:$0xff]  ;;  %v2990_v12 = vpack.c.bf16 %v283_v9, %v282_v7  ;;  %v292_v21 = vld [vmem:[%s2980_s30 + $0x139] sm:$0xff] }
  0x14   : > { %v2992_v13 = vpack.c.bf16 %v291_v11, %v290_v10  ;;  %v266_v14 = vld [vmem:[%s2980_s30 + $0x1] sm:$0xff]  ;;  %v267_v15 = vld [vmem:[%s2980_s30 + $0x9] sm:$0xff]  ;;  %2516 = vmatmul.msk.bf16.vlgmr.msra.gmra.mxu1 %vm323_vm0, %v2985_v8  ;;  %v268_v23 = vld [vmem:[%s2980_s30 + $0x19] sm:$0xff] }
  0x15   : > { %v298_v16 = vpack.c.bf16 %v267_v15, %v266_v14  ;;  %2520 = vmatmul.msk.bf16.vlgmr.msra.gmra.mxu2 %vm323_vm0, %v2990_v12  ;;  %v277_v18 = vld [vmem:[%s2980_s30 + $0x81] sm:$0xff]  ;;  %v278_v29 = vld [vmem:[%s2980_s30 + $0x91] sm:$0xff]  ;;  %v279_v30 = vld [vmem:[%s2980_s30 + $0x99] sm:$0xff]  ;;  %1395 = vmatpush.bf16.msra.mxu1 %v2902_v43 }
  0x16   : > { %2524 = vmatmul.msk.bf16.vlgmr.msra.gmra.mxu3 %vm323_vm0, %v2992_v13  ;;  %v285_v20 = vld [vmem:[%s2980_s30 + $0xe1] sm:$0xff]  ;;  %v3011_v25 = vpack.c.bf16 %v277_v18, %v276_v17  ;;  %v286_v31 = vld [vmem:[%s2980_s30 + $0xf1] sm:$0xff]  ;;  %v287_v32 = vld [vmem:[%s2980_s30 + $0xf9] sm:$0xff]  ;;  %v3032_v37 = vpack.c.bf16 %v279_v30, %v278_v29  ;;  %1622 = vmatpush.bf16.msra.mxu2 %v2903_v41 }
  0x17   : > { %2512 = vmatmul.msk.bf16.vlgmr.msra.gmra.mxu0 %vm323_vm0, %v298_v16  ;;  %v293_v22 = vld [vmem:[%s2980_s30 + $0x141] sm:$0xff]  ;;  %v3013_v26 = vpack.c.bf16 %v285_v20, %v284_v19  ;;  %v294_v33 = vld [vmem:[%s2980_s30 + $0x151] sm:$0xff]  ;;  %v295_v34 = vld [vmem:[%s2980_s30 + $0x159] sm:$0xff]  ;;  %v3034_v38 = vpack.c.bf16 %v287_v32, %v286_v31  ;;  %1848 = vmatpush.bf16.msra.mxu3 %v2904_v42 }
  0x18   : > { %v269_v24 = vld [vmem:[%s2980_s30 + $0x21] sm:$0xff]  ;;  %v3015_v27 = vpack.c.bf16 %v293_v22, %v292_v21  ;;  %v270_v35 = vld [vmem:[%s2980_s30 + $0x31] sm:$0xff]  ;;  %v271_v36 = vld [vmem:[%s2980_s30 + $0x39] sm:$0xff]  ;;  %v3036_v39 = vpack.c.bf16 %v295_v34, %v294_v33  ;;  %2074 = vmatpush.bf16.msra.mxu0 %v2905_v44 }
  0x19   : > { %v299_v28 = vpack.c.bf16 %v269_v24, %v268_v23  ;;  %v3038_v40 = vpack.c.bf16 %v271_v36, %v270_v35  ;;  %v280_v45 = vld [vmem:[%s2980_s30 + $0xa9] sm:$0xff]  ;;  %v281_v46 = vld [vmem:[%s2980_s30 + $0xb1] sm:$0xff]  ;;  %v216_v57 = vld [vmem:[%s2980_s30] sm:$0xff] }
  0x1a   : > { %v288_v47 = vld [vmem:[%s2980_s30 + $0x109] sm:$0xff]  ;;  %v289_v48 = vld [vmem:[%s2980_s30 + $0x111] sm:$0xff]  ;;  %v3068_v53 = vpack.c.bf16 %v281_v46, %v280_v45  ;;  %v2571_v62 = vld [vmem:[%s2980_s30 + $0x20] sm:$0xff] }
  0x1b   : > { %v296_v49 = vld [vmem:[%s2980_s30 + $0x169] sm:$0xff]  ;;  %v297_v50 = vld [vmem:[%s2980_s30 + $0x171] sm:$0xff]  ;;  %v3070_v54 = vpack.c.bf16 %v289_v48, %v288_v47  ;;  %v606_v2 = vld [vmem:[%s2980_s30 + $0x1a] sm:$0xff] }
  0x1c   : > { %v272_v51 = vld [vmem:[%s2980_s30 + $0x49] sm:$0xff]  ;;  %v273_v52 = vld [vmem:[%s2980_s30 + $0x51] sm:$0xff]  ;;  %v3072_v55 = vpack.c.bf16 %v297_v50, %v296_v49  ;;  %v609_v10 = vld [vmem:[%s2980_s30 + $0x3a] sm:$0xff] }
  0x1d   : > { %v3074_v56 = vpack.c.bf16 %v273_v52, %v272_v51  ;;  %v217_v58 = vld [vmem:[%s2980_s30 + $0x8] sm:$0xff]  ;;  %v2570_v61 = vld [vmem:[%s2980_s30 + $0x18] sm:$0xff]  ;;  %v2572_v4 = vld [vmem:[%s2980_s30 + $0x30] sm:$0xff] }
  0x1e   : > { %v604_v59 = vld [vmem:[%s2980_s30 + $0x2] sm:$0xff]  ;;  %v605_v60 = vld [vmem:[%s2980_s30 + $0xa] sm:$0xff]  ;;  %v248_v63 = vpack.c.bf16 %v217_v58, %v216_v57  ;;  %v863_v1 = vpack.c.bf16 %v2571_v62, %v2570_v61  ;;  %v2573_v5 = vld [vmem:[%s2980_s30 + $0x38] sm:$0xff] }
  0x1f   : > { %v636_v0 = vpack.c.bf16 %v605_v60, %v604_v59  ;;  %v607_v3 = vld [vmem:[%s2980_s30 + $0x22] sm:$0xff]  ;;  %v3100_v7 = vpack.c.bf16 %v2573_v5, %v2572_v4  ;;  %v608_v9 = vld [vmem:[%s2980_s30 + $0x32] sm:$0xff]  ;;  %v610_v17 = vld [vmem:[%s2980_s30 + $0x4a] sm:$0xff] }
  0x20   : > { %v3098_v6 = vpack.c.bf16 %v607_v3, %v606_v2  ;;  %v2574_v11 = vld [vmem:[%s2980_s30 + $0x48] sm:$0xff]  ;;  %v2575_v14 = vld [vmem:[%s2980_s30 + $0x50] sm:$0xff]  ;;  %v3113_v15 = vpack.c.bf16 %v609_v10, %v608_v9  ;;  %v2576_v19 = vld [vmem:[%s2980_s30 + $0x60] sm:$0xff] }
  0x21   : > { %v3115_v16 = vpack.c.bf16 %v2575_v14, %v2574_v11  ;;  %v611_v18 = vld [vmem:[%s2980_s30 + $0x52] sm:$0xff]  ;;  %v2577_v20 = vld [vmem:[%s2980_s30 + $0x68] sm:$0xff]  ;;  %v2579_v29 = vld [vmem:[%s2980_s30 + $0x80] sm:$0xff] }
  0x22   : > { %v3129_v21 = vpack.c.bf16 %v611_v18, %v610_v17  ;;  %v3131_v22 = vpack.c.bf16 %v2577_v20, %v2576_v19  ;;  %v612_v23 = vld [vmem:[%s2980_s30 + $0x62] sm:$0xff]  ;;  %v613_v24 = vld [vmem:[%s2980_s30 + $0x6a] sm:$0xff]  ;;  %v614_v41 = vld [vmem:[%s2980_s30 + $0x7a] sm:$0xff] }
  0x23   : > { %v3147_v31 = vpack.c.bf16 %v613_v24, %v612_v23  ;;  %v615_v42 = vld [vmem:[%s2980_s30 + $0x82] sm:$0xff]  ;;  %v2580_v43 = vld [vmem:[%s2980_s30 + $0x90] sm:$0xff]  ;;  %v2581_v44 = vld [vmem:[%s2980_s30 + $0x98] sm:$0xff] }
  0x24   : > { %2517 = vmatmul.msk.bf16.gmra.mxu1 %vm323_vm0, %v3011_v25  ;;  %v3179_v47 = vpack.c.bf16 %v615_v42, %v614_v41  ;;  %v3181_v48 = vpack.c.bf16 %v2581_v44, %v2580_v43  ;;  %v616_v58 = vld [vmem:[%s2980_s30 + $0x92] sm:$0xff]  ;;  %v617_v59 = vld [vmem:[%s2980_s30 + $0x9a] sm:$0xff]  ;;  %v2582_v60 = vld [vmem:[%s2980_s30 + $0xa8] sm:$0xff] }
  0x25   : > { %2521 = vmatmul.msk.bf16.gmra.mxu2 %vm323_vm0, %v3013_v26  ;;  %v2583_v61 = vld [vmem:[%s2980_s30 + $0xb0] sm:$0xff]  ;;  %v2584_v14 = vld [vmem:[%s2980_s30 + $0xc0] sm:$0xff]  ;;  %v2585_v17 = vld [vmem:[%s2980_s30 + $0xc8] sm:$0xff] }
  0x26   : > { %2525 = vmatmul.msk.bf16.gmra.mxu3 %vm323_vm0, %v3015_v27  ;;  %v618_v10 = vld [vmem:[%s2980_s30 + $0xaa] sm:$0xff]  ;;  %v619_v11 = vld [vmem:[%s2980_s30 + $0xb2] sm:$0xff]  ;;  %v3245_v23 = vpack.c.bf16 %v2585_v17, %v2584_v14  ;;  %v620_v43 = vld [vmem:[%s2980_s30 + $0xc2] sm:$0xff] }
  0x27   : > { %2513 = vmatmul.msk.bf16.gmra.mxu0 %vm323_vm0, %v299_v28  ;;  %v3243_v20 = vpack.c.bf16 %v619_v11, %v618_v10  ;;  %v621_v44 = vld [vmem:[%s2980_s30 + $0xca] sm:$0xff] }
  0x28   : > { %3830 = vst [vmem:[#allocation9_spill] sm:$0xff] %v3245_v23  ;;  %v3273_v11 = vpack.c.bf16 %v621_v44, %v620_v43 }
  0x29   : > { %3829 = vst [vmem:[#allocation8_spill] sm:$0xff] %v3243_v20 }
  0x2a   : > { %3833 = vst [vmem:[#allocation12_spill] sm:$0xff] %v3273_v11 }
  0x34   : > { %2518 = vmatmul.msk.bf16.gmra.mxu1 %vm323_vm0, %v3032_v37 }
  0x35   : > { %2522 = vmatmul.msk.bf16.gmra.mxu2 %vm323_vm0, %v3034_v38 }
  0x36   : > { %2526 = vmatmul.msk.bf16.gmra.mxu3 %vm323_vm0, %v3036_v39 }
  0x37   : > { %2514 = vmatmul.msk.bf16.gmra.mxu0 %vm323_vm0, %v3038_v40 }
  0x44   : > { %2519 = vmatmul.msk.bf16.gmra.mxu1 %vm323_vm0, %v3068_v53 }
  0x45   : > { %2523 = vmatmul.msk.bf16.gmra.mxu2 %vm323_vm0, %v3070_v54 }
  0x46   : > { %2527 = vmatmul.msk.bf16.gmra.mxu3 %vm323_vm0, %v3072_v55 }
  0x47   : > { %2515 = vmatmul.msk.bf16.gmra.mxu0 %vm323_vm0, %v3074_v56 }
  0x54   : > { %2532 = vmatmul.msk.bf16.vlgmr.msrb.gmra.mxu1 %vm323_vm0, %v248_v63 }
  0x55   : > { %2554 = vmatmul.msk.bf16.vlgmr.msrb.gmra.mxu2 %vm323_vm0, %v636_v0  ;;  %v3211_v0 = vpack.c.bf16 %v617_v59, %v616_v58  ;;  %v2586_v58 = vld [vmem:[%s2980_s30 + $0xd8] sm:$0xff]  ;;  %v2587_v59 = vld [vmem:[%s2980_s30 + $0xe0] sm:$0xff] }
  0x56   : > { %2608 = vmatmul.msk.bf16.vlgmr.msrb.gmra.mxu3 %vm323_vm0, %v863_v1 }
  0x57   : > { %2662 = vmatmul.msk.bf16.vlgmr.msrb.gmra.mxu0 %vm323_vm0, %v299_v28  ;;  %v2578_v28 = vld [vmem:[%s2980_s30 + $0x78] sm:$0xff] }
  0x58   : > { %v3149_v32 = vpack.c.bf16 %v2579_v29, %v2578_v28 }
  0x64   : > { %2533 = vmatmul.msk.bf16.gmra.mxu1 %vm323_vm0, %v863_v1  ;;  %v3213_v1 = vpack.c.bf16 %v2583_v61, %v2582_v60 }
  0x65   : > { %2555 = vmatmul.msk.bf16.gmra.mxu2 %vm323_vm0, %v3098_v6 }
  0x66   : > { %2609 = vmatmul.msk.bf16.gmra.mxu3 %vm323_vm0, %v3100_v7  ;;  %3826 = vst [vmem:[#allocation5_spill] sm:$0xff] %v3213_v1 }
  0x67   : > { %2663 = vmatmul.msk.bf16.gmra.mxu0 %vm323_vm0, %v3038_v40 }
  0x74   : > { %2534 = vmatmul.msk.bf16.gmra.mxu1 %vm323_vm0, %v3100_v7 }
  0x75   : > { %2556 = vmatmul.msk.bf16.gmra.mxu2 %vm323_vm0, %v3113_v15 }
  0x76   : > { %2610 = vmatmul.msk.bf16.gmra.mxu3 %vm323_vm0, %v3115_v16 }
  0x77   : > { %2664 = vmatmul.msk.bf16.gmra.mxu0 %vm323_vm0, %v3074_v56 }
  0x84   : > { %2535 = vmatmul.msk.bf16.gmra.mxu1 %vm323_vm0, %v3115_v16 }
  0x85   : > { %2557 = vmatmul.msk.bf16.gmra.mxu2 %vm323_vm0, %v3129_v21 }
  0x86   : > { %2611 = vmatmul.msk.bf16.gmra.mxu3 %vm323_vm0, %v3131_v22 }
  0x87   : > { %2665 = vmatmul.msk.bf16.gmra.mxu0 %vm323_vm0, %v2985_v8 }
  0x91   : > { %v3145_v30 = vpop.f32.mrf.mxu1 }
  0x94   : > { %v3151_v33 = vpop.f32.mrf.mxu0  ;;  %2536 = vmatmul.msk.bf16.gmra.mxu1 %vm323_vm0, %v3131_v22 }
  0x95   : > { %2558 = vmatmul.msk.bf16.gmra.mxu2 %vm323_vm0, %v3147_v31 }
  0x96   : > { %2612 = vmatmul.msk.bf16.gmra.mxu3 %vm323_vm0, %v3149_v32 }
  0x97   : > { %2666 = vmatmul.msk.bf16.gmra.mxu0 %vm323_vm0, %v3011_v25 }
  0x98   : > { %v3161_v8 = vpop.f32.mrf.mxu2 }
  0x99   : > { %v3163_v34 = vpop.f32.mrf.mxu3  ;;  %v3165_v35 = vpop.f32.mrf.mxu1 }
  0x9c   : > { %v3167_v36 = vpop.f32.mrf.mxu0 }
  0xa0   : > { %v3173_v45 = vpop.f32.mrf.mxu2 }
  0xa1   : > { %v3175_v46 = vpop.f32.mrf.mxu3  ;;  %v3177_v25 = vpop.f32.mrf.mxu1 }
  0xa2   : > { %3823 = vst [vmem:[#allocation2_spill] sm:$0xff] %v3175_v46 }
  0xa4   : > { %v3183_v49 = vpop.f32.mrf.mxu0  ;;  %2537 = vmatmul.msk.bf16.gmra.mxu1 %vm323_vm0, %v3149_v32 }
  0xa5   : > { %2559 = vmatmul.msk.bf16.gmra.mxu2 %vm323_vm0, %v3179_v47 }
  0xa6   : > { %2613 = vmatmul.msk.bf16.gmra.mxu3 %vm323_vm0, %v3181_v48 }
  0xa7   : > { %2667 = vmatmul.msk.bf16.gmra.mxu0 %vm323_vm0, %v3032_v37 }
  0xa8   : > { %v3193_v50 = vpop.f32.mrf.mxu2 }
  0xa9   : > { %v3195_v51 = vpop.f32.mrf.mxu3  ;;  %v3197_v52 = vpop.f32.mrf.mxu1 }
  0xaa   : > { %3824 = vst [vmem:[#allocation3_spill] sm:$0xff] %v3195_v51 }
  0xac   : > { %v3199_v57 = vpop.f32.mrf.mxu0 }
  0xb0   : > { %v3205_v62 = vpop.f32.mrf.mxu2 }
  0xb1   : > { %v3207_v63 = vpop.f32.mrf.mxu3  ;;  %v3209_v37 = vpop.f32.mrf.mxu1 }
  0xb2   : > { %3825 = vst [vmem:[#allocation4_spill] sm:$0xff] %v3207_v63 }
  0xb4   : > { %v3215_v2 = vpop.f32.mrf.mxu0  ;;  %2538 = vmatmul.msk.bf16.gmra.mxu1 %vm323_vm0, %v3181_v48 }
  0xb5   : > { %2560 = vmatmul.msk.bf16.gmra.mxu2 %vm323_vm0, %v3211_v0 }
  0xb6   : > { %2614 = vmatmul.msk.bf16.gmra.mxu3 %vm323_vm0, %v3213_v1 }
  0xb7   : > { %2668 = vmatmul.msk.bf16.gmra.mxu0 %vm323_vm0, %v3068_v53 }
  0xb8   : > { %v3225_v3 = vpop.f32.mrf.mxu2 }
  0xb9   : > { %v3227_v4 = vpop.f32.mrf.mxu3  ;;  %v3229_v5 = vpop.f32.mrf.mxu1 }
  0xba   : > { %3827 = vst [vmem:[#allocation6_spill] sm:$0xff] %v3227_v4  ;;  %v623_v4 = vld [vmem:[%s2980_s30 + $0xe2] sm:$0xff] }
  0xbc   : > { %v3231_v9 = vpop.f32.mrf.mxu0 }
  0xc0   : > { %v3237_v18 = vpop.f32.mrf.mxu2 }
  0xc1   : > { %v3239_v19 = vpop.f32.mrf.mxu3  ;;  %v3241_v53 = vpop.f32.mrf.mxu1 }
  0xc2   : > { %3828 = vst [vmem:[#allocation7_spill] sm:$0xff] %v3239_v19 }
  0xc4   : > { %v3247_v24 = vpop.f32.mrf.mxu0  ;;  %2539 = vmatmul.msk.bf16.gmra.mxu1 %vm323_vm0, %v3213_v1 }
  0xc5   : > { %2561 = vmatmul.msk.bf16.gmra.mxu2 %vm323_vm0, %v3243_v20 }
  0xc6   : > { %2615 = vmatmul.msk.bf16.gmra.mxu3 %vm323_vm0, %v3245_v23 }
  0xc7   : > { %2669 = vmatmul.msk.bf16.gmra.mxu0 %vm323_vm0, %v2990_v12  ;;  %v3275_v12 = vpack.c.bf16 %v2587_v59, %v2586_v58 }
  0xc8   : > { %v3257_v28 = vpop.f32.mrf.mxu2 }
  0xc9   : > { %v3259_v29 = vpop.f32.mrf.mxu3  ;;  %v3261_v41 = vpop.f32.mrf.mxu1 }
  0xca   : > { %3831 = vst [vmem:[#allocation10_spill] sm:$0xff] %v3259_v29  ;;  %v622_v29 = vld [vmem:[%s2980_s30 + $0xda] sm:$0xff] }
  0xcb   : > { %v3293_v46 = vpack.c.bf16 %v623_v4, %v622_v29 }
  0xcc   : > { %v3263_v42 = vpop.f32.mrf.mxu0 }
  0xd0   : > { %v3269_v60 = vpop.f32.mrf.mxu2 }
  0xd1   : > { %v3271_v61 = vpop.f32.mrf.mxu3  ;;  %v524_v10 = vpop.f32.mrf.mxu1 }
  0xd2   : > { %3832 = vst [vmem:[#allocation11_spill] sm:$0xff] %v3271_v61  ;;  %v525_v14 = vadd.f32 %v524_v10, %v3151_v33 }
  0xd4   : > { %v1171_v17 = vpop.f32.mrf.mxu0  ;;  %2540 = vmatmul.msk.bf16.gmra.mxu1 %vm323_vm0, %v3245_v23  ;;  %v2588_v23 = vld [vmem:[%s2980_s30 + $0xf0] sm:$0xff] }
  0xd5   : > { %2562 = vmatmul.msk.bf16.gmra.mxu2 %vm323_vm0, %v3273_v11  ;;  %v2589_v11 = vld [vmem:[%s2980_s30 + $0xf8] sm:$0xff] }
  0xd6   : > { %2616 = vmatmul.msk.bf16.gmra.mxu3 %vm323_vm0, %v3275_v12 }
  0xd7   : > { %2670 = vmatmul.msk.bf16.gmra.mxu0 %vm323_vm0, %v3013_v26  ;;  %v3295_v26 = vpack.c.bf16 %v2589_v11, %v2588_v23  ;;  %v624_v11 = vld [vmem:[%s2980_s30 + $0xf2] sm:$0xff] }
  0xd8   : > { %v718_v43 = vpop.f32.mrf.mxu2 }
  0xd9   : > { %v945_v44 = vpop.f32.mrf.mxu3  ;;  %v798_v58 = vadd.f32 %v718_v43, %v525_v14  ;;  %v526_v59 = vpop.f32.mrf.mxu1 }
  0xda   : > { %v527_v33 = vadd.f32 %v526_v59, %v3167_v36  ;;  %v2591_v59 = vld [vmem:[%s2980_s30 + $0x110] sm:$0xff] }
  0xdb   : > { %v1025_v10 = vadd.f32 %v945_v44, %v798_v58  ;;  %v625_v44 = vld [vmem:[%s2980_s30 + $0xfa] sm:$0xff]  ;;  %v2590_v58 = vld [vmem:[%s2980_s30 + $0x108] sm:$0xff] }
  0xdc   : > { %v1173_v61 = vpop.f32.mrf.mxu0 }
  0xdd   : > { %v3288_v19 = vadd.f32 %v1171_v17, %v1025_v10 }
  0xe0   : > { %v720_v63 = vpop.f32.mrf.mxu2 }
  0xe1   : > { %v947_v51 = vpop.f32.mrf.mxu3  ;;  %v799_v20 = vadd.f32 %v720_v63, %v527_v33  ;;  %v529_v1 = vpop.f32.mrf.mxu1 }
  0xe2   : > { %v530_v14 = vadd.f32 %v529_v1, %v3183_v49 }
  0xe3   : > { %v1026_v36 = vadd.f32 %v947_v51, %v799_v20 }
  0xe4   : > { %v1176_v43 = vpop.f32.mrf.mxu0  ;;  %2541 = vmatmul.msk.bf16.gmra.mxu1 %vm323_vm0, %v3275_v12 }
  0xe5   : > { %2563 = vmatmul.msk.bf16.gmra.mxu2 %vm323_vm0, %v3293_v46  ;;  %v3304_v63 = vadd.f32 %v1173_v61, %v1026_v36 }
  0xe6   : > { %2617 = vmatmul.msk.bf16.gmra.mxu3 %vm323_vm0, %v3295_v26 }
  0xe7   : > { %3834 = vst [vmem:[#allocation13_spill] sm:$0xff] %v3304_v63  ;;  %2671 = vmatmul.msk.bf16.gmra.mxu0 %vm323_vm0, %v3034_v38  ;;  %v3315_v63 = vpack.c.bf16 %v625_v44, %v624_v11  ;;  %v3317_v38 = vpack.c.bf16 %v2591_v59, %v2590_v58  ;;  %v626_v44 = vld [vmem:[%s2980_s30 + $0x10a] sm:$0xff]  ;;  %v627_v59 = vld [vmem:[%s2980_s30 + $0x112] sm:$0xff] }
  0xe8   : > { %v723_v49 = vpop.f32.mrf.mxu2 }
  0xe9   : > { %v950_v51 = vpop.f32.mrf.mxu3  ;;  %v800_v1 = vadd.f32 %v723_v49, %v530_v14  ;;  %v531_v4 = vpop.f32.mrf.mxu1 }
  0xea   : > { %v532_v20 = vadd.f32 %v531_v4, %v3199_v57 }
  0xeb   : > { %v1027_v23 = vadd.f32 %v950_v51, %v800_v1 }
  0xec   : > { %v1178_v29 = vpop.f32.mrf.mxu0 }
  0xed   : > { %v3310_v17 = vadd.f32 %v1176_v43, %v1027_v23 }
  0xf0   : > { %v725_v33 = vpop.f32.mrf.mxu2 }
  0xf1   : > { %v952_v61 = vpop.f32.mrf.mxu3  ;;  %v801_v10 = vadd.f32 %v725_v33, %v532_v20  ;;  %v534_v36 = vpop.f32.mrf.mxu1  ;;  %v2592_v33 = vld [vmem:[%s2980_s30 + $0x120] sm:$0xff] }
  0xf2   : > { %v535_v14 = vadd.f32 %v534_v36, %v3215_v2 }
  0xf3   : > { %v1028_v57 = vadd.f32 %v952_v61, %v801_v10  ;;  %v2593_v61 = vld [vmem:[%s2980_s30 + $0x128] sm:$0xff] }
  0xf4   : > { %v1181_v49 = vpop.f32.mrf.mxu0  ;;  %2542 = vmatmul.msk.bf16.gmra.mxu1 %vm323_vm0, %v3295_v26 }
  0xf5   : > { %2564 = vmatmul.msk.bf16.gmra.mxu2 %vm323_vm0, %v3315_v63  ;;  %v3326_v43 = vadd.f32 %v1178_v29, %v1028_v57 }
  0xf6   : > { %2618 = vmatmul.msk.bf16.gmra.mxu3 %vm323_vm0, %v3317_v38 }
  0xf7   : > { %3835 = vst [vmem:[#allocation14_spill] sm:$0xff] %v3326_v43  ;;  %2672 = vmatmul.msk.bf16.gmra.mxu0 %vm323_vm0, %v3070_v54  ;;  %v3337_v43 = vpack.c.bf16 %v627_v59, %v626_v44  ;;  %v3339_v54 = vpack.c.bf16 %v2593_v61, %v2592_v33  ;;  %v628_v59 = vld [vmem:[%s2980_s30 + $0x122] sm:$0xff]  ;;  %v629_v61 = vld [vmem:[%s2980_s30 + $0x12a] sm:$0xff] }
  0xf8   : > { %v728_v2 = vpop.f32.mrf.mxu2 }
  0xf9   : > { %v955_v51 = vpop.f32.mrf.mxu3  ;;  %v802_v1 = vadd.f32 %v728_v2, %v535_v14  ;;  %v536_v4 = vpop.f32.mrf.mxu1 }
  0xfa   : > { %v537_v20 = vadd.f32 %v536_v4, %v3231_v9 }
  0xfb   : > { %v1029_v23 = vadd.f32 %v955_v51, %v802_v1 }
  0xfc   : > { %v1183_v11 = vpop.f32.mrf.mxu0 }
  0xfd   : > { %v3332_v58 = vadd.f32 %v1181_v49, %v1029_v23 }
 0x100   : > { %v730_v10 = vpop.f32.mrf.mxu2 }
 0x101   : > { %v957_v29 = vpop.f32.mrf.mxu3  ;;  %v803_v36 = vadd.f32 %v730_v10, %v537_v20  ;;  %v539_v57 = vpop.f32.mrf.mxu1  ;;  %v2594_v10 = vld [vmem:[%s2980_s30 + $0x138] sm:$0xff] }
 0x102   : > { %v540_v14 = vadd.f32 %v539_v57, %v3247_v24 }
 0x103   : > { %v1030_v9 = vadd.f32 %v957_v29, %v803_v36  ;;  %v2595_v29 = vld [vmem:[%s2980_s30 + $0x140] sm:$0xff] }
 0x104   : > { %v1186_v2 = vpop.f32.mrf.mxu0  ;;  %2543 = vmatmul.msk.bf16.gmra.mxu1 %vm323_vm0, %v3317_v38 }
 0x105   : > { %2565 = vmatmul.msk.bf16.gmra.mxu2 %vm323_vm0, %v3337_v43  ;;  %v3348_v49 = vadd.f32 %v1183_v11, %v1030_v9 }
 0x106   : > { %2619 = vmatmul.msk.bf16.gmra.mxu3 %vm323_vm0, %v3339_v54 }
 0x107   : > { %3836 = vst [vmem:[#allocation15_spill] sm:$0xff] %v3348_v49  ;;  %2673 = vmatmul.msk.bf16.gmra.mxu0 %vm323_vm0, %v2992_v13  ;;  %v3359_v49 = vpack.c.bf16 %v629_v61, %v628_v59  ;;  %v3361_v13 = vpack.c.bf16 %v2595_v29, %v2594_v10  ;;  %v630_v61 = vld [vmem:[%s2980_s30 + $0x13a] sm:$0xff]  ;;  %v631_v29 = vld [vmem:[%s2980_s30 + $0x142] sm:$0xff] }
 0x108   : > { %v733_v24 = vpop.f32.mrf.mxu2 }
 0x109   : > { %v960_v51 = vpop.f32.mrf.mxu3  ;;  %v804_v1 = vadd.f32 %v733_v24, %v540_v14  ;;  %v541_v4 = vpop.f32.mrf.mxu1 }
 0x10a   : > { %v542_v20 = vadd.f32 %v541_v4, %v3263_v42 }
 0x10b   : > { %v1031_v23 = vadd.f32 %v960_v51, %v804_v1 }
 0x10c   : > { %v1188_v44 = vpop.f32.mrf.mxu0 }
 0x10d   : > { %v3354_v33 = vadd.f32 %v1186_v2, %v1031_v23 }
 0x10f   : > { %3837 = vst [vmem:[#allocation16_spill] sm:$0xff] %v3354_v33  ;;  %v3381_v33 = vpack.c.bf16 %v631_v29, %v630_v61  ;;  %v632_v61 = vld [vmem:[%s2980_s30 + $0x152] sm:$0xff] }
 0x110   : > { %v735_v36 = vpop.f32.mrf.mxu2 }
 0x111   : > { %v962_v11 = vpop.f32.mrf.mxu3  ;;  %v805_v57 = vadd.f32 %v735_v36, %v542_v20  ;;  %v544_v9 = vpop.f32.mrf.mxu1  ;;  %v2596_v36 = vld [vmem:[%s2980_s30 + $0x150] sm:$0xff] }
 0x112   : > { %v545_v24 = vadd.f32 %v544_v9, %v3145_v30 }
 0x113   : > { %v1032_v14 = vadd.f32 %v962_v11, %v805_v57  ;;  %v2597_v11 = vld [vmem:[%s2980_s30 + $0x158] sm:$0xff] }
 0x114   : > { %v1191_v42 = vpop.f32.mrf.mxu0  ;;  %2544 = vmatmul.msk.bf16.gmra.mxu1 %vm323_vm0, %v3339_v54  ;;  %v3383_v30 = vpack.c.bf16 %v2597_v11, %v2596_v36  ;;  %v633_v36 = vld [vmem:[%s2980_s30 + $0x15a] sm:$0xff]  ;;  %v2598_v11 = vld [vmem:[%s2980_s30 + $0x168] sm:$0xff] }
 0x115   : > { %2566 = vmatmul.msk.bf16.gmra.mxu2 %vm323_vm0, %v3359_v49  ;;  %v3369_v2 = vadd.f32 %v1188_v44, %v1032_v14 }
 0x116   : > { %2620 = vmatmul.msk.bf16.gmra.mxu3 %vm323_vm0, %v3361_v13 }
 0x117   : > { %3838 = vst [vmem:[#allocation17_spill] sm:$0xff] %v3369_v2  ;;  %2674 = vmatmul.msk.bf16.gmra.mxu0 %vm323_vm0, %v3015_v27 }
 0x118   : > { %v738_v51 = vpop.f32.mrf.mxu2 }
 0x119   : > { %v965_v1 = vpop.f32.mrf.mxu3  ;;  %v806_v4 = vadd.f32 %v738_v51, %v545_v24  ;;  %v546_v20 = vpop.f32.mrf.mxu1 }
 0x11a   : > { %v547_v44 = vadd.f32 %v546_v20, %v3165_v35 }
 0x11b   : > { %v1033_v23 = vadd.f32 %v965_v1, %v806_v4 }
 0x11c   : > { %v1193_v59 = vpop.f32.mrf.mxu0 }
 0x11d   : > { %v3375_v10 = vadd.f32 %v1191_v42, %v1033_v23 }
 0x120   : > { %v740_v57 = vpop.f32.mrf.mxu2 }
 0x121   : > { %v967_v14 = vpop.f32.mrf.mxu3  ;;  %v807_v2 = vadd.f32 %v740_v57, %v547_v44  ;;  %v549_v27 = vpop.f32.mrf.mxu1  ;;  %v2599_v44 = vld [vmem:[%s2980_s30 + $0x170] sm:$0xff] }
 0x122   : > { %v550_v42 = vadd.f32 %v549_v27, %v3177_v25  ;;  %v877_v25 = vpack.c.bf16 %v2599_v44, %v2598_v11  ;;  %v635_v44 = vld [vmem:[%s2980_s30 + $0x172] sm:$0xff] }
 0x123   : > { %v1034_v9 = vadd.f32 %v967_v14, %v807_v2 }
 0x124   : > { %v1196_v24 = vpop.f32.mrf.mxu0  ;;  %2545 = vmatmul.msk.bf16.gmra.mxu1 %vm323_vm0, %v3361_v13 }
 0x125   : > { %2567 = vmatmul.msk.bf16.gmra.mxu2 %vm323_vm0, %v3381_v33  ;;  %v3391_v35 = vadd.f32 %v1193_v59, %v1034_v9 }
 0x126   : > { %2621 = vmatmul.msk.bf16.gmra.mxu3 %vm323_vm0, %v3383_v30 }
 0x127   : > { %3839 = vst [vmem:[#allocation18_spill] sm:$0xff] %v3391_v35  ;;  %2675 = vmatmul.msk.bf16.gmra.mxu0 %vm323_vm0, %v3036_v39  ;;  %v3403_v35 = vpack.c.bf16 %v633_v36, %v632_v61  ;;  %v634_v36 = vld [vmem:[%s2980_s30 + $0x16a] sm:$0xff] }
 0x128   : > { %v743_v2 = vpop.f32.mrf.mxu2 }
 0x129   : > { %v970_v51 = vpop.f32.mrf.mxu3  ;;  %v808_v1 = vadd.f32 %v743_v2, %v550_v42  ;;  %v551_v4 = vpop.f32.mrf.mxu1 }
 0x12a   : > { %v552_v59 = vadd.f32 %v551_v4, %v3197_v52 }
 0x12b   : > { %v1035_v20 = vadd.f32 %v970_v51, %v808_v1 }
 0x12c   : > { %v1198_v23 = vpop.f32.mrf.mxu0 }
 0x12d   : > { %v3397_v29 = vadd.f32 %v1196_v24, %v1035_v20 }
 0x130   : > { %v745_v57 = vpop.f32.mrf.mxu2 }
 0x131   : > { %v972_v14 = vpop.f32.mrf.mxu3  ;;  %v809_v9 = vadd.f32 %v745_v57, %v552_v59  ;;  %v554_v39 = vpop.f32.mrf.mxu1  ;;  %v2600_v59 = vld [vmem:[%s2980_s30 + $0x180] sm:$0xff]  ;;  %v2601_v57 = vld [vmem:[%s2980_s30 + $0x188] sm:$0xff] }
 0x132   : > { %v555_v24 = vadd.f32 %v554_v39, %v3209_v37  ;;  %v3424_v39 = vpack.c.bf16 %v635_v44, %v634_v36 }
 0x133   : > { %v1036_v27 = vadd.f32 %v972_v14, %v809_v9  ;;  %v2654_v14 = vld [vmem:[%s2980_s30 + $0x181] sm:$0xff]  ;;  %v2655_v9 = vld [vmem:[%s2980_s30 + $0x189] sm:$0xff] }
 0x134   : > { %v1201_v42 = vpop.f32.mrf.mxu0  ;;  %2546 = vmatmul.msk.bf16.gmra.mxu1 %vm323_vm0, %v3383_v30 }
 0x135   : > { %2568 = vmatmul.msk.bf16.gmra.mxu2 %vm323_vm0, %v3403_v35  ;;  %v3410_v52 = vadd.f32 %v1198_v23, %v1036_v27 }
 0x136   : > { %2622 = vmatmul.msk.bf16.gmra.mxu3 %vm323_vm0, %v877_v25 }
 0x137   : > { %3840 = vst [vmem:[#allocation19_spill] sm:$0xff] %v3410_v52  ;;  %2676 = vmatmul.msk.bf16.gmra.mxu0 %vm323_vm0, %v3072_v55 }
 0x138   : > { %v748_v2 = vpop.f32.mrf.mxu2 }
 0x139   : > { %v975_v51 = vpop.f32.mrf.mxu3  ;;  %v810_v1 = vadd.f32 %v748_v2, %v555_v24  ;;  %v556_v4 = vpop.f32.mrf.mxu1  ;;  %v878_v24 = vpack.c.bf16 %v2601_v57, %v2600_v59  ;;  %v1104_v2 = vpack.c.bf16 %v2655_v9, %v2654_v14 }
 0x13a   : > { %v557_v23 = vadd.f32 %v556_v4, %v3229_v5 }
 0x13b   : > { %v1037_v20 = vadd.f32 %v975_v51, %v810_v1 }
 0x13c   : > { %v1203_v61 = vpop.f32.mrf.mxu0 }
 0x13d   : > { %v3416_v11 = vadd.f32 %v1201_v42, %v1037_v20 }
 0x140   : > { %v750_v27 = vpop.f32.mrf.mxu2 }
 0x141   : > { %v977_v55 = vpop.f32.mrf.mxu3  ;;  %v811_v52 = vadd.f32 %v750_v27, %v557_v23  ;;  %v559_v37 = vpop.f32.mrf.mxu1 }
 0x142   : > { %v560_v42 = vadd.f32 %v559_v37, %v3241_v53 }
 0x143   : > { %v1038_v51 = vadd.f32 %v977_v55, %v811_v52 }
 0x144   : > { %v1206_v1 = vpop.f32.mrf.mxu0  ;;  %2547 = vmatmul.msk.bf16.gmra.mxu1 %vm323_vm0, %v877_v25 }
 0x145   : > { %2569 = vmatmul.msk.bf16.gmra.mxu2 %vm323_vm0, %v3424_v39  ;;  %v3430_v5 = vadd.f32 %v1203_v61, %v1038_v51 }
 0x146   : > { %2623 = vmatmul.msk.bf16.gmra.mxu3 %vm323_vm0, %v878_v24 }
 0x147   : > { %2677 = vmatmul.msk.bf16.gmra.mxu0 %vm323_vm0, %v1104_v2 }
 0x148   : > { %v753_v4 = vpop.f32.mrf.mxu2 }
 0x149   : > { %v980_v20 = vpop.f32.mrf.mxu3  ;;  %v812_v36 = vadd.f32 %v753_v4, %v560_v42  ;;  %v561_v44 = vpop.f32.mrf.mxu1 }
 0x14a   : > { %v562_v25 = vadd.f32 %v561_v44, %v3261_v41 }
 0x14b   : > { %v1039_v59 = vadd.f32 %v980_v20, %v812_v36 }
 0x14c   : > { %v1208_v52 = vpop.f32.mrf.mxu0 }
 0x14d   : > { %v3434_v57 = vadd.f32 %v1206_v1, %v1039_v59 }
 0x150   : > { %v755_v23 = vpop.f32.mrf.mxu2 }
 0x151   : > { %v982_v14 = vpop.f32.mrf.mxu3  ;;  %v813_v9 = vadd.f32 %v755_v23, %v562_v25  ;;  %v564_v27 = vpop.f32.mrf.mxu1 }
 0x152   : > { %v565_v41 = vadd.f32 %v564_v27, %v3161_v8 }
 0x153   : > { %v1040_v61 = vadd.f32 %v982_v14, %v813_v9 }
 0x154   : > { %v1211_v55 = vpop.f32.mrf.mxu0  ;;  %2716 = vmatmul.msk.bf16.vlgmr.msra.gmra.mxu1 %vm323_vm0, %v3098_v6 }
 0x155   : > { %2770 = vmatmul.msk.bf16.vlgmr.msra.gmra.mxu2 %vm323_vm0, %v3100_v7  ;;  %v3443_v53 = vadd.f32 %v1208_v52, %v1040_v61  ;;  %v2790_v61 = vld [vmem:[%s2980_s30 + $0x61] sm:$0xff] }
 0x156   : > { %2824 = vmatmul.msk.bf16.vlgmr.msra.gmra.mxu3 %vm323_vm0, %v3038_v40 }
 0x157   : > { %2878 = vmatmul.msk.bf16.vlgmr.msra.gmra.mxu0 %vm323_vm0, %v3113_v15 }
 0x158   : > { %v758_v37 = vpop.f32.mrf.mxu2 }
 0x159   : > { %v985_v24 = vpop.f32.mrf.mxu3  ;;  %v814_v2 = vadd.f32 %v758_v37, %v565_v41  ;;  %v566_v51 = vpop.f32.mrf.mxu1 }
 0x15a   : > { %v567_v7 = vadd.f32 %v566_v51, %v3173_v45 }
 0x15b   : > { %v1041_v1 = vadd.f32 %v985_v24, %v814_v2 }
 0x15c   : > { %v1213_v42 = vpop.f32.mrf.mxu0 }
 0x15d   : > { %v3448_v6 = vadd.f32 %v1211_v55, %v1041_v1 }
 0x160   : > { %v760_v4 = vpop.f32.mrf.mxu2 }
 0x161   : > { %v987_v20 = vpop.f32.mrf.mxu3  ;;  %v815_v40 = vadd.f32 %v760_v4, %v567_v7  ;;  %v569_v36 = vpop.f32.mrf.mxu1 }
 0x162   : > { %v570_v45 = vadd.f32 %v569_v36, %v3193_v50 }
 0x163   : > { %v1042_v44 = vadd.f32 %v987_v20, %v815_v40 }
 0x164   : > { %v1216_v59 = vpop.f32.mrf.mxu0  ;;  %2717 = vmatmul.msk.bf16.gmra.mxu1 %vm323_vm0, %v3113_v15 }
 0x165   : > { %2771 = vmatmul.msk.bf16.gmra.mxu2 %vm323_vm0, %v3115_v16  ;;  %v3457_v8 = vadd.f32 %v1213_v42, %v1042_v44  ;;  %v2791_v16 = vld [vmem:[%s2980_s30 + $0x69] sm:$0xff] }
 0x166   : > { %2825 = vmatmul.msk.bf16.gmra.mxu3 %vm323_vm0, %v3074_v56  ;;  %v1770_v2 = vpack.c.bf16 %v2791_v16, %v2790_v61 }
 0x167   : > { %2879 = vmatmul.msk.bf16.gmra.mxu0 %vm323_vm0, %v3129_v21 }
 0x168   : > { %v763_v52 = vpop.f32.mrf.mxu2 }
 0x169   : > { %v990_v25 = vpop.f32.mrf.mxu3  ;;  %v816_v23 = vadd.f32 %v763_v52, %v570_v45  ;;  %v571_v14 = vpop.f32.mrf.mxu1 }
 0x16a   : > { %v572_v55 = vadd.f32 %v571_v14, %v3205_v62 }
 0x16b   : > { %v1043_v9 = vadd.f32 %v990_v25, %v816_v23 }
 0x16c   : > { %v1218_v27 = vpop.f32.mrf.mxu0 }
 0x16d   : > { %v3462_v15 = vadd.f32 %v1216_v59, %v1043_v9  ;;  %v2793_v59 = vld [vmem:[%s2980_s30 + $0x81] sm:$0xff] }
 0x170   : > { %v765_v56 = vpop.f32.mrf.mxu2 }
 0x171   : > { %v992_v41 = vpop.f32.mrf.mxu3  ;;  %v817_v37 = vadd.f32 %v765_v56, %v572_v55  ;;  %v574_v24 = vpop.f32.mrf.mxu1 }
 0x172   : > { %v575_v62 = vadd.f32 %v574_v24, %v3225_v3 }
 0x173   : > { %v1044_v51 = vadd.f32 %v992_v41, %v817_v37 }
 0x174   : > { %v1221_v50 = vpop.f32.mrf.mxu0  ;;  %2718 = vmatmul.msk.bf16.gmra.mxu1 %vm323_vm0, %v3129_v21  ;;  %v2792_v21 = vld [vmem:[%s2980_s30 + $0x79] sm:$0xff] }
 0x175   : > { %2772 = vmatmul.msk.bf16.gmra.mxu2 %vm323_vm0, %v3131_v22  ;;  %v3472_v1 = vadd.f32 %v1218_v27, %v1044_v51  ;;  %v1771_v14 = vpack.c.bf16 %v2793_v59, %v2792_v21 }
 0x176   : > { %2826 = vmatmul.msk.bf16.gmra.mxu3 %vm323_vm0, %v1770_v2  ;;  %v2795_v2 = vld [vmem:[%s2980_s30 + $0x99] sm:$0xff] }
 0x177   : > { %2880 = vmatmul.msk.bf16.gmra.mxu0 %vm323_vm0, %v3147_v31 }
 0x178   : > { %v768_v42 = vpop.f32.mrf.mxu2 }
 0x179   : > { %v995_v7 = vpop.f32.mrf.mxu3  ;;  %v818_v4 = vadd.f32 %v768_v42, %v575_v62  ;;  %v576_v20 = vpop.f32.mrf.mxu1 }
 0x17a   : > { %v577_v22 = vadd.f32 %v576_v20, %v3237_v18 }
 0x17b   : > { %v1045_v40 = vadd.f32 %v995_v7, %v818_v4 }
 0x17c   : > { %v1223_v36 = vpop.f32.mrf.mxu0 }
 0x17d   : > { %v3477_v44 = vadd.f32 %v1221_v50, %v1045_v40 }
 0x180   : > { %v770_v45 = vpop.f32.mrf.mxu2 }
 0x181   : > { %v997_v52 = vpop.f32.mrf.mxu3  ;;  %v819_v25 = vadd.f32 %v770_v45, %v577_v22  ;;  %v579_v23 = vpop.f32.mrf.mxu1 }
 0x182   : > { %v580_v18 = vadd.f32 %v579_v23, %v3257_v28 }
 0x183   : > { %v1046_v9 = vadd.f32 %v997_v52, %v819_v25  ;;  %v2797_v25 = vld [vmem:[%s2980_s30 + $0xb1] sm:$0xff] }
 0x184   : > { %v1226_v3 = vpop.f32.mrf.mxu0  ;;  %2719 = vmatmul.msk.bf16.gmra.mxu1 %vm323_vm0, %v3147_v31  ;;  %v2794_v31 = vld [vmem:[%s2980_s30 + $0x91] sm:$0xff] }
 0x185   : > { %2773 = vmatmul.msk.bf16.gmra.mxu2 %vm323_vm0, %v3149_v32  ;;  %v3487_v27 = vadd.f32 %v1223_v36, %v1046_v9  ;;  %v1772_v7 = vpack.c.bf16 %v2795_v2, %v2794_v31 }
 0x186   : > { %2827 = vmatmul.msk.bf16.gmra.mxu3 %vm323_vm0, %v1771_v14 }
 0x187   : > { %2881 = vmatmul.msk.bf16.gmra.mxu0 %vm323_vm0, %v3179_v47 }
 0x188   : > { %v773_v61 = vpop.f32.mrf.mxu2 }
 0x189   : > { %v1000_v16 = vpop.f32.mrf.mxu3  ;;  %v820_v55 = vadd.f32 %v773_v61, %v580_v18  ;;  %v581_v56 = vpop.f32.mrf.mxu1 }
 0x18a   : > { %v582_v32 = vadd.f32 %v581_v56, %v3269_v60 }
 0x18b   : > { %v1047_v41 = vadd.f32 %v1000_v16, %v820_v55  ;;  %v3842_v55 = vld [vmem:[#allocation5_spill] sm:$0xff] }
 0x18c   : > { %v1228_v37 = vpop.f32.mrf.mxu0 }
 0x18d   : > { %v3492_v24 = vadd.f32 %v1226_v3, %v1047_v41  ;;  %v3843_v41 = vld [vmem:[#allocation8_spill] sm:$0xff] }
 0x190   : > { %v775_v51 = vpop.f32.mrf.mxu2 }
 0x191   : > { %v1002_v50 = vpop.f32.mrf.mxu3  ;;  %v821_v62 = vadd.f32 %v775_v51, %v582_v32  ;;  %v584_v42 = vpop.f32.mrf.mxu1 }
 0x192   : > { %v585_v60 = vadd.f32 %v584_v42, %v3163_v34 }
 0x193   : > { %v1048_v4 = vadd.f32 %v1002_v50, %v821_v62 }
 0x194   : > { %v1231_v28 = vpop.f32.mrf.mxu0  ;;  %2720 = vmatmul.msk.bf16.gmra.mxu1 %vm323_vm0, %v3179_v47  ;;  %v2796_v47 = vld [vmem:[%s2980_s30 + $0xa9] sm:$0xff] }
 0x195   : > { %2774 = vmatmul.msk.bf16.gmra.mxu2 %vm323_vm0, %v3181_v48  ;;  %v3502_v20 = vadd.f32 %v1228_v37, %v1048_v4  ;;  %v3841_v48 = vld [vmem:[#allocation2_spill] sm:$0xff]  ;;  %v1773_v61 = vpack.c.bf16 %v2797_v25, %v2796_v47  ;;  %v3844_v37 = vld [vmem:[#allocation3_spill] sm:$0xff]  ;;  %v3846_v25 = vld [vmem:[#allocation9_spill] sm:$0xff] }
 0x196   : > { %2828 = vmatmul.msk.bf16.gmra.mxu3 %vm323_vm0, %v1772_v7  ;;  %v2799_v4 = vld [vmem:[%s2980_s30 + $0xc9] sm:$0xff] }
 0x197   : > { %2882 = vmatmul.msk.bf16.gmra.mxu0 %vm323_vm0, %v3211_v0 }
 0x198   : > { %v778_v40 = vpop.f32.mrf.mxu2 }
 0x199   : > { %v1005_v36 = vpop.f32.mrf.mxu3  ;;  %v822_v21 = vadd.f32 %v778_v40, %v585_v60  ;;  %v586_v59 = vpop.f32.mrf.mxu1 }
 0x19a   : > { %v587_v23 = vadd.f32 %v586_v59, %v3841_v48 }
 0x19b   : > { %v1049_v22 = vadd.f32 %v1005_v36, %v822_v21 }
 0x19c   : > { %v1233_v45 = vpop.f32.mrf.mxu0 }
 0x19d   : > { %v3507_v52 = vadd.f32 %v1231_v28, %v1049_v22  ;;  %v3845_v28 = vld [vmem:[#allocation4_spill] sm:$0xff] }
 0x1a0   : > { %v780_v14 = vpop.f32.mrf.mxu2 }
 0x1a1   : > { %v1007_v9 = vpop.f32.mrf.mxu3  ;;  %v823_v3 = vadd.f32 %v780_v14, %v587_v23  ;;  %v589_v18 = vpop.f32.mrf.mxu1  ;;  %v3847_v23 = vld [vmem:[#allocation12_spill] sm:$0xff]  ;;  %v3848_v14 = vld [vmem:[#allocation6_spill] sm:$0xff] }
 0x1a2   : > { %v590_v31 = vadd.f32 %v589_v18, %v3844_v37 }
 0x1a3   : > { %v1050_v16 = vadd.f32 %v1007_v9, %v823_v3 }
 0x1a4   : > { %v1236_v34 = vpop.f32.mrf.mxu0  ;;  %2721 = vmatmul.msk.bf16.gmra.mxu1 %vm323_vm0, %v3211_v0  ;;  %v2798_v0 = vld [vmem:[%s2980_s30 + $0xc1] sm:$0xff] }
 0x1a5   : > { %2775 = vmatmul.msk.bf16.gmra.mxu2 %vm323_vm0, %v3842_v55  ;;  %v3517_v56 = vadd.f32 %v1233_v45, %v1050_v16  ;;  %v1774_v22 = vpack.c.bf16 %v2799_v4, %v2798_v0 }
 0x1a6   : > { %2829 = vmatmul.msk.bf16.gmra.mxu3 %vm323_vm0, %v1773_v61 }
 0x1a7   : > { %2883 = vmatmul.msk.bf16.gmra.mxu0 %vm323_vm0, %v3843_v41 }
 0x1a8   : > { %v783_v2 = vpop.f32.mrf.mxu2 }
 0x1a9   : > { %v1010_v32 = vpop.f32.mrf.mxu3  ;;  %v824_v51 = vadd.f32 %v783_v2, %v590_v31  ;;  %v591_v50 = vpop.f32.mrf.mxu1  ;;  %v2801_v31 = vld [vmem:[%s2980_s30 + $0xe1] sm:$0xff] }
 0x1aa   : > { %v592_v60 = vadd.f32 %v591_v50, %v3845_v28  ;;  %v3849_v2 = vld [vmem:[#allocation7_spill] sm:$0xff] }
 0x1ab   : > { %v1051_v62 = vadd.f32 %v1010_v32, %v824_v51 }
 0x1ac   : > { %v1238_v42 = vpop.f32.mrf.mxu0 }
 0x1ad   : > { %v3522_v7 = vadd.f32 %v1236_v34, %v1051_v62 }
 0x1b0   : > { %v785_v40 = vpop.f32.mrf.mxu2 }
 0x1b1   : > { %v1012_v36 = vpop.f32.mrf.mxu3  ;;  %v825_v21 = vadd.f32 %v785_v40, %v592_v60  ;;  %v594_v59 = vpop.f32.mrf.mxu1  ;;  %v3850_v40 = vld [vmem:[#allocation10_spill] sm:$0xff] }
 0x1b2   : > { %v595_v9 = vadd.f32 %v594_v59, %v3848_v14 }
 0x1b3   : > { %v1052_v45 = vadd.f32 %v1012_v36, %v825_v21 }
 0x1b4   : > { %v1241_v47 = vpop.f32.mrf.mxu0  ;;  %2722 = vmatmul.msk.bf16.gmra.mxu1 %vm323_vm0, %v3843_v41  ;;  %v2800_v41 = vld [vmem:[%s2980_s30 + $0xd9] sm:$0xff] }
 0x1b5   : > { %2776 = vmatmul.msk.bf16.gmra.mxu2 %vm323_vm0, %v3846_v25  ;;  %v3532_v48 = vadd.f32 %v1238_v42, %v1052_v45  ;;  %v1775_v0 = vpack.c.bf16 %v2801_v31, %v2800_v41 }
 0x1b6   : > { %2830 = vmatmul.msk.bf16.gmra.mxu3 %vm323_vm0, %v1774_v22 }
 0x1b7   : > { %2884 = vmatmul.msk.bf16.gmra.mxu0 %vm323_vm0, %v3847_v23 }
 0x1b8   : > { %v788_v3 = vpop.f32.mrf.mxu2 }
 0x1b9   : > { %v1015_v18 = vpop.f32.mrf.mxu3  ;;  %v826_v61 = vadd.f32 %v788_v3, %v595_v9  ;;  %v596_v16 = vpop.f32.mrf.mxu1  ;;  %v2803_v9 = vld [vmem:[%s2980_s30 + $0xf9] sm:$0xff] }
 0x1ba   : > { %v597_v32 = vadd.f32 %v596_v16, %v3849_v2 }
 0x1bb   : > { %v1053_v34 = vadd.f32 %v1015_v18, %v826_v61 }
 0x1bc   : > { %v1243_v55 = vpop.f32.mrf.mxu0 }
 0x1bd   : > { %v3537_v37 = vadd.f32 %v1241_v47, %v1053_v34 }
 0x1c0   : > { %v790_v51 = vpop.f32.mrf.mxu2 }
 0x1c1   : > { %v1017_v50 = vpop.f32.mrf.mxu3  ;;  %v827_v62 = vadd.f32 %v790_v51, %v597_v32  ;;  %v599_v42 = vpop.f32.mrf.mxu1 }
 0x1c2   : > { %v600_v36 = vadd.f32 %v599_v42, %v3850_v40  ;;  %v3852_v40 = vld [vmem:[#allocation13_spill] sm:$0xff] }
 0x1c3   : > { %v1054_v4 = vadd.f32 %v1017_v50, %v827_v62 }
 0x1c4   : > { %v1246_v28 = vpop.f32.mrf.mxu0  ;;  %2723 = vmatmul.msk.bf16.gmra.mxu1 %vm323_vm0, %v3847_v23  ;;  %v2802_v23 = vld [vmem:[%s2980_s30 + $0xf1] sm:$0xff] }
 0x1c5   : > { %2777 = vmatmul.msk.bf16.gmra.mxu2 %vm323_vm0, %v3275_v12  ;;  %v3547_v60 = vadd.f32 %v1243_v55, %v1054_v4  ;;  %v3851_v12 = vld [vmem:[#allocation11_spill] sm:$0xff]  ;;  %v1776_v55 = vpack.c.bf16 %v2803_v9, %v2802_v23 }
 0x1c6   : > { %2831 = vmatmul.msk.bf16.gmra.mxu3 %vm323_vm0, %v1775_v0  ;;  %v2804_v4 = vld [vmem:[%s2980_s30 + $0x109] sm:$0xff] }
 0x1c7   : > { %2885 = vmatmul.msk.bf16.gmra.mxu0 %vm323_vm0, %v3293_v46 }
 0x1c8   : > { %v793_v21 = vpop.f32.mrf.mxu2 }
 0x1c9   : > { %v1020_v59 = vpop.f32.mrf.mxu3  ;;  %v828_v22 = vadd.f32 %v793_v21, %v600_v36  ;;  %v601_v45 = vpop.f32.mrf.mxu1 }
 0x1ca   : > { %v602_v3 = vadd.f32 %v601_v45, %v3851_v12 }
 0x1cb   : > { %v1055_v47 = vadd.f32 %v1020_v59, %v828_v22 }
 0x1cc   : > { %v1248_v25 = vpop.f32.mrf.mxu0 }
 0x1cd   : > { %v3552_v14 = vadd.f32 %v1246_v28, %v1055_v47  ;;  %v2805_v28 = vld [vmem:[%s2980_s30 + $0x111] sm:$0xff] }
 0x1ce   : > { %v1777_v45 = vpack.c.bf16 %v2805_v28, %v2804_v4 }
 0x1d0   : > { %v795_v18 = vpop.f32.mrf.mxu2 }
 0x1d1   : > { %v1022_v61 = vpop.f32.mrf.mxu3  ;;  %v829_v16 = vadd.f32 %v795_v18, %v602_v3  ;;  %v1397_v34 = vpop.f32.mrf.mxu1 }
 0x1d2   : > { %v1477_v32 = vadd.f32 %v1397_v34, %v3288_v19 }
 0x1d3   : > { %v1056_v41 = vadd.f32 %v1022_v61, %v829_v16 }
 0x1d4   : > { %v2076_v31 = vpop.f32.mrf.mxu0  ;;  %2724 = vmatmul.msk.bf16.gmra.mxu1 %vm323_vm0, %v3293_v46 }
 0x1d5   : > { %2778 = vmatmul.msk.bf16.gmra.mxu2 %vm323_vm0, %v3295_v26  ;;  %v3562_v2 = vadd.f32 %v1248_v25, %v1056_v41 }
 0x1d6   : > { %2832 = vmatmul.msk.bf16.gmra.mxu3 %vm323_vm0, %v1776_v55 }
 0x1d7   : > { %2886 = vmatmul.msk.bf16.gmra.mxu0 %vm323_vm0, %v3315_v63 }
 0x1d8   : > { %v1624_v51 = vpop.f32.mrf.mxu2 }
 0x1d9   : > { %v1850_v50 = vpop.f32.mrf.mxu3  ;;  %v1704_v62 = vadd.f32 %v1624_v51, %v1477_v32  ;;  %v1399_v42 = vpop.f32.mrf.mxu1 }
 0x1da   : > { %v1478_v19 = vadd.f32 %v1399_v42, %v3852_v40  ;;  %v2806_v42 = vld [vmem:[%s2980_s30 + $0x121] sm:$0xff] }
 0x1db   : > { %v1930_v0 = vadd.f32 %v1850_v50, %v1704_v62 }
 0x1dc   : > { %v2078_v46 = vpop.f32.mrf.mxu0 }
 0x1dd   : > { %v2156_v26 = vadd.f32 %v2076_v31, %v1930_v0  ;;  %v2807_v0 = vld [vmem:[%s2980_s30 + $0x129] sm:$0xff] }
 0x1df   : > { %2188 = vst.msk [vmem:[%s3571_s18] sm:$0xff] %vm323_vm0, %v2156_v26  ;;  %v2291_v23 = vmul.f32 %v2156_v26, %v2156_v26  ;;  %v2220_v12 = vsel %vm323_vm0, %v2156_v26, 0.0  ;;  %v3853_v26 = vld [vmem:[#allocation14_spill] sm:$0xff] }
 0x1e0   : > { %v1626_v36 = vpop.f32.mrf.mxu2 }
 0x1e1   : > { %v1852_v21 = vpop.f32.mrf.mxu3  ;;  %v1705_v59 = vadd.f32 %v1626_v36, %v1478_v19  ;;  %v1402_v22 = vpop.f32.mrf.mxu1  ;;  %v2323_v34 = vsel %vm323_vm0, %v2291_v23, 0.0 }
 0x1e2   : > { %v1479_v18 = vadd.f32 %v1402_v22, %v3310_v17  ;;  %v1778_v22 = vpack.c.bf16 %v2807_v0, %v2806_v42 }
 0x1e3   : > { %v1931_v47 = vadd.f32 %v1852_v21, %v1705_v59 }
 0x1e4   : > { %v2081_v25 = vpop.f32.mrf.mxu0  ;;  %2725 = vmatmul.msk.bf16.gmra.mxu1 %vm323_vm0, %v3315_v63 }
 0x1e5   : > { %v2157_v9 = vadd.f32 %v2078_v46, %v1931_v47  ;;  %2779 = vmatmul.msk.bf16.gmra.mxu2 %vm323_vm0, %v3317_v38 }
 0x1e6   : > { %2833 = vmatmul.msk.bf16.gmra.mxu3 %vm323_vm0, %v1777_v45 }
 0x1e7   : > { %2887 = vmatmul.msk.bf16.gmra.mxu0 %vm323_vm0, %v3337_v43  ;;  %2189 = vst.msk [vmem:[%s3571_s18 + $0x8] sm:$0xff] %vm323_vm0, %v2157_v9  ;;  %v2221_v3 = vsel %vm323_vm0, %v2157_v9, 0.0  ;;  %v2292_v63 = vmul.f32 %v2157_v9, %v2157_v9 }
 0x1e8   : > { %v2222_v61 = vadd.f32 %v2221_v3, %v2220_v12  ;;  %v1629_v16 = vpop.f32.mrf.mxu2 }
 0x1e9   : > { %v1855_v38 = vpop.f32.mrf.mxu3  ;;  %v2324_v55 = vsel %vm323_vm0, %v2292_v63, 0.0  ;;  %v1706_v41 = vadd.f32 %v1629_v16, %v1479_v18  ;;  %v1404_v31 = vpop.f32.mrf.mxu1 }
 0x1ea   : > { %v2325_v32 = vadd.f32 %v2324_v55, %v2323_v34  ;;  %v1480_v4 = vadd.f32 %v1404_v31, %v3853_v26  ;;  %v2808_v31 = vld [vmem:[%s2980_s30 + $0x139] sm:$0xff] }
 0x1eb   : > { %v1932_v51 = vadd.f32 %v1855_v38, %v1706_v41 }
 0x1ec   : > { %v2083_v50 = vpop.f32.mrf.mxu0 }
 0x1ed   : > { %v2158_v62 = vadd.f32 %v2081_v25, %v1932_v51 }
 0x1ef   : > { %2190 = vst.msk [vmem:[%s3571_s18 + $0x10] sm:$0xff] %vm323_vm0, %v2158_v62  ;;  %v2223_v46 = vsel %vm323_vm0, %v2158_v62, 0.0  ;;  %v2293_v17 = vmul.f32 %v2158_v62, %v2158_v62  ;;  %v3854_v62 = vld [vmem:[#allocation15_spill] sm:$0xff] }
 0x1f0   : > { %v2224_v28 = vadd.f32 %v2223_v46, %v2222_v61  ;;  %v1631_v40 = vpop.f32.mrf.mxu2 }
 0x1f1   : > { %v1857_v19 = vpop.f32.mrf.mxu3  ;;  %v2326_v36 = vsel %vm323_vm0, %v2293_v17, 0.0  ;;  %v1707_v21 = vadd.f32 %v1631_v40, %v1480_v4  ;;  %v1407_v59 = vpop.f32.mrf.mxu1 }
 0x1f2   : > { %v2327_v45 = vadd.f32 %v2326_v36, %v2325_v32  ;;  %v1481_v3 = vadd.f32 %v1407_v59, %v3332_v58  ;;  %v2809_v32 = vld [vmem:[%s2980_s30 + $0x141] sm:$0xff] }
 0x1f3   : > { %v1933_v47 = vadd.f32 %v1857_v19, %v1707_v21 }
 0x1f4   : > { %v2086_v25 = vpop.f32.mrf.mxu0  ;;  %2726 = vmatmul.msk.bf16.gmra.mxu1 %vm323_vm0, %v3337_v43 }
 0x1f5   : > { %v2159_v23 = vadd.f32 %v2083_v50, %v1933_v47  ;;  %2780 = vmatmul.msk.bf16.gmra.mxu2 %vm323_vm0, %v3339_v54 }
 0x1f6   : > { %2834 = vmatmul.msk.bf16.gmra.mxu3 %vm323_vm0, %v1778_v22 }
 0x1f7   : > { %2888 = vmatmul.msk.bf16.gmra.mxu0 %vm323_vm0, %v3359_v49  ;;  %2191 = vst.msk [vmem:[%s3571_s18 + $0x18] sm:$0xff] %vm323_vm0, %v2159_v23  ;;  %v2225_v9 = vsel %vm323_vm0, %v2159_v23, 0.0  ;;  %v2294_v12 = vmul.f32 %v2159_v23, %v2159_v23 }
 0x1f8   : > { %v2226_v43 = vadd.f32 %v2225_v9, %v2224_v28  ;;  %v1634_v63 = vpop.f32.mrf.mxu2  ;;  %v1779_v28 = vpack.c.bf16 %v2809_v32, %v2808_v31 }
 0x1f9   : > { %v1860_v18 = vpop.f32.mrf.mxu3  ;;  %v2328_v54 = vsel %vm323_vm0, %v2294_v12, 0.0  ;;  %v1708_v61 = vadd.f32 %v1634_v63, %v1481_v3  ;;  %v1409_v16 = vpop.f32.mrf.mxu1 }
 0x1fa   : > { %v2329_v38 = vadd.f32 %v2328_v54, %v2327_v45  ;;  %v1482_v58 = vadd.f32 %v1409_v16, %v3854_v62  ;;  %v3855_v45 = vld [vmem:[#allocation16_spill] sm:$0xff] }
 0x1fb   : > { %v1934_v34 = vadd.f32 %v1860_v18, %v1708_v61  ;;  %v2810_v54 = vld [vmem:[%s2980_s30 + $0x151] sm:$0xff]  ;;  %v2811_v61 = vld [vmem:[%s2980_s30 + $0x159] sm:$0xff] }
 0x1fc   : > { %v2088_v55 = vpop.f32.mrf.mxu0 }
 0x1fd   : > { %v2160_v41 = vadd.f32 %v2086_v25, %v1934_v34  ;;  %v3856_v34 = vld [vmem:[#allocation17_spill] sm:$0xff] }
 0x1ff   : > { %2192 = vst.msk [vmem:[%s3571_s18 + $0x20] sm:$0xff] %vm323_vm0, %v2160_v41  ;;  %v2227_v51 = vsel %vm323_vm0, %v2160_v41, 0.0  ;;  %v2295_v50 = vmul.f32 %v2160_v41, %v2160_v41 }
 0x200   : > { %v2228_v42 = vadd.f32 %v2227_v51, %v2226_v43  ;;  %v1636_v0 = vpop.f32.mrf.mxu2 }
 0x201   : > { %v1862_v46 = vpop.f32.mrf.mxu3  ;;  %v2330_v17 = vsel %vm323_vm0, %v2295_v50, 0.0  ;;  %v1709_v26 = vadd.f32 %v1636_v0, %v1482_v58  ;;  %v1412_v4 = vpop.f32.mrf.mxu1  ;;  %v1780_v58 = vpack.c.bf16 %v2811_v61, %v2810_v54 }
 0x202   : > { %v2331_v40 = vadd.f32 %v2330_v17, %v2329_v38  ;;  %v1483_v47 = vadd.f32 %v1412_v4, %v3855_v45 }
 0x203   : > { %v1935_v19 = vadd.f32 %v1862_v46, %v1709_v26 }
 0x204   : > { %v2091_v36 = vpop.f32.mrf.mxu0  ;;  %2727 = vmatmul.msk.bf16.gmra.mxu1 %vm323_vm0, %v3359_v49 }
 0x205   : > { %v2161_v21 = vadd.f32 %v2088_v55, %v1935_v19  ;;  %2781 = vmatmul.msk.bf16.gmra.mxu2 %vm323_vm0, %v3361_v13 }
 0x206   : > { %2835 = vmatmul.msk.bf16.gmra.mxu3 %vm323_vm0, %v1779_v28 }
 0x207   : > { %2889 = vmatmul.msk.bf16.gmra.mxu0 %vm323_vm0, %v3381_v33  ;;  %2193 = vst.msk [vmem:[%s3571_s18 + $0x28] sm:$0xff] %vm323_vm0, %v2161_v21  ;;  %v2229_v59 = vsel %vm323_vm0, %v2161_v21, 0.0  ;;  %v2296_v22 = vmul.f32 %v2161_v21, %v2161_v21 }
 0x208   : > { %v2230_v49 = vadd.f32 %v2229_v59, %v2228_v42  ;;  %v1639_v25 = vpop.f32.mrf.mxu2 }
 0x209   : > { %v1865_v23 = vpop.f32.mrf.mxu3  ;;  %v2332_v13 = vsel %vm323_vm0, %v2296_v22, 0.0  ;;  %v1710_v9 = vadd.f32 %v1639_v25, %v1483_v47  ;;  %v1414_v12 = vpop.f32.mrf.mxu1  ;;  %v2704_v47 = vld [vmem:[%s2980_s30 + $0x152] sm:$0xff]  ;;  %v2758_v25 = vld [vmem:[%s2980_s30 + $0x168] sm:$0xff] }
 0x20a   : > { %v2333_v3 = vadd.f32 %v2332_v13, %v2331_v40  ;;  %v1484_v55 = vadd.f32 %v1414_v12, %v3856_v34  ;;  %v2812_v13 = vld [vmem:[%s2980_s30 + $0x169] sm:$0xff] }
 0x20b   : > { %v1936_v43 = vadd.f32 %v1865_v23, %v1710_v9  ;;  %v2759_v23 = vld [vmem:[%s2980_s30 + $0x170] sm:$0xff] }
 0x20c   : > { %v2093_v63 = vpop.f32.mrf.mxu0  ;;  %v2813_v9 = vld [vmem:[%s2980_s30 + $0x171] sm:$0xff] }
 0x20d   : > { %v2162_v18 = vadd.f32 %v2091_v36, %v1936_v43 }
 0x20f   : > { %2194 = vst.msk [vmem:[%s3571_s18 + $0x30] sm:$0xff] %vm323_vm0, %v2162_v18  ;;  %v2231_v16 = vsel %vm323_vm0, %v2162_v18, 0.0  ;;  %v2297_v38 = vmul.f32 %v2162_v18, %v2162_v18 }
 0x210   : > { %v2232_v41 = vadd.f32 %v2231_v16, %v2230_v49  ;;  %v1641_v31 = vpop.f32.mrf.mxu2  ;;  %v2705_v49 = vld [vmem:[%s2980_s30 + $0x15a] sm:$0xff] }
 0x211   : > { %v1867_v32 = vpop.f32.mrf.mxu3  ;;  %v2334_v51 = vsel %vm323_vm0, %v2297_v38, 0.0  ;;  %v1711_v50 = vadd.f32 %v1641_v31, %v1484_v55  ;;  %v1417_v62 = vpop.f32.mrf.mxu1  ;;  %v1328_v61 = vpack.c.bf16 %v2705_v49, %v2704_v47  ;;  %v1555_v55 = vpack.c.bf16 %v2759_v23, %v2758_v25  ;;  %v3858_v47 = vld [vmem:[#allocation19_spill] sm:$0xff] }
 0x212   : > { %v2335_v42 = vadd.f32 %v2334_v51, %v2333_v3  ;;  %v3857_v3 = vld [vmem:[#allocation18_spill] sm:$0xff]  ;;  %v2869_v23 = vld [vmem:[%s2980_s30 + $0x18a] sm:$0xff] }
 0x213   : > { %v1937_v0 = vadd.f32 %v1867_v32, %v1711_v50  ;;  %v2868_v25 = vld [vmem:[%s2980_s30 + $0x182] sm:$0xff] }
 0x214   : > { %v2096_v46 = vpop.f32.mrf.mxu0  ;;  %2728 = vmatmul.msk.bf16.gmra.mxu1 %vm323_vm0, %v3381_v33  ;;  %v1485_v33 = vadd.f32 %v1417_v62, %v3375_v10 }
 0x215   : > { %v2163_v17 = vadd.f32 %v2093_v63, %v1937_v0  ;;  %2782 = vmatmul.msk.bf16.gmra.mxu2 %vm323_vm0, %v3383_v30 }
 0x216   : > { %2836 = vmatmul.msk.bf16.gmra.mxu3 %vm323_vm0, %v1780_v58 }
 0x217   : > { %2890 = vmatmul.msk.bf16.gmra.mxu0 %vm323_vm0, %v3403_v35  ;;  %2195 = vst.msk [vmem:[%s3571_s18 + $0x38] sm:$0xff] %vm323_vm0, %v2163_v17  ;;  %v2233_v26 = vsel %vm323_vm0, %v2163_v17, 0.0  ;;  %v2298_v4 = vmul.f32 %v2163_v17, %v2163_v17 }
 0x218   : > { %v2234_v28 = vadd.f32 %v2233_v26, %v2232_v41  ;;  %v1644_v30 = vpop.f32.mrf.mxu2  ;;  %v1781_v41 = vpack.c.bf16 %v2813_v9, %v2812_v13 }
 0x219   : > { %v1870_v40 = vpop.f32.mrf.mxu3  ;;  %v2336_v19 = vsel %vm323_vm0, %v2298_v4, 0.0  ;;  %v1712_v36 = vadd.f32 %v1644_v30, %v1485_v33  ;;  %v1419_v35 = vpop.f32.mrf.mxu1 }
 0x21a   : > { %v2337_v21 = vadd.f32 %v2336_v19, %v2335_v42  ;;  %v1486_v43 = vadd.f32 %v1419_v35, %v3857_v3  ;;  %v2706_v19 = vld [vmem:[%s2980_s30 + $0x16a] sm:$0xff]  ;;  %v2760_v35 = vld [vmem:[%s2980_s30 + $0x180] sm:$0xff] }
 0x21b   : > { %v1938_v59 = vadd.f32 %v1870_v40, %v1712_v36  ;;  %v2707_v36 = vld [vmem:[%s2980_s30 + $0x172] sm:$0xff] }
 0x21c   : > { %v2098_v22 = vpop.f32.mrf.mxu0 }
 0x21d   : > { %v2164_v45 = vadd.f32 %v2096_v46, %v1938_v59  ;;  %v2815_v59 = vld [vmem:[%s2980_s30 + $0x189] sm:$0xff] }
 0x21f   : > { %2196 = vst.msk [vmem:[%s3571_s18 + $0x40] sm:$0xff] %vm323_vm0, %v2164_v45  ;;  %v2235_v10 = vsel %vm323_vm0, %v2164_v45, 0.0  ;;  %v2299_v12 = vmul.f32 %v2164_v45, %v2164_v45 }
 0x220   : > { %v2236_v63 = vadd.f32 %v2235_v10, %v2234_v28  ;;  %v1646_v18 = vpop.f32.mrf.mxu2 }
 0x221   : > { %v1872_v54 = vpop.f32.mrf.mxu3  ;;  %v2338_v16 = vsel %vm323_vm0, %v2299_v12, 0.0  ;;  %v1713_v38 = vadd.f32 %v1646_v18, %v1486_v43  ;;  %v1422_v34 = vpop.f32.mrf.mxu1  ;;  %v1329_v12 = vpack.c.bf16 %v2707_v36, %v2706_v19  ;;  %v2870_v36 = vld [vmem:[%s2980_s30 + $0x19a] sm:$0xff] }
 0x222   : > { %v2339_v31 = vadd.f32 %v2338_v16, %v2337_v21  ;;  %v1487_v42 = vadd.f32 %v1422_v34, %v3397_v29  ;;  %v2761_v21 = vld [vmem:[%s2980_s30 + $0x188] sm:$0xff]  ;;  %v2008_v16 = vpack.c.bf16 %v2869_v23, %v2868_v25 }
 0x223   : > { %v1939_v32 = vadd.f32 %v1872_v54, %v1713_v38  ;;  %v2814_v29 = vld [vmem:[%s2980_s30 + $0x181] sm:$0xff]  ;;  %v1556_v18 = vpack.c.bf16 %v2761_v21, %v2760_v35 }
 0x224   : > { %v2101_v51 = vpop.f32.mrf.mxu0  ;;  %2729 = vmatmul.msk.bf16.gmra.mxu1 %vm323_vm0, %v1328_v61  ;;  %v1782_v54 = vpack.c.bf16 %v2815_v59, %v2814_v29  ;;  %v2871_v35 = vld [vmem:[%s2980_s30 + $0x1a2] sm:$0xff] }
 0x225   : > { %v2165_v50 = vadd.f32 %v2098_v22, %v1939_v32  ;;  %2783 = vmatmul.msk.bf16.gmra.mxu2 %vm323_vm0, %v1555_v55 }
 0x226   : > { %2837 = vmatmul.msk.bf16.gmra.mxu3 %vm323_vm0, %v1781_v41 }
 0x227   : > { %2891 = vmatmul.msk.bf16.gmra.mxu0 %vm323_vm0, %v3424_v39  ;;  %2197 = vst.msk [vmem:[%s3571_s18 + $0x48] sm:$0xff] %vm323_vm0, %v2165_v50  ;;  %v2237_v62 = vsel %vm323_vm0, %v2165_v50, 0.0  ;;  %v2300_v58 = vmul.f32 %v2165_v50, %v2165_v50 }
 0x228   : > { %v2238_v0 = vadd.f32 %v2237_v62, %v2236_v63  ;;  %v1649_v46 = vpop.f32.mrf.mxu2 }
 0x229   : > { %v1875_v17 = vpop.f32.mrf.mxu3  ;;  %v2340_v26 = vsel %vm323_vm0, %v2300_v58, 0.0  ;;  %v1714_v4 = vadd.f32 %v1649_v46, %v1487_v42  ;;  %v1424_v39 = vpop.f32.mrf.mxu1 }
 0x22a   : > { %v2341_v33 = vadd.f32 %v2340_v26, %v2339_v31  ;;  %v1488_v49 = vadd.f32 %v1424_v39, %v3858_v47  ;;  %v2762_v39 = vld [vmem:[%s2980_s30 + $0x198] sm:$0xff] }
 0x22b   : > { %v1940_v28 = vadd.f32 %v1875_v17, %v1714_v4 }
 0x22c   : > { %v2103_v30 = vpop.f32.mrf.mxu0 }
 0x22d   : > { %v2166_v40 = vadd.f32 %v2101_v51, %v1940_v28  ;;  %v2816_v28 = vld [vmem:[%s2980_s30 + $0x199] sm:$0xff] }
 0x22f   : > { %2198 = vst.msk [vmem:[%s3571_s18 + $0x50] sm:$0xff] %vm323_vm0, %v2166_v40  ;;  %v2239_v22 = vsel %vm323_vm0, %v2166_v40, 0.0  ;;  %v2301_v45 = vmul.f32 %v2166_v40, %v2166_v40 }
 0x230   : > { %v2240_v13 = vadd.f32 %v2239_v22, %v2238_v0  ;;  %v1651_v9 = vpop.f32.mrf.mxu2 }
 0x231   : > { %v1877_v10 = vpop.f32.mrf.mxu3  ;;  %v2342_v3 = vsel %vm323_vm0, %v2301_v45, 0.0  ;;  %v1715_v43 = vadd.f32 %v1651_v9, %v1488_v49  ;;  %v1427_v63 = vpop.f32.mrf.mxu1 }
 0x232   : > { %v2343_v61 = vadd.f32 %v2342_v3, %v2341_v33  ;;  %v1489_v32 = vadd.f32 %v1427_v63, %v3416_v11  ;;  %v2763_v33 = vld [vmem:[%s2980_s30 + $0x1a0] sm:$0xff] }
 0x233   : > { %v1941_v38 = vadd.f32 %v1877_v10, %v1715_v43  ;;  %v1557_v49 = vpack.c.bf16 %v2763_v33, %v2762_v39 }
 0x234   : > { %v2106_v34 = vpop.f32.mrf.mxu0  ;;  %2730 = vmatmul.msk.bf16.gmra.mxu1 %vm323_vm0, %v1329_v12 }
 0x235   : > { %v2167_v55 = vadd.f32 %v2103_v30, %v1941_v38  ;;  %2784 = vmatmul.msk.bf16.gmra.mxu2 %vm323_vm0, %v1556_v18  ;;  %v2817_v30 = vld [vmem:[%s2980_s30 + $0x1a1] sm:$0xff] }
 0x236   : > { %2838 = vmatmul.msk.bf16.gmra.mxu3 %vm323_vm0, %v1782_v54  ;;  %v1783_v25 = vpack.c.bf16 %v2817_v30, %v2816_v28 }
 0x237   : > { %2892 = vmatmul.msk.bf16.gmra.mxu0 %vm323_vm0, %v2008_v16  ;;  %2199 = vst.msk [vmem:[%s3571_s18 + $0x58] sm:$0xff] %vm323_vm0, %v2167_v55  ;;  %v2241_v41 = vsel %vm323_vm0, %v2167_v55, 0.0  ;;  %v2302_v31 = vmul.f32 %v2167_v55, %v2167_v55 }
 0x238   : > { %v2242_v51 = vadd.f32 %v2241_v41, %v2240_v13  ;;  %v1654_v50 = vpop.f32.mrf.mxu2  ;;  %v2009_v13 = vpack.c.bf16 %v2871_v35, %v2870_v36 }
 0x239   : > { %v1880_v62 = vpop.f32.mrf.mxu3  ;;  %v2344_v58 = vsel %vm323_vm0, %v2302_v31, 0.0  ;;  %v1716_v42 = vadd.f32 %v1654_v50, %v1489_v32  ;;  %v1429_v0 = vpop.f32.mrf.mxu1 }
 0x23a   : > { %v2345_v46 = vadd.f32 %v2344_v58, %v2343_v61  ;;  %v1490_v19 = vadd.f32 %v1429_v0, %v3430_v5 }
 0x23b   : > { %v1942_v17 = vadd.f32 %v1880_v62, %v1716_v42 }
 0x23c   : > { %v2108_v26 = vpop.f32.mrf.mxu0 }
 0x23d   : > { %v2168_v4 = vadd.f32 %v2106_v34, %v1942_v17 }
 0x23f   : > { %2200 = vst.msk [vmem:[%s3571_s18 + $0x60] sm:$0xff] %vm323_vm0, %v2168_v4  ;;  %v2243_v11 = vsel %vm323_vm0, %v2168_v4, 0.0  ;;  %v2303_v40 = vmul.f32 %v2168_v4, %v2168_v4 }
 0x240   : > { %v2244_v21 = vadd.f32 %v2243_v11, %v2242_v51  ;;  %v1656_v29 = vpop.f32.mrf.mxu2 }
 0x241   : > { %v1882_v59 = vpop.f32.mrf.mxu3  ;;  %v2346_v22 = vsel %vm323_vm0, %v2303_v40, 0.0  ;;  %v1717_v45 = vadd.f32 %v1656_v29, %v1490_v19  ;;  %v1432_v47 = vpop.f32.mrf.mxu1 }
 0x242   : > { %v2347_v23 = vadd.f32 %v2346_v22, %v2345_v46  ;;  %v1491_v43 = vadd.f32 %v1432_v47, %v3434_v57 }
 0x243   : > { %v1943_v9 = vadd.f32 %v1882_v59, %v1717_v45 }
 0x244   : > { %v2111_v10 = vpop.f32.mrf.mxu0  ;;  %2731 = vmatmul.msk.bf16.gmra.mxu1 %vm323_vm0, %v2008_v16 }
 0x245   : > { %v2169_v12 = vadd.f32 %v2108_v26, %v1943_v9  ;;  %2785 = vmatmul.msk.bf16.gmra.mxu2 %vm323_vm0, %v1557_v49 }
 0x246   : > { %2839 = vmatmul.msk.bf16.gmra.mxu3 %vm323_vm0, %v1783_v25 }
 0x247   : > { %2893 = vmatmul.msk.bf16.gmra.mxu0 %vm323_vm0, %v2009_v13  ;;  %2201 = vst.msk [vmem:[%s3571_s18 + $0x68] sm:$0xff] %vm323_vm0, %v2169_v12  ;;  %v2245_v5 = vsel %vm323_vm0, %v2169_v12, 0.0  ;;  %v2304_v3 = vmul.f32 %v2169_v12, %v2169_v12 }
 0x248   : > { %v2246_v63 = vadd.f32 %v2245_v5, %v2244_v21  ;;  %v1659_v18 = vpop.f32.mrf.mxu2 }
 0x249   : > { %v1885_v54 = vpop.f32.mrf.mxu3  ;;  %v2348_v61 = vsel %vm323_vm0, %v2304_v3, 0.0  ;;  %v1718_v16 = vadd.f32 %v1659_v18, %v1491_v43  ;;  %v1434_v38 = vpop.f32.mrf.mxu1 }
 0x24a   : > { %v2349_v34 = vadd.f32 %v2348_v61, %v2347_v23  ;;  %v1492_v50 = vadd.f32 %v1434_v38, %v3443_v53 }
 0x24b   : > { %v1944_v55 = vadd.f32 %v1885_v54, %v1718_v16 }
 0x24c   : > { %v2113_v41 = vpop.f32.mrf.mxu0 }
 0x24d   : > { %v2170_v31 = vadd.f32 %v2111_v10, %v1944_v55 }
 0x24f   : > { %2202 = vst.msk [vmem:[%s3571_s18 + $0x70] sm:$0xff] %vm323_vm0, %v2170_v31  ;;  %v2247_v32 = vsel %vm323_vm0, %v2170_v31, 0.0  ;;  %v2305_v51 = vmul.f32 %v2170_v31, %v2170_v31 }
 0x250   : > { %v2248_v57 = vadd.f32 %v2247_v32, %v2246_v63  ;;  %v1661_v62 = vpop.f32.mrf.mxu2 }
 0x251   : > { %v1887_v58 = vpop.f32.mrf.mxu3  ;;  %v2350_v42 = vsel %vm323_vm0, %v2305_v51, 0.0  ;;  %v1719_v0 = vadd.f32 %v1661_v62, %v1492_v50  ;;  %v1437_v46 = vpop.f32.mrf.mxu1 }
 0x252   : > { %v2351_v17 = vadd.f32 %v2350_v42, %v2349_v34  ;;  %v1493_v30 = vadd.f32 %v1437_v46, %v3448_v6 }
 0x253   : > { %v1945_v26 = vadd.f32 %v1887_v58, %v1719_v0 }
 0x254   : > { %v2116_v4 = vpop.f32.mrf.mxu0 }
 0x255   : > { %v2171_v39 = vadd.f32 %v2113_v41, %v1945_v26 }
 0x257   : > { %2203 = vst.msk [vmem:[%s3571_s18 + $0x78] sm:$0xff] %vm323_vm0, %v2171_v39  ;;  %v2249_v33 = vsel %vm323_vm0, %v2171_v39, 0.0  ;;  %v2306_v28 = vmul.f32 %v2171_v39, %v2171_v39 }
 0x258   : > { %v2250_v53 = vadd.f32 %v2249_v33, %v2248_v57  ;;  %v1664_v11 = vpop.f32.mrf.mxu2 }
 0x259   : > { %v1890_v40 = vpop.f32.mrf.mxu3  ;;  %v2352_v19 = vsel %vm323_vm0, %v2306_v28, 0.0  ;;  %v1720_v36 = vadd.f32 %v1664_v11, %v1493_v30  ;;  %v1439_v35 = vpop.f32.mrf.mxu1 }
 0x25a   : > { %v2353_v21 = vadd.f32 %v2352_v19, %v2351_v17  ;;  %v1494_v49 = vadd.f32 %v1439_v35, %v3457_v8 }
 0x25b   : > { %v1946_v29 = vadd.f32 %v1890_v40, %v1720_v36 }
 0x25c   : > { %v2118_v59 = vpop.f32.mrf.mxu0 }
 0x25d   : > { %v2172_v22 = vadd.f32 %v2116_v4, %v1946_v29 }
 0x25f   : > { %2204 = vst.msk [vmem:[%s3571_s18 + $0x80] sm:$0xff] %vm323_vm0, %v2172_v22  ;;  %v2251_v45 = vsel %vm323_vm0, %v2172_v22, 0.0  ;;  %v2307_v47 = vmul.f32 %v2172_v22, %v2172_v22 }
 0x260   : > { %v2252_v6 = vadd.f32 %v2251_v45, %v2250_v53  ;;  %v1666_v25 = vpop.f32.mrf.mxu2 }
 0x261   : > { %v1892_v23 = vpop.f32.mrf.mxu3  ;;  %v2354_v13 = vsel %vm323_vm0, %v2307_v47, 0.0  ;;  %v1721_v9 = vadd.f32 %v1666_v25, %v1494_v49  ;;  %v1442_v10 = vpop.f32.mrf.mxu1 }
 0x262   : > { %v2355_v12 = vadd.f32 %v2354_v13, %v2353_v21  ;;  %v1495_v54 = vadd.f32 %v1442_v10, %v3462_v15 }
 0x263   : > { %v1947_v5 = vadd.f32 %v1892_v23, %v1721_v9 }
 0x264   : > { %v2121_v3 = vpop.f32.mrf.mxu0 }
 0x265   : > { %v2173_v43 = vadd.f32 %v2118_v59, %v1947_v5 }
 0x267   : > { %2205 = vst.msk [vmem:[%s3571_s18 + $0x88] sm:$0xff] %vm323_vm0, %v2173_v43  ;;  %v2253_v63 = vsel %vm323_vm0, %v2173_v43, 0.0  ;;  %v2308_v18 = vmul.f32 %v2173_v43, %v2173_v43 }
 0x268   : > { %v2254_v8 = vadd.f32 %v2253_v63, %v2252_v6  ;;  %v1669_v61 = vpop.f32.mrf.mxu2 }
 0x269   : > { %v1895_v16 = vpop.f32.mrf.mxu3  ;;  %v2356_v38 = vsel %vm323_vm0, %v2308_v18, 0.0  ;;  %v1722_v34 = vadd.f32 %v1669_v61, %v1495_v54  ;;  %v1444_v55 = vpop.f32.mrf.mxu1 }
 0x26a   : > { %v2357_v41 = vadd.f32 %v2356_v38, %v2355_v12  ;;  %v1496_v62 = vadd.f32 %v1444_v55, %v3472_v1 }
 0x26b   : > { %v1948_v31 = vadd.f32 %v1895_v16, %v1722_v34 }
 0x26c   : > { %v2123_v32 = vpop.f32.mrf.mxu0 }
 0x26d   : > { %v2174_v51 = vadd.f32 %v2121_v3, %v1948_v31 }
 0x26f   : > { %2206 = vst.msk [vmem:[%s3571_s18 + $0x90] sm:$0xff] %vm323_vm0, %v2174_v51  ;;  %v2255_v50 = vsel %vm323_vm0, %v2174_v51, 0.0  ;;  %v2309_v57 = vmul.f32 %v2174_v51, %v2174_v51 }
 0x270   : > { %v2256_v15 = vadd.f32 %v2255_v50, %v2254_v8  ;;  %v1671_v58 = vpop.f32.mrf.mxu2 }
 0x271   : > { %v1897_v42 = vpop.f32.mrf.mxu3  ;;  %v2358_v0 = vsel %vm323_vm0, %v2309_v57, 0.0  ;;  %v1723_v46 = vadd.f32 %v1671_v58, %v1496_v62  ;;  %v1447_v17 = vpop.f32.mrf.mxu1 }
 0x272   : > { %v2359_v26 = vadd.f32 %v2358_v0, %v2357_v41  ;;  %v1497_v53 = vadd.f32 %v1447_v17, %v3477_v44 }
 0x273   : > { %v1949_v4 = vadd.f32 %v1897_v42, %v1723_v46 }
 0x274   : > { %v2126_v39 = vpop.f32.mrf.mxu0 }
 0x275   : > { %v2175_v33 = vadd.f32 %v2123_v32, %v1949_v4 }
 0x277   : > { %2207 = vst.msk [vmem:[%s3571_s18 + $0x98] sm:$0xff] %vm323_vm0, %v2175_v33  ;;  %v2257_v28 = vsel %vm323_vm0, %v2175_v33, 0.0  ;;  %v2310_v30 = vmul.f32 %v2175_v33, %v2175_v33 }
 0x278   : > { %v2258_v1 = vadd.f32 %v2257_v28, %v2256_v15  ;;  %v1674_v11 = vpop.f32.mrf.mxu2 }
 0x279   : > { %v1900_v40 = vpop.f32.mrf.mxu3  ;;  %v2360_v19 = vsel %vm323_vm0, %v2310_v30, 0.0  ;;  %v1724_v36 = vadd.f32 %v1674_v11, %v1497_v53  ;;  %v1449_v35 = vpop.f32.mrf.mxu1 }
 0x27a   : > { %v2361_v21 = vadd.f32 %v2360_v19, %v2359_v26  ;;  %v1498_v49 = vadd.f32 %v1449_v35, %v3487_v27 }
 0x27b   : > { %v1950_v29 = vadd.f32 %v1900_v40, %v1724_v36 }
 0x27c   : > { %v2128_v59 = vpop.f32.mrf.mxu0 }
 0x27d   : > { %v2176_v22 = vadd.f32 %v2126_v39, %v1950_v29 }
 0x27f   : > { %2208 = vst.msk [vmem:[%s3571_s18 + $0xa0] sm:$0xff] %vm323_vm0, %v2176_v22  ;;  %v2259_v45 = vsel %vm323_vm0, %v2176_v22, 0.0  ;;  %v2311_v47 = vmul.f32 %v2176_v22, %v2176_v22 }
 0x280   : > { %v2260_v44 = vadd.f32 %v2259_v45, %v2258_v1  ;;  %v1676_v6 = vpop.f32.mrf.mxu2 }
 0x281   : > { %v1902_v25 = vpop.f32.mrf.mxu3  ;;  %v2362_v23 = vsel %vm323_vm0, %v2311_v47, 0.0  ;;  %v1725_v13 = vadd.f32 %v1676_v6, %v1498_v49  ;;  %v1452_v9 = vpop.f32.mrf.mxu1 }
 0x282   : > { %v2363_v10 = vadd.f32 %v2362_v23, %v2361_v21  ;;  %v1499_v18 = vadd.f32 %v1452_v9, %v3492_v24 }
 0x283   : > { %v1951_v12 = vadd.f32 %v1902_v25, %v1725_v13 }
 0x284   : > { %v2131_v5 = vpop.f32.mrf.mxu0 }
 0x285   : > { %v2177_v3 = vadd.f32 %v2128_v59, %v1951_v12 }
 0x287   : > { %2209 = vst.msk [vmem:[%s3571_s18 + $0xa8] sm:$0xff] %vm323_vm0, %v2177_v3  ;;  %v2261_v43 = vsel %vm323_vm0, %v2177_v3, 0.0  ;;  %v2312_v63 = vmul.f32 %v2177_v3, %v2177_v3 }
 0x288   : > { %v2262_v27 = vadd.f32 %v2261_v43, %v2260_v44  ;;  %v1679_v54 = vpop.f32.mrf.mxu2 }
 0x289   : > { %v1905_v8 = vpop.f32.mrf.mxu3  ;;  %v2364_v61 = vsel %vm323_vm0, %v2312_v63, 0.0  ;;  %v1726_v16 = vadd.f32 %v1679_v54, %v1499_v18  ;;  %v1454_v38 = vpop.f32.mrf.mxu1 }
 0x28a   : > { %v2365_v34 = vadd.f32 %v2364_v61, %v2363_v10  ;;  %v1500_v50 = vadd.f32 %v1454_v38, %v3502_v20 }
 0x28b   : > { %v1952_v55 = vadd.f32 %v1905_v8, %v1726_v16 }
 0x28c   : > { %v2133_v41 = vpop.f32.mrf.mxu0 }
 0x28d   : > { %v2178_v31 = vadd.f32 %v2131_v5, %v1952_v55 }
 0x28f   : > { %2210 = vst.msk [vmem:[%s3571_s18 + $0xb0] sm:$0xff] %vm323_vm0, %v2178_v31  ;;  %v2263_v32 = vsel %vm323_vm0, %v2178_v31, 0.0  ;;  %v2313_v51 = vmul.f32 %v2178_v31, %v2178_v31 }
 0x290   : > { %v2264_v24 = vadd.f32 %v2263_v32, %v2262_v27  ;;  %v1681_v57 = vpop.f32.mrf.mxu2 }
 0x291   : > { %v1907_v62 = vpop.f32.mrf.mxu3  ;;  %v2366_v15 = vsel %vm323_vm0, %v2313_v51, 0.0  ;;  %v1727_v58 = vadd.f32 %v1681_v57, %v1500_v50  ;;  %v1457_v42 = vpop.f32.mrf.mxu1 }
 0x292   : > { %v2367_v0 = vadd.f32 %v2366_v15, %v2365_v34  ;;  %v1501_v33 = vadd.f32 %v1457_v42, %v3507_v52 }
 0x293   : > { %v1953_v46 = vadd.f32 %v1907_v62, %v1727_v58 }
 0x294   : > { %v2136_v17 = vpop.f32.mrf.mxu0 }
 0x295   : > { %v2179_v26 = vadd.f32 %v2133_v41, %v1953_v46 }
 0x297   : > { %2211 = vst.msk [vmem:[%s3571_s18 + $0xb8] sm:$0xff] %vm323_vm0, %v2179_v26  ;;  %v2265_v4 = vsel %vm323_vm0, %v2179_v26, 0.0  ;;  %v2314_v39 = vmul.f32 %v2179_v26, %v2179_v26 }
 0x298   : > { %v2266_v20 = vadd.f32 %v2265_v4, %v2264_v24  ;;  %v1684_v28 = vpop.f32.mrf.mxu2 }
 0x299   : > { %v1910_v30 = vpop.f32.mrf.mxu3  ;;  %v2368_v53 = vsel %vm323_vm0, %v2314_v39, 0.0  ;;  %v1728_v1 = vadd.f32 %v1684_v28, %v1501_v33  ;;  %v1459_v11 = vpop.f32.mrf.mxu1 }
 0x29a   : > { %v2369_v40 = vadd.f32 %v2368_v53, %v2367_v0  ;;  %v1502_v59 = vadd.f32 %v1459_v11, %v3517_v56 }
 0x29b   : > { %v1954_v19 = vadd.f32 %v1910_v30, %v1728_v1 }
 0x29c   : > { %v2138_v36 = vpop.f32.mrf.mxu0 }
 0x29d   : > { %v2180_v35 = vadd.f32 %v2136_v17, %v1954_v19 }
 0x29f   : > { %2212 = vst.msk [vmem:[%s3571_s18 + $0xc0] sm:$0xff] %vm323_vm0, %v2180_v35  ;;  %v2267_v21 = vsel %vm323_vm0, %v2180_v35, 0.0  ;;  %v2315_v29 = vmul.f32 %v2180_v35, %v2180_v35 }
 0x2a0   : > { %v2268_v52 = vadd.f32 %v2267_v21, %v2266_v20  ;;  %v1686_v22 = vpop.f32.mrf.mxu2 }
 0x2a1   : > { %v1912_v45 = vpop.f32.mrf.mxu3  ;;  %v2370_v47 = vsel %vm323_vm0, %v2315_v29, 0.0  ;;  %v1729_v49 = vadd.f32 %v1686_v22, %v1502_v59  ;;  %v1462_v44 = vpop.f32.mrf.mxu1 }
 0x2a2   : > { %v2371_v6 = vadd.f32 %v2370_v47, %v2369_v40  ;;  %v1503_v12 = vadd.f32 %v1462_v44, %v3522_v7 }
 0x2a3   : > { %v1955_v25 = vadd.f32 %v1912_v45, %v1729_v49 }
 0x2a4   : > { %v2141_v23 = vpop.f32.mrf.mxu0 }
 0x2a5   : > { %v2181_v13 = vadd.f32 %v2138_v36, %v1955_v25 }
 0x2a7   : > { %2213 = vst.msk [vmem:[%s3571_s18 + $0xc8] sm:$0xff] %vm323_vm0, %v2181_v13  ;;  %v2269_v9 = vsel %vm323_vm0, %v2181_v13, 0.0  ;;  %v2316_v10 = vmul.f32 %v2181_v13, %v2181_v13 }
 0x2a8   : > { %v2270_v56 = vadd.f32 %v2269_v9, %v2268_v52  ;;  %v1689_v5 = vpop.f32.mrf.mxu2 }
 0x2a9   : > { %v1915_v3 = vpop.f32.mrf.mxu3  ;;  %v2372_v43 = vsel %vm323_vm0, %v2316_v10, 0.0  ;;  %v1730_v63 = vadd.f32 %v1689_v5, %v1503_v12  ;;  %v1464_v18 = vpop.f32.mrf.mxu1 }
 0x2aa   : > { %v2373_v27 = vadd.f32 %v2372_v43, %v2371_v6  ;;  %v1504_v34 = vadd.f32 %v1464_v18, %v3532_v48 }
 0x2ab   : > { %v1956_v54 = vadd.f32 %v1915_v3, %v1730_v63 }
 0x2ac   : > { %v2143_v8 = vpop.f32.mrf.mxu0 }
 0x2ad   : > { %v2182_v61 = vadd.f32 %v2141_v23, %v1956_v54 }
 0x2af   : > { %2214 = vst.msk [vmem:[%s3571_s18 + $0xd0] sm:$0xff] %vm323_vm0, %v2182_v61  ;;  %v2271_v16 = vsel %vm323_vm0, %v2182_v61, 0.0  ;;  %v2317_v38 = vmul.f32 %v2182_v61, %v2182_v61 }
 0x2b0   : > { %v2272_v7 = vadd.f32 %v2271_v16, %v2270_v56  ;;  %v1691_v55 = vpop.f32.mrf.mxu2 }
 0x2b1   : > { %v1917_v41 = vpop.f32.mrf.mxu3  ;;  %v2374_v31 = vsel %vm323_vm0, %v2317_v38, 0.0  ;;  %v1731_v32 = vadd.f32 %v1691_v55, %v1504_v34  ;;  %v1467_v51 = vpop.f32.mrf.mxu1 }
 0x2b2   : > { %v2375_v50 = vadd.f32 %v2374_v31, %v2373_v27  ;;  %v1505_v42 = vadd.f32 %v1467_v51, %v3537_v37 }
 0x2b3   : > { %v1957_v24 = vadd.f32 %v1917_v41, %v1731_v32 }
 0x2b4   : > { %v2146_v62 = vpop.f32.mrf.mxu0 }
 0x2b5   : > { %v2183_v57 = vadd.f32 %v2143_v8, %v1957_v24 }
 0x2b7   : > { %2215 = vst.msk [vmem:[%s3571_s18 + $0xd8] sm:$0xff] %vm323_vm0, %v2183_v57  ;;  %v2273_v15 = vsel %vm323_vm0, %v2183_v57, 0.0  ;;  %v2318_v58 = vmul.f32 %v2183_v57, %v2183_v57 }
 0x2b8   : > { %v2274_v48 = vadd.f32 %v2273_v15, %v2272_v7  ;;  %v1694_v0 = vpop.f32.mrf.mxu2 }
 0x2b9   : > { %v1920_v46 = vpop.f32.mrf.mxu3  ;;  %v2376_v17 = vsel %vm323_vm0, %v2318_v58, 0.0  ;;  %v1732_v26 = vadd.f32 %v1694_v0, %v1505_v42  ;;  %v1469_v4 = vpop.f32.mrf.mxu1 }
 0x2ba   : > { %v2377_v39 = vadd.f32 %v2376_v17, %v2375_v50  ;;  %v1506_v53 = vadd.f32 %v1469_v4, %v3547_v60 }
 0x2bb   : > { %v1958_v33 = vadd.f32 %v1920_v46, %v1732_v26 }
 0x2bc   : > { %v2148_v1 = vpop.f32.mrf.mxu0 }
 0x2bd   : > { %v2184_v20 = vadd.f32 %v2146_v62, %v1958_v33 }
 0x2bf   : > { %2216 = vst.msk [vmem:[%s3571_s18 + $0xe0] sm:$0xff] %vm323_vm0, %v2184_v20  ;;  %v2275_v28 = vsel %vm323_vm0, %v2184_v20, 0.0  ;;  %v2319_v30 = vmul.f32 %v2184_v20, %v2184_v20 }
 0x2c0   : > { %v2276_v37 = vadd.f32 %v2275_v28, %v2274_v48  ;;  %v1696_v11 = vpop.f32.mrf.mxu2 }
 0x2c1   : > { %v1922_v40 = vpop.f32.mrf.mxu3  ;;  %v2378_v19 = vsel %vm323_vm0, %v2319_v30, 0.0  ;;  %v1733_v36 = vadd.f32 %v1696_v11, %v1506_v53  ;;  %v1472_v21 = vpop.f32.mrf.mxu1 }
 0x2c2   : > { %v2379_v35 = vadd.f32 %v2378_v19, %v2377_v39  ;;  %v1507_v45 = vadd.f32 %v1472_v21, %v3552_v14 }
 0x2c3   : > { %v1959_v29 = vadd.f32 %v1922_v40, %v1733_v36 }
 0x2c4   : > { %v2151_v23 = vpop.f32.mrf.mxu0 }
 0x2c5   : > { %v2185_v59 = vadd.f32 %v2148_v1, %v1959_v29 }
 0x2c7   : > { %2217 = vst.msk [vmem:[%s3571_s18 + $0xe8] sm:$0xff] %vm323_vm0, %v2185_v59  ;;  %v2277_v52 = vsel %vm323_vm0, %v2185_v59, 0.0  ;;  %v2320_v22 = vmul.f32 %v2185_v59, %v2185_v59 }
 0x2c8   : > { %v2278_v60 = vadd.f32 %v2277_v52, %v2276_v37  ;;  %v1699_v47 = vpop.f32.mrf.mxu2 }
 0x2c9   : > { %v1925_v49 = vpop.f32.mrf.mxu3  ;;  %v2380_v44 = vsel %vm323_vm0, %v2320_v22, 0.0  ;;  %v1734_v6 = vadd.f32 %v1699_v47, %v1507_v45  ;;  %v1474_v9 = vpop.f32.mrf.mxu1 }
 0x2ca   : > { %v2381_v25 = vadd.f32 %v2380_v44, %v2379_v35  ;;  %v1508_v5 = vadd.f32 %v1474_v9, %v3562_v2 }
 0x2cb   : > { %v1960_v13 = vadd.f32 %v1925_v49, %v1734_v6 }
 0x2cc   : > { %v2153_v8 = vpop.f32.mrf.mxu0 }
 0x2cd   : > { %v2186_v10 = vadd.f32 %v2151_v23, %v1960_v13 }
 0x2cf   : > { %2218 = vst.msk [vmem:[%s3571_s18 + $0xf0] sm:$0xff] %vm323_vm0, %v2186_v10  ;;  %v2279_v12 = vsel %vm323_vm0, %v2186_v10, 0.0  ;;  %v2321_v56 = vmul.f32 %v2186_v10, %v2186_v10 }
 0x2d0   : > { %v2280_v14 = vadd.f32 %v2279_v12, %v2278_v60  ;;  %v1701_v3 = vpop.f32.mrf.mxu2 }
 0x2d1   : > { %v2382_v43 = vsel %vm323_vm0, %v2321_v56, 0.0  ;;  %v1735_v63 = vadd.f32 %v1701_v3, %v1508_v5  ;;  %v1927_v27 = vpop.f32.mrf.mxu3 }
 0x2d2   : > { %v2383_v18 = vadd.f32 %v2382_v43, %v2381_v25 }
 0x2d3   : > { %v1961_v54 = vadd.f32 %v1927_v27, %v1735_v63 }
 0x2d5   : > { %v2187_v61 = vadd.f32 %v2153_v8, %v1961_v54 }
 0x2d7   : > { %2219 = vst.msk [vmem:[%s3571_s18 + $0xf8] sm:$0xff] %vm323_vm0, %v2187_v61  ;;  %v2281_v16 = vsel %vm323_vm0, %v2187_v61, 0.0  ;;  %v2322_v38 = vmul.f32 %v2187_v61, %v2187_v61 }
 0x2d8   : > { %v2282_v34 = vadd.f32 %v2281_v16, %v2280_v14 }
 0x2d9   : > { %v2384_v2 = vsel %vm323_vm0, %v2322_v38, 0.0 }
 0x2da   : > { %v2283_v7 = vrot.slane %v2282_v34, 4  ;;  %v2385_v55 = vadd.f32 %v2384_v2, %v2383_v18 }
 0x2dc   : > { %v2284_v41 = vadd.f32 %v2283_v7, %v2282_v34  ;;  %v2386_v31 = vrot.slane %v2385_v55, 4 }
 0x2de   : > { %v2285_v32 = vrot.slane %v2284_v41, 2  ;;  %v2387_v51 = vadd.f32 %v2386_v31, %v2385_v55 }
 0x2e0   : > { %v2286_v50 = vadd.f32 %v2285_v32, %v2284_v41  ;;  %v2388_v24 = vrot.slane %v2387_v51, 2 }
 0x2e2   : > { %v2287_v57 = vrot.slane %v2286_v50, 1  ;;  %v2389_v62 = vadd.f32 %v2388_v24, %v2387_v51 }
 0x2e4   : > { %v2288_v15 = vadd.f32 %v2287_v57, %v2286_v50  ;;  %v2390_v58 = vrot.slane %v2389_v62, 1 }
 0x2e6   : > { %2290 = vst.msk [vmem:[%s211_s21] sm:$0x1] %vm2289_vm1, %v2288_v15  ;;  %v2391_v42 = vadd.f32 %v2390_v58, %v2389_v62 }
 0x2e8   : > { %2392 = vst.msk [vmem:[%s214_s24] sm:$0x1] %vm2289_vm1, %v2391_v42 }
 0x2e9 PF: > { %s15_s15 = sadd.s32 1, %s2924_s15  }
 0x2ea   : > { %p12_p4 = scmp.ge.s32.totalorder %s15_s15, 4  }
 0x2ec   :  { %14 = sbr.rel (!%p12_p4) target bundleno = 1 (0x1), region = 92 }

// kernel: conv2d_decoder_forward.23
= control target key start
LH: loop header
LB: loop body
LE: loop exit
PB: predicated region body
PF: predicated region fallthrough
CT: control target
= control target key end

     0   :  { %vm827_vm1 = vcmask 195584   ;;  %s1758_s1 = inlined_call_operand.vmem [shape: bf16[128,24], index: 1, kind: input, shape index: {}]   ;;  %s1759_s2 = inlined_call_operand.vmem [shape: f32[1,24], index: 2, kind: input, shape index: {}]   ;;  %s1760_s0 = inlined_call_operand.vmem [shape: f32[256,128], index: 0, kind: input, shape index: {}]   ;;  %s1761_s3 = inlined_call_operand.vmem [shape: f32[256,24], index: 3, kind: output, shape index: {}]  }
   0x1   :  { %v903_v0 = vld [vmem:[%s1758_s1 + $0x38] sm:$0xff]  ;;  %v902_v1 = vld [vmem:[%s1758_s1 + $0x30] sm:$0xff]  ;;  %v901_v2 = vld [vmem:[%s1758_s1 + $0x28] sm:$0xff] }
   0x2   :  { %130 = vmatpush.bf16.msra.mxu0 %v903_v0  ;;  %904 = vmatpush.bf16.msra.mxu1 %v903_v0  ;;  %v900_v3 = vld [vmem:[%s1758_s1 + $0x20] sm:$0xff]  ;;  %v899_v4 = vld [vmem:[%s1758_s1 + $0x18] sm:$0xff]  ;;  %v898_v5 = vld [vmem:[%s1758_s1 + $0x10] sm:$0xff] }
   0x3   :  { %905 = vmatpush.bf16.msra.mxu2 %v903_v0  ;;  %906 = vmatpush.bf16.msra.mxu3 %v903_v0  ;;  %v897_v6 = vld [vmem:[%s1758_s1 + $0x8] sm:$0xff]  ;;  %v896_v7 = vld [vmem:[%s1758_s1] sm:$0xff]  ;;  %v16_v20 = vld [vmem:[%s1760_s0 + $0x10] sm:$0xff] }
   0x4   :  { %v14_v8 = vld [vmem:[%s1760_s0] sm:$0xff]  ;;  %v15_v9 = vld [vmem:[%s1760_s0 + $0x8] sm:$0xff]  ;;  %v17_v21 = vld [vmem:[%s1760_s0 + $0x18] sm:$0xff] }
   0x5   :  { %v22_v10 = vld [vmem:[%s1760_s0 + $0x40] sm:$0xff]  ;;  %v23_v11 = vld [vmem:[%s1760_s0 + $0x48] sm:$0xff]  ;;  %v46_v16 = vpack.c.bf16 %v15_v9, %v14_v8  ;;  %v24_v22 = vld [vmem:[%s1760_s0 + $0x50] sm:$0xff]  ;;  %v47_v28 = vpack.c.bf16 %v17_v21, %v16_v20 }
   0x6   :  { %131 = vmatpush.bf16.msra.mxu0 %v902_v1  ;;  %907 = vmatpush.bf16.msra.mxu1 %v902_v1  ;;  %v30_v12 = vld [vmem:[%s1760_s0 + $0x80] sm:$0xff]  ;;  %v31_v13 = vld [vmem:[%s1760_s0 + $0x88] sm:$0xff]  ;;  %v50_v17 = vpack.c.bf16 %v23_v11, %v22_v10  ;;  %v25_v23 = vld [vmem:[%s1760_s0 + $0x58] sm:$0xff] }
   0x7   :  { %908 = vmatpush.bf16.msra.mxu2 %v902_v1  ;;  %909 = vmatpush.bf16.msra.mxu3 %v902_v1  ;;  %v38_v14 = vld [vmem:[%s1760_s0 + $0xc0] sm:$0xff]  ;;  %v39_v15 = vld [vmem:[%s1760_s0 + $0xc8] sm:$0xff]  ;;  %v54_v18 = vpack.c.bf16 %v31_v13, %v30_v12  ;;  %v32_v24 = vld [vmem:[%s1760_s0 + $0x90] sm:$0xff]  ;;  %v51_v29 = vpack.c.bf16 %v25_v23, %v24_v22 }
   0x8   :  { %v58_v19 = vpack.c.bf16 %v39_v15, %v38_v14  ;;  %v33_v25 = vld [vmem:[%s1760_s0 + $0x98] sm:$0xff]  ;;  %v40_v26 = vld [vmem:[%s1760_s0 + $0xd0] sm:$0xff]  ;;  %v18_v32 = vld [vmem:[%s1760_s0 + $0x20] sm:$0xff] }
   0x9   :  { %v41_v27 = vld [vmem:[%s1760_s0 + $0xd8] sm:$0xff]  ;;  %v55_v30 = vpack.c.bf16 %v33_v25, %v32_v24  ;;  %v19_v33 = vld [vmem:[%s1760_s0 + $0x28] sm:$0xff]  ;;  %v26_v34 = vld [vmem:[%s1760_s0 + $0x60] sm:$0xff] }
   0xa   :  { %132 = vmatpush.bf16.msra.mxu0 %v901_v2  ;;  %910 = vmatpush.bf16.msra.mxu1 %v901_v2  ;;  %v59_v31 = vpack.c.bf16 %v41_v27, %v40_v26  ;;  %v27_v35 = vld [vmem:[%s1760_s0 + $0x68] sm:$0xff]  ;;  %v34_v36 = vld [vmem:[%s1760_s0 + $0xa0] sm:$0xff]  ;;  %v48_v40 = vpack.c.bf16 %v19_v33, %v18_v32  ;;  %v20_v44 = vld [vmem:[%s1760_s0 + $0x30] sm:$0xff] }
   0xb   :  { %911 = vmatpush.bf16.msra.mxu2 %v901_v2  ;;  %912 = vmatpush.bf16.msra.mxu3 %v901_v2  ;;  %v35_v37 = vld [vmem:[%s1760_s0 + $0xa8] sm:$0xff]  ;;  %v42_v38 = vld [vmem:[%s1760_s0 + $0xe0] sm:$0xff]  ;;  %v52_v41 = vpack.c.bf16 %v27_v35, %v26_v34  ;;  %v21_v45 = vld [vmem:[%s1760_s0 + $0x38] sm:$0xff] }
   0xc   :  { %v43_v39 = vld [vmem:[%s1760_s0 + $0xe8] sm:$0xff]  ;;  %v56_v42 = vpack.c.bf16 %v35_v37, %v34_v36  ;;  %v28_v46 = vld [vmem:[%s1760_s0 + $0x70] sm:$0xff]  ;;  %v29_v47 = vld [vmem:[%s1760_s0 + $0x78] sm:$0xff]  ;;  %v49_v52 = vpack.c.bf16 %v21_v45, %v20_v44 }
   0xd   :  { %v60_v43 = vpack.c.bf16 %v43_v39, %v42_v38  ;;  %v36_v48 = vld [vmem:[%s1760_s0 + $0xb0] sm:$0xff]  ;;  %v37_v49 = vld [vmem:[%s1760_s0 + $0xb8] sm:$0xff]  ;;  %v53_v53 = vpack.c.bf16 %v29_v47, %v28_v46  ;;  %v1201_v56 = vld [vmem:[%s1759_s2] ss:$0 sm:$0xff] }
   0xe   :  { %133 = vmatpush.bf16.msra.mxu0 %v900_v3  ;;  %913 = vmatpush.bf16.msra.mxu1 %v900_v3  ;;  %v44_v50 = vld [vmem:[%s1760_s0 + $0xf0] sm:$0xff]  ;;  %v45_v51 = vld [vmem:[%s1760_s0 + $0xf8] sm:$0xff]  ;;  %v57_v54 = vpack.c.bf16 %v37_v49, %v36_v48 }
   0xf   :  { %914 = vmatpush.bf16.msra.mxu2 %v900_v3  ;;  %915 = vmatpush.bf16.msra.mxu3 %v900_v3  ;;  %v61_v55 = vpack.c.bf16 %v45_v51, %v44_v50 }
  0x12   :  { %134 = vmatpush.bf16.msra.mxu0 %v899_v4  ;;  %916 = vmatpush.bf16.msra.mxu1 %v899_v4 }
  0x13   :  { %917 = vmatpush.bf16.msra.mxu2 %v899_v4  ;;  %918 = vmatpush.bf16.msra.mxu3 %v899_v4 }
  0x16   :  { %135 = vmatpush.bf16.msra.mxu0 %v898_v5  ;;  %919 = vmatpush.bf16.msra.mxu1 %v898_v5 }
  0x17   :  { %920 = vmatpush.bf16.msra.mxu2 %v898_v5  ;;  %921 = vmatpush.bf16.msra.mxu3 %v898_v5 }
  0x1a   :  { %136 = vmatpush.bf16.msra.mxu0 %v897_v6  ;;  %922 = vmatpush.bf16.msra.mxu1 %v897_v6 }
  0x1b   :  { %923 = vmatpush.bf16.msra.mxu2 %v897_v6  ;;  %924 = vmatpush.bf16.msra.mxu3 %v897_v6 }
  0x1e   :  { %137 = vmatpush.bf16.msra.mxu0 %v896_v7  ;;  %925 = vmatpush.bf16.msra.mxu1 %v896_v7 }
  0x1f   :  { %926 = vmatpush.bf16.msra.mxu2 %v896_v7  ;;  %927 = vmatpush.bf16.msra.mxu3 %v896_v7 }
  0x21   :  { %138 = vmatmul.bf16.vlgmr.msra.gmra.mxu0 %v46_v16  ;;  %158 = vmatmul.bf16.vlgmr.msra.gmra.mxu1 %v50_v17 }
  0x22   :  { %178 = vmatmul.bf16.vlgmr.msra.gmra.mxu2 %v54_v18  ;;  %198 = vmatmul.bf16.vlgmr.msra.gmra.mxu3 %v58_v19 }
  0x31   :  { %143 = vmatmul.bf16.gmra.mxu0 %v47_v28  ;;  %163 = vmatmul.bf16.gmra.mxu1 %v51_v29 }
  0x32   :  { %183 = vmatmul.bf16.gmra.mxu2 %v55_v30  ;;  %203 = vmatmul.bf16.gmra.mxu3 %v59_v31 }
  0x41   :  { %148 = vmatmul.bf16.gmra.mxu0 %v48_v40  ;;  %168 = vmatmul.bf16.gmra.mxu1 %v52_v41 }
  0x42   :  { %188 = vmatmul.bf16.gmra.mxu2 %v56_v42  ;;  %208 = vmatmul.bf16.gmra.mxu3 %v60_v43 }
  0x51   :  { %153 = vmatmul.bf16.gmra.mxu0 %v49_v52  ;;  %173 = vmatmul.bf16.gmra.mxu1 %v53_v53 }
  0x52   :  { %193 = vmatmul.bf16.gmra.mxu2 %v57_v54  ;;  %213 = vmatmul.bf16.gmra.mxu3 %v61_v55 }
  0x9e   :  { %v139_v57 = vpop.f32.mrf.mxu0  ;;  %v159_v58 = vpop.f32.mrf.mxu1 }
  0x9f   :  { %v140_v59 = vadd.f32 %v1201_v56, %v139_v57  ;;  %v160_v60 = vadd.f32 %v1201_v56, %v159_v58 }
  0xa1   :  { %v219_v61 = vsub.f32 0.0, %v140_v59  ;;  %v227_v62 = vsub.f32 0.0, %v160_v60 }
  0xa3   :  { %v251_v63 = vmul.f32 1.442695, %v219_v61  ;;  %v267_v0 = vmul.f32 1.442695, %v227_v62 }
  0xa5   :  { %929 = vpow2.f32 %v251_v63  ;;  %v179_v1 = vpop.f32.mrf.mxu2  ;;  %v199_v2 = vpop.f32.mrf.mxu3 }
  0xa6   :  { %931 = vpow2.f32 %v267_v0  ;;  %v180_v3 = vadd.f32 %v1201_v56, %v179_v1  ;;  %v200_v4 = vadd.f32 %v1201_v56, %v199_v2  ;;  %v141_v5 = vpop.f32.mrf.mxu0  ;;  %v161_v6 = vpop.f32.mrf.mxu1 }
  0xa7   :  { %v142_v7 = vadd.f32 %v1201_v56, %v141_v5  ;;  %v162_v8 = vadd.f32 %v1201_v56, %v161_v6 }
  0xa8   :  { %v235_v9 = vsub.f32 0.0, %v180_v3  ;;  %v243_v10 = vsub.f32 0.0, %v200_v4 }
  0xa9   :  { %v220_v11 = vsub.f32 0.0, %v142_v7  ;;  %v228_v12 = vsub.f32 0.0, %v162_v8 }
  0xaa   :  { %v283_v13 = vmul.f32 1.442695, %v235_v9  ;;  %v299_v14 = vmul.f32 1.442695, %v243_v10 }
  0xab   :  { %v930_v15 = vpop.eup %929  ;;  %v253_v18 = vmul.f32 1.442695, %v220_v11  ;;  %v269_v20 = vmul.f32 1.442695, %v228_v12 }
  0xac   :  { %v932_v16 = vpop.eup %931  ;;  %v1209_v17 = vadd.f32 1.0, %v930_v15  ;;  %933 = vpow2.f32 %v283_v13 }
  0xad   :  { %v1211_v19 = vadd.f32 1.0, %v932_v16  ;;  %935 = vpow2.f32 %v299_v14  ;;  %v181_v21 = vpop.f32.mrf.mxu2  ;;  %v201_v23 = vpop.f32.mrf.mxu3 }
  0xae   :  { %937 = vrcp.f32 %v1209_v17  ;;  %v182_v22 = vadd.f32 %v1201_v56, %v181_v21  ;;  %v356_v24 = vand.u32 2147483647, %v1209_v17  ;;  %v144_v25 = vpop.f32.mrf.mxu0  ;;  %v164_v26 = vpop.f32.mrf.mxu1  ;;  %v358_v28 = vand.u32 2147483648, %v1209_v17 }
  0xaf   :  { %939 = vrcp.f32 %v1211_v19  ;;  %v476_v29 = vand.u32 2147483647, %v1211_v19  ;;  %v478_v32 = vand.u32 2147483648, %v1211_v19  ;;  %v202_v34 = vadd.f32 %v1201_v56, %v201_v23 }
  0xb0   :  { %941 = vpow2.f32 %v253_v18  ;;  %v236_v30 = vsub.f32 0.0, %v182_v22  ;;  %vm352_vm0 = vweird.f32 %v1209_v17  ;;  %v1227_v37 = vadd.f32 %v1201_v56, %v144_v25 }
  0xb1   :  { %943 = vpow2.f32 %v269_v20  ;;  %v1230_v38 = vadd.f32 %v1201_v56, %v164_v26  ;;  %vm1233_vm2 = vcmp.eq.f32.partialorder %v356_v24, 8.507059e+37  ;;  %vm472_vm3 = vweird.f32 %v1211_v19 }
  0xb2   :  { %v934_v27 = vpop.eup %933  ;;  %v359_v43 = vor.u32 1.1754944e-38, %v358_v28  ;;  %vm1240_vm4 = vcmp.eq.f32.partialorder %v476_v29, 8.507059e+37  ;;  %v285_v46 = vmul.f32 1.442695, %v236_v30  ;;  %v479_v49 = vor.u32 1.1754944e-38, %v478_v32 }
  0xb3   :  { %v936_v31 = vpop.eup %935  ;;  %v1220_v33 = vadd.f32 1.0, %v934_v27  ;;  %v244_v50 = vsub.f32 0.0, %v202_v34  ;;  %v221_v52 = vsub.f32 0.0, %v1227_v37  ;;  %v229_v53 = vsub.f32 0.0, %v1230_v38 }
  0xb4   :  { %v938_v35 = vpop.eup %937  ;;  %v1224_v36 = vadd.f32 1.0, %v936_v31 }
  0xb5   :  { %v940_v39 = vpop.eup %939  ;;  %v348_v40 = vmul.f32 %v938_v35, %v1209_v17  ;;  %945 = vrcp.f32 %v1220_v33  ;;  %vm353_vm5 = vweird.f32 %v938_v35  ;;  %v596_v55 = vand.u32 2147483647, %v1220_v33  ;;  %v184_v37 = vpop.f32.mrf.mxu2 }
  0xb6   :  { %v942_v42 = vpop.eup %941  ;;  %v468_v44 = vmul.f32 %v940_v39, %v1211_v19  ;;  %947 = vrcp.f32 %v1224_v36  ;;  %vm473_vm6 = vweird.f32 %v940_v39  ;;  %vm592_vm7 = vweird.f32 %v1220_v33  ;;  %vm354_vm8 = vmor %vm352_vm0, %vm353_vm5  ;;  %v204_v38 = vpop.f32.mrf.mxu3 }
  0xb7   :  { %v944_v47 = vpop.eup %943  ;;  %v349_v48 = vsub.f32 1.0, %v348_v40  ;;  %v1248_v57 = vadd.f32 1.0, %v942_v42  ;;  %949 = vpow2.f32 %v285_v46  ;;  %v598_v62 = vand.u32 2147483648, %v1220_v33  ;;  %vm474_vm10 = vmor %vm472_vm3, %vm473_vm6 }
  0xb8   :  { %v469_v51 = vsub.f32 1.0, %v468_v44  ;;  %v1250_v58 = vadd.f32 1.0, %v944_v47  ;;  %v716_v63 = vand.u32 2147483647, %v1224_v36  ;;  %vm712_vm9 = vweird.f32 %v1224_v36 }
  0xb9   :  { %v350_v54 = vmul.f32 %v938_v35, %v349_v48  ;;  %951 = vrcp.f32 %v1248_v57  ;;  %v301_v2 = vmul.f32 1.442695, %v244_v50  ;;  %vm1264_vm11 = vcmp.eq.f32.partialorder %v596_v55, 8.507059e+37  ;;  %v146_v48 = vpop.f32.mrf.mxu0 }
  0xba   :  { %v470_v59 = vmul.f32 %v940_v39, %v469_v51  ;;  %v718_v6 = vand.u32 2147483648, %v1224_v36  ;;  %953 = vrcp.f32 %v1250_v58  ;;  %v599_v12 = vor.u32 1.1754944e-38, %v598_v62 }
  0xbb   :  { %v946_v60 = vpop.eup %945  ;;  %v351_v61 = vadd.f32 %v938_v35, %v350_v54  ;;  %vm1279_vm12 = vcmp.eq.f32.partialorder %v716_v63, 8.507059e+37  ;;  %v371_v14 = vand.u32 2147483647, %v1248_v57  ;;  %955 = vpow2.f32 %v301_v2 }
  0xbc   :  { %v471_v0 = vadd.f32 %v940_v39, %v470_v59  ;;  %v588_v1 = vmul.f32 %v946_v60, %v1220_v33  ;;  %v948_v3 = vpop.eup %947  ;;  %vm593_vm13 = vweird.f32 %v946_v60  ;;  %v719_v19 = vor.u32 1.1754944e-38, %v718_v6 }
  0xbd   :  { %v355_v4 = vsel %vm354_vm8, %v938_v35, %v351_v61  ;;  %v708_v10 = vmul.f32 %v948_v3, %v1224_v36  ;;  %v950_v15 = vpop.eup %949  ;;  %vm713_vm14 = vweird.f32 %v948_v3  ;;  %vm367_vm15 = vweird.f32 %v1248_v57  ;;  %vm594_vm0 = vmor %vm592_vm7, %vm593_vm13 }
  0xbe   :  { %v360_v7 = vsel %vm1233_vm2, %v359_v43, %v355_v4  ;;  %v475_v8 = vsel %vm474_vm10, %v940_v39, %v471_v0  ;;  %v589_v9 = vsub.f32 1.0, %v588_v1  ;;  %v1289_v20 = vadd.f32 1.0, %v950_v15  ;;  %vm714_vm3 = vmor %vm712_vm9, %vm713_vm14 }
  0xbf   :  { %828 = vst.msk [vmem:[%s1761_s3] sm:$0xff] %vm827_vm1, %v360_v7  ;;  %v480_v11 = vsel %vm1240_vm4, %v479_v49, %v475_v8  ;;  %v709_v17 = vsub.f32 1.0, %v708_v10  ;;  %v952_v18 = vpop.eup %951  ;;  %v255_v24 = vmul.f32 1.442695, %v221_v52  ;;  %vm1294_vm2 = vcmp.eq.f32.partialorder %v371_v14, 8.507059e+37  ;;  %v166_v7 = vpop.f32.mrf.mxu1 }
  0xc0   :  { %836 = vst.msk [vmem:[%s1761_s3 + $0x40] sm:$0xff] %vm827_vm1, %v480_v11  ;;  %v590_v16 = vmul.f32 %v946_v60, %v589_v9  ;;  %v363_v23 = vmul.f32 %v952_v18, %v1248_v57  ;;  %v954_v25 = vpop.eup %953  ;;  %v373_v27 = vand.u32 2147483648, %v1248_v57  ;;  %957 = vrcp.f32 %v1289_v20 }
  0xc1   :  { %v710_v22 = vmul.f32 %v948_v3, %v709_v17  ;;  %v271_v28 = vmul.f32 1.442695, %v229_v53  ;;  %v483_v32 = vmul.f32 %v954_v25, %v1250_v58  ;;  %vm368_vm4 = vweird.f32 %v952_v18  ;;  %v956_v39 = vpop.eup %955 }
  0xc2   :  { %v591_v21 = vadd.f32 %v946_v60, %v590_v16  ;;  %v364_v31 = vsub.f32 1.0, %v363_v23  ;;  %v491_v33 = vand.u32 2147483647, %v1250_v58  ;;  %v493_v35 = vand.u32 2147483648, %v1250_v58  ;;  %vm369_vm6 = vmor %vm367_vm15, %vm368_vm4  ;;  %v206_v23 = vpop.f32.mrf.mxu3 }
  0xc3   :  { %v711_v30 = vadd.f32 %v948_v3, %v710_v22  ;;  %v484_v42 = vsub.f32 1.0, %v483_v32  ;;  %959 = vpow2.f32 %v255_v24  ;;  %vm488_vm5 = vweird.f32 %v954_v25  ;;  %v149_v24 = vpop.f32.mrf.mxu0 }
  0xc4   :  { %v595_v29 = vsel %vm594_vm0, %v946_v60, %v591_v21  ;;  %v365_v41 = vmul.f32 %v952_v18, %v364_v31  ;;  %v1314_v43 = vadd.f32 1.0, %v956_v39  ;;  %961 = vpow2.f32 %v271_v28 }
  0xc5   :  { %v600_v34 = vsel %vm1264_vm11, %v599_v12, %v595_v29  ;;  %v715_v40 = vsel %vm714_vm3, %v948_v3, %v711_v30  ;;  %v485_v45 = vmul.f32 %v954_v25, %v484_v42  ;;  %v185_v46 = vadd.f32 %v1201_v56, %v184_v37 }
  0xc6   :  { %844 = vst.msk [vmem:[%s1761_s3 + $0x80] sm:$0xff] %vm827_vm1, %v600_v34  ;;  %v720_v36 = vsel %vm1279_vm12, %v719_v19, %v715_v40  ;;  %v366_v44 = vadd.f32 %v952_v18, %v365_v41  ;;  %v205_v47 = vadd.f32 %v1201_v56, %v204_v38  ;;  %v958_v49 = vpop.eup %957  ;;  %v374_v50 = vor.u32 1.1754944e-38, %v373_v27  ;;  %v186_v19 = vpop.f32.mrf.mxu2 }
  0xc7   :  { %852 = vst.msk [vmem:[%s1761_s3 + $0xc0] sm:$0xff] %vm827_vm1, %v720_v36  ;;  %vm487_vm7 = vweird.f32 %v1250_v58  ;;  %vm1326_vm8 = vcmp.eq.f32.partialorder %v491_v33, 8.507059e+37  ;;  %963 = vrcp.f32 %v1314_v43  ;;  %v486_v53 = vadd.f32 %v954_v25, %v485_v45 }
  0xc8   :  { %v370_v52 = vsel %vm369_vm6, %v952_v18, %v366_v44  ;;  %v494_v54 = vor.u32 1.1754944e-38, %v493_v35  ;;  %v603_v55 = vmul.f32 %v958_v49, %v1289_v20  ;;  %vm489_vm9 = vmor %vm487_vm7, %vm488_vm5  ;;  %v611_v57 = vand.u32 2147483647, %v1289_v20 }
  0xc9   :  { %v375_v59 = vsel %vm1294_vm2, %v374_v50, %v370_v52  ;;  %v613_v58 = vand.u32 2147483648, %v1289_v20  ;;  %v237_v60 = vsub.f32 0.0, %v185_v46  ;;  %v960_v61 = vpop.eup %959  ;;  %v490_v62 = vsel %vm489_vm9, %v954_v25, %v486_v53 }
  0xca   :  { %829 = vst.msk [vmem:[%s1761_s3 + $0x8] sm:$0xff] %vm827_vm1, %v375_v59  ;;  %v604_v63 = vsub.f32 1.0, %v603_v55  ;;  %v245_v0 = vsub.f32 0.0, %v205_v47  ;;  %v147_v1 = vadd.f32 %v1201_v56, %v146_v48  ;;  %v962_v2 = vpop.eup %961  ;;  %v495_v3 = vsel %vm1326_vm8, %v494_v54, %v490_v62 }
  0xcb   :  { %v731_v4 = vand.u32 2147483647, %v1314_v43  ;;  %v733_v5 = vand.u32 2147483648, %v1314_v43  ;;  %v1346_v6 = vadd.f32 1.0, %v960_v61  ;;  %837 = vst.msk [vmem:[%s1761_s3 + $0x48] sm:$0xff] %vm827_vm1, %v495_v3  ;;  %vm608_vm10 = vweird.f32 %v958_v49 }
  0xcc   :  { %v605_v8 = vmul.f32 %v958_v49, %v604_v63  ;;  %v1352_v9 = vadd.f32 1.0, %v962_v2  ;;  %v287_v10 = vmul.f32 1.442695, %v237_v60  ;;  %vm607_vm11 = vweird.f32 %v1289_v20  ;;  %v169_v60 = vpop.f32.mrf.mxu1 }
  0xcd   :  { %v964_v11 = vpop.eup %963  ;;  %965 = vrcp.f32 %v1346_v6  ;;  %v303_v12 = vmul.f32 1.442695, %v245_v0  ;;  %v222_v13 = vsub.f32 0.0, %v147_v1  ;;  %v167_v16 = vadd.f32 %v1201_v56, %v166_v7  ;;  %vm609_vm12 = vmor %vm607_vm11, %vm608_vm10 }
  0xce   :  { %v606_v14 = vadd.f32 %v958_v49, %v605_v8  ;;  %v723_v15 = vmul.f32 %v964_v11, %v1314_v43  ;;  %967 = vrcp.f32 %v1352_v9  ;;  %vm612_vm13 = vcmp.eq.f32.partialorder %v611_v57, 8.507059e+37 }
  0xcf   :  { %v614_v17 = vor.u32 1.1754944e-38, %v613_v58  ;;  %vm727_vm14 = vweird.f32 %v1314_v43  ;;  %vm1360_vm15 = vcmp.eq.f32.partialorder %v731_v4, 8.507059e+37  ;;  %v734_v22 = vor.u32 1.1754944e-38, %v733_v5 }
  0xd0   :  { %v610_v20 = vsel %vm609_vm12, %v958_v49, %v606_v14  ;;  %v724_v21 = vsub.f32 1.0, %v723_v15  ;;  %969 = vpow2.f32 %v287_v10  ;;  %vm382_vm0 = vweird.f32 %v1346_v6 }
  0xd1   :  { %v615_v25 = vsel %vm612_vm13, %v614_v17, %v610_v20  ;;  %971 = vpow2.f32 %v303_v12  ;;  %v257_v26 = vmul.f32 1.442695, %v222_v13  ;;  %vm728_vm2 = vweird.f32 %v964_v11 }
  0xd2   :  { %845 = vst.msk [vmem:[%s1761_s3 + $0x88] sm:$0xff] %vm827_vm1, %v615_v25  ;;  %v725_v27 = vmul.f32 %v964_v11, %v724_v21  ;;  %v230_v28 = vsub.f32 0.0, %v167_v16  ;;  %v187_v29 = vadd.f32 %v1201_v56, %v186_v19  ;;  %v386_v31 = vand.u32 2147483647, %v1346_v6  ;;  %vm729_vm3 = vmor %vm727_vm14, %vm728_vm2 }
  0xd3   :  { %v966_v30 = vpop.eup %965  ;;  %973 = vpow2.f32 %v257_v26  ;;  %v207_v32 = vadd.f32 %v1201_v56, %v206_v23  ;;  %v150_v34 = vadd.f32 %v1201_v56, %v149_v24  ;;  %v388_v38 = vand.u32 2147483648, %v1346_v6 }
  0xd4   :  { %v968_v33 = vpop.eup %967  ;;  %v726_v35 = vadd.f32 %v964_v11, %v725_v27  ;;  %v378_v37 = vmul.f32 %v966_v30, %v1346_v6  ;;  %v273_v39 = vmul.f32 1.442695, %v230_v28  ;;  %vm502_vm4 = vweird.f32 %v1352_v9  ;;  %v189_v28 = vpop.f32.mrf.mxu2 }
  0xd5   :  { %v498_v40 = vmul.f32 %v968_v33, %v1352_v9  ;;  %v508_v41 = vand.u32 2147483648, %v1352_v9  ;;  %v238_v42 = vsub.f32 0.0, %v187_v29  ;;  %v246_v46 = vsub.f32 0.0, %v207_v32 }
  0xd6   :  { %v970_v36 = vpop.eup %969  ;;  %v730_v44 = vsel %vm729_vm3, %v964_v11, %v726_v35  ;;  %v379_v45 = vsub.f32 1.0, %v378_v37  ;;  %975 = vpow2.f32 %v273_v39  ;;  %v223_v43 = vsub.f32 0.0, %v150_v34 }
  0xd7   :  { %v972_v47 = vpop.eup %971  ;;  %v735_v48 = vsel %vm1360_vm15, %v734_v22, %v730_v44  ;;  %v499_v49 = vsub.f32 1.0, %v498_v40  ;;  %v1382_v50 = vadd.f32 1.0, %v970_v36  ;;  %vm383_vm5 = vweird.f32 %v966_v30 }
  0xd8   :  { %853 = vst.msk [vmem:[%s1761_s3 + $0xc8] sm:$0xff] %vm827_vm1, %v735_v48  ;;  %v380_v51 = vmul.f32 %v966_v30, %v379_v45  ;;  %v1388_v52 = vadd.f32 1.0, %v972_v47  ;;  %v289_v53 = vmul.f32 1.442695, %v238_v42  ;;  %vm503_vm6 = vweird.f32 %v968_v33  ;;  %vm384_vm8 = vmor %vm382_vm0, %vm383_vm5 }
  0xd9   :  { %v974_v54 = vpop.eup %973  ;;  %v500_v55 = vmul.f32 %v968_v33, %v499_v49  ;;  %v506_v59 = vand.u32 2147483647, %v1352_v9  ;;  %977 = vrcp.f32 %v1382_v50  ;;  %vm387_vm7 = vcmp.eq.f32.partialorder %v386_v31, 8.507059e+37  ;;  %vm504_vm9 = vmor %vm502_vm4, %vm503_vm6 }
  0xda   :  { %v381_v57 = vadd.f32 %v966_v30, %v380_v51  ;;  %v389_v58 = vor.u32 1.1754944e-38, %v388_v38  ;;  %979 = vrcp.f32 %v1388_v52  ;;  %v509_v62 = vor.u32 1.1754944e-38, %v508_v41  ;;  %v209_v51 = vpop.f32.mrf.mxu3 }
  0xdb   :  { %v501_v61 = vadd.f32 %v968_v33, %v500_v55  ;;  %v305_v63 = vmul.f32 1.442695, %v246_v46  ;;  %v259_v0 = vmul.f32 1.442695, %v223_v43  ;;  %v626_v3 = vand.u32 2147483647, %v1382_v50 }
  0xdc   :  { %v976_v1 = vpop.eup %975  ;;  %v385_v2 = vsel %vm384_vm8, %v966_v30, %v381_v57  ;;  %v1399_v4 = vadd.f32 1.0, %v974_v54  ;;  %981 = vpow2.f32 %v289_v53  ;;  %vm507_vm10 = vcmp.eq.f32.partialorder %v506_v59, 8.507059e+37  ;;  %v191_v23 = vpop.f32.mrf.mxu2 }
  0xdd   :  { %v390_v5 = vsel %vm387_vm7, %v389_v58, %v385_v2  ;;  %v505_v7 = vsel %vm504_vm9, %v968_v33, %v501_v61  ;;  %v170_v6 = vadd.f32 %v1201_v56, %v169_v60  ;;  %v628_v10 = vand.u32 2147483648, %v1382_v50 }
  0xde   :  { %830 = vst.msk [vmem:[%s1761_s3 + $0x10] sm:$0xff] %vm827_vm1, %v390_v5  ;;  %v510_v8 = vsel %vm507_vm10, %v509_v62, %v505_v7  ;;  %v746_v9 = vand.u32 2147483647, %v1388_v52  ;;  %983 = vrcp.f32 %v1399_v4  ;;  %vm622_vm11 = vweird.f32 %v1382_v50 }
  0xdf   :  { %v978_v11 = vpop.eup %977  ;;  %838 = vst.msk [vmem:[%s1761_s3 + $0x50] sm:$0xff] %vm827_vm1, %v510_v8  ;;  %v748_v12 = vand.u32 2147483648, %v1388_v52  ;;  %v1415_v13 = vadd.f32 1.0, %v976_v1  ;;  %985 = vpow2.f32 %v305_v63  ;;  %vm1418_vm12 = vcmp.eq.f32.partialorder %v626_v3, 8.507059e+37 }
  0xe0   :  { %v980_v14 = vpop.eup %979  ;;  %v618_v15 = vmul.f32 %v978_v11, %v1382_v50  ;;  %vm742_vm13 = vweird.f32 %v1388_v52  ;;  %987 = vpow2.f32 %v259_v0  ;;  %v401_v18 = vand.u32 2147483647, %v1399_v4 }
  0xe1   :  { %v738_v17 = vmul.f32 %v980_v14, %v1388_v52  ;;  %v403_v19 = vand.u32 2147483648, %v1399_v4  ;;  %989 = vrcp.f32 %v1415_v13  ;;  %v629_v22 = vor.u32 1.1754944e-38, %v628_v10 }
  0xe2   :  { %v982_v20 = vpop.eup %981  ;;  %v619_v21 = vsub.f32 1.0, %v618_v15  ;;  %vm1427_vm14 = vcmp.eq.f32.partialorder %v746_v9, 8.507059e+37  ;;  %v231_v24 = vsub.f32 0.0, %v170_v6  ;;  %v749_v26 = vor.u32 1.1754944e-38, %v748_v12  ;;  %v151_v6 = vpop.f32.mrf.mxu0 }
  0xe3   :  { %v739_v25 = vsub.f32 1.0, %v738_v17  ;;  %vm397_vm15 = vweird.f32 %v1399_v4  ;;  %v1432_v27 = vadd.f32 1.0, %v982_v20  ;;  %vm623_vm0 = vweird.f32 %v978_v11 }
  0xe4   :  { %v984_v29 = vpop.eup %983  ;;  %v620_v30 = vmul.f32 %v978_v11, %v619_v21  ;;  %vm743_vm2 = vweird.f32 %v980_v14  ;;  %v521_v31 = vand.u32 2147483647, %v1415_v13  ;;  %vm1436_vm3 = vcmp.eq.f32.partialorder %v401_v18, 8.507059e+37  ;;  %vm624_vm5 = vmor %vm622_vm11, %vm623_vm0  ;;  %v171_v18 = vpop.f32.mrf.mxu1 }
  0xe5   :  { %v986_v32 = vpop.eup %985  ;;  %v740_v34 = vmul.f32 %v980_v14, %v739_v25  ;;  %v393_v33 = vmul.f32 %v984_v29, %v1399_v4  ;;  %v404_v37 = vor.u32 1.1754944e-38, %v403_v19  ;;  %991 = vrcp.f32 %v1432_v27  ;;  %vm744_vm6 = vmor %vm742_vm13, %vm743_vm2 }
  0xe6   :  { %v988_v38 = vpop.eup %987  ;;  %v621_v39 = vadd.f32 %v978_v11, %v620_v30  ;;  %vm517_vm4 = vweird.f32 %v1415_v13  ;;  %v523_v40 = vand.u32 2147483648, %v1415_v13  ;;  %v275_v41 = vmul.f32 1.442695, %v231_v24 }
  0xe7   :  { %v190_v42 = vadd.f32 %v1201_v56, %v189_v28  ;;  %v990_v36 = vpop.eup %989  ;;  %v741_v44 = vadd.f32 %v980_v14, %v740_v34  ;;  %v394_v45 = vsub.f32 1.0, %v393_v33  ;;  %v1447_v46 = vadd.f32 1.0, %v986_v32 }
  0xe8   :  { %v1449_v47 = vadd.f32 1.0, %v988_v38  ;;  %v625_v48 = vsel %vm624_vm5, %v978_v11, %v621_v39  ;;  %vm398_vm7 = vweird.f32 %v984_v29  ;;  %v513_v49 = vmul.f32 %v990_v36, %v1415_v13 }
  0xe9   :  { %vm1455_vm8 = vcmp.eq.f32.partialorder %v521_v31, 8.507059e+37  ;;  %v641_v50 = vand.u32 2147483647, %v1432_v27  ;;  %v630_v53 = vsel %vm1418_vm12, %v629_v22, %v625_v48  ;;  %v745_v54 = vsel %vm744_vm6, %v980_v14, %v741_v44  ;;  %vm399_vm10 = vmor %vm397_vm15, %vm398_vm7 }
  0xea   :  { %v395_v55 = vmul.f32 %v984_v29, %v394_v45  ;;  %v643_v59 = vand.u32 2147483648, %v1432_v27  ;;  %846 = vst.msk [vmem:[%s1761_s3 + $0x90] sm:$0xff] %vm827_vm1, %v630_v53  ;;  %v750_v52 = vsel %vm1427_vm14, %v749_v26, %v745_v54  ;;  %v514_v57 = vsub.f32 1.0, %v513_v49 }
  0xeb   :  { %v524_v58 = vor.u32 1.1754944e-38, %v523_v40  ;;  %993 = vrcp.f32 %v1447_v46  ;;  %v992_v60 = vpop.eup %991  ;;  %854 = vst.msk [vmem:[%s1761_s3 + $0xd0] sm:$0xff] %vm827_vm1, %v750_v52  ;;  %vm637_vm9 = vweird.f32 %v1432_v27  ;;  %v210_v62 = vadd.f32 %v1201_v56, %v209_v51  ;;  %v211_v51 = vpop.f32.mrf.mxu3 }
  0xec   :  { %v396_v61 = vadd.f32 %v984_v29, %v395_v55  ;;  %995 = vrcp.f32 %v1449_v47  ;;  %v515_v63 = vmul.f32 %v990_v36, %v514_v57  ;;  %vm518_vm11 = vweird.f32 %v990_v36  ;;  %v154_v57 = vpop.f32.mrf.mxu0 }
  0xed   :  { %v633_v0 = vmul.f32 %v992_v60, %v1432_v27  ;;  %vm1481_vm12 = vcmp.eq.f32.partialorder %v641_v50, 8.507059e+37  ;;  %v644_v3 = vor.u32 1.1754944e-38, %v643_v59  ;;  %v761_v5 = vand.u32 2147483647, %v1447_v46  ;;  %vm519_vm14 = vmor %vm517_vm4, %vm518_vm11 }
  0xee   :  { %v400_v2 = vsel %vm399_vm10, %v984_v29, %v396_v61  ;;  %v763_v7 = vand.u32 2147483648, %v1447_v46  ;;  %v516_v4 = vadd.f32 %v990_v36, %v515_v63  ;;  %vm638_vm13 = vweird.f32 %v992_v60 }
  0xef   :  { %v405_v8 = vsel %vm1436_vm3, %v404_v37, %v400_v2  ;;  %v634_v10 = vsub.f32 1.0, %v633_v0  ;;  %vm412_vm15 = vweird.f32 %v1449_v47  ;;  %997 = vpow2.f32 %v275_v41  ;;  %vm639_vm2 = vmor %vm637_vm9, %vm638_vm13 }
  0xf0   :  { %831 = vst.msk [vmem:[%s1761_s3 + $0x18] sm:$0xff] %vm827_vm1, %v405_v8  ;;  %v239_v9 = vsub.f32 0.0, %v190_v42  ;;  %v247_v11 = vsub.f32 0.0, %v210_v62  ;;  %v520_v14 = vsel %vm519_vm14, %v990_v36, %v516_v4  ;;  %v416_v16 = vand.u32 2147483647, %v1449_v47 }
  0xf1   :  { %v994_v12 = vpop.eup %993  ;;  %v635_v15 = vmul.f32 %v992_v60, %v634_v10  ;;  %v152_v17 = vadd.f32 %v1201_v56, %v151_v6  ;;  %v525_v20 = vsel %vm1455_vm8, %v524_v58, %v520_v14  ;;  %v418_v21 = vand.u32 2147483648, %v1449_v47 }
  0xf2   :  { %v996_v19 = vpop.eup %995  ;;  %v753_v13 = vmul.f32 %v994_v12, %v1447_v46  ;;  %v291_v22 = vmul.f32 1.442695, %v239_v9  ;;  %839 = vst.msk [vmem:[%s1761_s3 + $0x58] sm:$0xff] %vm827_vm1, %v525_v20  ;;  %vm758_vm0 = vweird.f32 %v994_v12  ;;  %v307_v26 = vmul.f32 1.442695, %v247_v11 }
  0xf3   :  { %v636_v24 = vadd.f32 %v992_v60, %v635_v15  ;;  %v408_v25 = vmul.f32 %v996_v19, %v1449_v47  ;;  %v224_v29 = vsub.f32 0.0, %v152_v17  ;;  %v172_v30 = vadd.f32 %v1201_v56, %v171_v18 }
  0xf4   :  { %v754_v28 = vsub.f32 1.0, %v753_v13  ;;  %999 = vpow2.f32 %v291_v22  ;;  %v192_v34 = vadd.f32 %v1201_v56, %v191_v23  ;;  %vm413_vm3 = vweird.f32 %v996_v19 }
  0xf5   :  { %v640_v31 = vsel %vm639_vm2, %v992_v60, %v636_v24  ;;  %v409_v32 = vsub.f32 1.0, %v408_v25  ;;  %1001 = vpow2.f32 %v307_v26  ;;  %v998_v33 = vpop.eup %997  ;;  %v261_v38 = vmul.f32 1.442695, %v224_v29  ;;  %vm414_vm7 = vmor %vm412_vm15, %vm413_vm3 }
  0xf6   :  { %v645_v35 = vsel %vm1481_vm12, %v644_v3, %v640_v31  ;;  %v755_v37 = vmul.f32 %v994_v12, %v754_v28  ;;  %v232_v39 = vsub.f32 0.0, %v172_v30  ;;  %v1518_v40 = vadd.f32 1.0, %v998_v33 }
  0xf7   :  { %847 = vst.msk [vmem:[%s1761_s3 + $0x98] sm:$0xff] %vm827_vm1, %v645_v35  ;;  %v410_v27 = vmul.f32 %v996_v19, %v409_v32  ;;  %v240_v41 = vsub.f32 0.0, %v192_v34  ;;  %vm757_vm4 = vweird.f32 %v1447_v46  ;;  %1003 = vpow2.f32 %v261_v38 }
  0xf8   :  { %v756_v42 = vadd.f32 %v994_v12, %v755_v37  ;;  %v277_v36 = vmul.f32 1.442695, %v232_v39  ;;  %vm759_vm5 = vmor %vm757_vm4, %vm758_vm0  ;;  %vm762_vm6 = vcmp.eq.f32.partialorder %v761_v5, 8.507059e+37  ;;  %v764_v44 = vor.u32 1.1754944e-38, %v763_v7  ;;  %v1057_v7 = vld [vmem:[%s1759_s2] ss:$0 sm:$0xff] }
  0xf9   :  { %v411_v45 = vadd.f32 %v996_v19, %v410_v27  ;;  %1005 = vrcp.f32 %v1518_v40  ;;  %v419_v43 = vor.u32 1.1754944e-38, %v418_v21  ;;  %v293_v50 = vmul.f32 1.442695, %v240_v41 }
  0xfa   :  { %v1000_v48 = vpop.eup %999  ;;  %v760_v49 = vsel %vm759_vm5, %v994_v12, %v756_v42  ;;  %1007 = vpow2.f32 %v277_v36  ;;  %vm417_vm8 = vcmp.eq.f32.partialorder %v416_v16, 8.507059e+37  ;;  %v536_v52 = vand.u32 2147483647, %v1518_v40 }
  0xfb   :  { %v1002_v53 = vpop.eup %1001  ;;  %v765_v46 = vsel %vm762_vm6, %v764_v44, %v760_v49  ;;  %v415_v54 = vsel %vm414_vm7, %v996_v19, %v411_v45  ;;  %v1525_v55 = vadd.f32 1.0, %v1000_v48  ;;  %1009 = vpow2.f32 %v293_v50  ;;  %v174_v19 = vpop.f32.mrf.mxu1 }
  0xfc   :  { %855 = vst.msk [vmem:[%s1761_s3 + $0xd8] sm:$0xff] %vm827_vm1, %v765_v46  ;;  %v420_v59 = vsel %vm417_vm8, %v419_v43, %v415_v54  ;;  %v1532_v47 = vadd.f32 1.0, %v1002_v53  ;;  %v212_v58 = vadd.f32 %v1201_v56, %v211_v51  ;;  %v538_v61 = vand.u32 2147483648, %v1518_v40  ;;  %v194_v53 = vpop.f32.mrf.mxu2 }
  0xfd   :  { %832 = vst.msk [vmem:[%s1761_s3 + $0x20] sm:$0xff] %vm827_vm1, %v420_v59  ;;  %1011 = vrcp.f32 %v1525_v55  ;;  %v1004_v60 = vpop.eup %1003  ;;  %v658_v63 = vand.u32 2147483648, %v1525_v55  ;;  %v1547_v2 = vadd.f32 %v1201_v56, %v154_v57  ;;  %vm532_vm9 = vweird.f32 %v1518_v40 }
  0xfe   :  { %1013 = vrcp.f32 %v1532_v47  ;;  %v778_v0 = vand.u32 2147483648, %v1532_v47  ;;  %v1544_v1 = vadd.f32 1.0, %v1004_v60  ;;  %vm1551_vm10 = vcmp.eq.f32.partialorder %v536_v52, 8.507059e+37 }
  0xff   :  { %v1006_v62 = vpop.eup %1005  ;;  %v656_v6 = vand.u32 2147483647, %v1525_v55  ;;  %v776_v8 = vand.u32 2147483647, %v1532_v47  ;;  %v248_v10 = vsub.f32 0.0, %v212_v58  ;;  %v539_v12 = vor.u32 1.1754944e-38, %v538_v61 }
 0x100   :  { %v1008_v3 = vpop.eup %1007  ;;  %v528_v5 = vmul.f32 %v1006_v62, %v1518_v40  ;;  %1015 = vrcp.f32 %v1544_v1  ;;  %v433_v4 = vand.u32 2147483648, %v1544_v1  ;;  %vm652_vm11 = vweird.f32 %v1525_v55 }
 0x101   :  { %v1010_v9 = vpop.eup %1009  ;;  %v1560_v14 = vadd.f32 1.0, %v1008_v3  ;;  %vm533_vm12 = vweird.f32 %v1006_v62  ;;  %v659_v16 = vor.u32 1.1754944e-38, %v658_v63  ;;  %vm772_vm13 = vweird.f32 %v1532_v47  ;;  %v156_v63 = vpop.f32.mrf.mxu0 }
 0x102   :  { %v529_v11 = vsub.f32 1.0, %v528_v5  ;;  %v779_v17 = vor.u32 1.1754944e-38, %v778_v0  ;;  %v1563_v18 = vadd.f32 1.0, %v1010_v9  ;;  %vm1566_vm14 = vcmp.eq.f32.partialorder %v656_v6, 8.507059e+37  ;;  %vm534_vm2 = vmor %vm532_vm9, %vm533_vm12 }
 0x103   :  { %v1012_v15 = vpop.eup %1011  ;;  %v431_v23 = vand.u32 2147483647, %v1544_v1  ;;  %1017 = vrcp.f32 %v1560_v14  ;;  %vm1573_vm15 = vcmp.eq.f32.partialorder %v776_v8, 8.507059e+37  ;;  %v1577_v26 = vor.u32 1.1754944e-38, %v433_v4 }
 0x104   :  { %v1014_v20 = vpop.eup %1013  ;;  %v530_v13 = vmul.f32 %v1006_v62, %v529_v11  ;;  %v648_v21 = vmul.f32 %v1012_v15, %v1525_v55  ;;  %v309_v28 = vmul.f32 1.442695, %v248_v10  ;;  %v225_v29 = vsub.f32 0.0, %v1547_v2 }
 0x105   :  { %v768_v24 = vmul.f32 %v1014_v20, %v1532_v47  ;;  %vm427_vm0 = vweird.f32 %v1544_v1  ;;  %1019 = vrcp.f32 %v1563_v18  ;;  %v175_v32 = vadd.f32 %v1201_v56, %v174_v19 }
 0x106   :  { %v531_v30 = vadd.f32 %v1006_v62, %v530_v13  ;;  %v649_v31 = vsub.f32 1.0, %v648_v21  ;;  %v1016_v34 = vpop.eup %1015  ;;  %vm653_vm3 = vweird.f32 %v1012_v15  ;;  %v551_v35 = vand.u32 2147483647, %v1560_v14 }
 0x107   :  { %v769_v33 = vsub.f32 1.0, %v768_v24  ;;  %v553_v37 = vand.u32 2147483648, %v1560_v14  ;;  %vm773_vm4 = vweird.f32 %v1014_v20  ;;  %v423_v27 = vmul.f32 %v1016_v34, %v1544_v1  ;;  %vm654_vm8 = vmor %vm652_vm11, %vm653_vm3 }
 0x108   :  { %v535_v38 = vsel %vm534_vm2, %v1006_v62, %v531_v30  ;;  %v650_v39 = vmul.f32 %v1012_v15, %v649_v31  ;;  %vm1589_vm5 = vcmp.eq.f32.partialorder %v431_v23, 8.507059e+37  ;;  %vm547_vm6 = vweird.f32 %v1560_v14  ;;  %vm774_vm12 = vmor %vm772_vm13, %vm773_vm4  ;;  %v214_v62 = vpop.f32.mrf.mxu3  ;;  %v196_v31 = vpop.f32.mrf.mxu2 }
 0x109   :  { %v540_v56 = vsel %vm1551_vm10, %v539_v12, %v535_v38  ;;  %v770_v40 = vmul.f32 %v1014_v20, %v769_v33  ;;  %v671_v42 = vand.u32 2147483647, %v1563_v18  ;;  %v1018_v36 = vpop.eup %1017  ;;  %v424_v45 = vsub.f32 1.0, %v423_v27 }
 0x10a   :  { %840 = vst.msk [vmem:[%s1761_s3 + $0x60] sm:$0xff] %vm827_vm1, %v540_v56  ;;  %v651_v44 = vadd.f32 %v1012_v15, %v650_v39  ;;  %vm428_vm7 = vweird.f32 %v1016_v34  ;;  %1021 = vpow2.f32 %v309_v28  ;;  %v543_v49 = vmul.f32 %v1018_v36, %v1560_v14 }
 0x10b   :  { %v771_v48 = vadd.f32 %v1014_v20, %v770_v40  ;;  %vm1605_vm9 = vcmp.eq.f32.partialorder %v551_v35, 8.507059e+37  ;;  %v554_v50 = vor.u32 1.1754944e-38, %v553_v37  ;;  %vm667_vm10 = vweird.f32 %v1563_v18  ;;  %v1020_v46 = vpop.eup %1019  ;;  %vm429_vm13 = vmor %vm427_vm0, %vm428_vm7 }
 0x10c   :  { %v263_v51 = vmul.f32 1.442695, %v225_v29  ;;  %v655_v54 = vsel %vm654_vm8, %v1012_v15, %v651_v44  ;;  %v425_v55 = vmul.f32 %v1016_v34, %v424_v45  ;;  %v673_v59 = vand.u32 2147483648, %v1563_v18 }
 0x10d   :  { %v233_v52 = vsub.f32 0.0, %v175_v32  ;;  %v660_v57 = vsel %vm1566_vm14, %v659_v16, %v655_v54  ;;  %v775_v58 = vsel %vm774_vm12, %v1014_v20, %v771_v48  ;;  %v544_v60 = vsub.f32 1.0, %v543_v49  ;;  %v176_v16 = vpop.f32.mrf.mxu1 }
 0x10e   :  { %v663_v61 = vmul.f32 %v1020_v46, %v1563_v18  ;;  %848 = vst.msk [vmem:[%s1761_s3 + $0xa0] sm:$0xff] %vm827_vm1, %v660_v57  ;;  %v780_v47 = vsel %vm1573_vm15, %v779_v17, %v775_v58  ;;  %v426_v0 = vadd.f32 %v1016_v34, %v425_v55  ;;  %vm548_vm11 = vweird.f32 %v1018_v36 }
 0x10f   :  { %1023 = vpow2.f32 %v263_v51  ;;  %856 = vst.msk [vmem:[%s1761_s3 + $0xe0] sm:$0xff] %vm827_vm1, %v780_v47  ;;  %v545_v2 = vmul.f32 %v1018_v36, %v544_v60  ;;  %v279_v5 = vmul.f32 1.442695, %v233_v52  ;;  %v195_v6 = vadd.f32 %v1057_v7, %v194_v53  ;;  %vm549_vm15 = vmor %vm547_vm6, %vm548_vm11 }
 0x110   :  { %v664_v3 = vsub.f32 1.0, %v663_v61  ;;  %v1022_v8 = vpop.eup %1021  ;;  %v430_v4 = vsel %vm429_vm13, %v1016_v34, %v426_v0  ;;  %vm668_vm14 = vweird.f32 %v1020_v46  ;;  %v215_v10 = vadd.f32 %v1057_v7, %v214_v62  ;;  %v216_v41 = vpop.f32.mrf.mxu3 }
 0x111   :  { %v157_v9 = vadd.f32 %v1057_v7, %v156_v63  ;;  %v435_v11 = vsel %vm1589_vm5, %v1577_v26, %v430_v4  ;;  %v546_v12 = vadd.f32 %v1018_v36, %v545_v2  ;;  %v1636_v15 = vadd.f32 1.0, %v1022_v8  ;;  %vm669_vm2 = vmor %vm667_vm10, %vm668_vm14 }
 0x112   :  { %v665_v1 = vmul.f32 %v1020_v46, %v664_v3  ;;  %833 = vst.msk [vmem:[%s1761_s3 + $0x28] sm:$0xff] %vm827_vm1, %v435_v11  ;;  %1025 = vpow2.f32 %v279_v5  ;;  %v241_v17 = vsub.f32 0.0, %v195_v6  ;;  %v249_v19 = vsub.f32 0.0, %v215_v10 }
 0x113   :  { %v226_v20 = vsub.f32 0.0, %v157_v9  ;;  %v550_v13 = vsel %vm549_vm15, %v1018_v36, %v546_v12  ;;  %vm672_vm0 = vcmp.eq.f32.partialorder %v671_v42, 8.507059e+37  ;;  %1027 = vrcp.f32 %v1636_v15 }
 0x114   :  { %v666_v21 = vadd.f32 %v1020_v46, %v665_v1  ;;  %v555_v23 = vsel %vm1605_vm9, %v554_v50, %v550_v13  ;;  %v674_v24 = vor.u32 1.1754944e-38, %v673_v59  ;;  %v295_v14 = vmul.f32 1.442695, %v241_v17 }
 0x115   :  { %v1024_v22 = vpop.eup %1023  ;;  %v177_v25 = vadd.f32 %v1057_v7, %v176_v16  ;;  %841 = vst.msk [vmem:[%s1761_s3 + $0x68] sm:$0xff] %vm827_vm1, %v555_v23  ;;  %v311_v29 = vmul.f32 1.442695, %v249_v19  ;;  %v265_v30 = vmul.f32 1.442695, %v226_v20  ;;  %v197_v33 = vadd.f32 %v1057_v7, %v196_v31 }
 0x116   :  { %v670_v26 = vsel %vm669_vm2, %v1020_v46, %v666_v21  ;;  %v1655_v28 = vadd.f32 1.0, %v1024_v22  ;;  %1029 = vpow2.f32 %v295_v14  ;;  %v791_v42 = vand.u32 2147483647, %v1636_v15 }
 0x117   :  { %v675_v32 = vsel %vm672_vm0, %v674_v24, %v670_v26  ;;  %v234_v34 = vsub.f32 0.0, %v177_v25  ;;  %v242_v27 = vsub.f32 0.0, %v197_v33  ;;  %v793_v45 = vand.u32 2147483648, %v1636_v15 }
 0x118   :  { %849 = vst.msk [vmem:[%s1761_s3 + $0xa8] sm:$0xff] %vm827_vm1, %v675_v32  ;;  %1031 = vrcp.f32 %v1655_v28  ;;  %v1026_v18 = vpop.eup %1025  ;;  %v217_v49 = vadd.f32 %v1057_v7, %v216_v41  ;;  %vm787_vm4 = vweird.f32 %v1636_v15  ;;  %v446_v46 = vand.u32 2147483647, %v1655_v28 }
 0x119   :  { %1033 = vpow2.f32 %v311_v29  ;;  %v1028_v35 = vpop.eup %1027  ;;  %v1662_v37 = vadd.f32 1.0, %v1026_v18  ;;  %v281_v39 = vmul.f32 1.442695, %v234_v34  ;;  %v297_v36 = vmul.f32 1.442695, %v242_v27 }
 0x11a   :  { %1035 = vpow2.f32 %v265_v30  ;;  %v783_v38 = vmul.f32 %v1028_v35, %v1636_v15  ;;  %vm788_vm3 = vweird.f32 %v1028_v35  ;;  %v448_v54 = vand.u32 2147483648, %v1655_v28 }
 0x11b   :  { %1037 = vrcp.f32 %v1662_v37  ;;  %vm789_vm5 = vmor %vm787_vm4, %vm788_vm3  ;;  %vm792_vm6 = vcmp.eq.f32.partialorder %v791_v42, 8.507059e+37  ;;  %v794_v60 = vor.u32 1.1754944e-38, %v793_v45  ;;  %vm442_vm7 = vweird.f32 %v1655_v28 }
 0x11c   :  { %v1030_v56 = vpop.eup %1029  ;;  %v784_v40 = vsub.f32 1.0, %v783_v38  ;;  %1039 = vpow2.f32 %v281_v39  ;;  %v250_v61 = vsub.f32 0.0, %v217_v49  ;;  %vm1681_vm9 = vcmp.eq.f32.partialorder %v446_v46, 8.507059e+37 }
 0x11d   :  { %v1668_v48 = vadd.f32 1.0, %v1030_v56  ;;  %1041 = vpow2.f32 %v297_v36  ;;  %v449_v6 = vor.u32 1.1754944e-38, %v448_v54  ;;  %vm562_vm12 = vweird.f32 %v1662_v37 }
 0x11e   :  { %v1032_v44 = vpop.eup %1031  ;;  %v785_v50 = vmul.f32 %v1028_v35, %v784_v40  ;;  %v566_v10 = vand.u32 2147483647, %v1662_v37  ;;  %v568_v9 = vand.u32 2147483648, %v1662_v37  ;;  %v313_v11 = vmul.f32 1.442695, %v250_v61 }
 0x11f   :  { %v1034_v43 = vpop.eup %1033  ;;  %v438_v51 = vmul.f32 %v1032_v44, %v1655_v28  ;;  %1043 = vrcp.f32 %v1668_v48  ;;  %vm443_vm8 = vweird.f32 %v1032_v44  ;;  %v686_v17 = vand.u32 2147483647, %v1668_v48 }
 0x120   :  { %v1036_v53 = vpop.eup %1035  ;;  %v786_v55 = vadd.f32 %v1028_v35, %v785_v50  ;;  %v1675_v52 = vadd.f32 1.0, %v1034_v43  ;;  %vm444_vm10 = vmor %vm442_vm7, %vm443_vm8  ;;  %v688_v13 = vand.u32 2147483648, %v1668_v48  ;;  %vm567_vm14 = vcmp.eq.f32.partialorder %v566_v10, 8.507059e+37 }
 0x121   :  { %v439_v59 = vsub.f32 1.0, %v438_v51  ;;  %v1677_v57 = vadd.f32 1.0, %v1036_v53  ;;  %v1038_v58 = vpop.eup %1037  ;;  %v569_v23 = vor.u32 1.1754944e-38, %v568_v9  ;;  %vm682_vm0 = vweird.f32 %v1668_v48 }
 0x122   :  { %v790_v62 = vsel %vm789_vm5, %v1028_v35, %v786_v55  ;;  %v558_v47 = vmul.f32 %v1038_v58, %v1662_v37  ;;  %v1040_v0 = vpop.eup %1039  ;;  %1045 = vrcp.f32 %v1675_v52  ;;  %vm563_vm11 = vweird.f32 %v1038_v58 }
 0x123   :  { %v440_v63 = vmul.f32 %v1032_v44, %v439_v59  ;;  %v795_v2 = vsel %vm792_vm6, %v794_v60, %v790_v62  ;;  %v1042_v5 = vpop.eup %1041  ;;  %1047 = vrcp.f32 %v1677_v57  ;;  %v1705_v21 = vadd.f32 1.0, %v1040_v0  ;;  %vm564_vm13 = vmor %vm562_vm12, %vm563_vm11 }
 0x124   :  { %857 = vst.msk [vmem:[%s1761_s3 + $0xe8] sm:$0xff] %vm827_vm1, %v795_v2  ;;  %v559_v8 = vsub.f32 1.0, %v558_v47  ;;  %v1709_v24 = vadd.f32 1.0, %v1042_v5  ;;  %1049 = vpow2.f32 %v313_v11  ;;  %vm687_vm2 = vcmp.eq.f32.partialorder %v686_v17, 8.507059e+37 }
 0x125   :  { %v441_v7 = vadd.f32 %v1032_v44, %v440_v63  ;;  %v1044_v4 = vpop.eup %1043  ;;  %1051 = vrcp.f32 %v1705_v21  ;;  %v689_v32 = vor.u32 1.1754944e-38, %v688_v13  ;;  %v806_v34 = vand.u32 2147483647, %v1675_v52 }
 0x126   :  { %v560_v1 = vmul.f32 %v1038_v58, %v559_v8  ;;  %v678_v15 = vmul.f32 %v1044_v4, %v1668_v48  ;;  %vm683_vm15 = vweird.f32 %v1044_v4  ;;  %v808_v33 = vand.u32 2147483648, %v1675_v52 }
 0x127   :  { %v445_v12 = vsel %vm444_vm10, %v1032_v44, %v441_v7  ;;  %vm684_vm3 = vmor %vm682_vm0, %vm683_vm15  ;;  %1053 = vrcp.f32 %v1709_v24  ;;  %v463_v39 = vand.u32 2147483648, %v1677_v57  ;;  %v461_v40 = vand.u32 2147483647, %v1677_v57 }
 0x128   :  { %v450_v16 = vsel %vm1681_vm9, %v449_v6, %v445_v12  ;;  %v561_v19 = vadd.f32 %v1038_v58, %v560_v1  ;;  %v679_v20 = vsub.f32 1.0, %v678_v15  ;;  %v1046_v22 = vpop.eup %1045  ;;  %vm802_vm6 = vweird.f32 %v1675_v52 }
 0x129   :  { %834 = vst.msk [vmem:[%s1761_s3 + $0x30] sm:$0xff] %vm827_vm1, %v450_v16  ;;  %v1048_v14 = vpop.eup %1047  ;;  %v798_v28 = vmul.f32 %v1046_v22, %v1675_v52  ;;  %vm803_vm4 = vweird.f32 %v1046_v22  ;;  %vm807_vm8 = vcmp.eq.f32.partialorder %v806_v34, 8.507059e+37  ;;  %v809_v45 = vor.u32 1.1754944e-38, %v808_v33 }
 0x12a   :  { %v565_v25 = vsel %vm564_vm13, %v1038_v58, %v561_v19  ;;  %v680_v26 = vmul.f32 %v1044_v4, %v679_v20  ;;  %v453_v30 = vmul.f32 %v1048_v14, %v1677_v57  ;;  %v1050_v27 = vpop.eup %1049  ;;  %vm458_vm5 = vweird.f32 %v1048_v14  ;;  %vm804_vm7 = vmor %vm802_vm6, %vm803_vm4 }
 0x12b   :  { %v570_v29 = vsel %vm567_vm14, %v569_v23, %v565_v25  ;;  %v799_v18 = vsub.f32 1.0, %v798_v28  ;;  %v346_v36 = vadd.f32 1.0, %v1050_v27  ;;  %v1052_v44 = vpop.eup %1051  ;;  %vm457_vm9 = vweird.f32 %v1677_v57 }
 0x12c   :  { %842 = vst.msk [vmem:[%s1761_s3 + $0x70] sm:$0xff] %vm827_vm1, %v570_v29  ;;  %v681_v31 = vadd.f32 %v1044_v4, %v680_v26  ;;  %v454_v35 = vsub.f32 1.0, %v453_v30  ;;  %vm459_vm10 = vmor %vm457_vm9, %vm458_vm5  ;;  %v464_v43 = vor.u32 1.1754944e-38, %v463_v39  ;;  %v573_v50 = vmul.f32 %v1052_v44, %v1705_v21 }
 0x12d   :  { %v800_v38 = vmul.f32 %v1046_v22, %v799_v18  ;;  %1055 = vrcp.f32 %v346_v36  ;;  %v1054_v51 = vpop.eup %1053  ;;  %vm462_vm12 = vcmp.eq.f32.partialorder %v461_v40, 8.507059e+37  ;;  %v583_v52 = vand.u32 2147483648, %v1705_v21 }
 0x12e   :  { %v685_v37 = vsel %vm684_vm3, %v1044_v4, %v681_v31  ;;  %v455_v56 = vmul.f32 %v1048_v14, %v454_v35  ;;  %v574_v55 = vsub.f32 1.0, %v573_v50  ;;  %v693_v59 = vmul.f32 %v1054_v51, %v1709_v24 }
 0x12f   :  { %v690_v41 = vsel %vm687_vm2, %v689_v32, %v685_v37  ;;  %v801_v42 = vadd.f32 %v1046_v22, %v800_v38  ;;  %vm578_vm11 = vweird.f32 %v1052_v44  ;;  %v581_v58 = vand.u32 2147483647, %v1705_v21 }
 0x130   :  { %850 = vst.msk [vmem:[%s1761_s3 + $0xb0] sm:$0xff] %vm827_vm1, %v690_v41  ;;  %v456_v48 = vadd.f32 %v1048_v14, %v455_v56  ;;  %v575_v57 = vmul.f32 %v1052_v44, %v574_v55  ;;  %v694_v60 = vsub.f32 1.0, %v693_v59  ;;  %vm577_vm13 = vweird.f32 %v1705_v21 }
 0x131   :  { %v805_v49 = vsel %vm804_vm7, %v1046_v22, %v801_v42  ;;  %v703_v61 = vand.u32 2147483648, %v1709_v24  ;;  %vm698_vm14 = vweird.f32 %v1054_v51  ;;  %v701_v0 = vand.u32 2147483647, %v1709_v24  ;;  %vm579_vm15 = vmor %vm577_vm13, %vm578_vm11 }
 0x132   :  { %v810_v53 = vsel %vm807_vm8, %v809_v45, %v805_v49  ;;  %v460_v46 = vsel %vm459_vm10, %v1048_v14, %v456_v48  ;;  %v576_v63 = vadd.f32 %v1052_v44, %v575_v57  ;;  %v695_v47 = vmul.f32 %v1054_v51, %v694_v60 }
 0x133   :  { %858 = vst.msk [vmem:[%s1761_s3 + $0xf0] sm:$0xff] %vm827_vm1, %v810_v53  ;;  %v465_v54 = vsel %vm462_vm12, %v464_v43, %v460_v46  ;;  %v1056_v62 = vpop.eup %1055  ;;  %v584_v2 = vor.u32 1.1754944e-38, %v583_v52  ;;  %vm582_vm0 = vcmp.eq.f32.partialorder %v581_v58, 8.507059e+37  ;;  %vm697_vm2 = vweird.f32 %v1709_v24 }
 0x134   :  { %835 = vst.msk [vmem:[%s1761_s3 + $0x38] sm:$0xff] %vm827_vm1, %v465_v54  ;;  %v813_v3 = vmul.f32 %v1056_v62, %v346_v36  ;;  %v580_v5 = vsel %vm579_vm15, %v1052_v44, %v576_v63  ;;  %v696_v7 = vadd.f32 %v1054_v51, %v695_v47  ;;  %vm699_vm3 = vmor %vm697_vm2, %vm698_vm14  ;;  %v704_v8 = vor.u32 1.1754944e-38, %v703_v61 }
 0x135   :  { %v585_v6 = vsel %vm582_vm0, %v584_v2, %v580_v5  ;;  %vm702_vm4 = vcmp.eq.f32.partialorder %v701_v0, 8.507059e+37  ;;  %v823_v9 = vand.u32 2147483648, %v346_v36  ;;  %vm818_vm5 = vweird.f32 %v1056_v62 }
 0x136   :  { %v814_v4 = vsub.f32 1.0, %v813_v3  ;;  %843 = vst.msk [vmem:[%s1761_s3 + $0x78] sm:$0xff] %vm827_vm1, %v585_v6  ;;  %v700_v10 = vsel %vm699_vm3, %v1054_v51, %v696_v7  ;;  %v821_v1 = vand.u32 2147483647, %v346_v36  ;;  %vm817_vm6 = vweird.f32 %v346_v36 }
 0x137   :  { %v705_v11 = vsel %vm702_vm4, %v704_v8, %v700_v10  ;;  %vm819_vm7 = vmor %vm817_vm6, %vm818_vm5  ;;  %v824_v16 = vor.u32 1.1754944e-38, %v823_v9 }
 0x138   :  { %v815_v12 = vmul.f32 %v1056_v62, %v814_v4  ;;  %851 = vst.msk [vmem:[%s1761_s3 + $0xb8] sm:$0xff] %vm827_vm1, %v705_v11  ;;  %vm822_vm8 = vcmp.eq.f32.partialorder %v821_v1, 8.507059e+37 }
 0x13a   :  { %v816_v15 = vadd.f32 %v1056_v62, %v815_v12 }
 0x13c   :  { %v820_v17 = vsel %vm819_vm7, %v1056_v62, %v816_v15 }
 0x13d   :  { %v825_v19 = vsel %vm822_vm8, %v824_v16, %v820_v17 }
 0x13e   :  { %859 = vst.msk [vmem:[%s1761_s3 + $0xf8] sm:$0xff] %vm827_vm1, %v825_v19 }

// kernel: conv2d_decoder_forward.22
= control target key start
LH: loop header
LB: loop body
LE: loop exit
PB: predicated region body
PF: predicated region fallthrough
CT: control target
= control target key end

     0   :  { %s3659_s12 = smov 0   ;;  %s4705_s0 = inlined_call_operand.vmem [shape: f32[2,18,18,16], index: 0, kind: input, shape index: {}]   ;;  %s4706_s1 = inlined_call_operand.vmem [shape: bf16[2,2,3,16,32], index: 1, kind: input, shape index: {}]   ;;  %s4707_s2 = inlined_call_operand.vmem [shape: f32[1,32], index: 2, kind: input, shape index: {}]   ;;  %s4708_s3 = inlined_call_operand.vmem [shape: f32[2,16,2,16,32], index: 3, kind: output, shape index: {}]  }
   0x1 LB: > { %s3015_s13 = sadd.s32 4294967295, %s3637_s12   ;;  %p3019_p0 = scmp.ge.s32.totalorder %s3637_s12, 1  ;;  %s3637_s12 = sphi %s3659_s12, %s13_s12  }
   0x2   : > { %p137_p1 = scmp.lt.s32.totalorder %s3637_s12, 3 }
   0x4   : > { %p138_p2 = pnand %p3019_p0, %p137_p1 }
   0x6   : > { %141 = sbr.rel (%p138_p2) target bundleno = 923 (0x39b), region = 32 }
   0xb   : > { %v3609_v0 = vld [vmem:[%s4706_s1 + $0x8] sm:$0xff]  ;;  %v3608_v1 = vld [vmem:[%s4706_s1] sm:$0xff]  ;;  %v3610_v2 = vld [vmem:[%s4706_s1 + $0x10] sm:$0xff]  ;;  %p161_p3 = scmp.lt.s32.totalorder %s3015_s13, 1  ;;  %vm279_vm0 = vcmask 130048   ;;  %vm1533_vm1 = vcmask 261120  }
   0xc   : > { %v3611_v3 = vld [vmem:[%s4706_s1 + $0x18] sm:$0xff]  ;;  %v3612_v5 = vld [vmem:[%s4706_s1 + $0x20] sm:$0xff]  ;;  %335 = vmatpush.bf16.msra.mxu0 %v3609_v0  ;;  %478 = vmatpush.bf16.msra.mxu1 %v3608_v1  ;;  %v3614_v6 = vld [vmem:[%s4706_s1 + $0x30] sm:$0xff] }
   0xd   : > { %v3615_v4 = vld [vmem:[%s4706_s1 + $0x38] sm:$0xff]  ;;  %s4725_s13 = smov (!%p161_p3, %s3015_s13), 1  ;;  %v3613_v7 = vld [vmem:[%s4706_s1 + $0x28] sm:$0xff]  ;;  %672 = vmatpush.bf16.msra.mxu2 %v3610_v2  ;;  %899 = vmatpush.bf16.msra.mxu3 %v3611_v3 }
   0xe   : > { %s3620_s30 = smul.u32 432, %s4725_s13  ;;  %s3607_s19 = sshll.u32 %s4725_s13, 9 }
   0xf   : > { %s4150_s22 = scalar_lea.vmem %s4708_s3, %s3607_s19 }
  0x10   : > { %1125 = vmatpush.bf16.msrb.mxu0 %v3612_v5  ;;  %1351 = vmatpush.bf16.msrb.mxu1 %v3613_v7  ;;  %s3697_s6 = scalar_lea.vmem %s4705_s0, %s3620_s30 }
  0x11   : > { %1729 = vmatpush.bf16.msrb.mxu2 %v3615_v4  ;;  %1872 = vmatpush.bf16.msrb.mxu3 %v3614_v6  ;;  %v222_v8 = vld [vmem:[%s3697_s6 + $0x1] sm:$0xff]  ;;  %v223_v9 = vld [vmem:[%s3697_s6 + $0x9] sm:$0xff]  ;;  %v3087_v17 = vld [vmem:[%s3697_s6 + $0x18] sm:$0xff] }
  0x12   : > { %v172_v10 = vld [vmem:[%s3697_s6] sm:$0xff]  ;;  %v254_v11 = vpack.c.bf16 %v223_v9, %v222_v8  ;;  %v173_v12 = vld [vmem:[%s3697_s6 + $0x8] sm:$0xff]  ;;  %v3089_v24 = vld [vmem:[%s3697_s6 + $0x30] sm:$0xff] }
  0x13   : > { %v560_v13 = vld [vmem:[%s3697_s6 + $0x2] sm:$0xff]  ;;  %v561_v14 = vld [vmem:[%s3697_s6 + $0xa] sm:$0xff]  ;;  %v204_v15 = vpack.c.bf16 %v173_v12, %v172_v10  ;;  %v224_v20 = vld [vmem:[%s3697_s6 + $0x19] sm:$0xff] }
  0x14   : > { %v592_v16 = vpack.c.bf16 %v561_v14, %v560_v13  ;;  %v3088_v18 = vld [vmem:[%s3697_s6 + $0x20] sm:$0xff]  ;;  %3029 = vmatmul.msk.bf16.vlgmr.msra.gmra.mxu0 %vm279_vm0, %v254_v11  ;;  %v3090_v25 = vld [vmem:[%s3697_s6 + $0x38] sm:$0xff]  ;;  %v3091_v33 = vld [vmem:[%s3697_s6 + $0x48] sm:$0xff] }
  0x15   : > { %v3708_v19 = vpack.c.bf16 %v3088_v18, %v3087_v17  ;;  %3049 = vmatmul.msk.bf16.vlgmr.msra.gmra.mxu1 %vm279_vm0, %v204_v15  ;;  %v225_v21 = vld [vmem:[%s3697_s6 + $0x21] sm:$0xff]  ;;  %v3724_v28 = vpack.c.bf16 %v3090_v25, %v3089_v24  ;;  %v226_v29 = vld [vmem:[%s3697_s6 + $0x31] sm:$0xff]  ;;  %v227_v30 = vld [vmem:[%s3697_s6 + $0x39] sm:$0xff] }
  0x16   : > { %3071 = vmatmul.msk.bf16.vlgmr.msra.gmra.mxu2 %vm279_vm0, %v592_v16  ;;  %v562_v22 = vld [vmem:[%s3697_s6 + $0x1a] sm:$0xff]  ;;  %v563_v23 = vld [vmem:[%s3697_s6 + $0x22] sm:$0xff]  ;;  %v3720_v26 = vpack.c.bf16 %v225_v21, %v224_v20  ;;  %v564_v31 = vld [vmem:[%s3697_s6 + $0x32] sm:$0xff]  ;;  %v3740_v35 = vpack.c.bf16 %v227_v30, %v226_v29 }
  0x17   : > { %3125 = vmatmul.msk.bf16.vlgmr.msra.gmra.mxu3 %vm279_vm0, %v3708_v19  ;;  %v3722_v27 = vpack.c.bf16 %v563_v23, %v562_v22  ;;  %v565_v32 = vld [vmem:[%s3697_s6 + $0x3a] sm:$0xff]  ;;  %v3092_v34 = vld [vmem:[%s3697_s6 + $0x50] sm:$0xff]  ;;  %v3094_v43 = vld [vmem:[%s3697_s6 + $0x68] sm:$0xff] }
  0x18   : > { %v3742_v36 = vpack.c.bf16 %v565_v32, %v564_v31  ;;  %v3744_v37 = vpack.c.bf16 %v3092_v34, %v3091_v33  ;;  %v228_v38 = vld [vmem:[%s3697_s6 + $0x49] sm:$0xff]  ;;  %v229_v39 = vld [vmem:[%s3697_s6 + $0x51] sm:$0xff]  ;;  %v3093_v42 = vld [vmem:[%s3697_s6 + $0x60] sm:$0xff] }
  0x19   : > { %v566_v40 = vld [vmem:[%s3697_s6 + $0x4a] sm:$0xff]  ;;  %v567_v41 = vld [vmem:[%s3697_s6 + $0x52] sm:$0xff]  ;;  %v3760_v44 = vpack.c.bf16 %v229_v39, %v228_v38  ;;  %v3764_v46 = vpack.c.bf16 %v3094_v43, %v3093_v42  ;;  %v230_v47 = vld [vmem:[%s3697_s6 + $0x61] sm:$0xff] }
  0x1a   : > { %v3762_v45 = vpack.c.bf16 %v567_v41, %v566_v40  ;;  %v231_v48 = vld [vmem:[%s3697_s6 + $0x69] sm:$0xff]  ;;  %v3095_v51 = vld [vmem:[%s3697_s6 + $0x78] sm:$0xff]  ;;  %v3096_v52 = vld [vmem:[%s3697_s6 + $0x80] sm:$0xff] }
  0x1b   : > { %v568_v49 = vld [vmem:[%s3697_s6 + $0x62] sm:$0xff]  ;;  %v569_v50 = vld [vmem:[%s3697_s6 + $0x6a] sm:$0xff]  ;;  %v3780_v53 = vpack.c.bf16 %v231_v48, %v230_v47  ;;  %v3784_v55 = vpack.c.bf16 %v3096_v52, %v3095_v51  ;;  %v232_v56 = vld [vmem:[%s3697_s6 + $0x79] sm:$0xff] }
  0x1c   : > { %v3782_v54 = vpack.c.bf16 %v569_v50, %v568_v49  ;;  %v233_v57 = vld [vmem:[%s3697_s6 + $0x81] sm:$0xff]  ;;  %v3097_v60 = vld [vmem:[%s3697_s6 + $0x90] sm:$0xff]  ;;  %v3098_v61 = vld [vmem:[%s3697_s6 + $0x98] sm:$0xff] }
  0x1d   : > { %v570_v58 = vld [vmem:[%s3697_s6 + $0x7a] sm:$0xff]  ;;  %v571_v59 = vld [vmem:[%s3697_s6 + $0x82] sm:$0xff]  ;;  %v3800_v62 = vpack.c.bf16 %v233_v57, %v232_v56  ;;  %v3804_v0 = vpack.c.bf16 %v3098_v61, %v3097_v60  ;;  %v234_v1 = vld [vmem:[%s3697_s6 + $0x91] sm:$0xff] }
  0x1e   : > { %v3802_v63 = vpack.c.bf16 %v571_v59, %v570_v58  ;;  %v235_v2 = vld [vmem:[%s3697_s6 + $0x99] sm:$0xff]  ;;  %v3099_v5 = vld [vmem:[%s3697_s6 + $0xa8] sm:$0xff]  ;;  %v3100_v6 = vld [vmem:[%s3697_s6 + $0xb0] sm:$0xff] }
  0x1f   : > { %v572_v3 = vld [vmem:[%s3697_s6 + $0x92] sm:$0xff]  ;;  %v573_v4 = vld [vmem:[%s3697_s6 + $0x9a] sm:$0xff]  ;;  %v3820_v7 = vpack.c.bf16 %v235_v2, %v234_v1  ;;  %v3824_v9 = vpack.c.bf16 %v3100_v6, %v3099_v5  ;;  %v236_v10 = vld [vmem:[%s3697_s6 + $0xa9] sm:$0xff] }
  0x20   : > { %v3822_v8 = vpack.c.bf16 %v573_v4, %v572_v3  ;;  %v237_v11 = vld [vmem:[%s3697_s6 + $0xb1] sm:$0xff]  ;;  %v3101_v14 = vld [vmem:[%s3697_s6 + $0xc0] sm:$0xff]  ;;  %v3102_v15 = vld [vmem:[%s3697_s6 + $0xc8] sm:$0xff] }
  0x21   : > { %v574_v12 = vld [vmem:[%s3697_s6 + $0xaa] sm:$0xff]  ;;  %v575_v13 = vld [vmem:[%s3697_s6 + $0xb2] sm:$0xff]  ;;  %v3840_v16 = vpack.c.bf16 %v237_v11, %v236_v10  ;;  %v3844_v18 = vpack.c.bf16 %v3102_v15, %v3101_v14  ;;  %v238_v20 = vld [vmem:[%s3697_s6 + $0xc1] sm:$0xff] }
  0x22   : > { %v3842_v17 = vpack.c.bf16 %v575_v13, %v574_v12  ;;  %v239_v21 = vld [vmem:[%s3697_s6 + $0xc9] sm:$0xff]  ;;  %v3103_v24 = vld [vmem:[%s3697_s6 + $0xd8] sm:$0xff]  ;;  %v3104_v25 = vld [vmem:[%s3697_s6 + $0xe0] sm:$0xff] }
  0x23   : > { %v576_v22 = vld [vmem:[%s3697_s6 + $0xc2] sm:$0xff]  ;;  %v577_v23 = vld [vmem:[%s3697_s6 + $0xca] sm:$0xff]  ;;  %v3860_v29 = vpack.c.bf16 %v239_v21, %v238_v20  ;;  %v3864_v33 = vpack.c.bf16 %v3104_v25, %v3103_v24  ;;  %v240_v48 = vld [vmem:[%s3697_s6 + $0xd9] sm:$0xff] }
  0x24   : > { %3030 = vmatmul.msk.bf16.gmra.mxu0 %vm279_vm0, %v3720_v26  ;;  %v3862_v31 = vpack.c.bf16 %v577_v23, %v576_v22  ;;  %v241_v49 = vld [vmem:[%s3697_s6 + $0xe1] sm:$0xff]  ;;  %v3105_v52 = vld [vmem:[%s3697_s6 + $0xf0] sm:$0xff]  ;;  %v3106_v56 = vld [vmem:[%s3697_s6 + $0xf8] sm:$0xff] }
  0x25   : > { %3050 = vmatmul.msk.bf16.gmra.mxu1 %vm279_vm0, %v3708_v19  ;;  %v578_v50 = vld [vmem:[%s3697_s6 + $0xda] sm:$0xff]  ;;  %v579_v51 = vld [vmem:[%s3697_s6 + $0xe2] sm:$0xff]  ;;  %v3882_v58 = vpack.c.bf16 %v241_v49, %v240_v48  ;;  %v3886_v3 = vpack.c.bf16 %v3106_v56, %v3105_v52  ;;  %v242_v20 = vld [vmem:[%s3697_s6 + $0xf1] sm:$0xff] }
  0x26   : > { %3072 = vmatmul.msk.bf16.gmra.mxu2 %vm279_vm0, %v3722_v27  ;;  %v3884_v1 = vpack.c.bf16 %v579_v51, %v578_v50  ;;  %v243_v21 = vld [vmem:[%s3697_s6 + $0xf9] sm:$0xff]  ;;  %v3107_v24 = vld [vmem:[%s3697_s6 + $0x108] sm:$0xff]  ;;  %v3108_v25 = vld [vmem:[%s3697_s6 + $0x110] sm:$0xff] }
  0x27   : > { %3126 = vmatmul.msk.bf16.gmra.mxu3 %vm279_vm0, %v3724_v28  ;;  %v580_v22 = vld [vmem:[%s3697_s6 + $0xf2] sm:$0xff]  ;;  %v581_v23 = vld [vmem:[%s3697_s6 + $0xfa] sm:$0xff] }
  0x34   : > { %3031 = vmatmul.msk.bf16.gmra.mxu0 %vm279_vm0, %v3740_v35 }
  0x35   : > { %3051 = vmatmul.msk.bf16.gmra.mxu1 %vm279_vm0, %v3724_v28 }
  0x36   : > { %3073 = vmatmul.msk.bf16.gmra.mxu2 %vm279_vm0, %v3742_v36 }
  0x37   : > { %3127 = vmatmul.msk.bf16.gmra.mxu3 %vm279_vm0, %v3744_v37 }
  0x44   : > { %3032 = vmatmul.msk.bf16.gmra.mxu0 %vm279_vm0, %v3760_v44 }
  0x45   : > { %3052 = vmatmul.msk.bf16.gmra.mxu1 %vm279_vm0, %v3744_v37 }
  0x46   : > { %3074 = vmatmul.msk.bf16.gmra.mxu2 %vm279_vm0, %v3762_v45 }
  0x47   : > { %3128 = vmatmul.msk.bf16.gmra.mxu3 %vm279_vm0, %v3764_v46 }
  0x54   : > { %3033 = vmatmul.msk.bf16.gmra.mxu0 %vm279_vm0, %v3780_v53 }
  0x55   : > { %3053 = vmatmul.msk.bf16.gmra.mxu1 %vm279_vm0, %v3764_v46 }
  0x56   : > { %3075 = vmatmul.msk.bf16.gmra.mxu2 %vm279_vm0, %v3782_v54 }
  0x57   : > { %3129 = vmatmul.msk.bf16.gmra.mxu3 %vm279_vm0, %v3784_v55 }
  0x64   : > { %3034 = vmatmul.msk.bf16.gmra.mxu0 %vm279_vm0, %v3800_v62 }
  0x65   : > { %3054 = vmatmul.msk.bf16.gmra.mxu1 %vm279_vm0, %v3784_v55 }
  0x66   : > { %3076 = vmatmul.msk.bf16.gmra.mxu2 %vm279_vm0, %v3802_v63 }
  0x67   : > { %3130 = vmatmul.msk.bf16.gmra.mxu3 %vm279_vm0, %v3804_v0 }
  0x74   : > { %3035 = vmatmul.msk.bf16.gmra.mxu0 %vm279_vm0, %v3820_v7 }
  0x75   : > { %3055 = vmatmul.msk.bf16.gmra.mxu1 %vm279_vm0, %v3804_v0 }
  0x76   : > { %3077 = vmatmul.msk.bf16.gmra.mxu2 %vm279_vm0, %v3822_v8 }
  0x77   : > { %3131 = vmatmul.msk.bf16.gmra.mxu3 %vm279_vm0, %v3824_v9 }
  0x84   : > { %3036 = vmatmul.msk.bf16.gmra.mxu0 %vm279_vm0, %v3840_v16 }
  0x85   : > { %3056 = vmatmul.msk.bf16.gmra.mxu1 %vm279_vm0, %v3824_v9 }
  0x86   : > { %3078 = vmatmul.msk.bf16.gmra.mxu2 %vm279_vm0, %v3842_v17 }
  0x87   : > { %3132 = vmatmul.msk.bf16.gmra.mxu3 %vm279_vm0, %v3844_v18 }
  0x91   : > { %v337_v30 = vpop.f32.mrf.mxu0 }
  0x92   : > { %v480_v32 = vpop.f32.mrf.mxu1 }
  0x93   : > { %v481_v34 = vadd.f32 %v480_v32, %v337_v30  ;;  %v3906_v32 = vpack.c.bf16 %v243_v21, %v242_v20 }
  0x94   : > { %3037 = vmatmul.msk.bf16.gmra.mxu0 %vm279_vm0, %v3860_v29 }
  0x95   : > { %3057 = vmatmul.msk.bf16.gmra.mxu1 %vm279_vm0, %v3844_v18 }
  0x96   : > { %3079 = vmatmul.msk.bf16.gmra.mxu2 %vm279_vm0, %v3862_v31 }
  0x97   : > { %3133 = vmatmul.msk.bf16.gmra.mxu3 %vm279_vm0, %v3864_v33 }
  0x99   : > { %v674_v38 = vpop.f32.mrf.mxu2  ;;  %v339_v41 = vpop.f32.mrf.mxu0 }
  0x9a   : > { %v754_v39 = vadd.f32 %v674_v38, %v481_v34  ;;  %v901_v40 = vpop.f32.mrf.mxu3  ;;  %v482_v42 = vpop.f32.mrf.mxu1 }
  0x9b   : > { %v483_v47 = vadd.f32 %v482_v42, %v339_v41  ;;  %v829_v42 = vpack.c.bf16 %v3108_v25, %v3107_v24 }
  0x9c   : > { %v3874_v43 = vadd.f32 %v901_v40, %v754_v39  ;;  %v3908_v40 = vpack.c.bf16 %v581_v23, %v580_v22 }
  0xa1   : > { %v676_v57 = vpop.f32.mrf.mxu2  ;;  %v342_v61 = vpop.f32.mrf.mxu0 }
  0xa2   : > { %v755_v59 = vadd.f32 %v676_v57, %v483_v47  ;;  %v903_v60 = vpop.f32.mrf.mxu3  ;;  %v485_v2 = vpop.f32.mrf.mxu1 }
  0xa3   : > { %v486_v5 = vadd.f32 %v485_v2, %v342_v61  ;;  %v245_v61 = vld [vmem:[%s3697_s6 + $0x111] sm:$0xff] }
  0xa4   : > { %v3888_v4 = vadd.f32 %v903_v60, %v755_v59  ;;  %3038 = vmatmul.msk.bf16.gmra.mxu0 %vm279_vm0, %v3882_v58  ;;  %v244_v60 = vld [vmem:[%s3697_s6 + $0x109] sm:$0xff] }
  0xa5   : > { %3058 = vmatmul.msk.bf16.gmra.mxu1 %vm279_vm0, %v3864_v33  ;;  %v582_v2 = vld [vmem:[%s3697_s6 + $0x10a] sm:$0xff] }
  0xa6   : > { %3080 = vmatmul.msk.bf16.gmra.mxu2 %vm279_vm0, %v3884_v1 }
  0xa7   : > { %3134 = vmatmul.msk.bf16.gmra.mxu3 %vm279_vm0, %v3886_v3 }
  0xa9   : > { %v679_v6 = vpop.f32.mrf.mxu2  ;;  %v344_v12 = vpop.f32.mrf.mxu0 }
  0xaa   : > { %v756_v10 = vadd.f32 %v679_v6, %v486_v5  ;;  %v906_v11 = vpop.f32.mrf.mxu3  ;;  %v487_v13 = vpop.f32.mrf.mxu1  ;;  %v583_v5 = vld [vmem:[%s3697_s6 + $0x112] sm:$0xff]  ;;  %v3109_v6 = vld [vmem:[%s3697_s6 + $0x120] sm:$0xff] }
  0xab   : > { %v488_v15 = vadd.f32 %v487_v13, %v344_v12  ;;  %v3927_v12 = vpack.c.bf16 %v245_v61, %v244_v60  ;;  %v3929_v21 = vpack.c.bf16 %v583_v5, %v582_v2  ;;  %v3112_v60 = vld [vmem:[%s3697_s6 + $0x140] sm:$0xff] }
  0xac   : > { %v3898_v14 = vadd.f32 %v906_v11, %v756_v10  ;;  %v3110_v10 = vld [vmem:[%s3697_s6 + $0x128] sm:$0xff] }
  0xad   : > { %v830_v23 = vpack.c.bf16 %v3110_v10, %v3109_v6 }
  0xb1   : > { %v681_v30 = vpop.f32.mrf.mxu2  ;;  %v347_v39 = vpop.f32.mrf.mxu0 }
  0xb2   : > { %v757_v34 = vadd.f32 %v681_v30, %v488_v15  ;;  %v908_v38 = vpop.f32.mrf.mxu3  ;;  %v490_v41 = vpop.f32.mrf.mxu1 }
  0xb3   : > { %v491_v48 = vadd.f32 %v490_v41, %v347_v39 }
  0xb4   : > { %v3910_v47 = vadd.f32 %v908_v38, %v757_v34  ;;  %3039 = vmatmul.msk.bf16.gmra.mxu0 %vm279_vm0, %v3906_v32 }
  0xb5   : > { %3059 = vmatmul.msk.bf16.gmra.mxu1 %vm279_vm0, %v3886_v3 }
  0xb6   : > { %3081 = vmatmul.msk.bf16.gmra.mxu2 %vm279_vm0, %v3908_v40 }
  0xb7   : > { %3135 = vmatmul.msk.bf16.gmra.mxu3 %vm279_vm0, %v829_v42 }
  0xb9   : > { %v684_v49 = vpop.f32.mrf.mxu2  ;;  %v349_v52 = vpop.f32.mrf.mxu0 }
  0xba   : > { %v758_v50 = vadd.f32 %v684_v49, %v491_v48  ;;  %v911_v51 = vpop.f32.mrf.mxu3  ;;  %v492_v56 = vpop.f32.mrf.mxu1 }
  0xbb   : > { %v493_v59 = vadd.f32 %v492_v56, %v349_v52  ;;  %v584_v52 = vld [vmem:[%s3697_s6 + $0x122] sm:$0xff]  ;;  %v585_v56 = vld [vmem:[%s3697_s6 + $0x12a] sm:$0xff] }
  0xbc   : > { %v3919_v57 = vadd.f32 %v911_v51, %v758_v50  ;;  %v246_v50 = vld [vmem:[%s3697_s6 + $0x121] sm:$0xff]  ;;  %v247_v51 = vld [vmem:[%s3697_s6 + $0x129] sm:$0xff]  ;;  %v3949_v10 = vpack.c.bf16 %v585_v56, %v584_v52 }
  0xbd   : > { %v3947_v61 = vpack.c.bf16 %v247_v51, %v246_v50  ;;  %v249_v50 = vld [vmem:[%s3697_s6 + $0x141] sm:$0xff]  ;;  %v3113_v56 = vld [vmem:[%s3697_s6 + $0x150] sm:$0xff] }
  0xbe   : > { %v586_v51 = vld [vmem:[%s3697_s6 + $0x13a] sm:$0xff]  ;;  %v587_v52 = vld [vmem:[%s3697_s6 + $0x142] sm:$0xff] }
  0xc1   : > { %v686_v11 = vpop.f32.mrf.mxu2  ;;  %v352_v20 = vpop.f32.mrf.mxu0 }
  0xc2   : > { %v759_v13 = vadd.f32 %v686_v11, %v493_v59  ;;  %v913_v15 = vpop.f32.mrf.mxu3  ;;  %v495_v22 = vpop.f32.mrf.mxu1  ;;  %v3111_v59 = vld [vmem:[%s3697_s6 + $0x138] sm:$0xff] }
  0xc3   : > { %v496_v25 = vadd.f32 %v495_v22, %v352_v20 }
  0xc4   : > { %v3931_v24 = vadd.f32 %v913_v15, %v759_v13  ;;  %3040 = vmatmul.msk.bf16.gmra.mxu0 %vm279_vm0, %v3927_v12  ;;  %v831_v13 = vpack.c.bf16 %v3112_v60, %v3111_v59  ;;  %v3114_v59 = vld [vmem:[%s3697_s6 + $0x158] sm:$0xff] }
  0xc5   : > { %3060 = vmatmul.msk.bf16.gmra.mxu1 %vm279_vm0, %v829_v42 }
  0xc6   : > { %3082 = vmatmul.msk.bf16.gmra.mxu2 %vm279_vm0, %v3929_v21 }
  0xc7   : > { %3136 = vmatmul.msk.bf16.gmra.mxu3 %vm279_vm0, %v830_v23 }
  0xc9   : > { %v689_v30 = vpop.f32.mrf.mxu2  ;;  %v354_v39 = vpop.f32.mrf.mxu0 }
  0xca   : > { %v760_v34 = vadd.f32 %v689_v30, %v496_v25  ;;  %v916_v38 = vpop.f32.mrf.mxu3  ;;  %v497_v41 = vpop.f32.mrf.mxu1 }
  0xcb   : > { %v498_v49 = vadd.f32 %v497_v41, %v354_v39 }
  0xcc   : > { %v3939_v48 = vadd.f32 %v916_v38, %v760_v34 }
  0xd1   : > { %v691_v42 = vpop.f32.mrf.mxu2  ;;  %v357_v6 = vpop.f32.mrf.mxu0 }
  0xd2   : > { %v761_v2 = vadd.f32 %v691_v42, %v498_v49  ;;  %v918_v5 = vpop.f32.mrf.mxu3  ;;  %v500_v11 = vpop.f32.mrf.mxu1  ;;  %v248_v49 = vld [vmem:[%s3697_s6 + $0x139] sm:$0xff] }
  0xd3   : > { %v501_v20 = vadd.f32 %v500_v11, %v357_v6  ;;  %v3967_v60 = vpack.c.bf16 %v249_v50, %v248_v49  ;;  %v3969_v6 = vpack.c.bf16 %v587_v52, %v586_v51  ;;  %v250_v52 = vld [vmem:[%s3697_s6 + $0x151] sm:$0xff] }
  0xd4   : > { %v3951_v15 = vadd.f32 %v918_v5, %v761_v2  ;;  %3041 = vmatmul.msk.bf16.gmra.mxu0 %vm279_vm0, %v3947_v61 }
  0xd5   : > { %3061 = vmatmul.msk.bf16.gmra.mxu1 %vm279_vm0, %v830_v23  ;;  %4713 = vst [vmem:[#allocation3_spill] sm:$0xff] %v3967_v60 }
  0xd6   : > { %3083 = vmatmul.msk.bf16.gmra.mxu2 %vm279_vm0, %v3949_v10  ;;  %4714 = vst [vmem:[#allocation4_spill] sm:$0xff] %v3969_v6 }
  0xd7   : > { %3137 = vmatmul.msk.bf16.gmra.mxu3 %vm279_vm0, %v831_v13 }
  0xd9   : > { %v694_v22 = vpop.f32.mrf.mxu2  ;;  %v359_v34 = vpop.f32.mrf.mxu0 }
  0xda   : > { %v762_v25 = vadd.f32 %v694_v22, %v501_v20  ;;  %v921_v30 = vpop.f32.mrf.mxu3  ;;  %v502_v38 = vpop.f32.mrf.mxu1  ;;  %v832_v20 = vpack.c.bf16 %v3114_v59, %v3113_v56  ;;  %v251_v56 = vld [vmem:[%s3697_s6 + $0x159] sm:$0xff] }
  0xdb   : > { %v503_v41 = vadd.f32 %v502_v38, %v359_v34  ;;  %v588_v59 = vld [vmem:[%s3697_s6 + $0x152] sm:$0xff] }
  0xdc   : > { %v3959_v39 = vadd.f32 %v921_v30, %v762_v25 }
  0xde   : > { %4712 = vst [vmem:[#allocation2_spill] sm:$0xff] %v3959_v39 }
  0xe1   : > { %v696_v23 = vpop.f32.mrf.mxu2  ;;  %v362_v5 = vpop.f32.mrf.mxu0 }
  0xe2   : > { %v763_v42 = vadd.f32 %v696_v23, %v503_v41  ;;  %v923_v2 = vpop.f32.mrf.mxu3  ;;  %v505_v11 = vpop.f32.mrf.mxu1  ;;  %v589_v23 = vld [vmem:[%s3697_s6 + $0x15a] sm:$0xff] }
  0xe3   : > { %v506_v25 = vadd.f32 %v505_v11, %v362_v5  ;;  %v3987_v5 = vpack.c.bf16 %v251_v56, %v250_v52 }
  0xe4   : > { %v3971_v22 = vadd.f32 %v923_v2, %v763_v42  ;;  %3042 = vmatmul.msk.bf16.gmra.mxu0 %vm279_vm0, %v3967_v60  ;;  %v3115_v42 = vld [vmem:[%s3697_s6 + $0x168] sm:$0xff]  ;;  %v3116_v2 = vld [vmem:[%s3697_s6 + $0x170] sm:$0xff]  ;;  %v3989_v60 = vpack.c.bf16 %v589_v23, %v588_v59 }
  0xe5   : > { %3062 = vmatmul.msk.bf16.gmra.mxu1 %vm279_vm0, %v831_v13  ;;  %v3617_v23 = vld [vmem:[%s4706_s1 + $0x48] sm:$0xff] }
  0xe6   : > { %4715 = vst [vmem:[#allocation5_spill] sm:$0xff] %v3971_v22  ;;  %3084 = vmatmul.msk.bf16.gmra.mxu2 %vm279_vm0, %v3969_v6  ;;  %2293 = vmatpush.bf16.msra.mxu1 %v3617_v23 }
  0xe7   : > { %3138 = vmatmul.msk.bf16.gmra.mxu3 %vm279_vm0, %v832_v20 }
  0xe9   : > { %v699_v30 = vpop.f32.mrf.mxu2  ;;  %v364_v41 = vpop.f32.mrf.mxu0 }
  0xea   : > { %v764_v34 = vadd.f32 %v699_v30, %v506_v25  ;;  %v926_v38 = vpop.f32.mrf.mxu3  ;;  %v507_v49 = vpop.f32.mrf.mxu1  ;;  %v833_v30 = vpack.c.bf16 %v3116_v2, %v3115_v42  ;;  %v252_v42 = vld [vmem:[%s3697_s6 + $0x169] sm:$0xff]  ;;  %v253_v2 = vld [vmem:[%s3697_s6 + $0x171] sm:$0xff] }
  0xeb   : > { %v508_v51 = vadd.f32 %v507_v49, %v364_v41 }
  0xec   : > { %v3979_v50 = vadd.f32 %v926_v38, %v764_v34  ;;  %v3618_v38 = vld [vmem:[%s4706_s1 + $0x50] sm:$0xff] }
  0xed   : > { %2519 = vmatpush.bf16.msra.mxu2 %v3618_v38  ;;  %v3118_v38 = vld [vmem:[%s3697_s6 + $0x188] sm:$0xff] }
  0xf1   : > { %v701_v13 = vpop.f32.mrf.mxu2  ;;  %v367_v6 = vpop.f32.mrf.mxu0 }
  0xf2   : > { %v765_v11 = vadd.f32 %v701_v13, %v508_v51  ;;  %v928_v22 = vpop.f32.mrf.mxu3  ;;  %v510_v25 = vpop.f32.mrf.mxu1  ;;  %v590_v13 = vld [vmem:[%s3697_s6 + $0x16a] sm:$0xff] }
  0xf3   : > { %v511_v34 = vadd.f32 %v510_v25, %v367_v6  ;;  %v3616_v6 = vld [vmem:[%s4706_s1 + $0x40] sm:$0xff] }
  0xf4   : > { %v3991_v39 = vadd.f32 %v928_v22, %v765_v11  ;;  %3043 = vmatmul.msk.bf16.gmra.mxu0 %vm279_vm0, %v3987_v5  ;;  %v591_v11 = vld [vmem:[%s3697_s6 + $0x172] sm:$0xff]  ;;  %v3117_v25 = vld [vmem:[%s3697_s6 + $0x180] sm:$0xff] }
  0xf5   : > { %3063 = vmatmul.msk.bf16.gmra.mxu1 %vm279_vm0, %v832_v20  ;;  %v3619_v20 = vld [vmem:[%s4706_s1 + $0x58] sm:$0xff]  ;;  %2066 = vmatpush.bf16.msra.mxu0 %v3616_v6 }
  0xf6   : > { %4716 = vst [vmem:[#allocation6_spill] sm:$0xff] %v3991_v39  ;;  %3085 = vmatmul.msk.bf16.gmra.mxu2 %vm279_vm0, %v3989_v60  ;;  %2745 = vmatpush.bf16.msra.mxu3 %v3619_v20 }
  0xf7   : > { %3139 = vmatmul.msk.bf16.gmra.mxu3 %vm279_vm0, %v833_v30 }
  0xf9   : > { %v704_v22 = vpop.f32.mrf.mxu2  ;;  %v369_v51 = vpop.f32.mrf.mxu0 }
  0xfa   : > { %v766_v41 = vadd.f32 %v704_v22, %v511_v34  ;;  %v931_v49 = vpop.f32.mrf.mxu3  ;;  %v512_v52 = vpop.f32.mrf.mxu1  ;;  %v4019_v34 = vpack.c.bf16 %v253_v2, %v252_v42 }
  0xfb   : > { %v513_v59 = vadd.f32 %v512_v52, %v369_v51  ;;  %v834_v51 = vpack.c.bf16 %v3118_v38, %v3117_v25 }
  0xfc   : > { %v4008_v56 = vadd.f32 %v931_v49, %v766_v41  ;;  %v4021_v41 = vpack.c.bf16 %v591_v11, %v590_v13 }
  0xfe   : > { %4717 = vst [vmem:[#allocation7_spill] sm:$0xff] %v4008_v56 }
 0x101   : > { %v706_v6 = vpop.f32.mrf.mxu2  ;;  %v372_v39 = vpop.f32.mrf.mxu0 }
 0x102   : > { %v767_v22 = vadd.f32 %v706_v6, %v513_v59  ;;  %v933_v20 = vpop.f32.mrf.mxu3  ;;  %v515_v49 = vpop.f32.mrf.mxu1 }
 0x103   : > { %v516_v56 = vadd.f32 %v515_v49, %v372_v39 }
 0x104   : > { %v4023_v52 = vadd.f32 %v933_v20, %v767_v22  ;;  %3044 = vmatmul.msk.bf16.gmra.mxu0 %vm279_vm0, %v4019_v34 }
 0x105   : > { %3064 = vmatmul.msk.bf16.gmra.mxu1 %vm279_vm0, %v833_v30 }
 0x106   : > { %3086 = vmatmul.msk.bf16.gmra.mxu2 %vm279_vm0, %v4021_v41 }
 0x107   : > { %3140 = vmatmul.msk.bf16.gmra.mxu3 %vm279_vm0, %v834_v51 }
 0x109   : > { %v709_v59 = vpop.f32.mrf.mxu2  ;;  %v374_v2 = vpop.f32.mrf.mxu0 }
 0x10a   : > { %v768_v23 = vadd.f32 %v709_v59, %v516_v56  ;;  %v936_v42 = vpop.f32.mrf.mxu3  ;;  %v517_v13 = vpop.f32.mrf.mxu1 }
 0x10b   : > { %v518_v25 = vadd.f32 %v517_v13, %v374_v2 }
 0x10c   : > { %v4031_v11 = vadd.f32 %v936_v42, %v768_v23 }
 0x111   : > { %v711_v38 = vpop.f32.mrf.mxu2  ;;  %v377_v22 = vpop.f32.mrf.mxu0 }
 0x112   : > { %v769_v39 = vadd.f32 %v711_v38, %v518_v25  ;;  %v938_v6 = vpop.f32.mrf.mxu3  ;;  %v520_v20 = vpop.f32.mrf.mxu1 }
 0x113   : > { %v521_v30 = vadd.f32 %v520_v20, %v377_v22 }
 0x114   : > { %v4033_v49 = vadd.f32 %v938_v6, %v769_v39  ;;  %3179 = vmatmul.msk.bf16.vlgmr.msrb.gmra.mxu0 %vm279_vm0, %v3720_v26 }
 0x115   : > { %3233 = vmatmul.msk.bf16.vlgmr.msrb.gmra.mxu1 %vm279_vm0, %v3722_v27 }
 0x116   : > { %3321 = vmatmul.msk.bf16.vlgmr.msrb.gmra.mxu2 %vm279_vm0, %v3720_v26 }
 0x117   : > { %3341 = vmatmul.msk.bf16.vlgmr.msrb.gmra.mxu3 %vm279_vm0, %v3708_v19 }
 0x119   : > { %v714_v56 = vpop.f32.mrf.mxu2  ;;  %v379_v23 = vpop.f32.mrf.mxu0 }
 0x11a   : > { %v770_v51 = vadd.f32 %v714_v56, %v521_v30  ;;  %v941_v59 = vpop.f32.mrf.mxu3  ;;  %v522_v42 = vpop.f32.mrf.mxu1 }
 0x11b   : > { %v523_v13 = vadd.f32 %v522_v42, %v379_v23 }
 0x11c   : > { %v4043_v2 = vadd.f32 %v941_v59, %v770_v51 }
 0x121   : > { %v716_v25 = vpop.f32.mrf.mxu2  ;;  %v382_v6 = vpop.f32.mrf.mxu0 }
 0x122   : > { %v771_v38 = vadd.f32 %v716_v25, %v523_v13  ;;  %v943_v39 = vpop.f32.mrf.mxu3  ;;  %v525_v22 = vpop.f32.mrf.mxu1 }
 0x123   : > { %v526_v20 = vadd.f32 %v525_v22, %v382_v6 }
 0x124   : > { %v4045_v27 = vadd.f32 %v943_v39, %v771_v38  ;;  %3180 = vmatmul.msk.bf16.gmra.mxu0 %vm279_vm0, %v3740_v35 }
 0x125   : > { %3234 = vmatmul.msk.bf16.gmra.mxu1 %vm279_vm0, %v3742_v36 }
 0x126   : > { %3322 = vmatmul.msk.bf16.gmra.mxu2 %vm279_vm0, %v3740_v35 }
 0x127   : > { %3342 = vmatmul.msk.bf16.gmra.mxu3 %vm279_vm0, %v3724_v28 }
 0x129   : > { %v719_v19 = vpop.f32.mrf.mxu2  ;;  %v384_v56 = vpop.f32.mrf.mxu0 }
 0x12a   : > { %v772_v26 = vadd.f32 %v719_v19, %v526_v20  ;;  %v946_v30 = vpop.f32.mrf.mxu3  ;;  %v527_v51 = vpop.f32.mrf.mxu1 }
 0x12b   : > { %v528_v23 = vadd.f32 %v527_v51, %v384_v56 }
 0x12c   : > { %v4055_v59 = vadd.f32 %v946_v30, %v772_v26 }
 0x131   : > { %v721_v42 = vpop.f32.mrf.mxu2  ;;  %v387_v38 = vpop.f32.mrf.mxu0 }
 0x132   : > { %v773_v13 = vadd.f32 %v721_v42, %v528_v23  ;;  %v948_v25 = vpop.f32.mrf.mxu3  ;;  %v530_v39 = vpop.f32.mrf.mxu1 }
 0x133   : > { %v531_v6 = vadd.f32 %v530_v39, %v387_v38 }
 0x134   : > { %v4057_v36 = vadd.f32 %v948_v25, %v773_v13  ;;  %3181 = vmatmul.msk.bf16.gmra.mxu0 %vm279_vm0, %v3760_v44 }
 0x135   : > { %3235 = vmatmul.msk.bf16.gmra.mxu1 %vm279_vm0, %v3762_v45 }
 0x136   : > { %3323 = vmatmul.msk.bf16.gmra.mxu2 %vm279_vm0, %v3760_v44 }
 0x137   : > { %3343 = vmatmul.msk.bf16.gmra.mxu3 %vm279_vm0, %v3744_v37 }
 0x139   : > { %v724_v28 = vpop.f32.mrf.mxu2  ;;  %v389_v20 = vpop.f32.mrf.mxu0 }
 0x13a   : > { %v774_v35 = vadd.f32 %v724_v28, %v531_v6  ;;  %v951_v22 = vpop.f32.mrf.mxu3  ;;  %v532_v19 = vpop.f32.mrf.mxu1 }
 0x13b   : > { %v533_v30 = vadd.f32 %v532_v19, %v389_v20 }
 0x13c   : > { %v4067_v26 = vadd.f32 %v951_v22, %v774_v35 }
 0x141   : > { %v726_v56 = vpop.f32.mrf.mxu2  ;;  %v392_v42 = vpop.f32.mrf.mxu0 }
 0x142   : > { %v775_v51 = vadd.f32 %v726_v56, %v533_v30  ;;  %v953_v23 = vpop.f32.mrf.mxu3  ;;  %v535_v13 = vpop.f32.mrf.mxu1 }
 0x143   : > { %v536_v25 = vadd.f32 %v535_v13, %v392_v42 }
 0x144   : > { %v4069_v45 = vadd.f32 %v953_v23, %v775_v51  ;;  %3182 = vmatmul.msk.bf16.gmra.mxu0 %vm279_vm0, %v3780_v53 }
 0x145   : > { %3236 = vmatmul.msk.bf16.gmra.mxu1 %vm279_vm0, %v3782_v54 }
 0x146   : > { %3324 = vmatmul.msk.bf16.gmra.mxu2 %vm279_vm0, %v3780_v53 }
 0x147   : > { %3344 = vmatmul.msk.bf16.gmra.mxu3 %vm279_vm0, %v3764_v46 }
 0x149   : > { %v729_v37 = vpop.f32.mrf.mxu2  ;;  %v394_v39 = vpop.f32.mrf.mxu0 }
 0x14a   : > { %v776_v44 = vadd.f32 %v729_v37, %v536_v25  ;;  %v956_v38 = vpop.f32.mrf.mxu3  ;;  %v537_v6 = vpop.f32.mrf.mxu1 }
 0x14b   : > { %v538_v35 = vadd.f32 %v537_v6, %v394_v39 }
 0x14c   : > { %v4079_v28 = vadd.f32 %v956_v38, %v776_v44 }
 0x151   : > { %v731_v22 = vpop.f32.mrf.mxu2  ;;  %v397_v30 = vpop.f32.mrf.mxu0 }
 0x152   : > { %v777_v20 = vadd.f32 %v731_v22, %v538_v35  ;;  %v958_v19 = vpop.f32.mrf.mxu3  ;;  %v540_v56 = vpop.f32.mrf.mxu1 }
 0x153   : > { %v541_v51 = vadd.f32 %v540_v56, %v397_v30 }
 0x154   : > { %v4081_v54 = vadd.f32 %v958_v19, %v777_v20  ;;  %3183 = vmatmul.msk.bf16.gmra.mxu0 %vm279_vm0, %v3800_v62 }
 0x155   : > { %3237 = vmatmul.msk.bf16.gmra.mxu1 %vm279_vm0, %v3802_v63 }
 0x156   : > { %3325 = vmatmul.msk.bf16.gmra.mxu2 %vm279_vm0, %v3800_v62 }
 0x157   : > { %3345 = vmatmul.msk.bf16.gmra.mxu3 %vm279_vm0, %v3784_v55 }
 0x159   : > { %v734_v46 = vpop.f32.mrf.mxu2  ;;  %v399_v42 = vpop.f32.mrf.mxu0 }
 0x15a   : > { %v778_v53 = vadd.f32 %v734_v46, %v541_v51  ;;  %v961_v23 = vpop.f32.mrf.mxu3  ;;  %v542_v13 = vpop.f32.mrf.mxu1 }
 0x15b   : > { %v543_v37 = vadd.f32 %v542_v13, %v399_v42 }
 0x15c   : > { %v4091_v25 = vadd.f32 %v961_v23, %v778_v53 }
 0x161   : > { %v736_v44 = vpop.f32.mrf.mxu2  ;;  %v402_v6 = vpop.f32.mrf.mxu0 }
 0x162   : > { %v779_v38 = vadd.f32 %v736_v44, %v543_v37  ;;  %v963_v39 = vpop.f32.mrf.mxu3  ;;  %v545_v35 = vpop.f32.mrf.mxu1 }
 0x163   : > { %v546_v22 = vadd.f32 %v545_v35, %v402_v6 }
 0x164   : > { %v4093_v63 = vadd.f32 %v963_v39, %v779_v38  ;;  %3184 = vmatmul.msk.bf16.gmra.mxu0 %vm279_vm0, %v3820_v7 }
 0x165   : > { %3238 = vmatmul.msk.bf16.gmra.mxu1 %vm279_vm0, %v3822_v8 }
 0x166   : > { %3326 = vmatmul.msk.bf16.gmra.mxu2 %vm279_vm0, %v3820_v7 }
 0x167   : > { %3346 = vmatmul.msk.bf16.gmra.mxu3 %vm279_vm0, %v3804_v0 }
 0x169   : > { %v739_v55 = vpop.f32.mrf.mxu2  ;;  %v404_v19 = vpop.f32.mrf.mxu0 }
 0x16a   : > { %v780_v62 = vadd.f32 %v739_v55, %v546_v22  ;;  %v966_v20 = vpop.f32.mrf.mxu3  ;;  %v547_v30 = vpop.f32.mrf.mxu1 }
 0x16b   : > { %v548_v51 = vadd.f32 %v547_v30, %v404_v19 }
 0x16c   : > { %v4103_v56 = vadd.f32 %v966_v20, %v780_v62 }
 0x171   : > { %v741_v46 = vpop.f32.mrf.mxu2  ;;  %v407_v42 = vpop.f32.mrf.mxu0 }
 0x172   : > { %v781_v53 = vadd.f32 %v741_v46, %v548_v51  ;;  %v968_v23 = vpop.f32.mrf.mxu3  ;;  %v550_v13 = vpop.f32.mrf.mxu1 }
 0x173   : > { %v551_v37 = vadd.f32 %v550_v13, %v407_v42 }
 0x174   : > { %v4105_v8 = vadd.f32 %v968_v23, %v781_v53  ;;  %3185 = vmatmul.msk.bf16.gmra.mxu0 %vm279_vm0, %v3840_v16 }
 0x175   : > { %3239 = vmatmul.msk.bf16.gmra.mxu1 %vm279_vm0, %v3842_v17 }
 0x176   : > { %3327 = vmatmul.msk.bf16.gmra.mxu2 %vm279_vm0, %v3840_v16 }
 0x177   : > { %3347 = vmatmul.msk.bf16.gmra.mxu3 %vm279_vm0, %v3824_v9 }
 0x179   : > { %v744_v0 = vpop.f32.mrf.mxu2  ;;  %v409_v38 = vpop.f32.mrf.mxu0 }
 0x17a   : > { %v782_v7 = vadd.f32 %v744_v0, %v551_v37  ;;  %v971_v44 = vpop.f32.mrf.mxu3  ;;  %v552_v39 = vpop.f32.mrf.mxu1 }
 0x17b   : > { %v553_v35 = vadd.f32 %v552_v39, %v409_v38 }
 0x17c   : > { %v4115_v6 = vadd.f32 %v971_v44, %v782_v7 }
 0x181   : > { %v746_v22 = vpop.f32.mrf.mxu2  ;;  %v412_v20 = vpop.f32.mrf.mxu0 }
 0x182   : > { %v783_v55 = vadd.f32 %v746_v22, %v553_v35  ;;  %v973_v62 = vpop.f32.mrf.mxu3  ;;  %v555_v19 = vpop.f32.mrf.mxu1 }
 0x183   : > { %v556_v30 = vadd.f32 %v555_v19, %v412_v20 }
 0x184   : > { %v4117_v17 = vadd.f32 %v973_v62, %v783_v55  ;;  %3186 = vmatmul.msk.bf16.gmra.mxu0 %vm279_vm0, %v3860_v29 }
 0x185   : > { %3240 = vmatmul.msk.bf16.gmra.mxu1 %vm279_vm0, %v3862_v31 }
 0x186   : > { %3328 = vmatmul.msk.bf16.gmra.mxu2 %vm279_vm0, %v3860_v29 }
 0x187   : > { %3348 = vmatmul.msk.bf16.gmra.mxu3 %vm279_vm0, %v3844_v18  ;;  %v4133_v18 = vld [vmem:[%s4707_s2] ss:$0 sm:$0xff] }
 0x189   : > { %v749_v9 = vpop.f32.mrf.mxu2  ;;  %v414_v46 = vpop.f32.mrf.mxu0 }
 0x18a   : > { %v784_v16 = vadd.f32 %v749_v9, %v556_v30  ;;  %v976_v51 = vpop.f32.mrf.mxu3  ;;  %v557_v53 = vpop.f32.mrf.mxu1 }
 0x18b   : > { %v558_v42 = vadd.f32 %v557_v53, %v414_v46 }
 0x18c   : > { %v4127_v23 = vadd.f32 %v976_v51, %v784_v16 }
 0x191   : > { %v751_v13 = vpop.f32.mrf.mxu2  ;;  %v1127_v7 = vpop.f32.mrf.mxu0 }
 0x192   : > { %v785_v37 = vadd.f32 %v751_v13, %v558_v42  ;;  %v978_v0 = vpop.f32.mrf.mxu3  ;;  %v1207_v31 = vadd.f32 %v1127_v7, %v3874_v43  ;;  %v1353_v44 = vpop.f32.mrf.mxu1 }
 0x194   : > { %v4135_v29 = vadd.f32 %v978_v0, %v785_v37  ;;  %v1433_v38 = vadd.f32 %v1353_v44, %v1207_v31  ;;  %3187 = vmatmul.msk.bf16.gmra.mxu0 %vm279_vm0, %v3882_v58 }
 0x195   : > { %3241 = vmatmul.msk.bf16.gmra.mxu1 %vm279_vm0, %v3884_v1 }
 0x196   : > { %3329 = vmatmul.msk.bf16.gmra.mxu2 %vm279_vm0, %v3882_v58  ;;  %v1469_v43 = vadd.f32 %v4133_v18, %v1433_v38  ;;  %v3269_v38 = vld [vmem:[%s3697_s6 + $0x108] sm:$0xff] }
 0x197   : > { %3349 = vmatmul.msk.bf16.gmra.mxu3 %vm279_vm0, %v3864_v33 }
 0x198   : > { %v1501_v39 = vmax.f32 %v1469_v43, 0.0  ;;  %v3270_v43 = vld [vmem:[%s3697_s6 + $0x110] sm:$0xff] }
 0x199   : > { %v1731_v35 = vpop.f32.mrf.mxu2  ;;  %v1129_v1 = vpop.f32.mrf.mxu0 }
 0x19a   : > { %v1874_v22 = vpop.f32.mrf.mxu3  ;;  %1534 = vst.msk [vmem:[%s4150_s22] sm:$0xff] %vm1533_vm1, %v1501_v39  ;;  %v1208_v55 = vadd.f32 %v1129_v1, %v3888_v4  ;;  %v1355_v62 = vpop.f32.mrf.mxu1 }
 0x19b   : > { %v4154_v58 = vadd.f32 %v1874_v22, %v1731_v35 }
 0x19c   : > { %v1434_v33 = vadd.f32 %v1355_v62, %v1208_v55 }
 0x19e   : > { %v1470_v20 = vadd.f32 %v4133_v18, %v1434_v33  ;;  %v1608_v33 = vpack.c.bf16 %v3270_v43, %v3269_v38 }
 0x1a0   : > { %v1502_v19 = vmax.f32 %v1470_v20, 0.0 }
 0x1a1   : > { %v1733_v30 = vpop.f32.mrf.mxu2  ;;  %v1132_v16 = vpop.f32.mrf.mxu0 }
 0x1a2   : > { %v1876_v9 = vpop.f32.mrf.mxu3  ;;  %1535 = vst.msk [vmem:[%s4150_s22 + $0x8] sm:$0xff] %vm1533_vm1, %v1502_v19  ;;  %v1209_v46 = vadd.f32 %v1132_v16, %v3898_v14  ;;  %v1358_v53 = vpop.f32.mrf.mxu1 }
 0x1a3   : > { %v4160_v51 = vadd.f32 %v1876_v9, %v1733_v30 }
 0x1a4   : > { %v1435_v42 = vadd.f32 %v1358_v53, %v1209_v46  ;;  %3188 = vmatmul.msk.bf16.gmra.mxu0 %vm279_vm0, %v3906_v32 }
 0x1a5   : > { %3242 = vmatmul.msk.bf16.gmra.mxu1 %vm279_vm0, %v3908_v40 }
 0x1a6   : > { %3330 = vmatmul.msk.bf16.gmra.mxu2 %vm279_vm0, %v3906_v32  ;;  %v1471_v4 = vadd.f32 %v4133_v18, %v1435_v42 }
 0x1a7   : > { %3350 = vmatmul.msk.bf16.gmra.mxu3 %vm279_vm0, %v3886_v3 }
 0x1a8   : > { %v1503_v13 = vmax.f32 %v1471_v4, 0.0  ;;  %v3272_v4 = vld [vmem:[%s3697_s6 + $0x128] sm:$0xff] }
 0x1a9   : > { %v1736_v14 = vpop.f32.mrf.mxu2  ;;  %v1134_v0 = vpop.f32.mrf.mxu0 }
 0x1aa   : > { %v1879_v37 = vpop.f32.mrf.mxu3  ;;  %1536 = vst.msk [vmem:[%s4150_s22 + $0x20] sm:$0xff] %vm1533_vm1, %v1503_v13  ;;  %v1210_v31 = vadd.f32 %v1134_v0, %v3910_v47  ;;  %v1360_v40 = vpop.f32.mrf.mxu1 }
 0x1ab   : > { %v4174_v7 = vadd.f32 %v1879_v37, %v1736_v14 }
 0x1ac   : > { %v1436_v44 = vadd.f32 %v1360_v40, %v1210_v31 }
 0x1ae   : > { %v1472_v32 = vadd.f32 %v4133_v18, %v1436_v44 }
 0x1b0   : > { %v1504_v39 = vmax.f32 %v1472_v32, 0.0 }
 0x1b1   : > { %v1738_v35 = vpop.f32.mrf.mxu2  ;;  %v1137_v22 = vpop.f32.mrf.mxu0 }
 0x1b2   : > { %v1881_v3 = vpop.f32.mrf.mxu3  ;;  %1537 = vst.msk [vmem:[%s4150_s22 + $0x28] sm:$0xff] %vm1533_vm1, %v1504_v39  ;;  %v1211_v55 = vadd.f32 %v1137_v22, %v3919_v57  ;;  %v1363_v62 = vpop.f32.mrf.mxu1 }
 0x1b3   : > { %v4182_v1 = vadd.f32 %v1881_v3, %v1738_v35 }
 0x1b4   : > { %v1437_v47 = vadd.f32 %v1363_v62, %v1211_v55  ;;  %3189 = vmatmul.msk.bf16.gmra.mxu0 %vm279_vm0, %v3927_v12 }
 0x1b5   : > { %3243 = vmatmul.msk.bf16.gmra.mxu1 %vm279_vm0, %v3929_v21 }
 0x1b6   : > { %3331 = vmatmul.msk.bf16.gmra.mxu2 %vm279_vm0, %v3927_v12  ;;  %v1473_v20 = vadd.f32 %v4133_v18, %v1437_v47  ;;  %v3271_v12 = vld [vmem:[%s3697_s6 + $0x120] sm:$0xff] }
 0x1b7   : > { %3351 = vmatmul.msk.bf16.gmra.mxu3 %vm279_vm0, %v1608_v33  ;;  %v1609_v32 = vpack.c.bf16 %v3272_v4, %v3271_v12  ;;  %v3274_v33 = vld [vmem:[%s3697_s6 + $0x140] sm:$0xff]  ;;  %v4720_v12 = vld [vmem:[#allocation4_spill] sm:$0xff] }
 0x1b8   : > { %v1505_v19 = vmax.f32 %v1473_v20, 0.0 }
 0x1b9   : > { %v1741_v57 = vpop.f32.mrf.mxu2  ;;  %v1139_v9 = vpop.f32.mrf.mxu0 }
 0x1ba   : > { %v1884_v30 = vpop.f32.mrf.mxu3  ;;  %1538 = vst.msk [vmem:[%s4150_s22 + $0x40] sm:$0xff] %vm1533_vm1, %v1505_v19  ;;  %v1212_v46 = vadd.f32 %v1139_v9, %v3931_v24  ;;  %v1365_v53 = vpop.f32.mrf.mxu1  ;;  %v4718_v9 = vld [vmem:[#allocation2_spill] sm:$0xff] }
 0x1bb   : > { %v4195_v16 = vadd.f32 %v1884_v30, %v1741_v57 }
 0x1bc   : > { %v1438_v21 = vadd.f32 %v1365_v53, %v1212_v46 }
 0x1be   : > { %v1474_v42 = vadd.f32 %v4133_v18, %v1438_v21 }
 0x1c0   : > { %v1506_v13 = vmax.f32 %v1474_v42, 0.0  ;;  %v4719_v42 = vld [vmem:[#allocation3_spill] sm:$0xff] }
 0x1c1   : > { %v1743_v14 = vpop.f32.mrf.mxu2  ;;  %v1142_v0 = vpop.f32.mrf.mxu0 }
 0x1c2   : > { %v1886_v37 = vpop.f32.mrf.mxu3  ;;  %1539 = vst.msk [vmem:[%s4150_s22 + $0x48] sm:$0xff] %vm1533_vm1, %v1506_v13  ;;  %v1213_v40 = vadd.f32 %v1142_v0, %v3939_v48  ;;  %v1368_v44 = vpop.f32.mrf.mxu1 }
 0x1c3   : > { %v4203_v31 = vadd.f32 %v1886_v37, %v1743_v14 }
 0x1c4   : > { %v1439_v24 = vadd.f32 %v1368_v44, %v1213_v40  ;;  %3190 = vmatmul.msk.bf16.gmra.mxu0 %vm279_vm0, %v3947_v61  ;;  %v4721_v44 = vld [vmem:[#allocation5_spill] sm:$0xff] }
 0x1c5   : > { %3244 = vmatmul.msk.bf16.gmra.mxu1 %vm279_vm0, %v3949_v10 }
 0x1c6   : > { %3332 = vmatmul.msk.bf16.gmra.mxu2 %vm279_vm0, %v3947_v61  ;;  %v1475_v38 = vadd.f32 %v4133_v18, %v1439_v24  ;;  %v3273_v61 = vld [vmem:[%s3697_s6 + $0x138] sm:$0xff] }
 0x1c7   : > { %3352 = vmatmul.msk.bf16.gmra.mxu3 %vm279_vm0, %v1609_v32  ;;  %v1610_v21 = vpack.c.bf16 %v3274_v33, %v3273_v61 }
 0x1c8   : > { %v1507_v43 = vmax.f32 %v1475_v38, 0.0 }
 0x1c9   : > { %v1746_v48 = vpop.f32.mrf.mxu2  ;;  %v1144_v35 = vpop.f32.mrf.mxu0 }
 0x1ca   : > { %v1889_v39 = vpop.f32.mrf.mxu3  ;;  %1540 = vst.msk [vmem:[%s4150_s22 + $0x60] sm:$0xff] %vm1533_vm1, %v1507_v43  ;;  %v1214_v22 = vadd.f32 %v1144_v35, %v3951_v15  ;;  %v1370_v55 = vpop.f32.mrf.mxu1  ;;  %v3275_v35 = vld [vmem:[%s3697_s6 + $0x150] sm:$0xff] }
 0x1cb   : > { %v4216_v3 = vadd.f32 %v1889_v39, %v1746_v48  ;;  %v3309_v48 = vld [vmem:[%s3697_s6 + $0x151] sm:$0xff]  ;;  %v3310_v39 = vld [vmem:[%s3697_s6 + $0x159] sm:$0xff] }
 0x1cc   : > { %v1440_v10 = vadd.f32 %v1370_v55, %v1214_v22  ;;  %v3276_v22 = vld [vmem:[%s3697_s6 + $0x158] sm:$0xff]  ;;  %v1662_v33 = vpack.c.bf16 %v3310_v39, %v3309_v48 }
 0x1ce   : > { %v1476_v62 = vadd.f32 %v4133_v18, %v1440_v10 }
 0x1d0   : > { %v1508_v47 = vmax.f32 %v1476_v62, 0.0 }
 0x1d1   : > { %v1748_v20 = vpop.f32.mrf.mxu2  ;;  %v1147_v57 = vpop.f32.mrf.mxu0 }
 0x1d2   : > { %v1891_v19 = vpop.f32.mrf.mxu3  ;;  %1541 = vst.msk [vmem:[%s4150_s22 + $0x68] sm:$0xff] %vm1533_vm1, %v1508_v47  ;;  %v1215_v46 = vadd.f32 %v1147_v57, %v4718_v9  ;;  %v1373_v53 = vpop.f32.mrf.mxu1  ;;  %v1611_v57 = vpack.c.bf16 %v3276_v22, %v3275_v35  ;;  %v4723_v35 = vld [vmem:[#allocation7_spill] sm:$0xff] }
 0x1d3   : > { %v4224_v30 = vadd.f32 %v1891_v19, %v1748_v20 }
 0x1d4   : > { %v1441_v15 = vadd.f32 %v1373_v53, %v1215_v46  ;;  %3191 = vmatmul.msk.bf16.gmra.mxu0 %vm279_vm0, %v4719_v42 }
 0x1d5   : > { %3245 = vmatmul.msk.bf16.gmra.mxu1 %vm279_vm0, %v4720_v12 }
 0x1d6   : > { %3333 = vmatmul.msk.bf16.gmra.mxu2 %vm279_vm0, %v4719_v42  ;;  %v1477_v4 = vadd.f32 %v4133_v18, %v1441_v15  ;;  %v4722_v42 = vld [vmem:[#allocation6_spill] sm:$0xff] }
 0x1d7   : > { %3353 = vmatmul.msk.bf16.gmra.mxu3 %vm279_vm0, %v1610_v21 }
 0x1d8   : > { %v1509_v13 = vmax.f32 %v1477_v4, 0.0 }
 0x1d9   : > { %v1751_v14 = vpop.f32.mrf.mxu2  ;;  %v1149_v0 = vpop.f32.mrf.mxu0 }
 0x1da   : > { %v1894_v37 = vpop.f32.mrf.mxu3  ;;  %1542 = vst.msk [vmem:[%s4150_s22 + $0x80] sm:$0xff] %vm1533_vm1, %v1509_v13  ;;  %v1216_v32 = vadd.f32 %v1149_v0, %v4721_v44  ;;  %v1375_v24 = vpop.f32.mrf.mxu1  ;;  %v3277_v0 = vld [vmem:[%s3697_s6 + $0x168] sm:$0xff]  ;;  %v3278_v44 = vld [vmem:[%s3697_s6 + $0x170] sm:$0xff] }
 0x1db   : > { %v4237_v40 = vadd.f32 %v1894_v37, %v1751_v14  ;;  %v3311_v14 = vld [vmem:[%s3697_s6 + $0x169] sm:$0xff]  ;;  %v3312_v37 = vld [vmem:[%s3697_s6 + $0x171] sm:$0xff] }
 0x1dc   : > { %v1442_v38 = vadd.f32 %v1375_v24, %v1216_v32  ;;  %v1663_v48 = vpack.c.bf16 %v3312_v37, %v3311_v14 }
 0x1de   : > { %v1478_v43 = vadd.f32 %v4133_v18, %v1442_v38 }
 0x1e0   : > { %v1510_v55 = vmax.f32 %v1478_v43, 0.0 }
 0x1e1   : > { %v1753_v10 = vpop.f32.mrf.mxu2  ;;  %v1152_v61 = vpop.f32.mrf.mxu0 }
 0x1e2   : > { %v1896_v62 = vpop.f32.mrf.mxu3  ;;  %1543 = vst.msk [vmem:[%s4150_s22 + $0x88] sm:$0xff] %vm1533_vm1, %v1510_v55  ;;  %v1217_v20 = vadd.f32 %v1152_v61, %v3979_v50  ;;  %v1378_v19 = vpop.f32.mrf.mxu1 }
 0x1e3   : > { %v4247_v47 = vadd.f32 %v1896_v62, %v1753_v10  ;;  %v1612_v10 = vpack.c.bf16 %v3278_v44, %v3277_v0 }
 0x1e4   : > { %v1443_v9 = vadd.f32 %v1378_v19, %v1217_v20  ;;  %3192 = vmatmul.msk.bf16.gmra.mxu0 %vm279_vm0, %v3987_v5 }
 0x1e5   : > { %3246 = vmatmul.msk.bf16.gmra.mxu1 %vm279_vm0, %v3989_v60 }
 0x1e6   : > { %3334 = vmatmul.msk.bf16.gmra.mxu2 %vm279_vm0, %v1662_v33  ;;  %v1479_v46 = vadd.f32 %v4133_v18, %v1443_v9 }
 0x1e7   : > { %3354 = vmatmul.msk.bf16.gmra.mxu3 %vm279_vm0, %v1611_v57 }
 0x1e8   : > { %v1511_v50 = vmax.f32 %v1479_v46, 0.0 }
 0x1e9   : > { %v1756_v53 = vpop.f32.mrf.mxu2  ;;  %v1154_v15 = vpop.f32.mrf.mxu0 }
 0x1ea   : > { %v1899_v21 = vpop.f32.mrf.mxu3  ;;  %1544 = vst.msk [vmem:[%s4150_s22 + $0xa0] sm:$0xff] %vm1533_vm1, %v1511_v50  ;;  %v1218_v12 = vadd.f32 %v1154_v15, %v4722_v42  ;;  %v1380_v60 = vpop.f32.mrf.mxu1  ;;  %v3171_v50 = vld [vmem:[%s3697_s6 + $0x181] sm:$0xff]  ;;  %v3226_v42 = vld [vmem:[%s3697_s6 + $0x18a] sm:$0xff] }
 0x1eb   : > { %v4259_v5 = vadd.f32 %v1899_v21, %v1756_v53  ;;  %v3172_v53 = vld [vmem:[%s3697_s6 + $0x189] sm:$0xff] }
 0x1ec   : > { %v1444_v4 = vadd.f32 %v1380_v60, %v1218_v12  ;;  %v3225_v15 = vld [vmem:[%s3697_s6 + $0x182] sm:$0xff]  ;;  %v1060_v14 = vpack.c.bf16 %v3172_v53, %v3171_v50  ;;  %v3466_v50 = vld [vmem:[%s3697_s6 + $0x39] sm:$0xff] }
 0x1ed   : > { %v3279_v12 = vld [vmem:[%s3697_s6 + $0x180] sm:$0xff]  ;;  %v3280_v60 = vld [vmem:[%s3697_s6 + $0x188] sm:$0xff]  ;;  %v1286_v44 = vpack.c.bf16 %v3226_v42, %v3225_v15  ;;  %v3519_v53 = vld [vmem:[%s3697_s6 + $0x32] sm:$0xff] }
 0x1ee   : > { %v1480_v13 = vadd.f32 %v4133_v18, %v1444_v4 }
 0x1f0   : > { %v1512_v32 = vmax.f32 %v1480_v13, 0.0 }
 0x1f1   : > { %v1758_v24 = vpop.f32.mrf.mxu2  ;;  %v1157_v43 = vpop.f32.mrf.mxu0 }
 0x1f2   : > { %v1901_v38 = vpop.f32.mrf.mxu3  ;;  %1545 = vst.msk [vmem:[%s4150_s22 + $0xa8] sm:$0xff] %vm1533_vm1, %v1512_v32  ;;  %v1219_v22 = vadd.f32 %v1157_v43, %v4723_v35  ;;  %v1383_v55 = vpop.f32.mrf.mxu1 }
 0x1f3   : > { %v4269_v39 = vadd.f32 %v1901_v38, %v1758_v24  ;;  %v1613_v38 = vpack.c.bf16 %v3280_v60, %v3279_v12 }
 0x1f4   : > { %v1445_v62 = vadd.f32 %v1383_v55, %v1219_v22  ;;  %3193 = vmatmul.msk.bf16.gmra.mxu0 %vm279_vm0, %v4019_v34 }
 0x1f5   : > { %3247 = vmatmul.msk.bf16.gmra.mxu1 %vm279_vm0, %v4021_v41 }
 0x1f6   : > { %3335 = vmatmul.msk.bf16.gmra.mxu2 %vm279_vm0, %v1663_v48  ;;  %v1481_v61 = vadd.f32 %v4133_v18, %v1445_v62 }
 0x1f7   : > { %3355 = vmatmul.msk.bf16.gmra.mxu3 %vm279_vm0, %v1612_v10 }
 0x1f8   : > { %v1513_v33 = vmax.f32 %v1481_v61, 0.0 }
 0x1f9   : > { %v1761_v20 = vpop.f32.mrf.mxu2  ;;  %v1159_v57 = vpop.f32.mrf.mxu0 }
 0x1fa   : > { %v1904_v19 = vpop.f32.mrf.mxu3  ;;  %1546 = vst.msk [vmem:[%s4150_s22 + $0xc0] sm:$0xff] %vm1533_vm1, %v1513_v33  ;;  %v1220_v41 = vadd.f32 %v1159_v57, %v4023_v52  ;;  %v1385_v9 = vpop.f32.mrf.mxu1  ;;  %v3411_v57 = vld [vmem:[%s3697_s6 + $0x30] sm:$0xff] }
 0x1fb   : > { %v4281_v34 = vadd.f32 %v1904_v19, %v1761_v20  ;;  %v3357_v20 = vld [vmem:[%s3697_s6 + $0x1a] sm:$0xff]  ;;  %v3358_v19 = vld [vmem:[%s3697_s6 + $0x22] sm:$0xff] }
 0x1fc   : > { %v1446_v46 = vadd.f32 %v1385_v9, %v1220_v41  ;;  %v3412_v9 = vld [vmem:[%s3697_s6 + $0x38] sm:$0xff]  ;;  %v1986_v12 = vpack.c.bf16 %v3358_v19, %v3357_v20  ;;  %v3467_v20 = vld [vmem:[%s3697_s6 + $0x49] sm:$0xff] }
 0x1fd   : > { %v3468_v19 = vld [vmem:[%s3697_s6 + $0x51] sm:$0xff] }
 0x1fe   : > { %v1482_v21 = vadd.f32 %v4133_v18, %v1446_v46  ;;  %v3465_v46 = vld [vmem:[%s3697_s6 + $0x31] sm:$0xff] }
 0x200   : > { %v1514_v4 = vmax.f32 %v1482_v21, 0.0  ;;  %v3520_v21 = vld [vmem:[%s3697_s6 + $0x3a] sm:$0xff] }
 0x201   : > { %v1763_v13 = vpop.f32.mrf.mxu2  ;;  %v1162_v0 = vpop.f32.mrf.mxu0 }
 0x202   : > { %v1906_v37 = vpop.f32.mrf.mxu3  ;;  %1547 = vst.msk [vmem:[%s4150_s22 + $0xc8] sm:$0xff] %vm1533_vm1, %v1514_v4  ;;  %v1221_v32 = vadd.f32 %v1162_v0, %v4031_v11  ;;  %v1388_v24 = vpop.f32.mrf.mxu1 }
 0x203   : > { %v4293_v52 = vadd.f32 %v1906_v37, %v1763_v13  ;;  %v2213_v13 = vpack.c.bf16 %v3412_v9, %v3411_v57  ;;  %v3521_v57 = vld [vmem:[%s3697_s6 + $0x4a] sm:$0xff] }
 0x204   : > { %v1447_v43 = vadd.f32 %v1388_v24, %v1221_v32  ;;  %3194 = vmatmul.msk.bf16.gmra.mxu0 %vm279_vm0, %v1060_v14 }
 0x205   : > { %3248 = vmatmul.msk.bf16.gmra.mxu1 %vm279_vm0, %v1286_v44  ;;  %v2665_v44 = vpack.c.bf16 %v3520_v21, %v3519_v53 }
 0x206   : > { %3336 = vmatmul.msk.bf16.gmra.mxu2 %vm279_vm0, %v1060_v14  ;;  %v1483_v48 = vadd.f32 %v4133_v18, %v1447_v43 }
 0x207   : > { %3356 = vmatmul.msk.bf16.gmra.mxu3 %vm279_vm0, %v1613_v38 }
 0x208   : > { %v1515_v11 = vmax.f32 %v1483_v48, 0.0 }
 0x209   : > { %v1766_v35 = vpop.f32.mrf.mxu2  ;;  %v1164_v55 = vpop.f32.mrf.mxu0 }
 0x20a   : > { %v1909_v22 = vpop.f32.mrf.mxu3  ;;  %1548 = vst.msk [vmem:[%s4150_s22 + $0xe0] sm:$0xff] %vm1533_vm1, %v1515_v11  ;;  %v1222_v62 = vadd.f32 %v1164_v55, %v4033_v49  ;;  %v1390_v61 = vpop.f32.mrf.mxu1  ;;  %v2439_v49 = vpack.c.bf16 %v3466_v50, %v3465_v46 }
 0x20b   : > { %v4303_v10 = vadd.f32 %v1909_v22, %v1766_v35 }
 0x20c   : > { %v1448_v33 = vadd.f32 %v1390_v61, %v1222_v62  ;;  %v3413_v62 = vld [vmem:[%s3697_s6 + $0x48] sm:$0xff] }
 0x20e   : > { %v1484_v41 = vadd.f32 %v4133_v18, %v1448_v33  ;;  %v3414_v33 = vld [vmem:[%s3697_s6 + $0x50] sm:$0xff] }
 0x20f   : > { %v2214_v21 = vpack.c.bf16 %v3414_v33, %v3413_v62  ;;  %v3524_v62 = vld [vmem:[%s3697_s6 + $0x6a] sm:$0xff] }
 0x210   : > { %v1516_v15 = vmax.f32 %v1484_v41, 0.0  ;;  %v3522_v41 = vld [vmem:[%s3697_s6 + $0x52] sm:$0xff] }
 0x211   : > { %v1768_v42 = vpop.f32.mrf.mxu2  ;;  %v1167_v4 = vpop.f32.mrf.mxu0 }
 0x212   : > { %v1911_v60 = vpop.f32.mrf.mxu3  ;;  %1549 = vst.msk [vmem:[%s4150_s22 + $0xe8] sm:$0xff] %vm1533_vm1, %v1516_v15  ;;  %v1223_v37 = vadd.f32 %v1167_v4, %v4043_v2  ;;  %v1393_v0 = vpop.f32.mrf.mxu1  ;;  %v2440_v15 = vpack.c.bf16 %v3468_v19, %v3467_v20 }
 0x213   : > { %v4317_v14 = vadd.f32 %v1911_v60, %v1768_v42  ;;  %v2666_v60 = vpack.c.bf16 %v3522_v41, %v3521_v57 }
 0x214   : > { %v1449_v32 = vadd.f32 %v1393_v0, %v1223_v37  ;;  %3395 = vmatmul.msk.bf16.vlgmr.msra.gmra.mxu0 %vm279_vm0, %v1986_v12 }
 0x215   : > { %3449 = vmatmul.msk.bf16.vlgmr.msra.gmra.mxu1 %vm279_vm0, %v2213_v13 }
 0x216   : > { %3503 = vmatmul.msk.bf16.vlgmr.msra.gmra.mxu2 %vm279_vm0, %v2439_v49  ;;  %v1485_v24 = vadd.f32 %v4133_v18, %v1449_v32 }
 0x217   : > { %3557 = vmatmul.msk.bf16.vlgmr.msra.gmra.mxu3 %vm279_vm0, %v2665_v44 }
 0x218   : > { %v1517_v2 = vmax.f32 %v1485_v24, 0.0 }
 0x219   : > { %v1771_v38 = vpop.f32.mrf.mxu2  ;;  %v1169_v48 = vpop.f32.mrf.mxu0 }
 0x21a   : > { %v1914_v43 = vpop.f32.mrf.mxu3  ;;  %1550 = vst.msk [vmem:[%s4150_s22 + $0x100] sm:$0xff] %vm1533_vm1, %v1517_v2  ;;  %v1224_v35 = vadd.f32 %v1169_v48, %v4045_v27  ;;  %v1395_v22 = vpop.f32.mrf.mxu1  ;;  %v3416_v48 = vld [vmem:[%s3697_s6 + $0x68] sm:$0xff] }
 0x21b   : > { %v4327_v11 = vadd.f32 %v1914_v43, %v1771_v38  ;;  %v3415_v38 = vld [vmem:[%s3697_s6 + $0x60] sm:$0xff] }
 0x21c   : > { %v1450_v55 = vadd.f32 %v1395_v22, %v1224_v35  ;;  %v3469_v35 = vld [vmem:[%s3697_s6 + $0x61] sm:$0xff]  ;;  %v3470_v22 = vld [vmem:[%s3697_s6 + $0x69] sm:$0xff]  ;;  %v2215_v57 = vpack.c.bf16 %v3416_v48, %v3415_v38 }
 0x21d   : > { %v2441_v41 = vpack.c.bf16 %v3470_v22, %v3469_v35  ;;  %v3526_v38 = vld [vmem:[%s3697_s6 + $0x82] sm:$0xff] }
 0x21e   : > { %v1486_v61 = vadd.f32 %v4133_v18, %v1450_v55  ;;  %v3523_v55 = vld [vmem:[%s3697_s6 + $0x62] sm:$0xff] }
 0x220   : > { %v1518_v9 = vmax.f32 %v1486_v61, 0.0 }
 0x221   : > { %v1773_v46 = vpop.f32.mrf.mxu2  ;;  %v1172_v53 = vpop.f32.mrf.mxu0 }
 0x222   : > { %v1916_v50 = vpop.f32.mrf.mxu3  ;;  %1551 = vst.msk [vmem:[%s4150_s22 + $0x108] sm:$0xff] %vm1533_vm1, %v1518_v9  ;;  %v1225_v42 = vadd.f32 %v1172_v53, %v4055_v59  ;;  %v1398_v12 = vpop.f32.mrf.mxu1 }
 0x223   : > { %v4339_v27 = vadd.f32 %v1916_v50, %v1773_v46  ;;  %v2667_v50 = vpack.c.bf16 %v3524_v62, %v3523_v55 }
 0x224   : > { %v1451_v4 = vadd.f32 %v1398_v12, %v1225_v42  ;;  %3396 = vmatmul.msk.bf16.gmra.mxu0 %vm279_vm0, %v2665_v44 }
 0x225   : > { %3450 = vmatmul.msk.bf16.gmra.mxu1 %vm279_vm0, %v2214_v21 }
 0x226   : > { %3504 = vmatmul.msk.bf16.gmra.mxu2 %vm279_vm0, %v2440_v15  ;;  %v1487_v13 = vadd.f32 %v4133_v18, %v1451_v4 }
 0x227   : > { %3558 = vmatmul.msk.bf16.gmra.mxu3 %vm279_vm0, %v2666_v60 }
 0x228   : > { %v1519_v59 = vmax.f32 %v1487_v13, 0.0 }
 0x229   : > { %v1776_v49 = vpop.f32.mrf.mxu2  ;;  %v1174_v0 = vpop.f32.mrf.mxu0 }
 0x22a   : > { %v1919_v37 = vpop.f32.mrf.mxu3  ;;  %1552 = vst.msk [vmem:[%s4150_s22 + $0x120] sm:$0xff] %vm1533_vm1, %v1519_v59  ;;  %v1226_v32 = vadd.f32 %v1174_v0, %v4057_v36  ;;  %v1400_v24 = vpop.f32.mrf.mxu1  ;;  %v3418_v0 = vld [vmem:[%s3697_s6 + $0x80] sm:$0xff] }
 0x22b   : > { %v4349_v44 = vadd.f32 %v1919_v37, %v1776_v49  ;;  %v3417_v49 = vld [vmem:[%s3697_s6 + $0x78] sm:$0xff] }
 0x22c   : > { %v1452_v2 = vadd.f32 %v1400_v24, %v1226_v32  ;;  %v3471_v32 = vld [vmem:[%s3697_s6 + $0x79] sm:$0xff]  ;;  %v3472_v24 = vld [vmem:[%s3697_s6 + $0x81] sm:$0xff]  ;;  %v2216_v55 = vpack.c.bf16 %v3418_v0, %v3417_v49 }
 0x22d   : > { %v2442_v62 = vpack.c.bf16 %v3472_v24, %v3471_v32  ;;  %v3528_v49 = vld [vmem:[%s3697_s6 + $0x9a] sm:$0xff] }
 0x22e   : > { %v1488_v43 = vadd.f32 %v4133_v18, %v1452_v2  ;;  %v3525_v2 = vld [vmem:[%s3697_s6 + $0x7a] sm:$0xff] }
 0x230   : > { %v1520_v61 = vmax.f32 %v1488_v43, 0.0 }
 0x231   : > { %v1778_v33 = vpop.f32.mrf.mxu2  ;;  %v1177_v19 = vpop.f32.mrf.mxu0 }
 0x232   : > { %v1921_v20 = vpop.f32.mrf.mxu3  ;;  %1553 = vst.msk [vmem:[%s4150_s22 + $0x128] sm:$0xff] %vm1533_vm1, %v1520_v61  ;;  %v1227_v9 = vadd.f32 %v1177_v19, %v4067_v26  ;;  %v1403_v46 = vpop.f32.mrf.mxu1 }
 0x233   : > { %v4361_v36 = vadd.f32 %v1921_v20, %v1778_v33  ;;  %v2668_v20 = vpack.c.bf16 %v3526_v38, %v3525_v2 }
 0x234   : > { %v1453_v53 = vadd.f32 %v1403_v46, %v1227_v9  ;;  %3397 = vmatmul.msk.bf16.gmra.mxu0 %vm279_vm0, %v2666_v60 }
 0x235   : > { %3451 = vmatmul.msk.bf16.gmra.mxu1 %vm279_vm0, %v2215_v57 }
 0x236   : > { %3505 = vmatmul.msk.bf16.gmra.mxu2 %vm279_vm0, %v2441_v41  ;;  %v1489_v21 = vadd.f32 %v4133_v18, %v1453_v53 }
 0x237   : > { %3559 = vmatmul.msk.bf16.gmra.mxu3 %vm279_vm0, %v2667_v50 }
 0x238   : > { %v1521_v26 = vmax.f32 %v1489_v21, 0.0 }
 0x239   : > { %v1781_v15 = vpop.f32.mrf.mxu2  ;;  %v1179_v12 = vpop.f32.mrf.mxu0 }
 0x23a   : > { %v1924_v42 = vpop.f32.mrf.mxu3  ;;  %1554 = vst.msk [vmem:[%s4150_s22 + $0x140] sm:$0xff] %vm1533_vm1, %v1521_v26  ;;  %v1228_v4 = vadd.f32 %v1179_v12, %v4069_v45  ;;  %v1405_v13 = vpop.f32.mrf.mxu1  ;;  %v3420_v12 = vld [vmem:[%s3697_s6 + $0x98] sm:$0xff] }
 0x23b   : > { %v4371_v60 = vadd.f32 %v1924_v42, %v1781_v15  ;;  %v3419_v15 = vld [vmem:[%s3697_s6 + $0x90] sm:$0xff] }
 0x23c   : > { %v1454_v59 = vadd.f32 %v1405_v13, %v1228_v4  ;;  %v3473_v4 = vld [vmem:[%s3697_s6 + $0x91] sm:$0xff]  ;;  %v3474_v13 = vld [vmem:[%s3697_s6 + $0x99] sm:$0xff]  ;;  %v2217_v2 = vpack.c.bf16 %v3420_v12, %v3419_v15 }
 0x23d   : > { %v2443_v38 = vpack.c.bf16 %v3474_v13, %v3473_v4  ;;  %v3530_v15 = vld [vmem:[%s3697_s6 + $0xb2] sm:$0xff] }
 0x23e   : > { %v1490_v37 = vadd.f32 %v4133_v18, %v1454_v59  ;;  %v3527_v59 = vld [vmem:[%s3697_s6 + $0x92] sm:$0xff] }
 0x240   : > { %v1522_v43 = vmax.f32 %v1490_v37, 0.0 }
 0x241   : > { %v1783_v48 = vpop.f32.mrf.mxu2  ;;  %v1182_v22 = vpop.f32.mrf.mxu0 }
 0x242   : > { %v1926_v35 = vpop.f32.mrf.mxu3  ;;  %1555 = vst.msk [vmem:[%s4150_s22 + $0x148] sm:$0xff] %vm1533_vm1, %v1522_v43  ;;  %v1229_v61 = vadd.f32 %v1182_v22, %v4079_v28  ;;  %v1408_v33 = vpop.f32.mrf.mxu1 }
 0x243   : > { %v4383_v45 = vadd.f32 %v1926_v35, %v1783_v48  ;;  %v2669_v35 = vpack.c.bf16 %v3528_v49, %v3527_v59 }
 0x244   : > { %v1455_v19 = vadd.f32 %v1408_v33, %v1229_v61  ;;  %3398 = vmatmul.msk.bf16.gmra.mxu0 %vm279_vm0, %v2667_v50 }
 0x245   : > { %3452 = vmatmul.msk.bf16.gmra.mxu1 %vm279_vm0, %v2216_v55 }
 0x246   : > { %3506 = vmatmul.msk.bf16.gmra.mxu2 %vm279_vm0, %v2442_v62  ;;  %v1491_v57 = vadd.f32 %v4133_v18, %v1455_v19 }
 0x247   : > { %3560 = vmatmul.msk.bf16.gmra.mxu3 %vm279_vm0, %v2668_v20 }
 0x248   : > { %v1523_v28 = vmax.f32 %v1491_v57, 0.0 }
 0x249   : > { %v1786_v41 = vpop.f32.mrf.mxu2  ;;  %v1184_v46 = vpop.f32.mrf.mxu0 }
 0x24a   : > { %v1929_v9 = vpop.f32.mrf.mxu3  ;;  %1556 = vst.msk [vmem:[%s4150_s22 + $0x160] sm:$0xff] %vm1533_vm1, %v1523_v28  ;;  %v1230_v53 = vadd.f32 %v1184_v46, %v4081_v54  ;;  %v1410_v21 = vpop.f32.mrf.mxu1  ;;  %v3422_v46 = vld [vmem:[%s3697_s6 + $0xb0] sm:$0xff] }
 0x24b   : > { %v4393_v50 = vadd.f32 %v1929_v9, %v1786_v41  ;;  %v3421_v41 = vld [vmem:[%s3697_s6 + $0xa8] sm:$0xff] }
 0x24c   : > { %v1456_v26 = vadd.f32 %v1410_v21, %v1230_v53  ;;  %v3475_v53 = vld [vmem:[%s3697_s6 + $0xa9] sm:$0xff]  ;;  %v3476_v21 = vld [vmem:[%s3697_s6 + $0xb1] sm:$0xff]  ;;  %v2218_v59 = vpack.c.bf16 %v3422_v46, %v3421_v41 }
 0x24d   : > { %v2444_v49 = vpack.c.bf16 %v3476_v21, %v3475_v53  ;;  %v3532_v41 = vld [vmem:[%s3697_s6 + $0xca] sm:$0xff] }
 0x24e   : > { %v1492_v42 = vadd.f32 %v4133_v18, %v1456_v26  ;;  %v3529_v26 = vld [vmem:[%s3697_s6 + $0xaa] sm:$0xff] }
 0x250   : > { %v1524_v37 = vmax.f32 %v1492_v42, 0.0 }
 0x251   : > { %v1788_v0 = vpop.f32.mrf.mxu2  ;;  %v1187_v24 = vpop.f32.mrf.mxu0 }
 0x252   : > { %v1931_v32 = vpop.f32.mrf.mxu3  ;;  %1557 = vst.msk [vmem:[%s4150_s22 + $0x168] sm:$0xff] %vm1533_vm1, %v1524_v37  ;;  %v1231_v43 = vadd.f32 %v1187_v24, %v4091_v25  ;;  %v1413_v48 = vpop.f32.mrf.mxu1 }
 0x253   : > { %v4405_v54 = vadd.f32 %v1931_v32, %v1788_v0  ;;  %v2670_v32 = vpack.c.bf16 %v3530_v15, %v3529_v26 }
 0x254   : > { %v1457_v22 = vadd.f32 %v1413_v48, %v1231_v43  ;;  %3399 = vmatmul.msk.bf16.gmra.mxu0 %vm279_vm0, %v2668_v20 }
 0x255   : > { %3453 = vmatmul.msk.bf16.gmra.mxu1 %vm279_vm0, %v2217_v2 }
 0x256   : > { %3507 = vmatmul.msk.bf16.gmra.mxu2 %vm279_vm0, %v2443_v38  ;;  %v1493_v55 = vadd.f32 %v4133_v18, %v1457_v22 }
 0x257   : > { %3561 = vmatmul.msk.bf16.gmra.mxu3 %vm279_vm0, %v2669_v35 }
 0x258   : > { %v1525_v25 = vmax.f32 %v1493_v55, 0.0 }
 0x259   : > { %v1791_v62 = vpop.f32.mrf.mxu2  ;;  %v1189_v33 = vpop.f32.mrf.mxu0 }
 0x25a   : > { %v1934_v61 = vpop.f32.mrf.mxu3  ;;  %1558 = vst.msk [vmem:[%s4150_s22 + $0x180] sm:$0xff] %vm1533_vm1, %v1525_v25  ;;  %v1232_v19 = vadd.f32 %v1189_v33, %v4093_v63  ;;  %v1415_v57 = vpop.f32.mrf.mxu1  ;;  %v3424_v33 = vld [vmem:[%s3697_s6 + $0xc8] sm:$0xff] }
 0x25b   : > { %v4415_v20 = vadd.f32 %v1934_v61, %v1791_v62  ;;  %v3423_v62 = vld [vmem:[%s3697_s6 + $0xc0] sm:$0xff] }
 0x25c   : > { %v1458_v28 = vadd.f32 %v1415_v57, %v1232_v19  ;;  %v3477_v19 = vld [vmem:[%s3697_s6 + $0xc1] sm:$0xff]  ;;  %v3478_v57 = vld [vmem:[%s3697_s6 + $0xc9] sm:$0xff]  ;;  %v2219_v26 = vpack.c.bf16 %v3424_v33, %v3423_v62 }
 0x25d   : > { %v2445_v15 = vpack.c.bf16 %v3478_v57, %v3477_v19  ;;  %v3534_v62 = vld [vmem:[%s3697_s6 + $0xe2] sm:$0xff] }
 0x25e   : > { %v1494_v9 = vadd.f32 %v4133_v18, %v1458_v28  ;;  %v3531_v28 = vld [vmem:[%s3697_s6 + $0xc2] sm:$0xff] }
 0x260   : > { %v1526_v42 = vmax.f32 %v1494_v9, 0.0 }
 0x261   : > { %v1793_v12 = vpop.f32.mrf.mxu2  ;;  %v1192_v13 = vpop.f32.mrf.mxu0 }
 0x262   : > { %v1936_v4 = vpop.f32.mrf.mxu3  ;;  %1559 = vst.msk [vmem:[%s4150_s22 + $0x188] sm:$0xff] %vm1533_vm1, %v1526_v42  ;;  %v1233_v37 = vadd.f32 %v1192_v13, %v4103_v56  ;;  %v1418_v0 = vpop.f32.mrf.mxu1 }
 0x263   : > { %v4427_v63 = vadd.f32 %v1936_v4, %v1793_v12  ;;  %v2671_v4 = vpack.c.bf16 %v3532_v41, %v3531_v28 }
 0x264   : > { %v1459_v24 = vadd.f32 %v1418_v0, %v1233_v37  ;;  %3400 = vmatmul.msk.bf16.gmra.mxu0 %vm279_vm0, %v2669_v35 }
 0x265   : > { %3454 = vmatmul.msk.bf16.gmra.mxu1 %vm279_vm0, %v2218_v59 }
 0x266   : > { %3508 = vmatmul.msk.bf16.gmra.mxu2 %vm279_vm0, %v2444_v49  ;;  %v1495_v2 = vadd.f32 %v4133_v18, %v1459_v24 }
 0x267   : > { %3562 = vmatmul.msk.bf16.gmra.mxu3 %vm279_vm0, %v2670_v32 }
 0x268   : > { %v1527_v56 = vmax.f32 %v1495_v2, 0.0 }
 0x269   : > { %v1796_v38 = vpop.f32.mrf.mxu2  ;;  %v1194_v48 = vpop.f32.mrf.mxu0 }
 0x26a   : > { %v1939_v43 = vpop.f32.mrf.mxu3  ;;  %1560 = vst.msk [vmem:[%s4150_s22 + $0x1a0] sm:$0xff] %vm1533_vm1, %v1527_v56  ;;  %v1234_v22 = vadd.f32 %v1194_v48, %v4105_v8  ;;  %v1420_v55 = vpop.f32.mrf.mxu1  ;;  %v3426_v48 = vld [vmem:[%s3697_s6 + $0xe0] sm:$0xff] }
 0x26b   : > { %v4437_v35 = vadd.f32 %v1939_v43, %v1796_v38  ;;  %v3425_v38 = vld [vmem:[%s3697_s6 + $0xd8] sm:$0xff] }
 0x26c   : > { %v1460_v25 = vadd.f32 %v1420_v55, %v1234_v22  ;;  %v3479_v22 = vld [vmem:[%s3697_s6 + $0xd9] sm:$0xff]  ;;  %v3480_v55 = vld [vmem:[%s3697_s6 + $0xe1] sm:$0xff]  ;;  %v2220_v28 = vpack.c.bf16 %v3426_v48, %v3425_v38 }
 0x26d   : > { %v2446_v41 = vpack.c.bf16 %v3480_v55, %v3479_v22  ;;  %v3536_v38 = vld [vmem:[%s3697_s6 + $0xfa] sm:$0xff] }
 0x26e   : > { %v1496_v61 = vadd.f32 %v4133_v18, %v1460_v25  ;;  %v3533_v25 = vld [vmem:[%s3697_s6 + $0xda] sm:$0xff] }
 0x270   : > { %v1528_v9 = vmax.f32 %v1496_v61, 0.0 }
 0x271   : > { %v1798_v46 = vpop.f32.mrf.mxu2  ;;  %v1197_v21 = vpop.f32.mrf.mxu0 }
 0x272   : > { %v1941_v53 = vpop.f32.mrf.mxu3  ;;  %1561 = vst.msk [vmem:[%s4150_s22 + $0x1a8] sm:$0xff] %vm1533_vm1, %v1528_v9  ;;  %v1235_v42 = vadd.f32 %v1197_v21, %v4115_v6  ;;  %v1423_v12 = vpop.f32.mrf.mxu1 }
 0x273   : > { %v4449_v8 = vadd.f32 %v1941_v53, %v1798_v46  ;;  %v2672_v53 = vpack.c.bf16 %v3534_v62, %v3533_v25 }
 0x274   : > { %v1461_v13 = vadd.f32 %v1423_v12, %v1235_v42  ;;  %3401 = vmatmul.msk.bf16.gmra.mxu0 %vm279_vm0, %v2670_v32 }
 0x275   : > { %3455 = vmatmul.msk.bf16.gmra.mxu1 %vm279_vm0, %v2219_v26 }
 0x276   : > { %3509 = vmatmul.msk.bf16.gmra.mxu2 %vm279_vm0, %v2445_v15  ;;  %v1497_v59 = vadd.f32 %v4133_v18, %v1461_v13 }
 0x277   : > { %3563 = vmatmul.msk.bf16.gmra.mxu3 %vm279_vm0, %v2671_v4 }
 0x278   : > { %v1529_v6 = vmax.f32 %v1497_v59, 0.0 }
 0x279   : > { %v1801_v49 = vpop.f32.mrf.mxu2  ;;  %v1199_v0 = vpop.f32.mrf.mxu0 }
 0x27a   : > { %v1944_v37 = vpop.f32.mrf.mxu3  ;;  %1562 = vst.msk [vmem:[%s4150_s22 + $0x1c0] sm:$0xff] %vm1533_vm1, %v1529_v6  ;;  %v1236_v24 = vadd.f32 %v1199_v0, %v4117_v17  ;;  %v1425_v2 = vpop.f32.mrf.mxu1  ;;  %v3428_v0 = vld [vmem:[%s3697_s6 + $0xf8] sm:$0xff] }
 0x27b   : > { %v4459_v32 = vadd.f32 %v1944_v37, %v1801_v49  ;;  %v3427_v49 = vld [vmem:[%s3697_s6 + $0xf0] sm:$0xff] }
 0x27c   : > { %v1462_v56 = vadd.f32 %v1425_v2, %v1236_v24  ;;  %v3481_v24 = vld [vmem:[%s3697_s6 + $0xf1] sm:$0xff]  ;;  %v3482_v2 = vld [vmem:[%s3697_s6 + $0xf9] sm:$0xff]  ;;  %v2221_v25 = vpack.c.bf16 %v3428_v0, %v3427_v49 }
 0x27d   : > { %v2447_v62 = vpack.c.bf16 %v3482_v2, %v3481_v24  ;;  %v3538_v49 = vld [vmem:[%s3697_s6 + $0x112] sm:$0xff] }
 0x27e   : > { %v1498_v43 = vadd.f32 %v4133_v18, %v1462_v56  ;;  %v3535_v56 = vld [vmem:[%s3697_s6 + $0xf2] sm:$0xff] }
 0x280   : > { %v1530_v61 = vmax.f32 %v1498_v43, 0.0 }
 0x281   : > { %v1803_v33 = vpop.f32.mrf.mxu2  ;;  %v1202_v57 = vpop.f32.mrf.mxu0 }
 0x282   : > { %v1946_v19 = vpop.f32.mrf.mxu3  ;;  %1563 = vst.msk [vmem:[%s4150_s22 + $0x1c8] sm:$0xff] %vm1533_vm1, %v1530_v61  ;;  %v1237_v9 = vadd.f32 %v1202_v57, %v4127_v23  ;;  %v1428_v46 = vpop.f32.mrf.mxu1 }
 0x283   : > { %v4471_v17 = vadd.f32 %v1946_v19, %v1803_v33  ;;  %v2673_v33 = vpack.c.bf16 %v3536_v38, %v3535_v56 }
 0x284   : > { %v1463_v21 = vadd.f32 %v1428_v46, %v1237_v9  ;;  %3402 = vmatmul.msk.bf16.gmra.mxu0 %vm279_vm0, %v2671_v4 }
 0x285   : > { %3456 = vmatmul.msk.bf16.gmra.mxu1 %vm279_vm0, %v2220_v28 }
 0x286   : > { %3510 = vmatmul.msk.bf16.gmra.mxu2 %vm279_vm0, %v2446_v41  ;;  %v1499_v26 = vadd.f32 %v4133_v18, %v1463_v21 }
 0x287   : > { %3564 = vmatmul.msk.bf16.gmra.mxu3 %vm279_vm0, %v2672_v53 }
 0x288   : > { %v1531_v23 = vmax.f32 %v1499_v26, 0.0 }
 0x289   : > { %v1806_v15 = vpop.f32.mrf.mxu2  ;;  %v1204_v12 = vpop.f32.mrf.mxu0 }
 0x28a   : > { %v1949_v42 = vpop.f32.mrf.mxu3  ;;  %1564 = vst.msk [vmem:[%s4150_s22 + $0x1e0] sm:$0xff] %vm1533_vm1, %v1531_v23  ;;  %v1238_v13 = vadd.f32 %v1204_v12, %v4135_v29  ;;  %v1430_v59 = vpop.f32.mrf.mxu1  ;;  %v3429_v23 = vld [vmem:[%s3697_s6 + $0x108] sm:$0xff]  ;;  %v3484_v12 = vld [vmem:[%s3697_s6 + $0x111] sm:$0xff] }
 0x28b   : > { %v4481_v4 = vadd.f32 %v1949_v42, %v1806_v15  ;;  %v3430_v15 = vld [vmem:[%s3697_s6 + $0x110] sm:$0xff] }
 0x28c   : > { %v1464_v6 = vadd.f32 %v1430_v59, %v1238_v13  ;;  %v3483_v42 = vld [vmem:[%s3697_s6 + $0x109] sm:$0xff]  ;;  %v2222_v56 = vpack.c.bf16 %v3430_v15, %v3429_v23 }
 0x28d   : > { %v2448_v38 = vpack.c.bf16 %v3484_v12, %v3483_v42  ;;  %v3539_v15 = vld [vmem:[%s3697_s6 + $0x122] sm:$0xff]  ;;  %v3540_v42 = vld [vmem:[%s3697_s6 + $0x12a] sm:$0xff] }
 0x28e   : > { %v1500_v37 = vadd.f32 %v4133_v18, %v1464_v6  ;;  %v3537_v6 = vld [vmem:[%s3697_s6 + $0x10a] sm:$0xff] }
 0x290   : > { %v1532_v43 = vmax.f32 %v1500_v37, 0.0 }
 0x291   : > { %v1808_v48 = vpop.f32.mrf.mxu2  ;;  %v2068_v55 = vpop.f32.mrf.mxu0 }
 0x292   : > { %v1951_v22 = vpop.f32.mrf.mxu3  ;;  %1565 = vst.msk [vmem:[%s4150_s22 + $0x1e8] sm:$0xff] %vm1533_vm1, %v1532_v43  ;;  %v2295_v61 = vpop.f32.mrf.mxu1  ;;  %v2148_v18 = vadd.f32 %v2068_v55, %v4154_v58  ;;  %v4503_v58 = vld [vmem:[%s4707_s2] ss:$0 sm:$0xff]  ;;  %v2674_v43 = vpack.c.bf16 %v3538_v49, %v3537_v6 }
 0x293   : > { %v4493_v29 = vadd.f32 %v1951_v22, %v1808_v48 }
 0x294   : > { %3403 = vmatmul.msk.bf16.gmra.mxu0 %vm279_vm0, %v2672_v53  ;;  %v2375_v19 = vadd.f32 %v2295_v61, %v2148_v18 }
 0x295   : > { %3457 = vmatmul.msk.bf16.gmra.mxu1 %vm279_vm0, %v2221_v25 }
 0x296   : > { %3511 = vmatmul.msk.bf16.gmra.mxu2 %vm279_vm0, %v2447_v62 }
 0x297   : > { %3565 = vmatmul.msk.bf16.gmra.mxu3 %vm279_vm0, %v2673_v33 }
 0x299   : > { %v2521_v57 = vpop.f32.mrf.mxu2  ;;  %v2070_v9 = vpop.f32.mrf.mxu0 }
 0x29a   : > { %v2601_v28 = vadd.f32 %v2521_v57, %v2375_v19  ;;  %v2747_v41 = vpop.f32.mrf.mxu3  ;;  %v2297_v46 = vpop.f32.mrf.mxu1  ;;  %v2149_v21 = vadd.f32 %v2070_v9, %v4160_v51  ;;  %v3431_v9 = vld [vmem:[%s3697_s6 + $0x120] sm:$0xff] }
 0x29c   : > { %v2827_v53 = vadd.f32 %v2747_v41, %v2601_v28  ;;  %v2376_v59 = vadd.f32 %v2297_v46, %v2149_v21  ;;  %v3432_v46 = vld [vmem:[%s3697_s6 + $0x128] sm:$0xff] }
 0x29d   : > { %v3486_v21 = vld [vmem:[%s3697_s6 + $0x129] sm:$0xff]  ;;  %v2223_v49 = vpack.c.bf16 %v3432_v46, %v3431_v9 }
 0x29e   : > { %v2863_v26 = vadd.f32 %v4503_v58, %v2827_v53  ;;  %v3485_v53 = vld [vmem:[%s3697_s6 + $0x121] sm:$0xff] }
 0x29f   : > { %v3542_v9 = vld [vmem:[%s3697_s6 + $0x142] sm:$0xff] }
 0x2a0   : > { %v2895_v13 = vmax.f32 %v2863_v26, 0.0 }
 0x2a1   : > { %v2523_v37 = vpop.f32.mrf.mxu2  ;;  %v2073_v2 = vpop.f32.mrf.mxu0 }
 0x2a2   : > { %3573 = vst.msk [vmem:[%s4150_s22 + $0x10] sm:$0xff] %vm1533_vm1, %v2895_v13  ;;  %v2602_v0 = vadd.f32 %v2523_v37, %v2376_v59  ;;  %v2749_v24 = vpop.f32.mrf.mxu3  ;;  %v2300_v51 = vpop.f32.mrf.mxu1  ;;  %v2150_v22 = vadd.f32 %v2073_v2, %v4174_v7  ;;  %v2449_v37 = vpack.c.bf16 %v3486_v21, %v3485_v53 }
 0x2a4   : > { %v2828_v48 = vadd.f32 %v2749_v24, %v2602_v0  ;;  %3404 = vmatmul.msk.bf16.gmra.mxu0 %vm279_vm0, %v2673_v33  ;;  %v2377_v62 = vadd.f32 %v2300_v51, %v2150_v22  ;;  %v2675_v0 = vpack.c.bf16 %v3540_v42, %v3539_v15 }
 0x2a5   : > { %3458 = vmatmul.msk.bf16.gmra.mxu1 %vm279_vm0, %v2222_v56 }
 0x2a6   : > { %v2864_v55 = vadd.f32 %v4503_v58, %v2828_v48  ;;  %3512 = vmatmul.msk.bf16.gmra.mxu2 %vm279_vm0, %v2448_v38 }
 0x2a7   : > { %3566 = vmatmul.msk.bf16.gmra.mxu3 %vm279_vm0, %v2674_v43 }
 0x2a8   : > { %v2896_v25 = vmax.f32 %v2864_v55, 0.0 }
 0x2a9   : > { %v2526_v61 = vpop.f32.mrf.mxu2  ;;  %v2075_v18 = vpop.f32.mrf.mxu0 }
 0x2aa   : > { %3574 = vst.msk [vmem:[%s4150_s22 + $0x18] sm:$0xff] %vm1533_vm1, %v2896_v25  ;;  %v2603_v7 = vadd.f32 %v2526_v61, %v2377_v62  ;;  %v2752_v33 = vpop.f32.mrf.mxu3  ;;  %v2302_v19 = vpop.f32.mrf.mxu1  ;;  %v2151_v28 = vadd.f32 %v2075_v18, %v4182_v1  ;;  %v3487_v18 = vld [vmem:[%s3697_s6 + $0x139] sm:$0xff] }
 0x2ac   : > { %v2829_v57 = vadd.f32 %v2752_v33, %v2603_v7  ;;  %v2378_v23 = vadd.f32 %v2302_v19, %v2151_v28  ;;  %v3433_v7 = vld [vmem:[%s3697_s6 + $0x138] sm:$0xff]  ;;  %v3434_v33 = vld [vmem:[%s3697_s6 + $0x140] sm:$0xff] }
 0x2ad   : > { %v3488_v19 = vld [vmem:[%s3697_s6 + $0x141] sm:$0xff] }
 0x2ae   : > { %v2865_v41 = vadd.f32 %v4503_v58, %v2829_v57  ;;  %v2450_v15 = vpack.c.bf16 %v3488_v19, %v3487_v18 }
 0x2b0   : > { %v2897_v26 = vmax.f32 %v2865_v41, 0.0  ;;  %v3541_v41 = vld [vmem:[%s3697_s6 + $0x13a] sm:$0xff] }
 0x2b1   : > { %v2528_v12 = vpop.f32.mrf.mxu2  ;;  %v2078_v6 = vpop.f32.mrf.mxu0  ;;  %v2676_v42 = vpack.c.bf16 %v3542_v9, %v3541_v41 }
 0x2b2   : > { %3575 = vst.msk [vmem:[%s4150_s22 + $0x30] sm:$0xff] %vm1533_vm1, %v2897_v26  ;;  %v2604_v13 = vadd.f32 %v2528_v12, %v2378_v23  ;;  %v2754_v59 = vpop.f32.mrf.mxu3  ;;  %v2305_v1 = vpop.f32.mrf.mxu1  ;;  %v2152_v2 = vadd.f32 %v2078_v6, %v4195_v16  ;;  %v2224_v23 = vpack.c.bf16 %v3434_v33, %v3433_v7 }
 0x2b4   : > { %v2830_v24 = vadd.f32 %v2754_v59, %v2604_v13  ;;  %3405 = vmatmul.msk.bf16.gmra.mxu0 %vm279_vm0, %v2674_v43  ;;  %v2379_v51 = vadd.f32 %v2305_v1, %v2152_v2 }
 0x2b5   : > { %3459 = vmatmul.msk.bf16.gmra.mxu1 %vm279_vm0, %v2223_v49 }
 0x2b6   : > { %v2866_v56 = vadd.f32 %v4503_v58, %v2830_v24  ;;  %3513 = vmatmul.msk.bf16.gmra.mxu2 %vm279_vm0, %v2449_v37 }
 0x2b7   : > { %3567 = vmatmul.msk.bf16.gmra.mxu3 %vm279_vm0, %v2675_v0 }
 0x2b8   : > { %v2898_v38 = vmax.f32 %v2866_v56, 0.0 }
 0x2b9   : > { %v2531_v48 = vpop.f32.mrf.mxu2  ;;  %v2080_v22 = vpop.f32.mrf.mxu0 }
 0x2ba   : > { %3576 = vst.msk [vmem:[%s4150_s22 + $0x38] sm:$0xff] %vm1533_vm1, %v2898_v38  ;;  %v2605_v16 = vadd.f32 %v2531_v48, %v2379_v51  ;;  %v2757_v43 = vpop.f32.mrf.mxu3  ;;  %v2307_v55 = vpop.f32.mrf.mxu1  ;;  %v2153_v62 = vadd.f32 %v2080_v22, %v4203_v31  ;;  %v3435_v51 = vld [vmem:[%s3697_s6 + $0x150] sm:$0xff]  ;;  %v3436_v48 = vld [vmem:[%s3697_s6 + $0x158] sm:$0xff] }
 0x2bb   : > { %v2225_v19 = vpack.c.bf16 %v3436_v48, %v3435_v51 }
 0x2bc   : > { %v2831_v25 = vadd.f32 %v2757_v43, %v2605_v16  ;;  %v2380_v28 = vadd.f32 %v2307_v55, %v2153_v62  ;;  %v3489_v16 = vld [vmem:[%s3697_s6 + $0x151] sm:$0xff]  ;;  %v3490_v43 = vld [vmem:[%s3697_s6 + $0x159] sm:$0xff] }
 0x2bd   : > { %v3544_v62 = vld [vmem:[%s3697_s6 + $0x15a] sm:$0xff] }
 0x2be   : > { %v2867_v61 = vadd.f32 %v4503_v58, %v2831_v25  ;;  %v3543_v25 = vld [vmem:[%s3697_s6 + $0x152] sm:$0xff] }
 0x2c0   : > { %v2899_v57 = vmax.f32 %v2867_v61, 0.0 }
 0x2c1   : > { %v2533_v46 = vpop.f32.mrf.mxu2  ;;  %v2083_v26 = vpop.f32.mrf.mxu0 }
 0x2c2   : > { %3577 = vst.msk [vmem:[%s4150_s22 + $0x50] sm:$0xff] %vm1533_vm1, %v2899_v57  ;;  %v2606_v53 = vadd.f32 %v2533_v46, %v2380_v28  ;;  %v2759_v21 = vpop.f32.mrf.mxu3  ;;  %v2310_v31 = vpop.f32.mrf.mxu1  ;;  %v2154_v13 = vadd.f32 %v2083_v26, %v4216_v3  ;;  %v2451_v57 = vpack.c.bf16 %v3490_v43, %v3489_v16  ;;  %v2677_v28 = vpack.c.bf16 %v3544_v62, %v3543_v25 }
 0x2c4   : > { %v2832_v12 = vadd.f32 %v2759_v21, %v2606_v53  ;;  %3406 = vmatmul.msk.bf16.gmra.mxu0 %vm279_vm0, %v2675_v0  ;;  %v2381_v49 = vadd.f32 %v2310_v31, %v2154_v13 }
 0x2c5   : > { %3460 = vmatmul.msk.bf16.gmra.mxu1 %vm279_vm0, %v2224_v23 }
 0x2c6   : > { %v2868_v59 = vadd.f32 %v4503_v58, %v2832_v12  ;;  %3514 = vmatmul.msk.bf16.gmra.mxu2 %vm279_vm0, %v2450_v15 }
 0x2c7   : > { %3568 = vmatmul.msk.bf16.gmra.mxu3 %vm279_vm0, %v2676_v42 }
 0x2c8   : > { %v2900_v6 = vmax.f32 %v2868_v59, 0.0  ;;  %v3437_v59 = vld [vmem:[%s3697_s6 + $0x168] sm:$0xff] }
 0x2c9   : > { %v2536_v37 = vpop.f32.mrf.mxu2  ;;  %v2085_v0 = vpop.f32.mrf.mxu0 }
 0x2ca   : > { %3578 = vst.msk [vmem:[%s4150_s22 + $0x58] sm:$0xff] %vm1533_vm1, %v2900_v6  ;;  %v2607_v3 = vadd.f32 %v2536_v37, %v2381_v49  ;;  %v2762_v1 = vpop.f32.mrf.mxu3  ;;  %v2312_v24 = vpop.f32.mrf.mxu1  ;;  %v2155_v56 = vadd.f32 %v2085_v0, %v4224_v30  ;;  %v3438_v6 = vld [vmem:[%s3697_s6 + $0x170] sm:$0xff] }
 0x2cb   : > { %v3491_v49 = vld [vmem:[%s3697_s6 + $0x169] sm:$0xff]  ;;  %v3492_v37 = vld [vmem:[%s3697_s6 + $0x171] sm:$0xff]  ;;  %v2226_v48 = vpack.c.bf16 %v3438_v6, %v3437_v59 }
 0x2cc   : > { %v2833_v2 = vadd.f32 %v2762_v1, %v2607_v3  ;;  %v2382_v55 = vadd.f32 %v2312_v24, %v2155_v56  ;;  %v3545_v0 = vld [vmem:[%s3697_s6 + $0x16a] sm:$0xff]  ;;  %v3546_v24 = vld [vmem:[%s3697_s6 + $0x172] sm:$0xff]  ;;  %v2452_v16 = vpack.c.bf16 %v3492_v37, %v3491_v49 }
 0x2cd   : > { %v2678_v43 = vpack.c.bf16 %v3546_v24, %v3545_v0 }
 0x2ce   : > { %v2869_v38 = vadd.f32 %v4503_v58, %v2833_v2 }
 0x2d0   : > { %v2901_v22 = vmax.f32 %v2869_v38, 0.0 }
 0x2d1   : > { %v2538_v61 = vpop.f32.mrf.mxu2  ;;  %v2088_v18 = vpop.f32.mrf.mxu0 }
 0x2d2   : > { %3579 = vst.msk [vmem:[%s4150_s22 + $0x70] sm:$0xff] %vm1533_vm1, %v2901_v22  ;;  %v2608_v7 = vadd.f32 %v2538_v61, %v2382_v55  ;;  %v2764_v33 = vpop.f32.mrf.mxu3  ;;  %v2315_v30 = vpop.f32.mrf.mxu1  ;;  %v2156_v9 = vadd.f32 %v2088_v18, %v4237_v40 }
 0x2d4   : > { %v2834_v41 = vadd.f32 %v2764_v33, %v2608_v7  ;;  %3407 = vmatmul.msk.bf16.gmra.mxu0 %vm279_vm0, %v2676_v42  ;;  %v2383_v21 = vadd.f32 %v2315_v30, %v2156_v9  ;;  %v3440_v9 = vld [vmem:[%s3697_s6 + $0x188] sm:$0xff] }
 0x2d5   : > { %3461 = vmatmul.msk.bf16.gmra.mxu1 %vm279_vm0, %v2225_v19 }
 0x2d6   : > { %v2870_v46 = vadd.f32 %v4503_v58, %v2834_v41  ;;  %3515 = vmatmul.msk.bf16.gmra.mxu2 %vm279_vm0, %v2451_v57  ;;  %v3439_v41 = vld [vmem:[%s3697_s6 + $0x180] sm:$0xff] }
 0x2d7   : > { %3569 = vmatmul.msk.bf16.gmra.mxu3 %vm279_vm0, %v2677_v28 }
 0x2d8   : > { %v2902_v53 = vmax.f32 %v2870_v46, 0.0  ;;  %v3493_v46 = vld [vmem:[%s3697_s6 + $0x181] sm:$0xff] }
 0x2d9   : > { %v2541_v26 = vpop.f32.mrf.mxu2  ;;  %v2090_v15 = vpop.f32.mrf.mxu0 }
 0x2da   : > { %3580 = vst.msk [vmem:[%s4150_s22 + $0x78] sm:$0xff] %vm1533_vm1, %v2902_v53  ;;  %v2609_v40 = vadd.f32 %v2541_v26, %v2383_v21  ;;  %v2767_v23 = vpop.f32.mrf.mxu3  ;;  %v2317_v31 = vpop.f32.mrf.mxu1  ;;  %v2157_v12 = vadd.f32 %v2090_v15, %v4247_v47  ;;  %v3494_v53 = vld [vmem:[%s3697_s6 + $0x189] sm:$0xff] }
 0x2db   : > { %v2453_v59 = vpack.c.bf16 %v3494_v53, %v3493_v46 }
 0x2dc   : > { %v2835_v42 = vadd.f32 %v2767_v23, %v2609_v40  ;;  %v2384_v1 = vadd.f32 %v2317_v31, %v2157_v12  ;;  %v3547_v40 = vld [vmem:[%s3697_s6 + $0x182] sm:$0xff]  ;;  %v3548_v23 = vld [vmem:[%s3697_s6 + $0x18a] sm:$0xff] }
 0x2dd   : > { %v2679_v6 = vpack.c.bf16 %v3548_v23, %v3547_v40 }
 0x2de   : > { %v2871_v13 = vadd.f32 %v4503_v58, %v2835_v42 }
 0x2e0   : > { %v2903_v3 = vmax.f32 %v2871_v13, 0.0  ;;  %v2227_v13 = vpack.c.bf16 %v3440_v9, %v3439_v41 }
 0x2e1   : > { %v2543_v2 = vpop.f32.mrf.mxu2  ;;  %v2093_v51 = vpop.f32.mrf.mxu0 }
 0x2e2   : > { %3581 = vst.msk [vmem:[%s4150_s22 + $0x90] sm:$0xff] %vm1533_vm1, %v2903_v3  ;;  %v2610_v56 = vadd.f32 %v2543_v2, %v2384_v1  ;;  %v2769_v38 = vpop.f32.mrf.mxu3  ;;  %v2320_v47 = vpop.f32.mrf.mxu1  ;;  %v2158_v55 = vadd.f32 %v2093_v51, %v4259_v5 }
 0x2e4   : > { %v2836_v22 = vadd.f32 %v2769_v38, %v2610_v56  ;;  %3408 = vmatmul.msk.bf16.gmra.mxu0 %vm279_vm0, %v2677_v28  ;;  %v2385_v61 = vadd.f32 %v2320_v47, %v2158_v55  ;;  %v3441_v47 = vld [vmem:[%s3697_s6 + $0x198] sm:$0xff]  ;;  %v3496_v55 = vld [vmem:[%s3697_s6 + $0x1a1] sm:$0xff] }
 0x2e5   : > { %3462 = vmatmul.msk.bf16.gmra.mxu1 %vm279_vm0, %v2226_v48 }
 0x2e6   : > { %v2872_v25 = vadd.f32 %v4503_v58, %v2836_v22  ;;  %3516 = vmatmul.msk.bf16.gmra.mxu2 %vm279_vm0, %v2452_v16  ;;  %v3495_v22 = vld [vmem:[%s3697_s6 + $0x199] sm:$0xff] }
 0x2e7   : > { %3570 = vmatmul.msk.bf16.gmra.mxu3 %vm279_vm0, %v2678_v43 }
 0x2e8   : > { %v2904_v62 = vmax.f32 %v2872_v25, 0.0 }
 0x2e9   : > { %v2546_v7 = vpop.f32.mrf.mxu2  ;;  %v2095_v18 = vpop.f32.mrf.mxu0 }
 0x2ea   : > { %3582 = vst.msk [vmem:[%s4150_s22 + $0x98] sm:$0xff] %vm1533_vm1, %v2904_v62  ;;  %v2611_v5 = vadd.f32 %v2546_v7, %v2385_v61  ;;  %v2772_v33 = vpop.f32.mrf.mxu3  ;;  %v2322_v19 = vpop.f32.mrf.mxu1  ;;  %v2159_v30 = vadd.f32 %v2095_v18, %v4269_v39  ;;  %v3549_v61 = vld [vmem:[%s3697_s6 + $0x19a] sm:$0xff]  ;;  %v3550_v7 = vld [vmem:[%s3697_s6 + $0x1a2] sm:$0xff] }
 0x2ec   : > { %v2837_v57 = vadd.f32 %v2772_v33, %v2611_v5  ;;  %v2386_v26 = vadd.f32 %v2322_v19, %v2159_v30  ;;  %v2454_v30 = vpack.c.bf16 %v3496_v55, %v3495_v22 }
 0x2ee   : > { %v2873_v28 = vadd.f32 %v4503_v58, %v2837_v57 }
 0x2f0   : > { %v2905_v21 = vmax.f32 %v2873_v28, 0.0  ;;  %v2680_v28 = vpack.c.bf16 %v3550_v7, %v3549_v61 }
 0x2f1   : > { %v2548_v15 = vpop.f32.mrf.mxu2  ;;  %v2098_v12 = vpop.f32.mrf.mxu0 }
 0x2f2   : > { %3583 = vst.msk [vmem:[%s4150_s22 + $0xb0] sm:$0xff] %vm1533_vm1, %v2905_v21  ;;  %v2612_v31 = vadd.f32 %v2548_v15, %v2386_v26  ;;  %v2774_v42 = vpop.f32.mrf.mxu3  ;;  %v2325_v39 = vpop.f32.mrf.mxu1  ;;  %v2160_v37 = vadd.f32 %v2098_v12, %v4281_v34 }
 0x2f4   : > { %v2838_v49 = vadd.f32 %v2774_v42, %v2612_v31  ;;  %3409 = vmatmul.msk.bf16.gmra.mxu0 %vm279_vm0, %v2678_v43  ;;  %v2387_v0 = vadd.f32 %v2325_v39, %v2160_v37  ;;  %v3442_v43 = vld [vmem:[%s3697_s6 + $0x1a0] sm:$0xff] }
 0x2f5   : > { %3463 = vmatmul.msk.bf16.gmra.mxu1 %vm279_vm0, %v2227_v13  ;;  %v2228_v57 = vpack.c.bf16 %v3442_v43, %v3441_v47 }
 0x2f6   : > { %v2874_v3 = vadd.f32 %v4503_v58, %v2838_v49  ;;  %3517 = vmatmul.msk.bf16.gmra.mxu2 %vm279_vm0, %v2453_v59 }
 0x2f7   : > { %3571 = vmatmul.msk.bf16.gmra.mxu3 %vm279_vm0, %v2679_v6 }
 0x2f8   : > { %v2906_v1 = vmax.f32 %v2874_v3, 0.0 }
 0x2f9   : > { %v2551_v24 = vpop.f32.mrf.mxu2  ;;  %v2100_v56 = vpop.f32.mrf.mxu0 }
 0x2fa   : > { %3584 = vst.msk [vmem:[%s4150_s22 + $0xb8] sm:$0xff] %vm1533_vm1, %v2906_v1  ;;  %v2613_v34 = vadd.f32 %v2551_v24, %v2387_v0  ;;  %v2777_v2 = vpop.f32.mrf.mxu3  ;;  %v2327_v38 = vpop.f32.mrf.mxu1  ;;  %v2161_v48 = vadd.f32 %v2100_v56, %v4293_v52 }
 0x2fc   : > { %v2839_v51 = vadd.f32 %v2777_v2, %v2613_v34  ;;  %v2388_v62 = vadd.f32 %v2327_v38, %v2161_v48 }
 0x2fe   : > { %v2875_v16 = vadd.f32 %v4503_v58, %v2839_v51 }
 0x300   : > { %v2907_v25 = vmax.f32 %v2875_v16, 0.0 }
 0x301   : > { %v2553_v5 = vpop.f32.mrf.mxu2  ;;  %v2103_v19 = vpop.f32.mrf.mxu0 }
 0x302   : > { %3585 = vst.msk [vmem:[%s4150_s22 + $0xd0] sm:$0xff] %vm1533_vm1, %v2907_v25  ;;  %v2614_v33 = vadd.f32 %v2553_v5, %v2388_v62  ;;  %v2779_v18 = vpop.f32.mrf.mxu3  ;;  %v2330_v52 = vpop.f32.mrf.mxu1  ;;  %v2162_v9 = vadd.f32 %v2103_v19, %v4303_v10 }
 0x304   : > { %v2840_v41 = vadd.f32 %v2779_v18, %v2614_v33  ;;  %3410 = vmatmul.msk.bf16.gmra.mxu0 %vm279_vm0, %v2679_v6  ;;  %v2389_v21 = vadd.f32 %v2330_v52, %v2162_v9 }
 0x305   : > { %3464 = vmatmul.msk.bf16.gmra.mxu1 %vm279_vm0, %v2228_v57 }
 0x306   : > { %v2876_v46 = vadd.f32 %v4503_v58, %v2840_v41  ;;  %3518 = vmatmul.msk.bf16.gmra.mxu2 %vm279_vm0, %v2454_v30 }
 0x307   : > { %3572 = vmatmul.msk.bf16.gmra.mxu3 %vm279_vm0, %v2680_v28 }
 0x308   : > { %v2908_v53 = vmax.f32 %v2876_v46, 0.0 }
 0x309   : > { %v2556_v26 = vpop.f32.mrf.mxu2  ;;  %v2105_v15 = vpop.f32.mrf.mxu0 }
 0x30a   : > { %3586 = vst.msk [vmem:[%s4150_s22 + $0xd8] sm:$0xff] %vm1533_vm1, %v2908_v53  ;;  %v2615_v40 = vadd.f32 %v2556_v26, %v2389_v21  ;;  %v2782_v23 = vpop.f32.mrf.mxu3  ;;  %v2332_v10 = vpop.f32.mrf.mxu1  ;;  %v2163_v42 = vadd.f32 %v2105_v15, %v4317_v14 }
 0x30c   : > { %v2841_v31 = vadd.f32 %v2782_v23, %v2615_v40  ;;  %v2390_v59 = vadd.f32 %v2332_v10, %v2163_v42 }
 0x30e   : > { %v2877_v12 = vadd.f32 %v4503_v58, %v2841_v31 }
 0x310   : > { %v2909_v13 = vmax.f32 %v2877_v12, 0.0 }
 0x311   : > { %v2558_v39 = vpop.f32.mrf.mxu2  ;;  %v2108_v37 = vpop.f32.mrf.mxu0 }
 0x312   : > { %3587 = vst.msk [vmem:[%s4150_s22 + $0xf0] sm:$0xff] %vm1533_vm1, %v2909_v13  ;;  %v2616_v6 = vadd.f32 %v2558_v39, %v2390_v59  ;;  %v2784_v49 = vpop.f32.mrf.mxu3  ;;  %v2335_v3 = vpop.f32.mrf.mxu1  ;;  %v2164_v0 = vadd.f32 %v2108_v37, %v4327_v11 }
 0x314   : > { %v2842_v1 = vadd.f32 %v2784_v49, %v2616_v6  ;;  %v2391_v14 = vadd.f32 %v2335_v3, %v2164_v0 }
 0x316   : > { %v2878_v24 = vadd.f32 %v4503_v58, %v2842_v1 }
 0x318   : > { %v2910_v34 = vmax.f32 %v2878_v24, 0.0 }
 0x319   : > { %v2561_v2 = vpop.f32.mrf.mxu2  ;;  %v2110_v51 = vpop.f32.mrf.mxu0 }
 0x31a   : > { %3588 = vst.msk [vmem:[%s4150_s22 + $0xf8] sm:$0xff] %vm1533_vm1, %v2910_v34  ;;  %v2617_v56 = vadd.f32 %v2561_v2, %v2391_v14  ;;  %v2787_v38 = vpop.f32.mrf.mxu3  ;;  %v2337_v48 = vpop.f32.mrf.mxu1  ;;  %v2165_v47 = vadd.f32 %v2110_v51, %v4339_v27 }
 0x31c   : > { %v2843_v16 = vadd.f32 %v2787_v38, %v2617_v56  ;;  %v2392_v11 = vadd.f32 %v2337_v48, %v2165_v47 }
 0x31e   : > { %v2879_v43 = vadd.f32 %v4503_v58, %v2843_v16 }
 0x320   : > { %v2911_v22 = vmax.f32 %v2879_v43, 0.0 }
 0x321   : > { %v2563_v55 = vpop.f32.mrf.mxu2  ;;  %v2113_v61 = vpop.f32.mrf.mxu0 }
 0x322   : > { %3589 = vst.msk [vmem:[%s4150_s22 + $0x110] sm:$0xff] %vm1533_vm1, %v2911_v22  ;;  %v2618_v25 = vadd.f32 %v2563_v55, %v2392_v11  ;;  %v2789_v62 = vpop.f32.mrf.mxu3  ;;  %v2340_v7 = vpop.f32.mrf.mxu1  ;;  %v2166_v33 = vadd.f32 %v2113_v61, %v4349_v44 }
 0x324   : > { %v2844_v5 = vadd.f32 %v2789_v62, %v2618_v25  ;;  %v2393_v27 = vadd.f32 %v2340_v7, %v2166_v33 }
 0x326   : > { %v2880_v18 = vadd.f32 %v4503_v58, %v2844_v5 }
 0x328   : > { %v2912_v19 = vmax.f32 %v2880_v18, 0.0 }
 0x329   : > { %v2566_v57 = vpop.f32.mrf.mxu2  ;;  %v2115_v28 = vpop.f32.mrf.mxu0 }
 0x32a   : > { %3590 = vst.msk [vmem:[%s4150_s22 + $0x118] sm:$0xff] %vm1533_vm1, %v2912_v19  ;;  %v2619_v30 = vadd.f32 %v2566_v57, %v2393_v27  ;;  %v2792_v52 = vpop.f32.mrf.mxu3  ;;  %v2342_v41 = vpop.f32.mrf.mxu1  ;;  %v2167_v46 = vadd.f32 %v2115_v28, %v4361_v36 }
 0x32c   : > { %v2845_v9 = vadd.f32 %v2792_v52, %v2619_v30  ;;  %v2394_v44 = vadd.f32 %v2342_v41, %v2167_v46 }
 0x32e   : > { %v2881_v53 = vadd.f32 %v4503_v58, %v2845_v9 }
 0x330   : > { %v2913_v21 = vmax.f32 %v2881_v53, 0.0 }
 0x331   : > { %v2568_v26 = vpop.f32.mrf.mxu2  ;;  %v2118_v15 = vpop.f32.mrf.mxu0 }
 0x332   : > { %3591 = vst.msk [vmem:[%s4150_s22 + $0x130] sm:$0xff] %vm1533_vm1, %v2913_v21  ;;  %v2620_v40 = vadd.f32 %v2568_v26, %v2394_v44  ;;  %v2794_v23 = vpop.f32.mrf.mxu3  ;;  %v2345_v10 = vpop.f32.mrf.mxu1  ;;  %v2168_v42 = vadd.f32 %v2118_v15, %v4371_v60 }
 0x334   : > { %v2846_v31 = vadd.f32 %v2794_v23, %v2620_v40  ;;  %v2395_v36 = vadd.f32 %v2345_v10, %v2168_v42 }
 0x336   : > { %v2882_v12 = vadd.f32 %v4503_v58, %v2846_v31 }
 0x338   : > { %v2914_v13 = vmax.f32 %v2882_v12, 0.0 }
 0x339   : > { %v2571_v59 = vpop.f32.mrf.mxu2  ;;  %v2120_v49 = vpop.f32.mrf.mxu0 }
 0x33a   : > { %3592 = vst.msk [vmem:[%s4150_s22 + $0x138] sm:$0xff] %vm1533_vm1, %v2914_v13  ;;  %v2621_v39 = vadd.f32 %v2571_v59, %v2395_v36  ;;  %v2797_v6 = vpop.f32.mrf.mxu3  ;;  %v2347_v37 = vpop.f32.mrf.mxu1  ;;  %v2169_v1 = vadd.f32 %v2120_v49, %v4383_v45 }
 0x33c   : > { %v2847_v3 = vadd.f32 %v2797_v6, %v2621_v39  ;;  %v2396_v60 = vadd.f32 %v2347_v37, %v2169_v1 }
 0x33e   : > { %v2883_v0 = vadd.f32 %v4503_v58, %v2847_v3 }
 0x340   : > { %v2915_v24 = vmax.f32 %v2883_v0, 0.0 }
 0x341   : > { %v2573_v34 = vpop.f32.mrf.mxu2  ;;  %v2123_v56 = vpop.f32.mrf.mxu0 }
 0x342   : > { %3593 = vst.msk [vmem:[%s4150_s22 + $0x150] sm:$0xff] %vm1533_vm1, %v2915_v24  ;;  %v2622_v14 = vadd.f32 %v2573_v34, %v2396_v60  ;;  %v2799_v2 = vpop.f32.mrf.mxu3  ;;  %v2350_v38 = vpop.f32.mrf.mxu1  ;;  %v2170_v48 = vadd.f32 %v2123_v56, %v4393_v50 }
 0x344   : > { %v2848_v51 = vadd.f32 %v2799_v2, %v2622_v14  ;;  %v2397_v45 = vadd.f32 %v2350_v38, %v2170_v48 }
 0x346   : > { %v2884_v16 = vadd.f32 %v4503_v58, %v2848_v51 }
 0x348   : > { %v2916_v47 = vmax.f32 %v2884_v16, 0.0 }
 0x349   : > { %v2576_v43 = vpop.f32.mrf.mxu2  ;;  %v2125_v55 = vpop.f32.mrf.mxu0 }
 0x34a   : > { %3594 = vst.msk [vmem:[%s4150_s22 + $0x158] sm:$0xff] %vm1533_vm1, %v2916_v47  ;;  %v2623_v22 = vadd.f32 %v2576_v43, %v2397_v45  ;;  %v2802_v11 = vpop.f32.mrf.mxu3  ;;  %v2352_v25 = vpop.f32.mrf.mxu1  ;;  %v2171_v61 = vadd.f32 %v2125_v55, %v4405_v54 }
 0x34c   : > { %v2849_v62 = vadd.f32 %v2802_v11, %v2623_v22  ;;  %v2398_v50 = vadd.f32 %v2352_v25, %v2171_v61 }
 0x34e   : > { %v2885_v7 = vadd.f32 %v4503_v58, %v2849_v62 }
 0x350   : > { %v2917_v5 = vmax.f32 %v2885_v7, 0.0 }
 0x351   : > { %v2578_v33 = vpop.f32.mrf.mxu2  ;;  %v2128_v27 = vpop.f32.mrf.mxu0 }
 0x352   : > { %3595 = vst.msk [vmem:[%s4150_s22 + $0x170] sm:$0xff] %vm1533_vm1, %v2917_v5  ;;  %v2624_v18 = vadd.f32 %v2578_v33, %v2398_v50  ;;  %v2804_v19 = vpop.f32.mrf.mxu3  ;;  %v2355_v57 = vpop.f32.mrf.mxu1  ;;  %v2172_v52 = vadd.f32 %v2128_v27, %v4415_v20 }
 0x354   : > { %v2850_v30 = vadd.f32 %v2804_v19, %v2624_v18  ;;  %v2399_v54 = vadd.f32 %v2355_v57, %v2172_v52 }
 0x356   : > { %v2886_v28 = vadd.f32 %v4503_v58, %v2850_v30 }
 0x358   : > { %v2918_v41 = vmax.f32 %v2886_v28, 0.0 }
 0x359   : > { %v2581_v9 = vpop.f32.mrf.mxu2  ;;  %v2130_v21 = vpop.f32.mrf.mxu0 }
 0x35a   : > { %3596 = vst.msk [vmem:[%s4150_s22 + $0x178] sm:$0xff] %vm1533_vm1, %v2918_v41  ;;  %v2625_v46 = vadd.f32 %v2581_v9, %v2399_v54  ;;  %v2807_v53 = vpop.f32.mrf.mxu3  ;;  %v2357_v44 = vpop.f32.mrf.mxu1  ;;  %v2173_v40 = vadd.f32 %v2130_v21, %v4427_v63 }
 0x35c   : > { %v2851_v26 = vadd.f32 %v2807_v53, %v2625_v46  ;;  %v2400_v20 = vadd.f32 %v2357_v44, %v2173_v40 }
 0x35e   : > { %v2887_v23 = vadd.f32 %v4503_v58, %v2851_v26 }
 0x360   : > { %v2919_v15 = vmax.f32 %v2887_v23, 0.0 }
 0x361   : > { %v2583_v10 = vpop.f32.mrf.mxu2  ;;  %v2133_v12 = vpop.f32.mrf.mxu0 }
 0x362   : > { %3597 = vst.msk [vmem:[%s4150_s22 + $0x190] sm:$0xff] %vm1533_vm1, %v2919_v15  ;;  %v2626_v31 = vadd.f32 %v2583_v10, %v2400_v20  ;;  %v2809_v42 = vpop.f32.mrf.mxu3  ;;  %v2360_v13 = vpop.f32.mrf.mxu1  ;;  %v2174_v59 = vadd.f32 %v2133_v12, %v4437_v35 }
 0x364   : > { %v2852_v36 = vadd.f32 %v2809_v42, %v2626_v31  ;;  %v2401_v63 = vadd.f32 %v2360_v13, %v2174_v59 }
 0x366   : > { %v2888_v39 = vadd.f32 %v4503_v58, %v2852_v36 }
 0x368   : > { %v2920_v6 = vmax.f32 %v2888_v39, 0.0 }
 0x369   : > { %v2586_v49 = vpop.f32.mrf.mxu2  ;;  %v2135_v1 = vpop.f32.mrf.mxu0 }
 0x36a   : > { %3598 = vst.msk [vmem:[%s4150_s22 + $0x198] sm:$0xff] %vm1533_vm1, %v2920_v6  ;;  %v2627_v37 = vadd.f32 %v2586_v49, %v2401_v63  ;;  %v2812_v3 = vpop.f32.mrf.mxu3  ;;  %v2362_v0 = vpop.f32.mrf.mxu1  ;;  %v2175_v60 = vadd.f32 %v2135_v1, %v4449_v8 }
 0x36c   : > { %v2853_v24 = vadd.f32 %v2812_v3, %v2627_v37  ;;  %v2402_v35 = vadd.f32 %v2362_v0, %v2175_v60 }
 0x36e   : > { %v2889_v34 = vadd.f32 %v4503_v58, %v2853_v24 }
 0x370   : > { %v2921_v14 = vmax.f32 %v2889_v34, 0.0 }
 0x371   : > { %v2588_v2 = vpop.f32.mrf.mxu2  ;;  %v2138_v51 = vpop.f32.mrf.mxu0 }
 0x372   : > { %3599 = vst.msk [vmem:[%s4150_s22 + $0x1b0] sm:$0xff] %vm1533_vm1, %v2921_v14  ;;  %v2628_v56 = vadd.f32 %v2588_v2, %v2402_v35  ;;  %v2814_v38 = vpop.f32.mrf.mxu3  ;;  %v2365_v48 = vpop.f32.mrf.mxu1  ;;  %v2176_v47 = vadd.f32 %v2138_v51, %v4459_v32 }
 0x374   : > { %v2854_v16 = vadd.f32 %v2814_v38, %v2628_v56  ;;  %v2403_v8 = vadd.f32 %v2365_v48, %v2176_v47 }
 0x376   : > { %v2890_v45 = vadd.f32 %v4503_v58, %v2854_v16 }
 0x378   : > { %v2922_v43 = vmax.f32 %v2890_v45, 0.0 }
 0x379   : > { %v2591_v22 = vpop.f32.mrf.mxu2  ;;  %v2140_v25 = vpop.f32.mrf.mxu0 }
 0x37a   : > { %3600 = vst.msk [vmem:[%s4150_s22 + $0x1b8] sm:$0xff] %vm1533_vm1, %v2922_v43  ;;  %v2629_v11 = vadd.f32 %v2591_v22, %v2403_v8  ;;  %v2817_v55 = vpop.f32.mrf.mxu3  ;;  %v2367_v62 = vpop.f32.mrf.mxu1  ;;  %v2177_v7 = vadd.f32 %v2140_v25, %v4471_v17 }
 0x37c   : > { %v2855_v61 = vadd.f32 %v2817_v55, %v2629_v11  ;;  %v2404_v32 = vadd.f32 %v2367_v62, %v2177_v7 }
 0x37e   : > { %v2891_v5 = vadd.f32 %v4503_v58, %v2855_v61 }
 0x380   : > { %v2923_v50 = vmax.f32 %v2891_v5, 0.0 }
 0x381   : > { %v2593_v33 = vpop.f32.mrf.mxu2  ;;  %v2143_v27 = vpop.f32.mrf.mxu0 }
 0x382   : > { %3601 = vst.msk [vmem:[%s4150_s22 + $0x1d0] sm:$0xff] %vm1533_vm1, %v2923_v50  ;;  %v2630_v18 = vadd.f32 %v2593_v33, %v2404_v32  ;;  %v2819_v19 = vpop.f32.mrf.mxu3  ;;  %v2178_v30 = vadd.f32 %v2143_v27, %v4481_v4  ;;  %v2370_v52 = vpop.f32.mrf.mxu1 }
 0x384   : > { %v2856_v57 = vadd.f32 %v2819_v19, %v2630_v18  ;;  %v2405_v17 = vadd.f32 %v2370_v52, %v2178_v30 }
 0x386   : > { %v2892_v28 = vadd.f32 %v4503_v58, %v2856_v57 }
 0x388   : > { %v2924_v41 = vmax.f32 %v2892_v28, 0.0 }
 0x389   : > { %v2596_v54 = vpop.f32.mrf.mxu2  ;;  %v2145_v53 = vpop.f32.mrf.mxu0 }
 0x38a   : > { %3602 = vst.msk [vmem:[%s4150_s22 + $0x1d8] sm:$0xff] %vm1533_vm1, %v2924_v41  ;;  %v2631_v9 = vadd.f32 %v2596_v54, %v2405_v17  ;;  %v2822_v46 = vpop.f32.mrf.mxu3  ;;  %v2179_v44 = vadd.f32 %v2145_v53, %v4493_v29  ;;  %v2372_v40 = vpop.f32.mrf.mxu1 }
 0x38c   : > { %v2857_v21 = vadd.f32 %v2822_v46, %v2631_v9  ;;  %v2406_v23 = vadd.f32 %v2372_v40, %v2179_v44 }
 0x38e   : > { %v2893_v26 = vadd.f32 %v4503_v58, %v2857_v21 }
 0x390   : > { %v2925_v4 = vmax.f32 %v2893_v26, 0.0 }
 0x391   : > { %v2598_v15 = vpop.f32.mrf.mxu2 }
 0x392   : > { %3603 = vst.msk [vmem:[%s4150_s22 + $0x1f0] sm:$0xff] %vm1533_vm1, %v2925_v4  ;;  %v2632_v20 = vadd.f32 %v2598_v15, %v2406_v23  ;;  %v2824_v10 = vpop.f32.mrf.mxu3 }
 0x394   : > { %v2858_v31 = vadd.f32 %v2824_v10, %v2632_v20 }
 0x396   : > { %v2894_v42 = vadd.f32 %v4503_v58, %v2858_v31 }
 0x398   : > { %v2926_v12 = vmax.f32 %v2894_v42, 0.0 }
 0x39a   : > { %3604 = vst.msk [vmem:[%s4150_s22 + $0x1f8] sm:$0xff] %vm1533_vm1, %v2926_v12 }
 0x39b PF: > { %s13_s12 = sadd.s32 1, %s3637_s12  }
 0x39c   : > { %p10_p4 = scmp.ge.s32.totalorder %s13_s12, 4  }
 0x39e   :  { %12 = sbr.rel (!%p10_p4) target bundleno = 1 (0x1), region = 76 }

</bundles_post_ra>
